<compile_context>
chip_gen: v7x
topology: tpu7x:2x2x1
jax: 0.10.0
libtpu: 0.0.40
codegen_flags: <defaults>
</compile_context>

<pallas_src>
import jax
import jax.numpy as jnp
from jax.experimental import pallas as pl
from jax.experimental.pallas import tpu as pltpu

TASKS_NO = 10
AGENT_NO = 100
OBS_DIM = 3 * (AGENT_NO + 1) + 6 * TASKS_NO  # 363

# torch layout (out_features, in_features) of every Linear in the module.
_MAT_SHAPES = {
    "emd_d1": (16, 3),
    "emd_d2": (16, 16),
    "emd_o1": (16, 6),
    "emd_o2": (16, 16),
    "w_d1":   (16, 16),
    "w_d2":   (1, 16),
    "w_o1":   (16, 16),
    "w_o2":   (1, 16),
    "assign": (8, 64),
    "final":  (1, 8),
}


def _round8(n):
    return ((n + 7) // 8) * 8


def _build_layout():
    """Static row offsets of each weight / bias inside the packed (rows,128) slab."""
    layout = {}
    row = 0
    for name, (o, i) in _MAT_SHAPES.items():
        layout[name] = (row, o, i)               # rows [row, row+o), cols [0, i)
        row += _round8(o)
    for name, (o, _) in _MAT_SHAPES.items():
        layout[name + "_bias"] = (row, o, 1)     # stored as a column vector
        row += _round8(o)
    return layout, row


_LAYOUT, _PACK_ROWS = _build_layout()            # 256 rows total


# ----------------------------------------------------------------------------
# Deterministic parameter init (mirrors nn.init.orthogonal_ + zero bias).
# ----------------------------------------------------------------------------
def _orthogonal(key, out_dim, in_dim, gain=1.0):
    a = jax.random.normal(key, (max(out_dim, in_dim), min(out_dim, in_dim)),
                          dtype=jnp.float32)
    q, r = jnp.linalg.qr(a)
    q = q * jnp.sign(jnp.diagonal(r))
    if out_dim < in_dim:
        q = q.T
    return (gain * q).astype(jnp.float32)        # torch layout (out, in)


def init_params(seed=0):
    keys = jax.random.split(jax.random.PRNGKey(seed), len(_MAT_SHAPES))
    gains = {"final": 0.01}
    params = {}
    for k, name in zip(keys, _MAT_SHAPES):
        o, i = _MAT_SHAPES[name]
        params[name] = (_orthogonal(k, o, i, gains.get(name, 1.0)),
                        jnp.zeros((o,), jnp.float32))
    return params


def pack_params(params):
    """Pack all weights/biases into a single (_PACK_ROWS, 128) f32 slab."""
    p = jnp.zeros((_PACK_ROWS, 128), jnp.float32)
    for name, (wmat, bvec) in params.items():
        r, o, i = _LAYOUT[name]
        p = p.at[r:r + o, 0:i].set(wmat)
        rb, ob, _ = _LAYOUT[name + "_bias"]
        p = p.at[rb:rb + ob, 0:1].set(bvec.reshape(ob, 1))
    return p


# ----------------------------------------------------------------------------
# Kernel (feature-major: activations are (features, samples), samples on lanes)
# ----------------------------------------------------------------------------
def policy_kernel(tasks_ref, pos_ref, robot_ref, sela_ref, selt_ref,
                  bcast_ref, p_ref, out_ref):
    f32 = jnp.float32

    def w(name):
        r, o, i = _LAYOUT[name]
        return p_ref[r:r + o, 0:i]

    def b(name):
        r, o, _ = _LAYOUT[name + "_bias"]
        return p_ref[r:r + o, 0:1]

    def mm(a, bb):
        return jnp.dot(a, bb, preferred_element_type=f32)

    pos = pos_ref[...]          # (3, TB*100)  lane = b*100 + agent
    tasks = tasks_ref[...]      # (6, TB*10)   lane = b*10  + task
    robot = robot_ref[0]        # (3, TB)

    # ---- driver branch: attention-weighted sum over 100 agents ---------------
    v_d0 = jnp.maximum(mm(w("emd_d1"), pos) + b("emd_d1"), 0.0)
    v_d = mm(w("emd_d2"), v_d0) + b("emd_d2")                    # (16, TB*100)
    a_d0 = jnp.tanh(mm(w("w_d1"), v_d) + b("w_d1"))
    a_d = jax.nn.sigmoid(mm(w("w_d2"), a_d0) + b("w_d2"))        # (1,  TB*100)
    driver = mm(a_d * v_d, sela_ref[...])                        # (16, TB)

    # ---- selected-robot embedding (same weights as driver branch) ------------
    r0 = jnp.maximum(mm(w("emd_d1"), robot) + b("emd_d1"), 0.0)
    r1 = mm(w("emd_d2"), r0) + b("emd_d2")                       # (16, TB)

    # ---- order branch: attention-weighted sum over 10 tasks ------------------
    v_o0 = jnp.maximum(mm(w("emd_o1"), tasks) + b("emd_o1"), 0.0)
    v_o = mm(w("emd_o2"), v_o0) + b("emd_o2")                    # (16, TB*10)
    a_o0 = jnp.tanh(mm(w("w_o1"), v_o) + b("w_o1"))
    a_o = jax.nn.sigmoid(mm(w("w_o2"), a_o0) + b("w_o2"))        # (1,  TB*10)
    order = mm(a_o * v_o, selt_ref[...])                         # (16, TB)

    # ---- assign head: Wa @ cat([v_o, driver, order, r1]) + ba (split matmul) --
    wa = w("assign")                                             # (8, 64)
    g = (mm(wa[:, 16:32], driver) + mm(wa[:, 32:48], order)
         + mm(wa[:, 48:64], r1) + b("assign"))                   # (8, TB)
    g_rep = mm(g, bcast_ref[...])                                # (8, TB*10) per-task broadcast
    h = jnp.maximum(mm(wa[:, 0:16], v_o) + g_rep, 0.0)           # (8, TB*10)

    out_ref[0] = mm(w("final"), h) + b("final")                  # (1, TB*10), lane-dense


# ----------------------------------------------------------------------------
# Wrapper
# ----------------------------------------------------------------------------
def network_policy_forward(obs, params, block_b=64):
    """block_b must be a multiple of 64 (lane alignment of the transposed
    task/output slabs).  Batch is zero-padded up to a multiple of block_b."""
    assert block_b > 0 and block_b % 64 == 0
    obs = jnp.asarray(obs, jnp.float32).reshape(-1, OBS_DIM)
    B = obs.shape[0]
    nb = -(-B // block_b)            # grid length; >= 2 for large B keeps both v7x TCs busy
    Bp = nb * block_b
    if Bp != B:
        obs = jnp.pad(obs, ((0, Bp - B), (0, 0)))

    tasks = obs[:, :6 * TASKS_NO].reshape(Bp, TASKS_NO, 6)
    pos = obs[:, 6 * TASKS_NO:6 * TASKS_NO + 3 * AGENT_NO].reshape(Bp, AGENT_NO, 3)
    robot = obs[:, 6 * TASKS_NO + 3 * AGENT_NO:]

    # Feature-major layouts (wrapper-side plumbing, handled by XLA).
    tasks_t = tasks.transpose(2, 0, 1).reshape(6, Bp * TASKS_NO)
    pos_t = pos.transpose(2, 0, 1).reshape(3, Bp * AGENT_NO)
    robot_t = robot.reshape(nb, block_b, 3).transpose(0, 2, 1)   # (nb, 3, block_b)

    # Constant 0/1 matrices: segmented lane sums (agents/tasks -> batch) and the
    # inverse broadcast (batch -> tasks).  Constant index map -> DMA'd once.
    eye_b = jnp.eye(block_b, dtype=jnp.float32)
    sel_a = jnp.repeat(eye_b, AGENT_NO, axis=0)      # (block_b*100, block_b)
    sel_t = jnp.repeat(eye_b, TASKS_NO, axis=0)      # (block_b*10,  block_b)
    bcast_t = sel_t.T                                # (block_b, block_b*10)

    p = pack_params(params)

    la = block_b * AGENT_NO
    lt = block_b * TASKS_NO
    out = pl.pallas_call(
        policy_kernel,
        out_shape=jax.ShapeDtypeStruct((nb, 1, lt), jnp.float32),
        grid_spec=pltpu.PrefetchScalarGridSpec(
            num_scalar_prefetch=0,
            grid=(nb,),
            in_specs=[
                pl.BlockSpec((6, lt), lambda i: (0, i)),
                pl.BlockSpec((3, la), lambda i: (0, i)),
                pl.BlockSpec((1, 3, block_b), lambda i: (i, 0, 0)),
                pl.BlockSpec(sel_a.shape, lambda i: (0, 0)),
                pl.BlockSpec(sel_t.shape, lambda i: (0, 0)),
                pl.BlockSpec(bcast_t.shape, lambda i: (0, 0)),
                pl.BlockSpec(p.shape, lambda i: (0, 0)),
            ],
            out_specs=pl.BlockSpec((1, 1, lt), lambda i: (i, 0, 0)),
        ),
        compiler_params=pltpu.CompilerParams(
            dimension_semantics=("parallel",),
            vmem_limit_bytes=32 * 1024 * 1024,
        ),
    )(tasks_t, pos_t, robot_t, sel_a, sel_t, bcast_t, p)
    # torch's trailing `squeeze` only drops the trailing singleton; keep (B, 10).
    return out.reshape(Bp, TASKS_NO)[:B]


# ----------------------------------------------------------------------------
# Pure-JAX reference (mirrors the torch forward literally, incl. cat/repeat).
# ----------------------------------------------------------------------------
def reference_forward(obs, params):
    def lin(x, name):
        wmat, bvec = params[name]
        return x @ wmat.T + bvec

    obs = jnp.asarray(obs, jnp.float32).reshape(-1, OBS_DIM)
    B = obs.shape[0]
    tasks = obs[:, :6 * TASKS_NO].reshape(B, TASKS_NO, 6)
    pos = obs[:, 6 * TASKS_NO:6 * TASKS_NO + 3 * AGENT_NO].reshape(B, AGENT_NO, 3)
    robot = obs[:, 6 * TASKS_NO + 3 * AGENT_NO:]

    v_d = lin(jax.nn.relu(lin(pos, "emd_d1")), "emd_d2")
    alpha_d = jax.nn.sigmoid(lin(jnp.tanh(lin(v_d, "w_d1")), "w_d2"))
    driver = jnp.sum(alpha_d * v_d, axis=1)

    r1 = lin(jax.nn.relu(lin(robot, "emd_d1")), "emd_d2")

    v_o = lin(jax.nn.relu(lin(tasks, "emd_o1")), "emd_o2")
    alpha_o = jax.nn.sigmoid(lin(jnp.tanh(lin(v_o, "w_o1")), "w_o2"))
    order = jnp.sum(alpha_o * v_o, axis=1)

    vec = jnp.concatenate([driver, order, r1], axis=1)[:, None, :]
    vec = jnp.broadcast_to(vec, (B, TASKS_NO, 48))
    vector = jnp.concatenate([v_o, vec], axis=2)
    out = jax.nn.relu(lin(vector, "assign"))
    out = lin(out, "final")
    return jnp.squeeze(out, axis=-1)


if __name__ == "__main__":
    B = 48  # deliberately NOT a multiple of the 64-wide batch tile (tests padding path)
    key = jax.random.PRNGKey(0)
    obs = jax.random.normal(key, (B, OBS_DIM), dtype=jnp.float32)

    params = init_params(seed=0)

    out = jax.block_until_ready(network_policy_forward(obs, params, block_b=64))
    ref = jax.block_until_ready(reference_forward(obs, params))

    assert out.shape == (B, TASKS_NO)
    max_err = jnp.max(jnp.abs(out - ref))
    assert jnp.allclose(out, ref, atol=1e-2, rtol=1e-2), f"max abs err {max_err}"

    print("KERNEL_OK")
</pallas_src>

<mosaic_0001>
module attributes {stable_mosaic.version = 11 : i64} {
  func.func @policy_kernel(%arg0: i32, %arg1: memref<6x640xf32, #tpu.memory_space<vmem>>, %arg2: memref<3x6400xf32, #tpu.memory_space<vmem>>, %arg3: memref<1x3x64xf32, #tpu.memory_space<vmem>>, %arg4: memref<6400x64xf32, #tpu.memory_space<vmem>>, %arg5: memref<640x64xf32, #tpu.memory_space<vmem>>, %arg6: memref<64x640xf32, #tpu.memory_space<vmem>>, %arg7: memref<256x128xf32, #tpu.memory_space<vmem>>, %arg8: memref<1x1x640xf32, #tpu.memory_space<vmem>>) attributes {dimension_semantics = [#tpu.dimension_semantics<parallel>], iteration_bounds = array<i64: 1>, scalar_prefetch = 0 : i64, scratch_operands = 0 : i64, tpu.core_type = #tpu.core_type<tc>, window_params = [{transform_indices = @transform_0, window_bounds = array<i64: 6, 640>}, {transform_indices = @transform_1, window_bounds = array<i64: 3, 6400>}, {transform_indices = @transform_2, window_bounds = array<i64: 1, 3, 64>}, {pipeline_mode = #tpu.pipeline_mode<synchronous>, transform_indices = @transform_3, window_bounds = array<i64: 6400, 64>}, {pipeline_mode = #tpu.pipeline_mode<synchronous>, transform_indices = @transform_4, window_bounds = array<i64: 640, 64>}, {pipeline_mode = #tpu.pipeline_mode<synchronous>, transform_indices = @transform_5, window_bounds = array<i64: 64, 640>}, {pipeline_mode = #tpu.pipeline_mode<synchronous>, transform_indices = @transform_6, window_bounds = array<i64: 256, 128>}, {transform_indices = @transform_7, window_bounds = array<i64: 1, 1, 640>}]} {
    %c0 = arith.constant 0 : index
    %c0_0 = arith.constant 0 : index
    %0 = vector.load %arg2[%c0, %c0_0] : memref<3x6400xf32, #tpu.memory_space<vmem>>, vector<3x6400xf32>
    %c0_1 = arith.constant 0 : index
    %c0_2 = arith.constant 0 : index
    %1 = vector.load %arg1[%c0_1, %c0_2] : memref<6x640xf32, #tpu.memory_space<vmem>>, vector<6x640xf32>
    %c0_3 = arith.constant 0 : index
    %c0_4 = arith.constant 0 : index
    %c0_5 = arith.constant 0 : index
    %2 = vector.load %arg3[%c0_3, %c0_4, %c0_5] : memref<1x3x64xf32, #tpu.memory_space<vmem>>, vector<1x3x64xf32>
    %3 = vector.shape_cast %2 : vector<1x3x64xf32> to vector<3x64xf32>
    %c0_6 = arith.constant 0 : index
    %c0_7 = arith.constant 0 : index
    %4 = vector.load %arg7[%c0_6, %c0_7] : memref<256x128xf32, #tpu.memory_space<vmem>>, vector<16x3xf32>
    %cst = arith.constant dense<0.000000e+00> : vector<16x6400xf32>
    %5 = tpu.matmul %4, %0, %cst {dimension_numbers = #tpu.dot_dimension_numbers<[1], [0], [0], [1], [0, 0, 1, 1], [], []>} : vector<16x3xf32>, vector<3x6400xf32>, vector<16x6400xf32> -> vector<16x6400xf32>
    %c128 = arith.constant 128 : index
    %c0_8 = arith.constant 0 : index
    %6 = vector.load %arg7[%c128, %c0_8] : memref<256x128xf32, #tpu.memory_space<vmem>>, vector<16x1xf32>
    %7 = vector.broadcast %6 : vector<16x1xf32> to vector<16x6400xf32>
    %8 = arith.addf %5, %7 : vector<16x6400xf32>
    %cst_9 = arith.constant 0.000000e+00 : f32
    %9 = vector.broadcast %cst_9 : f32 to vector<16x6400xf32>
    %10 = arith.maximumf %8, %9 : vector<16x6400xf32>
    %c16 = arith.constant 16 : index
    %c0_10 = arith.constant 0 : index
    %11 = vector.load %arg7[%c16, %c0_10] : memref<256x128xf32, #tpu.memory_space<vmem>>, vector<16x16xf32>
    %cst_11 = arith.constant dense<0.000000e+00> : vector<16x6400xf32>
    %12 = tpu.matmul %11, %10, %cst_11 {dimension_numbers = #tpu.dot_dimension_numbers<[1], [0], [0], [1], [0, 0, 1, 1], [], []>} : vector<16x16xf32>, vector<16x6400xf32>, vector<16x6400xf32> -> vector<16x6400xf32>
    %c144 = arith.constant 144 : index
    %c0_12 = arith.constant 0 : index
    %13 = vector.load %arg7[%c144, %c0_12] : memref<256x128xf32, #tpu.memory_space<vmem>>, vector<16x1xf32>
    %14 = vector.broadcast %13 : vector<16x1xf32> to vector<16x6400xf32>
    %15 = arith.addf %12, %14 : vector<16x6400xf32>
    %c64 = arith.constant 64 : index
    %c0_13 = arith.constant 0 : index
    %16 = vector.load %arg7[%c64, %c0_13] : memref<256x128xf32, #tpu.memory_space<vmem>>, vector<16x16xf32>
    %cst_14 = arith.constant dense<0.000000e+00> : vector<16x6400xf32>
    %17 = tpu.matmul %16, %15, %cst_14 {dimension_numbers = #tpu.dot_dimension_numbers<[1], [0], [0], [1], [0, 0, 1, 1], [], []>} : vector<16x16xf32>, vector<16x6400xf32>, vector<16x6400xf32> -> vector<16x6400xf32>
    %c192 = arith.constant 192 : index
    %c0_15 = arith.constant 0 : index
    %18 = vector.load %arg7[%c192, %c0_15] : memref<256x128xf32, #tpu.memory_space<vmem>>, vector<16x1xf32>
    %19 = vector.broadcast %18 : vector<16x1xf32> to vector<16x6400xf32>
    %20 = arith.addf %17, %19 : vector<16x6400xf32>
    %21 = math.tanh %20 : vector<16x6400xf32>
    %c80 = arith.constant 80 : index
    %c0_16 = arith.constant 0 : index
    %22 = vector.load %arg7[%c80, %c0_16] : memref<256x128xf32, #tpu.memory_space<vmem>>, vector<1x16xf32>
    %cst_17 = arith.constant dense<0.000000e+00> : vector<1x6400xf32>
    %23 = tpu.matmul %22, %21, %cst_17 {dimension_numbers = #tpu.dot_dimension_numbers<[1], [0], [0], [1], [0, 0, 1, 1], [], []>} : vector<1x16xf32>, vector<16x6400xf32>, vector<1x6400xf32> -> vector<1x6400xf32>
    %c208 = arith.constant 208 : index
    %c0_18 = arith.constant 0 : index
    %24 = vector.load %arg7[%c208, %c0_18] : memref<256x128xf32, #tpu.memory_space<vmem>>, vector<1x1xf32>
    %25 = vector.broadcast %24 : vector<1x1xf32> to vector<1x6400xf32>
    %26 = arith.addf %23, %25 : vector<1x6400xf32>
    %27 = arith.negf %26 : vector<1x6400xf32>
    %28 = math.exp %27 : vector<1x6400xf32>
    %cst_19 = arith.constant 1.000000e+00 : f32
    %29 = vector.broadcast %cst_19 : f32 to vector<1x6400xf32>
    %30 = arith.addf %29, %28 : vector<1x6400xf32>
    %31 = arith.divf %29, %30 : vector<1x6400xf32>
    %32 = vector.broadcast %31 : vector<1x6400xf32> to vector<16x6400xf32>
    %33 = arith.mulf %32, %15 : vector<16x6400xf32>
    %c0_20 = arith.constant 0 : index
    %c0_21 = arith.constant 0 : index
    %34 = vector.load %arg4[%c0_20, %c0_21] : memref<6400x64xf32, #tpu.memory_space<vmem>>, vector<6400x64xf32>
    %cst_22 = arith.constant dense<0.000000e+00> : vector<16x64xf32>
    %35 = tpu.matmul %33, %34, %cst_22 {dimension_numbers = #tpu.dot_dimension_numbers<[1], [0], [0], [1], [0, 0, 1, 1], [], []>} : vector<16x6400xf32>, vector<6400x64xf32>, vector<16x64xf32> -> vector<16x64xf32>
    %c0_23 = arith.constant 0 : index
    %c0_24 = arith.constant 0 : index
    %36 = vector.load %arg7[%c0_23, %c0_24] : memref<256x128xf32, #tpu.memory_space<vmem>>, vector<16x3xf32>
    %cst_25 = arith.constant dense<0.000000e+00> : vector<16x64xf32>
    %37 = tpu.matmul %36, %3, %cst_25 {dimension_numbers = #tpu.dot_dimension_numbers<[1], [0], [0], [1], [0, 0, 1, 1], [], []>} : vector<16x3xf32>, vector<3x64xf32>, vector<16x64xf32> -> vector<16x64xf32>
    %c128_26 = arith.constant 128 : index
    %c0_27 = arith.constant 0 : index
    %38 = vector.load %arg7[%c128_26, %c0_27] : memref<256x128xf32, #tpu.memory_space<vmem>>, vector<16x1xf32>
    %39 = vector.broadcast %38 : vector<16x1xf32> to vector<16x64xf32>
    %40 = arith.addf %37, %39 : vector<16x64xf32>
    %cst_28 = arith.constant 0.000000e+00 : f32
    %41 = vector.broadcast %cst_28 : f32 to vector<16x64xf32>
    %42 = arith.maximumf %40, %41 : vector<16x64xf32>
    %c16_29 = arith.constant 16 : index
    %c0_30 = arith.constant 0 : index
    %43 = vector.load %arg7[%c16_29, %c0_30] : memref<256x128xf32, #tpu.memory_space<vmem>>, vector<16x16xf32>
    %cst_31 = arith.constant dense<0.000000e+00> : vector<16x64xf32>
    %44 = tpu.matmul %43, %42, %cst_31 {dimension_numbers = #tpu.dot_dimension_numbers<[1], [0], [0], [1], [0, 0, 1, 1], [], []>} : vector<16x16xf32>, vector<16x64xf32>, vector<16x64xf32> -> vector<16x64xf32>
    %c144_32 = arith.constant 144 : index
    %c0_33 = arith.constant 0 : index
    %45 = vector.load %arg7[%c144_32, %c0_33] : memref<256x128xf32, #tpu.memory_space<vmem>>, vector<16x1xf32>
    %46 = vector.broadcast %45 : vector<16x1xf32> to vector<16x64xf32>
    %47 = arith.addf %44, %46 : vector<16x64xf32>
    %c32 = arith.constant 32 : index
    %c0_34 = arith.constant 0 : index
    %48 = vector.load %arg7[%c32, %c0_34] : memref<256x128xf32, #tpu.memory_space<vmem>>, vector<16x6xf32>
    %cst_35 = arith.constant dense<0.000000e+00> : vector<16x640xf32>
    %49 = tpu.matmul %48, %1, %cst_35 {dimension_numbers = #tpu.dot_dimension_numbers<[1], [0], [0], [1], [0, 0, 1, 1], [], []>} : vector<16x6xf32>, vector<6x640xf32>, vector<16x640xf32> -> vector<16x640xf32>
    %c160 = arith.constant 160 : index
    %c0_36 = arith.constant 0 : index
    %50 = vector.load %arg7[%c160, %c0_36] : memref<256x128xf32, #tpu.memory_space<vmem>>, vector<16x1xf32>
    %51 = vector.broadcast %50 : vector<16x1xf32> to vector<16x640xf32>
    %52 = arith.addf %49, %51 : vector<16x640xf32>
    %cst_37 = arith.constant 0.000000e+00 : f32
    %53 = vector.broadcast %cst_37 : f32 to vector<16x640xf32>
    %54 = arith.maximumf %52, %53 : vector<16x640xf32>
    %c48 = arith.constant 48 : index
    %c0_38 = arith.constant 0 : index
    %55 = vector.load %arg7[%c48, %c0_38] : memref<256x128xf32, #tpu.memory_space<vmem>>, vector<16x16xf32>
    %cst_39 = arith.constant dense<0.000000e+00> : vector<16x640xf32>
    %56 = tpu.matmul %55, %54, %cst_39 {dimension_numbers = #tpu.dot_dimension_numbers<[1], [0], [0], [1], [0, 0, 1, 1], [], []>} : vector<16x16xf32>, vector<16x640xf32>, vector<16x640xf32> -> vector<16x640xf32>
    %c176 = arith.constant 176 : index
    %c0_40 = arith.constant 0 : index
    %57 = vector.load %arg7[%c176, %c0_40] : memref<256x128xf32, #tpu.memory_space<vmem>>, vector<16x1xf32>
    %58 = vector.broadcast %57 : vector<16x1xf32> to vector<16x640xf32>
    %59 = arith.addf %56, %58 : vector<16x640xf32>
    %c88 = arith.constant 88 : index
    %c0_41 = arith.constant 0 : index
    %60 = vector.load %arg7[%c88, %c0_41] : memref<256x128xf32, #tpu.memory_space<vmem>>, vector<16x16xf32>
    %cst_42 = arith.constant dense<0.000000e+00> : vector<16x640xf32>
    %61 = tpu.matmul %60, %59, %cst_42 {dimension_numbers = #tpu.dot_dimension_numbers<[1], [0], [0], [1], [0, 0, 1, 1], [], []>} : vector<16x16xf32>, vector<16x640xf32>, vector<16x640xf32> -> vector<16x640xf32>
    %c216 = arith.constant 216 : index
    %c0_43 = arith.constant 0 : index
    %62 = vector.load %arg7[%c216, %c0_43] : memref<256x128xf32, #tpu.memory_space<vmem>>, vector<16x1xf32>
    %63 = vector.broadcast %62 : vector<16x1xf32> to vector<16x640xf32>
    %64 = arith.addf %61, %63 : vector<16x640xf32>
    %65 = math.tanh %64 : vector<16x640xf32>
    %c104 = arith.constant 104 : index
    %c0_44 = arith.constant 0 : index
    %66 = vector.load %arg7[%c104, %c0_44] : memref<256x128xf32, #tpu.memory_space<vmem>>, vector<1x16xf32>
    %cst_45 = arith.constant dense<0.000000e+00> : vector<1x640xf32>
    %67 = tpu.matmul %66, %65, %cst_45 {dimension_numbers = #tpu.dot_dimension_numbers<[1], [0], [0], [1], [0, 0, 1, 1], [], []>} : vector<1x16xf32>, vector<16x640xf32>, vector<1x640xf32> -> vector<1x640xf32>
    %c232 = arith.constant 232 : index
    %c0_46 = arith.constant 0 : index
    %68 = vector.load %arg7[%c232, %c0_46] : memref<256x128xf32, #tpu.memory_space<vmem>>, vector<1x1xf32>
    %69 = vector.broadcast %68 : vector<1x1xf32> to vector<1x640xf32>
    %70 = arith.addf %67, %69 : vector<1x640xf32>
    %71 = arith.negf %70 : vector<1x640xf32>
    %72 = math.exp %71 : vector<1x640xf32>
    %cst_47 = arith.constant 1.000000e+00 : f32
    %73 = vector.broadcast %cst_47 : f32 to vector<1x640xf32>
    %74 = arith.addf %73, %72 : vector<1x640xf32>
    %75 = arith.divf %73, %74 : vector<1x640xf32>
    %76 = vector.broadcast %75 : vector<1x640xf32> to vector<16x640xf32>
    %77 = arith.mulf %76, %59 : vector<16x640xf32>
    %c0_48 = arith.constant 0 : index
    %c0_49 = arith.constant 0 : index
    %78 = vector.load %arg5[%c0_48, %c0_49] : memref<640x64xf32, #tpu.memory_space<vmem>>, vector<640x64xf32>
    %cst_50 = arith.constant dense<0.000000e+00> : vector<16x64xf32>
    %79 = tpu.matmul %77, %78, %cst_50 {dimension_numbers = #tpu.dot_dimension_numbers<[1], [0], [0], [1], [0, 0, 1, 1], [], []>} : vector<16x640xf32>, vector<640x64xf32>, vector<16x64xf32> -> vector<16x64xf32>
    %c112 = arith.constant 112 : index
    %c0_51 = arith.constant 0 : index
    %80 = vector.load %arg7[%c112, %c0_51] : memref<256x128xf32, #tpu.memory_space<vmem>>, vector<8x64xf32>
    %81 = vector.extract_strided_slice %80 {offsets = [0, 16], sizes = [8, 16], strides = [1, 1]} : vector<8x64xf32> to vector<8x16xf32>
    %cst_52 = arith.constant dense<0.000000e+00> : vector<8x64xf32>
    %82 = tpu.matmul %81, %35, %cst_52 {dimension_numbers = #tpu.dot_dimension_numbers<[1], [0], [0], [1], [0, 0, 1, 1], [], []>} : vector<8x16xf32>, vector<16x64xf32>, vector<8x64xf32> -> vector<8x64xf32>
    %83 = vector.extract_strided_slice %80 {offsets = [0, 32], sizes = [8, 16], strides = [1, 1]} : vector<8x64xf32> to vector<8x16xf32>
    %cst_53 = arith.constant dense<0.000000e+00> : vector<8x64xf32>
    %84 = tpu.matmul %83, %79, %cst_53 {dimension_numbers = #tpu.dot_dimension_numbers<[1], [0], [0], [1], [0, 0, 1, 1], [], []>} : vector<8x16xf32>, vector<16x64xf32>, vector<8x64xf32> -> vector<8x64xf32>
    %85 = arith.addf %82, %84 : vector<8x64xf32>
    %86 = vector.extract_strided_slice %80 {offsets = [0, 48], sizes = [8, 16], strides = [1, 1]} : vector<8x64xf32> to vector<8x16xf32>
    %cst_54 = arith.constant dense<0.000000e+00> : vector<8x64xf32>
    %87 = tpu.matmul %86, %47, %cst_54 {dimension_numbers = #tpu.dot_dimension_numbers<[1], [0], [0], [1], [0, 0, 1, 1], [], []>} : vector<8x16xf32>, vector<16x64xf32>, vector<8x64xf32> -> vector<8x64xf32>
    %88 = arith.addf %85, %87 : vector<8x64xf32>
    %c240 = arith.constant 240 : index
    %c0_55 = arith.constant 0 : index
    %89 = vector.load %arg7[%c240, %c0_55] : memref<256x128xf32, #tpu.memory_space<vmem>>, vector<8x1xf32>
    %90 = vector.broadcast %89 : vector<8x1xf32> to vector<8x64xf32>
    %91 = arith.addf %88, %90 : vector<8x64xf32>
    %c0_56 = arith.constant 0 : index
    %c0_57 = arith.constant 0 : index
    %92 = vector.load %arg6[%c0_56, %c0_57] : memref<64x640xf32, #tpu.memory_space<vmem>>, vector<64x640xf32>
    %cst_58 = arith.constant dense<0.000000e+00> : vector<8x640xf32>
    %93 = tpu.matmul %91, %92, %cst_58 {dimension_numbers = #tpu.dot_dimension_numbers<[1], [0], [0], [1], [0, 0, 1, 1], [], []>} : vector<8x64xf32>, vector<64x640xf32>, vector<8x640xf32> -> vector<8x640xf32>
    %94 = vector.extract_strided_slice %80 {offsets = [0, 0], sizes = [8, 16], strides = [1, 1]} : vector<8x64xf32> to vector<8x16xf32>
    %cst_59 = arith.constant dense<0.000000e+00> : vector<8x640xf32>
    %95 = tpu.matmul %94, %59, %cst_59 {dimension_numbers = #tpu.dot_dimension_numbers<[1], [0], [0], [1], [0, 0, 1, 1], [], []>} : vector<8x16xf32>, vector<16x640xf32>, vector<8x640xf32> -> vector<8x640xf32>
    %96 = arith.addf %95, %93 : vector<8x640xf32>
    %cst_60 = arith.constant 0.000000e+00 : f32
    %97 = vector.broadcast %cst_60 : f32 to vector<8x640xf32>
    %98 = arith.maximumf %96, %97 : vector<8x640xf32>
    %c120 = arith.constant 120 : index
    %c0_61 = arith.constant 0 : index
    %99 = vector.load %arg7[%c120, %c0_61] : memref<256x128xf32, #tpu.memory_space<vmem>>, vector<1x8xf32>
    %cst_62 = arith.constant dense<0.000000e+00> : vector<1x640xf32>
    %100 = tpu.matmul %99, %98, %cst_62 {dimension_numbers = #tpu.dot_dimension_numbers<[1], [0], [0], [1], [0, 0, 1, 1], [], []>} : vector<1x8xf32>, vector<8x640xf32>, vector<1x640xf32> -> vector<1x640xf32>
    %c248 = arith.constant 248 : index
    %c0_63 = arith.constant 0 : index
    %101 = vector.load %arg7[%c248, %c0_63] : memref<256x128xf32, #tpu.memory_space<vmem>>, vector<1x1xf32>
    %102 = vector.broadcast %101 : vector<1x1xf32> to vector<1x640xf32>
    %103 = arith.addf %100, %102 : vector<1x640xf32>
    %c0_64 = arith.constant 0 : index
    %c0_65 = arith.constant 0 : index
    %c0_66 = arith.constant 0 : index
    %104 = vector.load %arg8[%c0_64, %c0_65, %c0_66] : memref<1x1x640xf32, #tpu.memory_space<vmem>>, vector<1x1x640xf32>
    %105 = vector.shape_cast %104 : vector<1x1x640xf32> to vector<1x640xf32>
    %106 = vector.shape_cast %103 : vector<1x640xf32> to vector<1x1x640xf32>
    tpu.vector_store %arg8[%c0_64, %c0_65, %c0_66], %106 {strides = array<i32>} : memref<1x1x640xf32, #tpu.memory_space<vmem>>, vector<1x1x640xf32>,
    return
  }
  func.func @transform_0(%arg0: i32) -> (i32, i32) {
    %c0_i32 = arith.constant 0 : i32
    %c0_i32_0 = arith.constant 0 : i32
    return %c0_i32, %arg0 : i32, i32
  }
  func.func @transform_1(%arg0: i32) -> (i32, i32) {
    %c0_i32 = arith.constant 0 : i32
    %c0_i32_0 = arith.constant 0 : i32
    return %c0_i32, %arg0 : i32, i32
  }
  func.func @transform_2(%arg0: i32) -> (i32, i32, i32) {
    %c0_i32 = arith.constant 0 : i32
    %c0_i32_0 = arith.constant 0 : i32
    %c0_i32_1 = arith.constant 0 : i32
    return %arg0, %c0_i32, %c0_i32_0 : i32, i32, i32
  }
  func.func @transform_3(%arg0: i32) -> (i32, i32) {
    %c0_i32 = arith.constant 0 : i32
    %c0_i32_0 = arith.constant 0 : i32
    %c0_i32_1 = arith.constant 0 : i32
    return %c0_i32, %c0_i32_0 : i32, i32
  }
  func.func @transform_4(%arg0: i32) -> (i32, i32) {
    %c0_i32 = arith.constant 0 : i32
    %c0_i32_0 = arith.constant 0 : i32
    %c0_i32_1 = arith.constant 0 : i32
    return %c0_i32, %c0_i32_0 : i32, i32
  }
  func.func @transform_5(%arg0: i32) -> (i32, i32) {
    %c0_i32 = arith.constant 0 : i32
    %c0_i32_0 = arith.constant 0 : i32
    %c0_i32_1 = arith.constant 0 : i32
    return %c0_i32, %c0_i32_0 : i32, i32
  }
  func.func @transform_6(%arg0: i32) -> (i32, i32) {
    %c0_i32 = arith.constant 0 : i32
    %c0_i32_0 = arith.constant 0 : i32
    %c0_i32_1 = arith.constant 0 : i32
    return %c0_i32, %c0_i32_0 : i32, i32
  }
  func.func @transform_7(%arg0: i32) -> (i32, i32, i32) {
    %c0_i32 = arith.constant 0 : i32
    %c0_i32_0 = arith.constant 0 : i32
    %c0_i32_1 = arith.constant 0 : i32
    return %arg0, %c0_i32, %c0_i32_0 : i32, i32, i32
  }
}

</mosaic_0001>

<bundles_post_ra>
// kernel: tpu_custom_call.1
= control target key start
LH: loop header
LB: loop body
LE: loop exit
PB: predicated region body
PF: predicated region fallthrough
CT: control target
= control target key end

     0   :  { %vm129_vm0 = vcmask 1042432   ;;  %v22042_v4 = vmov 0.0   ;;  %vm122_vm1 = vcmask 23552   ;;  %v17173_v8 = vmov 0   ;;  %s22033_s0 = inlined_call_operand.vmem [shape: f32[6,640], index: 0, kind: input, shape index: {}]   ;;  %s22034_s1 = inlined_call_operand.vmem [shape: f32[3,6400], index: 1, kind: input, shape index: {}]   ;;  %s22035_s2 = inlined_call_operand.vmem [shape: f32[1,3,64], index: 2, kind: input, shape index: {}]   ;;  %s22036_s3 = inlined_call_operand.vmem [shape: f32[6400,64], index: 3, kind: input, shape index: {}]   ;;  %s22037_s4 = inlined_call_operand.vmem [shape: f32[640,64], index: 4, kind: input, shape index: {}]   ;;  %s22038_s5 = inlined_call_operand.vmem [shape: f32[64,640], index: 5, kind: input, shape index: {}]   ;;  %s22039_s6 = inlined_call_operand.vmem [shape: f32[256,128], index: 6, kind: input, shape index: {}]   ;;  %s22040_s7 = inlined_call_operand.hbm [shape: f32[1,1,640], index: 7, kind: output, shape index: {}]  }
   0x1   :  { %v27_v0 = vld [vmem:[%s22034_s1] sm:$0x77]  ;;  %v28_v1 = vld [vmem:[%s22034_s1 + $0x8] sm:$0x77]  ;;  %294 = vmatprep.mubr.f32.mxu0 %v22042_v4  ;;  %371 = vmatprep.mubr.f32.mxu1 %v22042_v4  ;;  %v29_v5 = vld [vmem:[%s22034_s1 + $0x10] sm:$0x77] }
   0x2   :  { %v97_v2 = vcombine.high %v27_v0, %v27_v0  ;;  %v98_v3 = vcombine.high %v28_v1, %v28_v1  ;;  %v17235_v6 = vld [vmem:[%s22039_s6] sm:$0xff]  ;;  %v30_v7 = vld [vmem:[%s22034_s1 + $0x18] sm:$0x77]  ;;  %16676 = vset.pattern.permute.xlu0 %v17173_v8  ;;  %16677 = vset.pattern.permute.xlu1 %v17173_v8  ;;  %v99_v9 = vcombine.high %v29_v5, %v29_v5  ;;  %v32_v12 = vld [vmem:[%s22034_s1 + $0x28] sm:$0x77] }
   0x3   :  { %v100_v10 = vcombine.high %v30_v7, %v30_v7  ;;  %v31_v11 = vld [vmem:[%s22034_s1 + $0x20] sm:$0x77]  ;;  %v17259_v13 = vld [vmem:[%s22039_s6 + $0x8] sm:$0xff]  ;;  %v102_v15 = vcombine.high %v32_v12, %v32_v12  ;;  %v33_v16 = vld [vmem:[%s22034_s1 + $0x30] sm:$0x77] }
   0x4   :  { %13826 = vmatprep.subr.msk.mxu0 %vm129_vm0, %v97_v2  ;;  %13830 = vmatprep.subr.msk.mxu1 %vm129_vm0, %v98_v3  ;;  %v101_v14 = vcombine.high %v31_v11, %v31_v11  ;;  %v34_v17 = vld [vmem:[%s22034_s1 + $0x38] sm:$0x77]  ;;  %v60_v18 = vld [vmem:[%s22039_s6 + $0x80] sm:$0xff]  ;;  %v103_v19 = vcombine.high %v33_v16, %v33_v16 }
   0x5   :  { %13827 = vmatpush1.msk.msra.mxu0 %vm129_vm0, %v27_v0  ;;  %13831 = vmatpush1.msk.msra.mxu1 %vm129_vm0, %v28_v1  ;;  %v104_v20 = vcombine.high %v34_v17, %v34_v17 }
   0x6   :  { %13828 = vmatmul.mubr.msk.f32.vlgmr.msra.gmra.mrb[0].mxu0 %vm122_vm1, %v17235_v6  ;;  %13832 = vmatmul.mubr.msk.f32.vlgmr.msra.gmra.mrb[0].mxu1 %vm122_vm1, %v17235_v6 }
   0x7   :  { %300 = vmatprep.mubr.f32.mxu0 %v22042_v4  ;;  %377 = vmatprep.mubr.f32.mxu1 %v22042_v4 }
   0x8   :  { %13834 = vmatprep.subr.msk.mxu0 %vm129_vm0, %v99_v9  ;;  %13838 = vmatprep.subr.msk.mxu1 %vm129_vm0, %v100_v10 }
   0x9   :  { %13835 = vmatpush1.msk.msra.mxu0 %vm129_vm0, %v29_v5  ;;  %13839 = vmatpush1.msk.msra.mxu1 %vm129_vm0, %v30_v7 }
   0xa   :  { %13829 = vmatmul.mubr.msk.f32.gmra.mrb[2].mxu0 %vm122_vm1, %v17259_v13  ;;  %13833 = vmatmul.mubr.msk.f32.gmra.mrb[2].mxu1 %vm122_vm1, %v17259_v13 }
   0xb   :  { %448 = vmatprep.mubr.f32.mxu0 %v22042_v4  ;;  %525 = vmatprep.mubr.f32.mxu1 %v22042_v4 }
   0xc   :  { %13842 = vmatprep.subr.msk.mxu0 %vm129_vm0, %v101_v14  ;;  %13846 = vmatprep.subr.msk.mxu1 %vm129_vm0, %v102_v15 }
   0xd   :  { %64 = vperm.xlu0 %16676, %v60_v18  }
   0xe   :  { %12 = vsyncpa [#allocation3], 0  ;;  %13836 = vmatmul.mubr.msk.f32.vlgmr.msra.gmra.mrb[4].mxu0 %vm122_vm1, %v17235_v6  ;;  %13840 = vmatmul.mubr.msk.f32.vlgmr.msra.gmra.mrb[4].mxu1 %vm122_vm1, %v17235_v6  ;;  %v61_v21 = vld [vmem:[%s22039_s6 + $0x88] sm:$0xff]  ;;  %v35_v22 = vld [vmem:[%s22034_s1 + $0x40] sm:$0x77]  ;;  %s17174_s19 = smov 96  }
   0xf   :  { %454 = vmatprep.mubr.f32.mxu0 %v22042_v4  ;;  %531 = vmatprep.mubr.f32.mxu1 %v22042_v4  ;;  %v36_v23 = vld [vmem:[%s22034_s1 + $0x48] sm:$0x77]  ;;  %v105_v24 = vcombine.high %v35_v22, %v35_v22  ;;  %v4203_v26 = vld [vmem:[%s22039_s6 + $0xc0] sm:$0xff]  ;;  %v37_v27 = vld [vmem:[%s22034_s1 + $0x50] sm:$0x77]  ;;  %s17175_s22 = smov 80  }
  0x10   :  { %13843 = vmatpush1.msk.msra.mxu0 %vm129_vm0, %v31_v11  ;;  %13847 = vmatpush1.msk.msra.mxu1 %vm129_vm0, %v32_v12  ;;  %v106_v25 = vcombine.high %v36_v23, %v36_v23  ;;  %v38_v28 = vld [vmem:[%s22034_s1 + $0x58] sm:$0x77]  ;;  %v107_v29 = vcombine.high %v37_v27, %v37_v27  ;;  %v6247_v31 = vld [vmem:[%s22039_s6 + $0xd0] sm:$0x1]  ;;  %v39_v32 = vld [vmem:[%s22034_s1 + $0x60] sm:$0x77] }
  0x11   :  { %13850 = vmatprep.subr.msk.mxu0 %vm129_vm0, %v103_v19  ;;  %13854 = vmatprep.subr.msk.mxu1 %vm129_vm0, %v104_v20  ;;  %v108_v30 = vcombine.high %v38_v28, %v38_v28  ;;  %v40_v33 = vld [vmem:[%s22034_s1 + $0x68] sm:$0x77]  ;;  %v109_v34 = vcombine.high %v39_v32, %v39_v32  ;;  %v41_v37 = vld [vmem:[%s22034_s1 + $0x70] sm:$0x77]  ;;  %v42_v38 = vld [vmem:[%s22034_s1 + $0x78] sm:$0x77] }
  0x12   :  { %13837 = vmatmul.mubr.msk.f32.gmra.mrb[6].mxu0 %vm122_vm1, %v17259_v13  ;;  %13841 = vmatmul.mubr.msk.f32.gmra.mrb[6].mxu1 %vm122_vm1, %v17259_v13  ;;  %v110_v35 = vcombine.high %v40_v33, %v40_v33  ;;  %v11464_v36 = vld [vmem:[%s22039_s6 + $0xa8] sm:$0xff]  ;;  %v111_v39 = vcombine.high %v41_v37, %v41_v37  ;;  %v112_v40 = vcombine.high %v42_v38, %v42_v38  ;;  %v11740_v41 = vld [vmem:[%s22039_s6 + $0xb8] sm:$0xff]  ;;  %v43_v42 = vld [vmem:[%s22034_s1 + $0x80] sm:$0x77]  ;;  %vm2269_vm2 = vcmask 130048  }
  0x13   :  { %602 = vmatprep.mubr.f32.mxu0 %v22042_v4  ;;  %679 = vmatprep.mubr.f32.mxu1 %v22042_v4  ;;  %v44_v43 = vld [vmem:[%s22034_s1 + $0x88] sm:$0x77]  ;;  %v113_v44 = vcombine.high %v43_v42, %v43_v42  ;;  %v11989_v46 = vld [vmem:[%s22039_s6 + $0xe0] sm:$0xff]  ;;  %v45_v47 = vld [vmem:[%s22034_s1 + $0x90] sm:$0x77]  ;;  %vm11482_vm3 = vcmask 1045504  }
  0x14   :  { %69 = vperm.xlu0 %16676, %v61_v21   ;;  %v114_v45 = vcombine.high %v44_v43, %v44_v43  ;;  %v46_v48 = vld [vmem:[%s22034_s1 + $0x98] sm:$0x77]  ;;  %v115_v49 = vcombine.high %v45_v47, %v45_v47  ;;  %v17445_v51 = vld [vmem:[%s22039_s6 + $0x70] sm:$0xff]  ;;  %v47_v52 = vld [vmem:[%s22034_s1 + $0xa0] sm:$0x77]  ;;  %vm11475_vm4 = vcmask 48128  }
  0x15   :  { %v116_v50 = vcombine.high %v46_v48, %v46_v48  ;;  %v48_v53 = vld [vmem:[%s22034_s1 + $0xa8] sm:$0x77]  ;;  %v117_v54 = vcombine.high %v47_v52, %v47_v52  ;;  %v49_v56 = vld [vmem:[%s22034_s1 + $0xb0] sm:$0x77]  ;;  %v50_v58 = vld [vmem:[%s22034_s1 + $0xb8] sm:$0x77] }
  0x16   :  { %13844 = vmatmul.mubr.msk.f32.vlgmr.msra.gmra.mrb[8].mxu0 %vm122_vm1, %v17235_v6  ;;  %13848 = vmatmul.mubr.msk.f32.vlgmr.msra.gmra.mrb[8].mxu1 %vm122_vm1, %v17235_v6  ;;  %v118_v55 = vcombine.high %v48_v53, %v48_v53  ;;  %v119_v57 = vcombine.high %v49_v56, %v49_v56  ;;  %v13540_v59 = vld [vmem:[%s22039_s6 + $0xf8] sm:$0x1]  ;;  %v120_v60 = vcombine.high %v50_v58, %v50_v58  ;;  %v51_v61 = vld [vmem:[%s22034_s1 + $0xc0] sm:$0x77]  ;;  %v2257_v63 = vld [vmem:[%s22039_s6 + $0x90] sm:$0xff]  ;;  %vm17178_vm5 = vmmov 0  }
  0x17   :  { %608 = vmatprep.mubr.f32.mxu0 %v22042_v4  ;;  %685 = vmatprep.mubr.f32.mxu1 %v22042_v4  ;;  %v121_v62 = vcombine.high %v51_v61, %v51_v61  ;;  %v2258_v0 = vld [vmem:[%s22039_s6 + $0x98] sm:$0xff]  ;;  %v4204_v1 = vld [vmem:[%s22039_s6 + $0xc8] sm:$0xff]  ;;  %v11463_v2 = vld [vmem:[%s22039_s6 + $0xa0] sm:$0xff]  ;;  %vm13104_vm6 = vcmask 523264   ;;  %vm13546_vm7 = vcmask 64512  }
  0x18   :  { %13851 = vmatpush1.msk.msra.mxu0 %vm129_vm0, %v33_v16  ;;  %13855 = vmatpush1.msk.msra.mxu1 %vm129_vm0, %v34_v17  ;;  %v11739_v3 = vld [vmem:[%s22039_s6 + $0xb0] sm:$0xff]  ;;  %v11988_v5 = vld [vmem:[%s22039_s6 + $0xd8] sm:$0xff] }
  0x19   :  { %13858 = vmatprep.subr.msk.mxu0 %vm129_vm0, %v105_v24  ;;  %13862 = vmatprep.subr.msk.mxu1 %vm129_vm0, %v106_v25  ;;  %v13057_v7 = vld [vmem:[%s22039_s6 + $0xf0] sm:$0xff] }
  0x1a   :  { %13845 = vmatmul.mubr.msk.f32.gmra.mrb[10].mxu0 %vm122_vm1, %v17259_v13  ;;  %13849 = vmatmul.mubr.msk.f32.gmra.mrb[10].mxu1 %vm122_vm1, %v17259_v13 }
  0x1b   :  { %756 = vmatprep.mubr.f32.mxu0 %v22042_v4  ;;  %833 = vmatprep.mubr.f32.mxu1 %v22042_v4 }
  0x1c   :  { %4207 = vperm.xlu0 %16676, %v4203_v26   ;;  %2261 = vperm.xlu1 %16677, %v2257_v63  }
  0x1e   :  { %13852 = vmatmul.mubr.msk.f32.vlgmr.msra.gmra.mrb[12].mxu0 %vm122_vm1, %v17235_v6  ;;  %13856 = vmatmul.mubr.msk.f32.vlgmr.msra.gmra.mrb[12].mxu1 %vm122_vm1, %v17235_v6 }
  0x1f   :  { %762 = vmatprep.mubr.f32.mxu0 %v22042_v4  ;;  %839 = vmatprep.mubr.f32.mxu1 %v22042_v4 }
  0x20   :  { %13859 = vmatpush1.msk.msra.mxu0 %vm129_vm0, %v35_v22  ;;  %13863 = vmatpush1.msk.msra.mxu1 %vm129_vm0, %v36_v23 }
  0x21   :  { %13866 = vmatprep.subr.msk.mxu0 %vm129_vm0, %v107_v29  ;;  %13870 = vmatprep.subr.msk.mxu1 %vm129_vm0, %v108_v30 }
  0x22   :  { %13853 = vmatmul.mubr.msk.f32.gmra.mrb[14].mxu0 %vm122_vm1, %v17259_v13  ;;  %13857 = vmatmul.mubr.msk.f32.gmra.mrb[14].mxu1 %vm122_vm1, %v17259_v13 }
  0x23   :  { %910 = vmatprep.mubr.f32.mxu0 %v22042_v4  ;;  %987 = vmatprep.mubr.f32.mxu1 %v22042_v4 }
  0x24   :  { %6250 = vperm.xlu0 %16676, %v6247_v31   ;;  %2266 = vperm.xlu1 %16677, %v2258_v0  }
  0x26   :  { %13860 = vmatmul.mubr.msk.f32.vlgmr.msra.gmra.mrb[16].mxu0 %vm122_vm1, %v17235_v6  ;;  %13864 = vmatmul.mubr.msk.f32.vlgmr.msra.gmra.mrb[16].mxu1 %vm122_vm1, %v17235_v6 }
  0x27   :  { %916 = vmatprep.mubr.f32.mxu0 %v22042_v4  ;;  %993 = vmatprep.mubr.f32.mxu1 %v22042_v4 }
  0x28   :  { %13867 = vmatpush1.msk.msra.mxu0 %vm129_vm0, %v37_v27  ;;  %13871 = vmatpush1.msk.msra.mxu1 %vm129_vm0, %v38_v28 }
  0x29   :  { %13874 = vmatprep.subr.msk.mxu0 %vm129_vm0, %v109_v34  ;;  %13878 = vmatprep.subr.msk.mxu1 %vm129_vm0, %v110_v35 }
  0x2a   :  { %13861 = vmatmul.mubr.msk.f32.gmra.mrb[18].mxu0 %vm122_vm1, %v17259_v13  ;;  %13865 = vmatmul.mubr.msk.f32.gmra.mrb[18].mxu1 %vm122_vm1, %v17259_v13 }
  0x2b   :  { %1064 = vmatprep.mubr.f32.mxu0 %v22042_v4  ;;  %1141 = vmatprep.mubr.f32.mxu1 %v22042_v4 }
  0x2c   :  { %11472 = vperm.xlu0 %16676, %v11464_v36   ;;  %4212 = vperm.xlu1 %16677, %v4204_v1  }
  0x2e   :  { %13868 = vmatmul.mubr.msk.f32.vlgmr.msra.gmra.mrb[20].mxu0 %vm122_vm1, %v17235_v6  ;;  %13872 = vmatmul.mubr.msk.f32.vlgmr.msra.gmra.mrb[20].mxu1 %vm122_vm1, %v17235_v6 }
  0x2f   :  { %1070 = vmatprep.mubr.f32.mxu0 %v22042_v4  ;;  %1147 = vmatprep.mubr.f32.mxu1 %v22042_v4 }
  0x30   :  { %13875 = vmatpush1.msk.msra.mxu0 %vm129_vm0, %v39_v32  ;;  %13879 = vmatpush1.msk.msra.mxu1 %vm129_vm0, %v40_v33 }
  0x31   :  { %13882 = vmatprep.subr.msk.mxu0 %vm129_vm0, %v111_v39  ;;  %13886 = vmatprep.subr.msk.mxu1 %vm129_vm0, %v112_v40 }
  0x32   :  { %13869 = vmatmul.mubr.msk.f32.gmra.mrb[22].mxu0 %vm122_vm1, %v17259_v13  ;;  %13873 = vmatmul.mubr.msk.f32.gmra.mrb[22].mxu1 %vm122_vm1, %v17259_v13 }
  0x33   :  { %1218 = vmatprep.mubr.f32.mxu0 %v22042_v4  ;;  %1295 = vmatprep.mubr.f32.mxu1 %v22042_v4 }
  0x34   :  { %11748 = vperm.xlu0 %16676, %v11740_v41   ;;  %11467 = vperm.xlu1 %16677, %v11463_v2  }
  0x36   :  { %13876 = vmatmul.mubr.msk.f32.vlgmr.msra.gmra.mrb[24].mxu0 %vm122_vm1, %v17235_v6  ;;  %13880 = vmatmul.mubr.msk.f32.vlgmr.msra.gmra.mrb[24].mxu1 %vm122_vm1, %v17235_v6 }
  0x37   :  { %1224 = vmatprep.mubr.f32.mxu0 %v22042_v4  ;;  %1301 = vmatprep.mubr.f32.mxu1 %v22042_v4 }
  0x38   :  { %13883 = vmatpush1.msk.msra.mxu0 %vm129_vm0, %v41_v37  ;;  %13887 = vmatpush1.msk.msra.mxu1 %vm129_vm0, %v42_v38 }
  0x39   :  { %13890 = vmatprep.subr.msk.mxu0 %vm129_vm0, %v113_v44  ;;  %13894 = vmatprep.subr.msk.mxu1 %vm129_vm0, %v114_v45 }
  0x3a   :  { %13877 = vmatmul.mubr.msk.f32.gmra.mrb[26].mxu0 %vm122_vm1, %v17259_v13  ;;  %13881 = vmatmul.mubr.msk.f32.gmra.mrb[26].mxu1 %vm122_vm1, %v17259_v13 }
  0x3b   :  { %1372 = vmatprep.mubr.f32.mxu0 %v22042_v4  ;;  %1449 = vmatprep.mubr.f32.mxu1 %v22042_v4 }
  0x3c   :  { %11997 = vperm.xlu0 %16676, %v11989_v46   ;;  %11743 = vperm.xlu1 %16677, %v11739_v3  }
  0x3e   :  { %13884 = vmatmul.mubr.msk.f32.vlgmr.msra.gmra.mrb[28].mxu0 %vm122_vm1, %v17235_v6  ;;  %13888 = vmatmul.mubr.msk.f32.vlgmr.msra.gmra.mrb[28].mxu1 %vm122_vm1, %v17235_v6 }
  0x3f   :  { %1378 = vmatprep.mubr.f32.mxu0 %v22042_v4  ;;  %1455 = vmatprep.mubr.f32.mxu1 %v22042_v4 }
  0x40   :  { %13891 = vmatpush1.msk.msra.mxu0 %vm129_vm0, %v43_v42  ;;  %13895 = vmatpush1.msk.msra.mxu1 %vm129_vm0, %v44_v43 }
  0x41   :  { %13898 = vmatprep.subr.msk.mxu0 %vm129_vm0, %v115_v49  ;;  %13902 = vmatprep.subr.msk.mxu1 %vm129_vm0, %v116_v50 }
  0x42   :  { %13885 = vmatmul.mubr.msk.f32.gmra.mrb[30].mxu0 %vm122_vm1, %v17259_v13  ;;  %13889 = vmatmul.mubr.msk.f32.gmra.mrb[30].mxu1 %vm122_vm1, %v17259_v13 }
  0x43   :  { %1526 = vmatprep.mubr.f32.mxu0 %v22042_v4  ;;  %1603 = vmatprep.mubr.f32.mxu1 %v22042_v4 }
  0x44   :  { %12834 = vrot.lane.b32.xlu0 %v17445_v51, %s17174_s19  ;;  %11992 = vperm.xlu1 %16677, %v11988_v5   ;;  %s17176_s19 = smov 112   ;;  %v17598_v5 = vld [vmem:[%s22039_s6 + $0x18] sm:$0xff] }
  0x46   :  { %13892 = vmatmul.mubr.msk.f32.vlgmr.msra.gmra.mrb[32].mxu0 %vm122_vm1, %v17235_v6  ;;  %13896 = vmatmul.mubr.msk.f32.vlgmr.msra.gmra.mrb[32].mxu1 %vm122_vm1, %v17235_v6 }
  0x47   :  { %1532 = vmatprep.mubr.f32.mxu0 %v22042_v4  ;;  %1609 = vmatprep.mubr.f32.mxu1 %v22042_v4 }
  0x48   :  { %13899 = vmatpush1.msk.msra.mxu0 %vm129_vm0, %v45_v47  ;;  %13903 = vmatpush1.msk.msra.mxu1 %vm129_vm0, %v46_v48 }
  0x49   :  { %13906 = vmatprep.subr.msk.mxu0 %vm129_vm0, %v117_v54  ;;  %13910 = vmatprep.subr.msk.mxu1 %vm129_vm0, %v118_v55 }
  0x4a   :  { %13893 = vmatmul.mubr.msk.f32.gmra.mrb[34].mxu0 %vm122_vm1, %v17259_v13  ;;  %13897 = vmatmul.mubr.msk.f32.gmra.mrb[34].mxu1 %vm122_vm1, %v17259_v13 }
  0x4b   :  { %1680 = vmatprep.mubr.f32.mxu0 %v22042_v4  ;;  %1757 = vmatprep.mubr.f32.mxu1 %v22042_v4 }
  0x4c   :  { %12982 = vrot.lane.b32.xlu0 %v17445_v51, %s17175_s22 }
  0x4e   :  { %13900 = vmatmul.mubr.msk.f32.vlgmr.msra.gmra.mrb[36].mxu0 %vm122_vm1, %v17235_v6  ;;  %13904 = vmatmul.mubr.msk.f32.vlgmr.msra.gmra.mrb[36].mxu1 %vm122_vm1, %v17235_v6 }
  0x4f   :  { %1686 = vmatprep.mubr.f32.mxu0 %v22042_v4  ;;  %1763 = vmatprep.mubr.f32.mxu1 %v22042_v4 }
  0x50   :  { %13907 = vmatpush1.msk.msra.mxu0 %vm129_vm0, %v47_v52  ;;  %13911 = vmatpush1.msk.msra.mxu1 %vm129_vm0, %v48_v53  ;;  %v17585_v52 = vld [vmem:[%s22039_s6 + $0x10] sm:$0xff] }
  0x51   :  { %13543 = vperm.xlu0 %16676, %v13540_v59   ;;  %13914 = vmatprep.subr.msk.mxu0 %vm129_vm0, %v119_v57 }
  0x52   :  { %13901 = vmatmul.mubr.msk.f32.gmra.mrb[38].mxu0 %vm122_vm1, %v17259_v13  ;;  %13905 = vmatmul.mubr.msk.f32.gmra.mrb[38].mxu1 %vm122_vm1, %v17259_v13 }
  0x53   :  { %1834 = vmatprep.mubr.f32.mxu0 %v22042_v4  ;;  %1911 = vmatprep.mubr.f32.mxu1 %v22042_v4 }
  0x54   :  { %13918 = vmatprep.subr.msk.mxu1 %vm129_vm0, %v120_v60 }
  0x56   :  { %13908 = vmatmul.mubr.msk.f32.vlgmr.msra.gmra.mrb[40].mxu0 %vm122_vm1, %v17235_v6  ;;  %13912 = vmatmul.mubr.msk.f32.vlgmr.msra.gmra.mrb[40].mxu1 %vm122_vm1, %v17235_v6 }
  0x57   :  { %1840 = vmatprep.mubr.f32.mxu0 %v22042_v4  ;;  %1917 = vmatprep.mubr.f32.mxu1 %v22042_v4 }
  0x58   :  { %13915 = vmatpush1.msk.msra.mxu0 %vm129_vm0, %v49_v56  ;;  %13919 = vmatpush1.msk.msra.mxu1 %vm129_vm0, %v50_v58 }
  0x59   :  { %13922 = vmatprep.subr.msk.mxu0 %vm129_vm0, %v121_v62 }
  0x5a   :  { %13909 = vmatmul.mubr.msk.f32.gmra.mrb[42].mxu0 %vm122_vm1, %v17259_v13  ;;  %13913 = vmatmul.mubr.msk.f32.gmra.mrb[42].mxu1 %vm122_vm1, %v17259_v13 }
  0x5b   :  { %1988 = vmatprep.mubr.f32.mxu0 %v22042_v4  ;;  %2065 = vmatprep.mubr.f32.mxu1 %v22042_v4 }
  0x5e   :  { %13916 = vmatmul.mubr.msk.f32.vlgmr.msra.gmra.mrb[44].mxu0 %vm122_vm1, %v17235_v6  ;;  %13920 = vmatmul.mubr.msk.f32.vlgmr.msra.gmra.mrb[44].mxu1 %vm122_vm1, %v17235_v6 }
  0x5f   :  { %1994 = vmatprep.mubr.f32.mxu0 %v22042_v4  ;;  %2071 = vmatprep.mubr.f32.mxu1 %v22042_v4 }
  0x60   :  { %13923 = vmatpush1.msk.msra.mxu0 %vm129_vm0, %v51_v61 }
  0x62   :  { %13917 = vmatmul.mubr.msk.f32.gmra.mrb[46].mxu0 %vm122_vm1, %v17259_v13  ;;  %13921 = vmatmul.mubr.msk.f32.gmra.mrb[46].mxu1 %vm122_vm1, %v17259_v13 }
  0x63   :  { %2142 = vmatprep.mubr.f32.mxu0 %v22042_v4  ;;  %2340 = vmatprep.mubr.f32.mxu1 %v22042_v4 }
  0x66   :  { %13924 = vmatmul.mubr.msk.f32.vlgmr.msra.gmra.mrb[48].mxu0 %vm122_vm1, %v17235_v6  ;;  %v12246_v6 = vld [vmem:[%s22039_s6 + $0xe8] sm:$0x1] }
  0x67   :  { %2148 = vmatprep.mubr.f32.mxu0 %v22042_v4  ;;  %12249 = vperm.xlu1 %16677, %v12246_v6  }
  0x6a   :  { %13925 = vmatmul.mubr.msk.f32.gmra.mrb[50].mxu0 %vm122_vm1, %v17259_v13 }
  0x6b   :  { %2417 = vmatprep.mubr.f32.mxu0 %v22042_v4  ;;  %12908 = vrot.lane.b32.xlu1 %v17445_v51, %s17176_s19 }
  0x6f   :  { %13060 = vperm.xlu1 %16677, %v13057_v7  }
  0x8c   :  { %v17564_v8 = vpop.permute.xlu0 %64 }
  0x8d   :  { %22118 = vst [vmem:[#allocation5_spill] sm:$0xff] %v17564_v8 }
  0x93   :  { %v17566_v13 = vpop.permute.xlu0 %69 }
  0x94   :  { %22119 = vst [vmem:[#allocation6_spill] sm:$0xff] %v17566_v13 }
  0xd9   :  { %v296_v9 = vpop.f32.mrb[0].mxu0  ;;  %v373_v10 = vpop.f32.mrb[0].mxu1 }
  0xda   :  { %v298_v11 = vpop.f32.mrb[1].mxu0  ;;  %v375_v12 = vpop.f32.mrb[1].mxu1  ;;  %v297_v14 = vadd.f32 %v296_v9, %v17564_v8  ;;  %v374_v15 = vadd.f32 %v373_v10, %v17564_v8 }
  0xdb   :  { %v299_v16 = vadd.f32 %v298_v11, %v17564_v8  ;;  %v376_v17 = vadd.f32 %v375_v12, %v17564_v8 }
  0xdc   :  { %v2155_v26 = vmax.f32 %v297_v14, 0.0  ;;  %v2157_v27 = vmax.f32 %v374_v15, 0.0 }
  0xdd   :  { %v302_v18 = vpop.f32.mrb[2].mxu0  ;;  %v379_v19 = vpop.f32.mrb[2].mxu1  ;;  %v2156_v30 = vmax.f32 %v299_v16, 0.0  ;;  %v2158_v31 = vmax.f32 %v376_v17, 0.0 }
  0xde   :  { %v303_v20 = vadd.f32 %v302_v18, %v17566_v13  ;;  %v380_v21 = vadd.f32 %v379_v19, %v17566_v13  ;;  %v304_v22 = vpop.f32.mrb[3].mxu0  ;;  %v381_v23 = vpop.f32.mrb[3].mxu1 }
  0xdf   :  { %v305_v24 = vadd.f32 %v304_v22, %v17566_v13  ;;  %v382_v25 = vadd.f32 %v381_v23, %v17566_v13 }
  0xe0   :  { %v2205_v28 = vmax.f32 %v303_v20, 0.0  ;;  %v2207_v29 = vmax.f32 %v380_v21, 0.0 }
  0xe1   :  { %v2206_v32 = vmax.f32 %v305_v24, 0.0  ;;  %v2208_v33 = vmax.f32 %v382_v25, 0.0  ;;  %v450_v34 = vpop.f32.mrb[4].mxu0  ;;  %v527_v35 = vpop.f32.mrb[4].mxu1 }
  0xe2   :  { %v15364_v36 = vpack.c.bf16 %v2205_v28, %v2155_v26  ;;  %v15368_v37 = vpack.c.bf16 %v2207_v29, %v2157_v27  ;;  %v452_v38 = vpop.f32.mrb[5].mxu0  ;;  %v529_v39 = vpop.f32.mrb[5].mxu1  ;;  %v528_v42 = vadd.f32 %v527_v35, %v17564_v8  ;;  %v451_v47 = vadd.f32 %v450_v34, %v17564_v8 }
  0xe3   :  { %v15366_v40 = vpack.c.bf16 %v2208_v33, %v2158_v31  ;;  %v15362_v41 = vpack.c.bf16 %v2206_v32, %v2156_v30  ;;  %v453_v43 = vadd.f32 %v452_v38, %v17564_v8  ;;  %v530_v44 = vadd.f32 %v529_v39, %v17564_v8 }
  0xe4   :  { %v2161_v55 = vmax.f32 %v528_v42, 0.0  ;;  %v2159_v0 = vmax.f32 %v451_v47, 0.0 }
  0xe5   :  { %v456_v45 = vpop.f32.mrb[6].mxu0  ;;  %v533_v46 = vpop.f32.mrb[6].mxu1  ;;  %15363 = vmatprep.subr.bf16.mxu1 %v15362_v41  ;;  %15367 = vmatprep.subr.bf16.mxu0 %v15366_v40  ;;  %v2160_v58 = vmax.f32 %v453_v43, 0.0  ;;  %v2162_v59 = vmax.f32 %v530_v44, 0.0 }
  0xe6   :  { %v457_v48 = vadd.f32 %v456_v45, %v17566_v13  ;;  %v534_v49 = vadd.f32 %v533_v46, %v17566_v13  ;;  %v458_v50 = vpop.f32.mrb[7].mxu0  ;;  %v535_v51 = vpop.f32.mrb[7].mxu1  ;;  %15365 = vmatpush1.bf16.msra.mxu1 %v15364_v36  ;;  %15369 = vmatpush1.bf16.msra.mxu0 %v15368_v37 }
  0xe7   :  { %v459_v53 = vadd.f32 %v458_v50, %v17566_v13  ;;  %v536_v54 = vadd.f32 %v535_v51, %v17566_v13 }
  0xe8   :  { %v2209_v56 = vmax.f32 %v457_v48, 0.0  ;;  %v2211_v57 = vmax.f32 %v534_v49, 0.0 }
  0xe9   :  { %v2212_v60 = vmax.f32 %v536_v54, 0.0  ;;  %v604_v61 = vpop.f32.mrb[8].mxu0  ;;  %v681_v62 = vpop.f32.mrb[8].mxu1  ;;  %13926 = vmatmul.mubr.msk.f32.vlgmr.msra.gmra.mrb[48].mxu1 %vm2269_vm2, %v17585_v52  ;;  %13928 = vmatmul.mubr.msk.f32.vlgmr.msra.gmra.mrb[52].mxu0 %vm2269_vm2, %v17585_v52  ;;  %v2210_v63 = vmax.f32 %v459_v53, 0.0 }
  0xea   :  { %v15376_v1 = vpack.c.bf16 %v2211_v57, %v2161_v55  ;;  %v606_v2 = vpop.f32.mrb[9].mxu0  ;;  %v683_v3 = vpop.f32.mrb[9].mxu1  ;;  %2346 = vmatprep.mubr.f32.mxu1 %v22042_v4  ;;  %2423 = vmatprep.mubr.f32.mxu0 %v22042_v4  ;;  %v605_v9 = vadd.f32 %v604_v61, %v17564_v8  ;;  %v682_v10 = vadd.f32 %v681_v62, %v17564_v8 }
  0xeb   :  { %v15374_v6 = vpack.c.bf16 %v2212_v60, %v2162_v59  ;;  %v15370_v7 = vpack.c.bf16 %v2210_v63, %v2160_v58  ;;  %v15372_v11 = vpack.c.bf16 %v2209_v56, %v2159_v0  ;;  %v684_v12 = vadd.f32 %v683_v3, %v17564_v8 }
  0xec   :  { %v607_v16 = vadd.f32 %v606_v2, %v17564_v8  ;;  %v2163_v23 = vmax.f32 %v605_v9, 0.0  ;;  %v2165_v24 = vmax.f32 %v682_v10, 0.0 }
  0xed   :  { %v610_v14 = vpop.f32.mrb[10].mxu0  ;;  %v687_v15 = vpop.f32.mrb[10].mxu1  ;;  %13927 = vmatmul.mubr.msk.f32.gmra.mrb[50].mxu1 %vm2269_vm2, %v17598_v5  ;;  %13929 = vmatmul.mubr.msk.f32.gmra.mrb[54].mxu0 %vm2269_vm2, %v17598_v5  ;;  %v2166_v27 = vmax.f32 %v684_v12, 0.0 }
  0xee   :  { %v611_v17 = vadd.f32 %v610_v14, %v17566_v13  ;;  %v688_v18 = vadd.f32 %v687_v15, %v17566_v13  ;;  %15371 = vmatprep.subr.bf16.mxu1 %v15370_v7  ;;  %15375 = vmatprep.subr.bf16.mxu0 %v15374_v6  ;;  %v612_v19 = vpop.f32.mrb[11].mxu0  ;;  %v689_v20 = vpop.f32.mrb[11].mxu1  ;;  %v2164_v36 = vmax.f32 %v607_v16, 0.0 }
  0xef   :  { %v613_v21 = vadd.f32 %v612_v19, %v17566_v13  ;;  %v690_v22 = vadd.f32 %v689_v20, %v17566_v13  ;;  %15373 = vmatpush1.bf16.msra.mxu1 %v15372_v11  ;;  %15377 = vmatpush1.bf16.msra.mxu0 %v15376_v1 }
  0xf0   :  { %v2213_v25 = vmax.f32 %v611_v17, 0.0  ;;  %v2215_v26 = vmax.f32 %v688_v18, 0.0  ;;  %2494 = vmatprep.mubr.f32.mxu1 %v22042_v4  ;;  %2571 = vmatprep.mubr.f32.mxu0 %v22042_v4 }
  0xf1   :  { %v2214_v28 = vmax.f32 %v613_v21, 0.0  ;;  %v2216_v29 = vmax.f32 %v690_v22, 0.0  ;;  %v758_v30 = vpop.f32.mrb[12].mxu0  ;;  %v835_v31 = vpop.f32.mrb[12].mxu1 }
  0xf2   :  { %v15380_v32 = vpack.c.bf16 %v2213_v25, %v2163_v23  ;;  %v15384_v33 = vpack.c.bf16 %v2215_v26, %v2165_v24  ;;  %13930 = vmatmul.mubr.msk.f32.vlgmr.msra.gmra.mrb[52].mxu1 %vm2269_vm2, %v17585_v52  ;;  %v760_v34 = vpop.f32.mrb[13].mxu0  ;;  %v837_v35 = vpop.f32.mrb[13].mxu1  ;;  %13932 = vmatmul.mubr.msk.f32.vlgmr.msra.gmra.mrb[56].mxu0 %vm2269_vm2, %v17585_v52  ;;  %v759_v38 = vadd.f32 %v758_v30, %v17564_v8 }
  0xf3   :  { %v15382_v37 = vpack.c.bf16 %v2216_v29, %v2166_v27  ;;  %2500 = vmatprep.mubr.f32.mxu1 %v22042_v4  ;;  %v836_v39 = vadd.f32 %v835_v31, %v17564_v8  ;;  %2577 = vmatprep.mubr.f32.mxu0 %v22042_v4  ;;  %v15378_v40 = vpack.c.bf16 %v2214_v28, %v2164_v36 }
  0xf4   :  { %v761_v41 = vadd.f32 %v760_v34, %v17564_v8  ;;  %v838_v42 = vadd.f32 %v837_v35, %v17564_v8  ;;  %v2167_v51 = vmax.f32 %v759_v38, 0.0 }
  0xf5   :  { %v764_v43 = vpop.f32.mrb[14].mxu0  ;;  %v841_v44 = vpop.f32.mrb[14].mxu1  ;;  %15383 = vmatprep.subr.bf16.mxu0 %v15382_v37  ;;  %15379 = vmatprep.subr.bf16.mxu1 %v15378_v40  ;;  %v2169_v53 = vmax.f32 %v836_v39, 0.0 }
  0xf6   :  { %v765_v45 = vadd.f32 %v764_v43, %v17566_v13  ;;  %v842_v46 = vadd.f32 %v841_v44, %v17566_v13  ;;  %13931 = vmatmul.mubr.msk.f32.gmra.mrb[54].mxu1 %vm2269_vm2, %v17598_v5  ;;  %v766_v47 = vpop.f32.mrb[15].mxu0  ;;  %v843_v48 = vpop.f32.mrb[15].mxu1  ;;  %13933 = vmatmul.mubr.msk.f32.gmra.mrb[58].mxu0 %vm2269_vm2, %v17598_v5  ;;  %v2168_v56 = vmax.f32 %v761_v41, 0.0  ;;  %v2170_v57 = vmax.f32 %v838_v42, 0.0 }
  0xf7   :  { %v767_v49 = vadd.f32 %v766_v47, %v17566_v13  ;;  %v844_v50 = vadd.f32 %v843_v48, %v17566_v13  ;;  %15381 = vmatpush1.bf16.msra.mxu1 %v15380_v32  ;;  %15385 = vmatpush1.bf16.msra.mxu0 %v15384_v33 }
  0xf8   :  { %v2217_v54 = vmax.f32 %v765_v45, 0.0  ;;  %v2219_v55 = vmax.f32 %v842_v46, 0.0  ;;  %2648 = vmatprep.mubr.f32.mxu1 %v22042_v4  ;;  %2725 = vmatprep.mubr.f32.mxu0 %v22042_v4 }
  0xf9   :  { %v2218_v58 = vmax.f32 %v767_v49, 0.0  ;;  %v2220_v59 = vmax.f32 %v844_v50, 0.0  ;;  %v912_v60 = vpop.f32.mrb[16].mxu0  ;;  %v989_v61 = vpop.f32.mrb[16].mxu1 }
  0xfa   :  { %v15388_v62 = vpack.c.bf16 %v2217_v54, %v2167_v51  ;;  %v15392_v63 = vpack.c.bf16 %v2219_v55, %v2169_v53  ;;  %13934 = vmatmul.mubr.msk.f32.vlgmr.msra.gmra.mrb[56].mxu1 %vm2269_vm2, %v17585_v52  ;;  %v914_v0 = vpop.f32.mrb[17].mxu0  ;;  %v991_v1 = vpop.f32.mrb[17].mxu1  ;;  %13936 = vmatmul.mubr.msk.f32.vlgmr.msra.gmra.mrb[60].mxu0 %vm2269_vm2, %v17585_v52  ;;  %v913_v6 = vadd.f32 %v912_v60, %v17564_v8 }
  0xfb   :  { %v15386_v2 = vpack.c.bf16 %v2218_v58, %v2168_v56  ;;  %v15390_v3 = vpack.c.bf16 %v2220_v59, %v2170_v57  ;;  %v990_v7 = vadd.f32 %v989_v61, %v17564_v8  ;;  %2654 = vmatprep.mubr.f32.mxu1 %v22042_v4  ;;  %2731 = vmatprep.mubr.f32.mxu0 %v22042_v4 }
  0xfc   :  { %v915_v9 = vadd.f32 %v914_v0, %v17564_v8  ;;  %v992_v10 = vadd.f32 %v991_v1, %v17564_v8  ;;  %v2171_v20 = vmax.f32 %v913_v6, 0.0 }
  0xfd   :  { %v918_v11 = vpop.f32.mrb[18].mxu0  ;;  %v995_v12 = vpop.f32.mrb[18].mxu1  ;;  %15387 = vmatprep.subr.bf16.mxu1 %v15386_v2  ;;  %15391 = vmatprep.subr.bf16.mxu0 %v15390_v3  ;;  %v2173_v21 = vmax.f32 %v990_v7, 0.0 }
  0xfe   :  { %v919_v14 = vadd.f32 %v918_v11, %v17566_v13  ;;  %v996_v15 = vadd.f32 %v995_v12, %v17566_v13  ;;  %13935 = vmatmul.mubr.msk.f32.gmra.mrb[58].mxu1 %vm2269_vm2, %v17598_v5  ;;  %v920_v16 = vpop.f32.mrb[19].mxu0  ;;  %v997_v17 = vpop.f32.mrb[19].mxu1  ;;  %15393 = vmatpush1.bf16.msra.mxu0 %v15392_v63  ;;  %v2172_v24 = vmax.f32 %v915_v9, 0.0  ;;  %v2174_v25 = vmax.f32 %v992_v10, 0.0 }
  0xff   :  { %13937 = vmatmul.mubr.msk.f32.gmra.mrb[62].mxu0 %vm2269_vm2, %v17598_v5  ;;  %v921_v18 = vadd.f32 %v920_v16, %v17566_v13  ;;  %v998_v19 = vadd.f32 %v997_v17, %v17566_v13  ;;  %15389 = vmatpush1.bf16.msra.mxu1 %v15388_v62 }
 0x100   :  { %v2221_v22 = vmax.f32 %v919_v14, 0.0  ;;  %v2223_v23 = vmax.f32 %v996_v15, 0.0  ;;  %2802 = vmatprep.mubr.f32.mxu1 %v22042_v4  ;;  %2879 = vmatprep.mubr.f32.mxu0 %v22042_v4 }
 0x101   :  { %v2222_v26 = vmax.f32 %v921_v18, 0.0  ;;  %v2224_v27 = vmax.f32 %v998_v19, 0.0  ;;  %v1066_v28 = vpop.f32.mrb[20].mxu0  ;;  %v1143_v29 = vpop.f32.mrb[20].mxu1 }
 0x102   :  { %v15396_v30 = vpack.c.bf16 %v2221_v22, %v2171_v20  ;;  %v15400_v31 = vpack.c.bf16 %v2223_v23, %v2173_v21  ;;  %13938 = vmatmul.mubr.msk.f32.vlgmr.msra.gmra.mrb[60].mxu1 %vm2269_vm2, %v17585_v52  ;;  %v1068_v32 = vpop.f32.mrb[21].mxu0  ;;  %v1145_v33 = vpop.f32.mrb[21].mxu1  ;;  %v1067_v36 = vadd.f32 %v1066_v28, %v17564_v8  ;;  %v1144_v37 = vadd.f32 %v1143_v29, %v17564_v8 }
 0x103   :  { %v15394_v34 = vpack.c.bf16 %v2222_v26, %v2172_v24  ;;  %v15398_v35 = vpack.c.bf16 %v2224_v27, %v2174_v25  ;;  %13940 = vmatmul.mubr.msk.f32.vlgmr.msra.gmra.mrb[64].mxu0 %vm2269_vm2, %v17585_v52  ;;  %2808 = vmatprep.mubr.f32.mxu1 %v22042_v4  ;;  %v1069_v38 = vadd.f32 %v1068_v32, %v17564_v8 }
 0x104   :  { %2885 = vmatprep.mubr.f32.mxu0 %v22042_v4  ;;  %v1146_v39 = vadd.f32 %v1145_v33, %v17564_v8  ;;  %v2175_v48 = vmax.f32 %v1067_v36, 0.0  ;;  %v2177_v49 = vmax.f32 %v1144_v37, 0.0 }
 0x105   :  { %v1072_v40 = vpop.f32.mrb[22].mxu0  ;;  %v1149_v41 = vpop.f32.mrb[22].mxu1  ;;  %15395 = vmatprep.subr.bf16.mxu1 %v15394_v34  ;;  %15399 = vmatprep.subr.bf16.mxu0 %v15398_v35  ;;  %v2176_v53 = vmax.f32 %v1069_v38, 0.0 }
 0x106   :  { %v1073_v42 = vadd.f32 %v1072_v40, %v17566_v13  ;;  %v1150_v43 = vadd.f32 %v1149_v41, %v17566_v13  ;;  %13939 = vmatmul.mubr.msk.f32.gmra.mrb[62].mxu1 %vm2269_vm2, %v17598_v5  ;;  %v1074_v44 = vpop.f32.mrb[23].mxu0  ;;  %v1151_v45 = vpop.f32.mrb[23].mxu1  ;;  %15401 = vmatpush1.bf16.msra.mxu0 %v15400_v31  ;;  %v2178_v54 = vmax.f32 %v1146_v39, 0.0 }
 0x107   :  { %13941 = vmatmul.mubr.msk.f32.gmra.mrb[66].mxu0 %vm2269_vm2, %v17598_v5  ;;  %v1075_v46 = vadd.f32 %v1074_v44, %v17566_v13  ;;  %v1152_v47 = vadd.f32 %v1151_v45, %v17566_v13  ;;  %15397 = vmatpush1.bf16.msra.mxu1 %v15396_v30 }
 0x108   :  { %v2225_v50 = vmax.f32 %v1073_v42, 0.0  ;;  %v2227_v51 = vmax.f32 %v1150_v43, 0.0  ;;  %2956 = vmatprep.mubr.f32.mxu1 %v22042_v4  ;;  %3033 = vmatprep.mubr.f32.mxu0 %v22042_v4 }
 0x109   :  { %v2226_v55 = vmax.f32 %v1075_v46, 0.0  ;;  %v2228_v56 = vmax.f32 %v1152_v47, 0.0  ;;  %v1220_v57 = vpop.f32.mrb[24].mxu0  ;;  %v1297_v58 = vpop.f32.mrb[24].mxu1 }
 0x10a   :  { %v15404_v59 = vpack.c.bf16 %v2225_v50, %v2175_v48  ;;  %v15408_v60 = vpack.c.bf16 %v2227_v51, %v2177_v49  ;;  %13942 = vmatmul.mubr.msk.f32.vlgmr.msra.gmra.mrb[64].mxu1 %vm2269_vm2, %v17585_v52  ;;  %v1222_v61 = vpop.f32.mrb[25].mxu0  ;;  %v1299_v62 = vpop.f32.mrb[25].mxu1  ;;  %v1221_v1 = vadd.f32 %v1220_v57, %v17564_v8  ;;  %v1298_v2 = vadd.f32 %v1297_v58, %v17564_v8 }
 0x10b   :  { %v15402_v63 = vpack.c.bf16 %v2226_v55, %v2176_v53  ;;  %v15406_v0 = vpack.c.bf16 %v2228_v56, %v2178_v54  ;;  %13944 = vmatmul.mubr.msk.f32.vlgmr.msra.gmra.mrb[68].mxu0 %vm2269_vm2, %v17585_v52  ;;  %2962 = vmatprep.mubr.f32.mxu1 %v22042_v4  ;;  %v1223_v3 = vadd.f32 %v1222_v61, %v17564_v8 }
 0x10c   :  { %3039 = vmatprep.mubr.f32.mxu0 %v22042_v4  ;;  %v1300_v6 = vadd.f32 %v1299_v62, %v17564_v8  ;;  %v2179_v17 = vmax.f32 %v1221_v1, 0.0  ;;  %v2181_v18 = vmax.f32 %v1298_v2, 0.0 }
 0x10d   :  { %v1226_v7 = vpop.f32.mrb[26].mxu0  ;;  %v1303_v9 = vpop.f32.mrb[26].mxu1  ;;  %15403 = vmatprep.subr.bf16.mxu1 %v15402_v63  ;;  %15407 = vmatprep.subr.bf16.mxu0 %v15406_v0  ;;  %v2180_v21 = vmax.f32 %v1223_v3, 0.0 }
 0x10e   :  { %v1227_v10 = vadd.f32 %v1226_v7, %v17566_v13  ;;  %v1304_v11 = vadd.f32 %v1303_v9, %v17566_v13  ;;  %13943 = vmatmul.mubr.msk.f32.gmra.mrb[66].mxu1 %vm2269_vm2, %v17598_v5  ;;  %v1228_v12 = vpop.f32.mrb[27].mxu0  ;;  %v1305_v14 = vpop.f32.mrb[27].mxu1  ;;  %15409 = vmatpush1.bf16.msra.mxu0 %v15408_v60  ;;  %v2182_v22 = vmax.f32 %v1300_v6, 0.0 }
 0x10f   :  { %13945 = vmatmul.mubr.msk.f32.gmra.mrb[70].mxu0 %vm2269_vm2, %v17598_v5  ;;  %v1229_v15 = vadd.f32 %v1228_v12, %v17566_v13  ;;  %v1306_v16 = vadd.f32 %v1305_v14, %v17566_v13  ;;  %15405 = vmatpush1.bf16.msra.mxu1 %v15404_v59 }
 0x110   :  { %v2229_v19 = vmax.f32 %v1227_v10, 0.0  ;;  %v2231_v20 = vmax.f32 %v1304_v11, 0.0  ;;  %3110 = vmatprep.mubr.f32.mxu1 %v22042_v4  ;;  %3187 = vmatprep.mubr.f32.mxu0 %v22042_v4 }
 0x111   :  { %v2230_v23 = vmax.f32 %v1229_v15, 0.0  ;;  %v2232_v24 = vmax.f32 %v1306_v16, 0.0  ;;  %v1374_v25 = vpop.f32.mrb[28].mxu0  ;;  %v1451_v26 = vpop.f32.mrb[28].mxu1 }
 0x112   :  { %v15412_v27 = vpack.c.bf16 %v2229_v19, %v2179_v17  ;;  %v15416_v28 = vpack.c.bf16 %v2231_v20, %v2181_v18  ;;  %13946 = vmatmul.mubr.msk.f32.vlgmr.msra.gmra.mrb[68].mxu1 %vm2269_vm2, %v17585_v52  ;;  %v1376_v29 = vpop.f32.mrb[29].mxu0  ;;  %v1453_v30 = vpop.f32.mrb[29].mxu1  ;;  %v1375_v33 = vadd.f32 %v1374_v25, %v17564_v8  ;;  %v1452_v34 = vadd.f32 %v1451_v26, %v17564_v8 }
 0x113   :  { %v15410_v31 = vpack.c.bf16 %v2230_v23, %v2180_v21  ;;  %v15414_v32 = vpack.c.bf16 %v2232_v24, %v2182_v22  ;;  %13948 = vmatmul.mubr.msk.f32.vlgmr.msra.gmra.mrb[72].mxu0 %vm2269_vm2, %v17585_v52  ;;  %3116 = vmatprep.mubr.f32.mxu1 %v22042_v4  ;;  %v1377_v35 = vadd.f32 %v1376_v29, %v17564_v8 }
 0x114   :  { %3193 = vmatprep.mubr.f32.mxu0 %v22042_v4  ;;  %v1454_v36 = vadd.f32 %v1453_v30, %v17564_v8  ;;  %v2183_v45 = vmax.f32 %v1375_v33, 0.0  ;;  %v2185_v46 = vmax.f32 %v1452_v34, 0.0 }
 0x115   :  { %v1380_v37 = vpop.f32.mrb[30].mxu0  ;;  %v1457_v38 = vpop.f32.mrb[30].mxu1  ;;  %15411 = vmatprep.subr.bf16.mxu1 %v15410_v31  ;;  %15415 = vmatprep.subr.bf16.mxu0 %v15414_v32  ;;  %v2184_v49 = vmax.f32 %v1377_v35, 0.0 }
 0x116   :  { %v1381_v39 = vadd.f32 %v1380_v37, %v17566_v13  ;;  %v1458_v40 = vadd.f32 %v1457_v38, %v17566_v13  ;;  %13947 = vmatmul.mubr.msk.f32.gmra.mrb[70].mxu1 %vm2269_vm2, %v17598_v5  ;;  %v1382_v41 = vpop.f32.mrb[31].mxu0  ;;  %v1459_v42 = vpop.f32.mrb[31].mxu1  ;;  %15417 = vmatpush1.bf16.msra.mxu0 %v15416_v28  ;;  %v2186_v50 = vmax.f32 %v1454_v36, 0.0 }
 0x117   :  { %13949 = vmatmul.mubr.msk.f32.gmra.mrb[74].mxu0 %vm2269_vm2, %v17598_v5  ;;  %v1383_v43 = vadd.f32 %v1382_v41, %v17566_v13  ;;  %v1460_v44 = vadd.f32 %v1459_v42, %v17566_v13  ;;  %15413 = vmatpush1.bf16.msra.mxu1 %v15412_v27 }
 0x118   :  { %v2233_v47 = vmax.f32 %v1381_v39, 0.0  ;;  %v2235_v48 = vmax.f32 %v1458_v40, 0.0  ;;  %3264 = vmatprep.mubr.f32.mxu1 %v22042_v4  ;;  %3341 = vmatprep.mubr.f32.mxu0 %v22042_v4 }
 0x119   :  { %v2234_v51 = vmax.f32 %v1383_v43, 0.0  ;;  %v2236_v53 = vmax.f32 %v1460_v44, 0.0  ;;  %v1528_v54 = vpop.f32.mrb[32].mxu0  ;;  %v1605_v55 = vpop.f32.mrb[32].mxu1 }
 0x11a   :  { %v15420_v56 = vpack.c.bf16 %v2233_v47, %v2183_v45  ;;  %v15424_v57 = vpack.c.bf16 %v2235_v48, %v2185_v46  ;;  %13950 = vmatmul.mubr.msk.f32.vlgmr.msra.gmra.mrb[72].mxu1 %vm2269_vm2, %v17585_v52  ;;  %v1530_v58 = vpop.f32.mrb[33].mxu0  ;;  %v1607_v59 = vpop.f32.mrb[33].mxu1  ;;  %v1529_v62 = vadd.f32 %v1528_v54, %v17564_v8  ;;  %v1606_v63 = vadd.f32 %v1605_v55, %v17564_v8 }
 0x11b   :  { %v15418_v60 = vpack.c.bf16 %v2234_v51, %v2184_v49  ;;  %v15422_v61 = vpack.c.bf16 %v2236_v53, %v2186_v50  ;;  %13952 = vmatmul.mubr.msk.f32.vlgmr.msra.gmra.mrb[76].mxu0 %vm2269_vm2, %v17585_v52  ;;  %3270 = vmatprep.mubr.f32.mxu1 %v22042_v4  ;;  %v1531_v0 = vadd.f32 %v1530_v58, %v17564_v8 }
 0x11c   :  { %3347 = vmatprep.mubr.f32.mxu0 %v22042_v4  ;;  %v1608_v1 = vadd.f32 %v1607_v59, %v17564_v8  ;;  %v2187_v14 = vmax.f32 %v1529_v62, 0.0  ;;  %v2189_v15 = vmax.f32 %v1606_v63, 0.0 }
 0x11d   :  { %v1534_v2 = vpop.f32.mrb[34].mxu0  ;;  %v1611_v3 = vpop.f32.mrb[34].mxu1  ;;  %15419 = vmatprep.subr.bf16.mxu1 %v15418_v60  ;;  %15423 = vmatprep.subr.bf16.mxu0 %v15422_v61  ;;  %v2188_v18 = vmax.f32 %v1531_v0, 0.0 }
 0x11e   :  { %v1535_v6 = vadd.f32 %v1534_v2, %v17566_v13  ;;  %v1612_v7 = vadd.f32 %v1611_v3, %v17566_v13  ;;  %13951 = vmatmul.mubr.msk.f32.gmra.mrb[74].mxu1 %vm2269_vm2, %v17598_v5  ;;  %v1536_v9 = vpop.f32.mrb[35].mxu0  ;;  %v1613_v10 = vpop.f32.mrb[35].mxu1  ;;  %15425 = vmatpush1.bf16.msra.mxu0 %v15424_v57  ;;  %v2190_v19 = vmax.f32 %v1608_v1, 0.0 }
 0x11f   :  { %13953 = vmatmul.mubr.msk.f32.gmra.mrb[78].mxu0 %vm2269_vm2, %v17598_v5  ;;  %v1537_v11 = vadd.f32 %v1536_v9, %v17566_v13  ;;  %v1614_v12 = vadd.f32 %v1613_v10, %v17566_v13  ;;  %15421 = vmatpush1.bf16.msra.mxu1 %v15420_v56 }
 0x120   :  { %v2237_v16 = vmax.f32 %v1535_v6, 0.0  ;;  %v2239_v17 = vmax.f32 %v1612_v7, 0.0  ;;  %3418 = vmatprep.mubr.f32.mxu1 %v22042_v4  ;;  %3495 = vmatprep.mubr.f32.mxu0 %v22042_v4 }
 0x121   :  { %v2238_v20 = vmax.f32 %v1537_v11, 0.0  ;;  %v2240_v21 = vmax.f32 %v1614_v12, 0.0  ;;  %v1682_v22 = vpop.f32.mrb[36].mxu0  ;;  %v1759_v23 = vpop.f32.mrb[36].mxu1 }
 0x122   :  { %v15428_v24 = vpack.c.bf16 %v2237_v16, %v2187_v14  ;;  %v15432_v25 = vpack.c.bf16 %v2239_v17, %v2189_v15  ;;  %13954 = vmatmul.mubr.msk.f32.vlgmr.msra.gmra.mrb[76].mxu1 %vm2269_vm2, %v17585_v52  ;;  %v1684_v26 = vpop.f32.mrb[37].mxu0  ;;  %v1761_v27 = vpop.f32.mrb[37].mxu1  ;;  %v1683_v30 = vadd.f32 %v1682_v22, %v17564_v8  ;;  %v1760_v31 = vadd.f32 %v1759_v23, %v17564_v8 }
 0x123   :  { %v15426_v28 = vpack.c.bf16 %v2238_v20, %v2188_v18  ;;  %v15430_v29 = vpack.c.bf16 %v2240_v21, %v2190_v19  ;;  %13956 = vmatmul.mubr.msk.f32.vlgmr.msra.gmra.mrb[80].mxu0 %vm2269_vm2, %v17585_v52  ;;  %3424 = vmatprep.mubr.f32.mxu1 %v22042_v4  ;;  %v1685_v32 = vadd.f32 %v1684_v26, %v17564_v8 }
 0x124   :  { %3501 = vmatprep.mubr.f32.mxu0 %v22042_v4  ;;  %v1762_v33 = vadd.f32 %v1761_v27, %v17564_v8  ;;  %v2191_v42 = vmax.f32 %v1683_v30, 0.0  ;;  %v2193_v43 = vmax.f32 %v1760_v31, 0.0 }
 0x125   :  { %v1688_v34 = vpop.f32.mrb[38].mxu0  ;;  %v1765_v35 = vpop.f32.mrb[38].mxu1  ;;  %15427 = vmatprep.subr.bf16.mxu1 %v15426_v28  ;;  %15431 = vmatprep.subr.bf16.mxu0 %v15430_v29  ;;  %v2192_v46 = vmax.f32 %v1685_v32, 0.0 }
 0x126   :  { %v1689_v36 = vadd.f32 %v1688_v34, %v17566_v13  ;;  %v1766_v37 = vadd.f32 %v1765_v35, %v17566_v13  ;;  %13955 = vmatmul.mubr.msk.f32.gmra.mrb[78].mxu1 %vm2269_vm2, %v17598_v5  ;;  %v1690_v38 = vpop.f32.mrb[39].mxu0  ;;  %v1767_v39 = vpop.f32.mrb[39].mxu1  ;;  %15433 = vmatpush1.bf16.msra.mxu0 %v15432_v25  ;;  %v2194_v47 = vmax.f32 %v1762_v33, 0.0 }
 0x127   :  { %13957 = vmatmul.mubr.msk.f32.gmra.mrb[82].mxu0 %vm2269_vm2, %v17598_v5  ;;  %v1691_v40 = vadd.f32 %v1690_v38, %v17566_v13  ;;  %v1768_v41 = vadd.f32 %v1767_v39, %v17566_v13  ;;  %15429 = vmatpush1.bf16.msra.mxu1 %v15428_v24 }
 0x128   :  { %v2241_v44 = vmax.f32 %v1689_v36, 0.0  ;;  %v2243_v45 = vmax.f32 %v1766_v37, 0.0  ;;  %3572 = vmatprep.mubr.f32.mxu1 %v22042_v4  ;;  %3649 = vmatprep.mubr.f32.mxu0 %v22042_v4 }
 0x129   :  { %v2242_v48 = vmax.f32 %v1691_v40, 0.0  ;;  %v2244_v49 = vmax.f32 %v1768_v41, 0.0  ;;  %v1836_v50 = vpop.f32.mrb[40].mxu0  ;;  %v1913_v51 = vpop.f32.mrb[40].mxu1 }
 0x12a   :  { %v15436_v53 = vpack.c.bf16 %v2241_v44, %v2191_v42  ;;  %v15440_v54 = vpack.c.bf16 %v2243_v45, %v2193_v43  ;;  %13958 = vmatmul.mubr.msk.f32.vlgmr.msra.gmra.mrb[80].mxu1 %vm2269_vm2, %v17585_v52  ;;  %v1838_v55 = vpop.f32.mrb[41].mxu0  ;;  %v1915_v56 = vpop.f32.mrb[41].mxu1  ;;  %v1837_v59 = vadd.f32 %v1836_v50, %v17564_v8  ;;  %v1914_v60 = vadd.f32 %v1913_v51, %v17564_v8 }
 0x12b   :  { %v15434_v57 = vpack.c.bf16 %v2242_v48, %v2192_v46  ;;  %v15438_v58 = vpack.c.bf16 %v2244_v49, %v2194_v47  ;;  %13960 = vmatmul.mubr.msk.f32.vlgmr.msra.gmra.mrb[84].mxu0 %vm2269_vm2, %v17585_v52  ;;  %3578 = vmatprep.mubr.f32.mxu1 %v22042_v4  ;;  %v1839_v61 = vadd.f32 %v1838_v55, %v17564_v8 }
 0x12c   :  { %3655 = vmatprep.mubr.f32.mxu0 %v22042_v4  ;;  %v1916_v62 = vadd.f32 %v1915_v56, %v17564_v8  ;;  %v2195_v10 = vmax.f32 %v1837_v59, 0.0  ;;  %v2197_v11 = vmax.f32 %v1914_v60, 0.0 }
 0x12d   :  { %v1842_v63 = vpop.f32.mrb[42].mxu0  ;;  %v1919_v0 = vpop.f32.mrb[42].mxu1  ;;  %15435 = vmatprep.subr.bf16.mxu1 %v15434_v57  ;;  %15439 = vmatprep.subr.bf16.mxu0 %v15438_v58  ;;  %v2196_v15 = vmax.f32 %v1839_v61, 0.0 }
 0x12e   :  { %v1843_v1 = vadd.f32 %v1842_v63, %v17566_v13  ;;  %v1920_v2 = vadd.f32 %v1919_v0, %v17566_v13  ;;  %13959 = vmatmul.mubr.msk.f32.gmra.mrb[82].mxu1 %vm2269_vm2, %v17598_v5  ;;  %v1844_v3 = vpop.f32.mrb[43].mxu0  ;;  %v1921_v6 = vpop.f32.mrb[43].mxu1  ;;  %15441 = vmatpush1.bf16.msra.mxu0 %v15440_v54  ;;  %v2198_v16 = vmax.f32 %v1916_v62, 0.0 }
 0x12f   :  { %13961 = vmatmul.mubr.msk.f32.gmra.mrb[86].mxu0 %vm2269_vm2, %v17598_v5  ;;  %v1845_v7 = vadd.f32 %v1844_v3, %v17566_v13  ;;  %v1922_v9 = vadd.f32 %v1921_v6, %v17566_v13  ;;  %15437 = vmatpush1.bf16.msra.mxu1 %v15436_v53 }
 0x130   :  { %v2245_v12 = vmax.f32 %v1843_v1, 0.0  ;;  %v2247_v14 = vmax.f32 %v1920_v2, 0.0  ;;  %3726 = vmatprep.mubr.f32.mxu1 %v22042_v4  ;;  %3803 = vmatprep.mubr.f32.mxu0 %v22042_v4  ;;  %v17828_v2 = vpop.permute.xlu1 %2261 }
 0x131   :  { %v2246_v17 = vmax.f32 %v1845_v7, 0.0  ;;  %v2248_v18 = vmax.f32 %v1922_v9, 0.0  ;;  %v1990_v19 = vpop.f32.mrb[44].mxu0  ;;  %v2067_v20 = vpop.f32.mrb[44].mxu1  ;;  %22120 = vst [vmem:[#allocation7_spill] sm:$0xff] %v17828_v2 }
 0x132   :  { %v15444_v21 = vpack.c.bf16 %v2245_v12, %v2195_v10  ;;  %v15448_v22 = vpack.c.bf16 %v2247_v14, %v2197_v11  ;;  %13962 = vmatmul.mubr.msk.f32.vlgmr.msra.gmra.mrb[84].mxu1 %vm2269_vm2, %v17585_v52  ;;  %v1992_v23 = vpop.f32.mrb[45].mxu0  ;;  %v2069_v24 = vpop.f32.mrb[45].mxu1  ;;  %v1991_v27 = vadd.f32 %v1990_v19, %v17564_v8  ;;  %v2068_v28 = vadd.f32 %v2067_v20, %v17564_v8 }
 0x133   :  { %v15442_v25 = vpack.c.bf16 %v2246_v17, %v2196_v15  ;;  %v15446_v26 = vpack.c.bf16 %v2248_v18, %v2198_v16  ;;  %13964 = vmatmul.mubr.msk.f32.vlgmr.msra.gmra.mrb[88].mxu0 %vm2269_vm2, %v17585_v52  ;;  %3732 = vmatprep.mubr.f32.mxu1 %v22042_v4  ;;  %v1993_v29 = vadd.f32 %v1992_v23, %v17564_v8 }
 0x134   :  { %3809 = vmatprep.mubr.f32.mxu0 %v22042_v4  ;;  %v2070_v30 = vadd.f32 %v2069_v24, %v17564_v8  ;;  %v2199_v39 = vmax.f32 %v1991_v27, 0.0  ;;  %v2201_v40 = vmax.f32 %v2068_v28, 0.0  ;;  %v17830_v10 = vpop.permute.xlu1 %2266 }
 0x135   :  { %v1996_v31 = vpop.f32.mrb[46].mxu0  ;;  %v2073_v32 = vpop.f32.mrb[46].mxu1  ;;  %15443 = vmatprep.subr.bf16.mxu1 %v15442_v25  ;;  %15447 = vmatprep.subr.bf16.mxu0 %v15446_v26  ;;  %v2200_v43 = vmax.f32 %v1993_v29, 0.0  ;;  %22121 = vst [vmem:[#allocation8_spill] sm:$0xff] %v17830_v10 }
 0x136   :  { %v1997_v33 = vadd.f32 %v1996_v31, %v17566_v13  ;;  %v2074_v34 = vadd.f32 %v2073_v32, %v17566_v13  ;;  %13963 = vmatmul.mubr.msk.f32.gmra.mrb[86].mxu1 %vm2269_vm2, %v17598_v5  ;;  %v1998_v35 = vpop.f32.mrb[47].mxu0  ;;  %v2075_v36 = vpop.f32.mrb[47].mxu1  ;;  %15449 = vmatpush1.bf16.msra.mxu0 %v15448_v22  ;;  %v2202_v44 = vmax.f32 %v2070_v30, 0.0  ;;  %v17867_v30 = vld [vmem:[%s22039_s6 + $0x40] sm:$0xff] }
 0x137   :  { %13965 = vmatmul.mubr.msk.f32.gmra.mrb[90].mxu0 %vm2269_vm2, %v17598_v5  ;;  %v1999_v37 = vadd.f32 %v1998_v35, %v17566_v13  ;;  %v2076_v38 = vadd.f32 %v2075_v36, %v17566_v13  ;;  %15445 = vmatpush1.bf16.msra.mxu1 %v15444_v21 }
 0x138   :  { %v2249_v41 = vmax.f32 %v1997_v33, 0.0  ;;  %v2251_v42 = vmax.f32 %v2074_v34, 0.0  ;;  %3880 = vmatprep.mubr.f32.mxu1 %v22042_v4  ;;  %3957 = vmatprep.mubr.f32.mxu0 %v22042_v4 }
 0x139   :  { %v2250_v45 = vmax.f32 %v1999_v37, 0.0  ;;  %v2252_v46 = vmax.f32 %v2076_v38, 0.0  ;;  %v2144_v47 = vpop.f32.mrb[48].mxu0 }
 0x13a   :  { %v15452_v48 = vpack.c.bf16 %v2249_v41, %v2199_v39  ;;  %v15456_v49 = vpack.c.bf16 %v2251_v42, %v2201_v40  ;;  %13966 = vmatmul.mubr.msk.f32.vlgmr.msra.gmra.mrb[88].mxu1 %vm2269_vm2, %v17585_v52  ;;  %v2146_v50 = vpop.f32.mrb[49].mxu0  ;;  %v2145_v54 = vadd.f32 %v2144_v47, %v17564_v8  ;;  %v17890_v39 = vld [vmem:[%s22039_s6 + $0x48] sm:$0xff] }
 0x13b   :  { %v15450_v51 = vpack.c.bf16 %v2250_v45, %v2200_v43  ;;  %v15454_v53 = vpack.c.bf16 %v2252_v46, %v2202_v44  ;;  %13968 = vmatmul.mubr.msk.f32.vlgmr.msra.gmra.mrb[92].mxu0 %vm2269_vm2, %v17585_v52  ;;  %3886 = vmatprep.mubr.f32.mxu1 %v22042_v4  ;;  %v2147_v55 = vadd.f32 %v2146_v50, %v17564_v8 }
 0x13c   :  { %3963 = vmatprep.mubr.f32.mxu0 %v22042_v4  ;;  %v2203_v60 = vmax.f32 %v2145_v54, 0.0 }
 0x13d   :  { %v2150_v56 = vpop.f32.mrb[50].mxu0  ;;  %15451 = vmatprep.subr.bf16.mxu1 %v15450_v51  ;;  %15455 = vmatprep.subr.bf16.mxu0 %v15454_v53  ;;  %v2204_v62 = vmax.f32 %v2147_v55, 0.0 }
 0x13e   :  { %v2151_v57 = vadd.f32 %v2150_v56, %v17566_v13  ;;  %13967 = vmatmul.mubr.msk.f32.gmra.mrb[90].mxu1 %vm2269_vm2, %v17598_v5  ;;  %v2152_v58 = vpop.f32.mrb[51].mxu0  ;;  %15457 = vmatpush1.bf16.msra.mxu0 %v15456_v49 }
 0x13f   :  { %13969 = vmatmul.mubr.msk.f32.gmra.mrb[94].mxu0 %vm2269_vm2, %v17598_v5  ;;  %v2153_v59 = vadd.f32 %v2152_v58, %v17566_v13  ;;  %15453 = vmatpush1.bf16.msra.mxu1 %v15452_v48  ;;  %v22138_v13 = vmov 0.0  }
 0x140   :  { %v2253_v61 = vmax.f32 %v2151_v57, 0.0  ;;  %4034 = vmatprep.mubr.f32.mxu1 %v22042_v4  ;;  %4111 = vmatprep.mubr.f32.mxu0 %v22042_v4 }
 0x141   :  { %v2254_v63 = vmax.f32 %v2153_v59, 0.0 }
 0x142   :  { %v15460_v0 = vpack.c.bf16 %v2253_v61, %v2203_v60  ;;  %13970 = vmatmul.mubr.msk.f32.vlgmr.msra.gmra.mrb[92].mxu1 %vm2269_vm2, %v17585_v52 }
 0x143   :  { %v15458_v1 = vpack.c.bf16 %v2254_v63, %v2204_v62  ;;  %13972 = vmatmul.mubr.msk.f32.vlgmr.msra.gmra.mrb[96].mxu0 %vm2269_vm2, %v17585_v52  ;;  %4040 = vmatprep.mubr.f32.mxu1 %v22042_v4 }
 0x144   :  { %4117 = vmatprep.mubr.f32.mxu0 %v22042_v4 }
 0x145   :  { %15459 = vmatprep.subr.bf16.mxu1 %v15458_v1 }
 0x146   :  { %13971 = vmatmul.mubr.msk.f32.gmra.mrb[94].mxu1 %vm2269_vm2, %v17598_v5 }
 0x147   :  { %13973 = vmatmul.mubr.msk.f32.gmra.mrb[98].mxu0 %vm2269_vm2, %v17598_v5  ;;  %15461 = vmatpush1.bf16.msra.mxu1 %v15460_v0 }
 0x148   :  { %4188 = vmatprep.mubr.f32.mxu1 %v22042_v4  ;;  %4285 = vmatprep.mubr.f32.mxu0 %v22042_v4 }
 0x14a   :  { %13974 = vmatmul.mubr.msk.f32.vlgmr.msra.gmra.mrb[96].mxu1 %vm2269_vm2, %v17585_v52 }
 0x14b   :  { %4194 = vmatprep.mubr.f32.mxu1 %v22042_v4 }
 0x14e   :  { %13975 = vmatmul.mubr.msk.f32.gmra.mrb[98].mxu1 %vm2269_vm2, %v17598_v5 }
 0x14f   :  { %4362 = vmatprep.mubr.f32.mxu1 %v22042_v4 }
 0x1bc   :  { %v2342_v3 = vpop.f32.mrb[48].mxu1  ;;  %v2419_v6 = vpop.f32.mrb[52].mxu0 }
 0x1bd   :  { %v2344_v7 = vpop.f32.mrb[49].mxu1  ;;  %v2421_v9 = vpop.f32.mrb[53].mxu0  ;;  %v17851_v20 = vadd.f32 %v2342_v3, %v17828_v2  ;;  %v17854_v21 = vadd.f32 %v2419_v6, %v17828_v2 }
 0x1be   :  { %v17839_v16 = vadd.f32 %v2344_v7, %v17828_v2  ;;  %v17842_v17 = vadd.f32 %v2421_v9, %v17828_v2 }
 0x1c0   :  { %v2348_v11 = vpop.f32.mrb[50].mxu1  ;;  %v2425_v12 = vpop.f32.mrb[54].mxu0 }
 0x1c1   :  { %v17833_v14 = vadd.f32 %v2348_v11, %v17830_v10  ;;  %v17836_v52 = vadd.f32 %v2425_v12, %v17830_v10  ;;  %v2350_v15 = vpop.f32.mrb[51].mxu1  ;;  %v2427_v5 = vpop.f32.mrb[55].mxu0 }
 0x1c2   :  { %v17845_v18 = vadd.f32 %v2350_v15, %v17830_v10  ;;  %v17848_v19 = vadd.f32 %v2427_v5, %v17830_v10 }
 0x1c3   :  { %v15464_v24 = vpack.c.bf16 %v17833_v14, %v17851_v20  ;;  %v15468_v25 = vpack.c.bf16 %v17836_v52, %v17854_v21 }
 0x1c4   :  { %v15462_v22 = vpack.c.bf16 %v17845_v18, %v17839_v16  ;;  %v15466_v23 = vpack.c.bf16 %v17848_v19, %v17842_v17 }
 0x1c5   :  { %v2496_v26 = vpop.f32.mrb[52].mxu1  ;;  %v2573_v27 = vpop.f32.mrb[56].mxu0 }
 0x1c6   :  { %v2498_v28 = vpop.f32.mrb[53].mxu1  ;;  %15463 = vmatprep.subr.bf16.mxu0 %v15462_v22  ;;  %15467 = vmatprep.subr.bf16.mxu1 %v15466_v23  ;;  %v2575_v29 = vpop.f32.mrb[57].mxu0  ;;  %v17893_v40 = vadd.f32 %v2496_v26, %v17828_v2  ;;  %v17902_v43 = vadd.f32 %v2573_v27, %v17828_v2 }
 0x1c7   :  { %15465 = vmatpush1.bf16.msra.mxu0 %v15464_v24  ;;  %15469 = vmatpush1.bf16.msra.mxu1 %v15468_v25  ;;  %v17877_v35 = vadd.f32 %v2498_v28, %v17828_v2  ;;  %v17896_v41 = vadd.f32 %v2575_v29, %v17828_v2 }
 0x1c9   :  { %v2502_v31 = vpop.f32.mrb[54].mxu1  ;;  %v2579_v33 = vpop.f32.mrb[58].mxu0 }
 0x1ca   :  { %v17870_v32 = vadd.f32 %v2502_v31, %v17830_v10  ;;  %v2504_v34 = vpop.f32.mrb[55].mxu1  ;;  %13976 = vmatmul.mubr.msk.f32.vlgmr.msra.gmra.mrb[100].mxu0 %vm2269_vm2, %v17867_v30  ;;  %13978 = vmatmul.mubr.msk.f32.vlgmr.msra.gmra.mrb[100].mxu1 %vm2269_vm2, %v17867_v30  ;;  %v17880_v36 = vadd.f32 %v2579_v33, %v17830_v10  ;;  %v2581_v38 = vpop.f32.mrb[59].mxu0 }
 0x1cb   :  { %v17883_v37 = vadd.f32 %v2504_v34, %v17830_v10  ;;  %4291 = vmatprep.mubr.f32.mxu0 %v22042_v4  ;;  %4368 = vmatprep.mubr.f32.mxu1 %v22042_v4  ;;  %v17899_v42 = vadd.f32 %v2581_v38, %v17830_v10 }
 0x1cc   :  { %v15472_v46 = vpack.c.bf16 %v17870_v32, %v17893_v40  ;;  %v15476_v50 = vpack.c.bf16 %v17880_v36, %v17902_v43 }
 0x1cd   :  { %v15470_v44 = vpack.c.bf16 %v17883_v37, %v17877_v35  ;;  %v2650_v45 = vpop.f32.mrb[56].mxu1  ;;  %v15474_v47 = vpack.c.bf16 %v17899_v42, %v17896_v41  ;;  %v2727_v48 = vpop.f32.mrb[60].mxu0 }
 0x1ce   :  { %v2652_v49 = vpop.f32.mrb[57].mxu1  ;;  %13977 = vmatmul.mubr.msk.f32.gmra.mrb[102].mxu0 %vm2269_vm2, %v17890_v39  ;;  %13979 = vmatmul.mubr.msk.f32.gmra.mrb[102].mxu1 %vm2269_vm2, %v17890_v39  ;;  %v2729_v51 = vpop.f32.mrb[61].mxu0  ;;  %v17942_v63 = vadd.f32 %v2650_v45, %v17828_v2  ;;  %v17945_v0 = vadd.f32 %v2727_v48, %v17828_v2 }
 0x1cf   :  { %15471 = vmatprep.subr.bf16.mxu0 %v15470_v44  ;;  %4439 = vmatprep.mubr.f32.mxu0 %v22042_v4  ;;  %v17919_v56 = vadd.f32 %v2652_v49, %v17828_v2  ;;  %v17933_v61 = vadd.f32 %v2729_v51, %v17828_v2 }
 0x1d0   :  { %15475 = vmatprep.subr.bf16.mxu1 %v15474_v47  ;;  %15473 = vmatpush1.bf16.msra.mxu0 %v15472_v46 }
 0x1d1   :  { %15477 = vmatpush1.bf16.msra.mxu1 %v15476_v50  ;;  %v2656_v53 = vpop.f32.mrb[58].mxu1  ;;  %4516 = vmatprep.mubr.f32.mxu1 %v22042_v4 }
 0x1d2   :  { %v2733_v54 = vpop.f32.mrb[62].mxu0  ;;  %v2658_v55 = vpop.f32.mrb[59].mxu1  ;;  %v17922_v57 = vadd.f32 %v2656_v53, %v17830_v10 }
 0x1d3   :  { %v17925_v58 = vadd.f32 %v2733_v54, %v17830_v10  ;;  %v17928_v59 = vadd.f32 %v2658_v55, %v17830_v10  ;;  %v2735_v60 = vpop.f32.mrb[63].mxu0  ;;  %13980 = vmatmul.mubr.msk.f32.vlgmr.msra.gmra.mrb[104].mxu0 %vm2269_vm2, %v17867_v30 }
 0x1d4   :  { %v17936_v62 = vadd.f32 %v2735_v60, %v17830_v10  ;;  %13982 = vmatmul.mubr.msk.f32.vlgmr.msra.gmra.mrb[104].mxu1 %vm2269_vm2, %v17867_v30  ;;  %4445 = vmatprep.mubr.f32.mxu0 %v22042_v4  ;;  %v15480_v11 = vpack.c.bf16 %v17922_v57, %v17942_v63 }
 0x1d5   :  { %v15478_v1 = vpack.c.bf16 %v17928_v59, %v17919_v56  ;;  %v2804_v3 = vpop.f32.mrb[60].mxu1  ;;  %4522 = vmatprep.mubr.f32.mxu1 %v22042_v4  ;;  %v15484_v12 = vpack.c.bf16 %v17925_v58, %v17945_v0 }
 0x1d6   :  { %v15482_v6 = vpack.c.bf16 %v17936_v62, %v17933_v61  ;;  %v2881_v7 = vpop.f32.mrb[64].mxu0  ;;  %v2806_v9 = vpop.f32.mrb[61].mxu1  ;;  %v17985_v33 = vadd.f32 %v2804_v3, %v17828_v2 }
 0x1d7   :  { %v2883_v15 = vpop.f32.mrb[65].mxu0  ;;  %13981 = vmatmul.mubr.msk.f32.gmra.mrb[106].mxu0 %vm2269_vm2, %v17890_v39  ;;  %15479 = vmatprep.subr.bf16.mxu0 %v15478_v1  ;;  %v17963_v24 = vadd.f32 %v2806_v9, %v17828_v2  ;;  %v17992_v44 = vadd.f32 %v2881_v7, %v17828_v2 }
 0x1d8   :  { %13983 = vmatmul.mubr.msk.f32.gmra.mrb[106].mxu1 %vm2269_vm2, %v17890_v39  ;;  %15483 = vmatprep.subr.bf16.mxu1 %v15482_v6  ;;  %v17972_v28 = vadd.f32 %v2883_v15, %v17828_v2 }
 0x1d9   :  { %15481 = vmatpush1.bf16.msra.mxu0 %v15480_v11  ;;  %15485 = vmatpush1.bf16.msra.mxu1 %v15484_v12  ;;  %v2810_v5 = vpop.f32.mrb[62].mxu1 }
 0x1da   :  { %v2887_v22 = vpop.f32.mrb[66].mxu0  ;;  %v2812_v23 = vpop.f32.mrb[63].mxu1  ;;  %4593 = vmatprep.mubr.f32.mxu0 %v22042_v4  ;;  %4670 = vmatprep.mubr.f32.mxu1 %v22042_v4  ;;  %v17966_v25 = vadd.f32 %v2810_v5, %v17830_v10 }
 0x1db   :  { %v17969_v26 = vadd.f32 %v2812_v23, %v17830_v10  ;;  %v2889_v27 = vpop.f32.mrb[67].mxu0  ;;  %v17975_v29 = vadd.f32 %v2887_v22, %v17830_v10 }
 0x1dc   :  { %v17978_v31 = vadd.f32 %v2889_v27, %v17830_v10  ;;  %13984 = vmatmul.mubr.msk.f32.vlgmr.msra.gmra.mrb[108].mxu0 %vm2269_vm2, %v17867_v30  ;;  %13986 = vmatmul.mubr.msk.f32.vlgmr.msra.gmra.mrb[108].mxu1 %vm2269_vm2, %v17867_v30  ;;  %v15488_v48 = vpack.c.bf16 %v17966_v25, %v17985_v33 }
 0x1dd   :  { %22122 = vst [vmem:[#allocation9_spill] sm:$0xff] %v17975_v29  ;;  %v15486_v34 = vpack.c.bf16 %v17969_v26, %v17963_v24  ;;  %v2958_v38 = vpop.f32.mrb[64].mxu1  ;;  %4599 = vmatprep.mubr.f32.mxu0 %v22042_v4  ;;  %4676 = vmatprep.mubr.f32.mxu1 %v22042_v4  ;;  %v15492_v50 = vpack.c.bf16 %v17975_v29, %v17992_v44  ;;  %v8699_v29 = vld [vmem:[%s22036_s3 + $0x220] sm:$0xff] }
 0x1de   :  { %v15490_v45 = vpack.c.bf16 %v17978_v31, %v17972_v28  ;;  %v3035_v46 = vpop.f32.mrb[68].mxu0  ;;  %v2960_v47 = vpop.f32.mrb[65].mxu1  ;;  %v18027_v11 = vadd.f32 %v2958_v38, %v17828_v2 }
 0x1df   :  { %v3037_v49 = vpop.f32.mrb[69].mxu0  ;;  %15487 = vmatprep.subr.bf16.mxu0 %v15486_v34  ;;  %v18006_v55 = vadd.f32 %v2960_v47, %v17828_v2  ;;  %v18035_v5 = vadd.f32 %v3035_v46, %v17828_v2 }
 0x1e0   :  { %13985 = vmatmul.mubr.msk.f32.gmra.mrb[110].mxu0 %vm2269_vm2, %v17890_v39  ;;  %13987 = vmatmul.mubr.msk.f32.gmra.mrb[110].mxu1 %vm2269_vm2, %v17890_v39  ;;  %v18016_v6 = vadd.f32 %v3037_v49, %v17828_v2  ;;  %22128 = vst [vmem:[#allocation15_spill] sm:$0xff] %v18027_v11 }
 0x1e1   :  { %15491 = vmatprep.subr.bf16.mxu1 %v15490_v45  ;;  %15489 = vmatpush1.bf16.msra.mxu0 %v15488_v48  ;;  %v2964_v51 = vpop.f32.mrb[66].mxu1  ;;  %22129 = vst [vmem:[#allocation16_spill] sm:$0xff] %v18035_v5 }
 0x1e2   :  { %15493 = vmatpush1.bf16.msra.mxu1 %v15492_v50  ;;  %v3041_v53 = vpop.f32.mrb[70].mxu0  ;;  %v2966_v54 = vpop.f32.mrb[67].mxu1  ;;  %4747 = vmatprep.mubr.f32.mxu0 %v22042_v4  ;;  %v18009_v60 = vadd.f32 %v2964_v51, %v17830_v10  ;;  %22125 = vst [vmem:[#allocation12_spill] sm:$0xff] %v18016_v6 }
 0x1e3   :  { %v18012_v1 = vadd.f32 %v2966_v54, %v17830_v10  ;;  %v3043_v3 = vpop.f32.mrb[71].mxu0  ;;  %4824 = vmatprep.mubr.f32.mxu1 %v22042_v4  ;;  %v18019_v7 = vadd.f32 %v3041_v53, %v17830_v10 }
 0x1e4   :  { %22123 = vst [vmem:[#allocation10_spill] sm:$0xff] %v18009_v60  ;;  %v18022_v9 = vadd.f32 %v3043_v3, %v17830_v10  ;;  %13988 = vmatmul.mubr.msk.f32.vlgmr.msra.gmra.mrb[112].mxu0 %vm2269_vm2, %v17867_v30  ;;  %v15496_v34 = vpack.c.bf16 %v18009_v60, %v18027_v11  ;;  %v8745_v11 = vld [vmem:[%s22036_s3 + $0x390] sm:$0xff] }
 0x1e5   :  { %22124 = vst [vmem:[#allocation11_spill] sm:$0xff] %v18012_v1  ;;  %22126 = vst [vmem:[#allocation13_spill] sm:$0xff] %v18019_v7  ;;  %v15494_v12 = vpack.c.bf16 %v18012_v1, %v18006_v55  ;;  %13990 = vmatmul.mubr.msk.f32.vlgmr.msra.gmra.mrb[112].mxu1 %vm2269_vm2, %v17867_v30  ;;  %v3112_v15 = vpop.f32.mrb[68].mxu1  ;;  %4753 = vmatprep.mubr.f32.mxu0 %v22042_v4  ;;  %v15500_v45 = vpack.c.bf16 %v18019_v7, %v18035_v5  ;;  %v8697_v5 = vld [vmem:[%s22036_s3 + $0x210] sm:$0xff] }
 0x1e6   :  { %22127 = vst [vmem:[#allocation14_spill] sm:$0xff] %v18022_v9  ;;  %v15498_v22 = vpack.c.bf16 %v18022_v9, %v18016_v6  ;;  %v3189_v23 = vpop.f32.mrb[72].mxu0  ;;  %v3114_v27 = vpop.f32.mrb[69].mxu1  ;;  %4830 = vmatprep.mubr.f32.mxu1 %v22042_v4  ;;  %v8746_v6 = vld [vmem:[%s22036_s3 + $0x398] sm:$0xff] }
 0x1e7   :  { %v3191_v38 = vpop.f32.mrb[73].mxu0  ;;  %15495 = vmatprep.subr.bf16.mxu0 %v15494_v12  ;;  %v18050_v49 = vadd.f32 %v3114_v27, %v17828_v2 }
 0x1e8   :  { %13989 = vmatmul.mubr.msk.f32.gmra.mrb[114].mxu0 %vm2269_vm2, %v17890_v39  ;;  %15499 = vmatprep.subr.bf16.mxu1 %v15498_v22  ;;  %v18060_v54 = vadd.f32 %v3191_v38, %v17828_v2  ;;  %v18071_v22 = vadd.f32 %v3112_v15, %v17828_v2  ;;  %v18079_v38 = vadd.f32 %v3189_v23, %v17828_v2 }
 0x1e9   :  { %13991 = vmatmul.mubr.msk.f32.gmra.mrb[114].mxu1 %vm2269_vm2, %v17890_v39  ;;  %15497 = vmatpush1.bf16.msra.mxu0 %v15496_v34  ;;  %v3118_v46 = vpop.f32.mrb[70].mxu1  ;;  %22130 = vst [vmem:[#allocation17_spill] sm:$0xff] %v18050_v49 }
 0x1ea   :  { %15501 = vmatpush1.bf16.msra.mxu1 %v15500_v45  ;;  %v3195_v47 = vpop.f32.mrb[74].mxu0  ;;  %v3120_v48 = vpop.f32.mrb[71].mxu1  ;;  %4901 = vmatprep.mubr.f32.mxu0 %v22042_v4  ;;  %v18053_v50 = vadd.f32 %v3118_v46, %v17830_v10  ;;  %22133 = vst [vmem:[#allocation20_spill] sm:$0xff] %v18060_v54  ;;  %22136 = vst [vmem:[#allocation23_spill] sm:$0xff] %v18071_v22 }
 0x1eb   :  { %v18056_v51 = vadd.f32 %v3120_v48, %v17830_v10  ;;  %v3197_v53 = vpop.f32.mrb[75].mxu0  ;;  %4978 = vmatprep.mubr.f32.mxu1 %v22042_v4  ;;  %v18063_v3 = vadd.f32 %v3195_v47, %v17830_v10  ;;  %22137 = vst [vmem:[#allocation24_spill] sm:$0xff] %v18079_v38 }
 0x1ec   :  { %22131 = vst [vmem:[#allocation18_spill] sm:$0xff] %v18053_v50  ;;  %v18066_v12 = vadd.f32 %v3197_v53, %v17830_v10  ;;  %13992 = vmatmul.mubr.msk.f32.vlgmr.msra.gmra.mrb[116].mxu0 %vm2269_vm2, %v17867_v30  ;;  %v15504_v15 = vpack.c.bf16 %v18053_v50, %v18071_v22 }
 0x1ed   :  { %22132 = vst [vmem:[#allocation19_spill] sm:$0xff] %v18056_v51  ;;  %22134 = vst [vmem:[#allocation21_spill] sm:$0xff] %v18063_v3  ;;  %v15502_v27 = vpack.c.bf16 %v18056_v51, %v18050_v49  ;;  %13994 = vmatmul.mubr.msk.f32.vlgmr.msra.gmra.mrb[116].mxu1 %vm2269_vm2, %v17867_v30  ;;  %v3266_v34 = vpop.f32.mrb[72].mxu1  ;;  %4907 = vmatprep.mubr.f32.mxu0 %v22042_v4  ;;  %v15508_v53 = vpack.c.bf16 %v18063_v3, %v18079_v38  ;;  %v8698_v49 = vld [vmem:[%s22036_s3 + $0x218] sm:$0xff] }
 0x1ee   :  { %22135 = vst [vmem:[#allocation22_spill] sm:$0xff] %v18066_v12  ;;  %v15506_v45 = vpack.c.bf16 %v18066_v12, %v18060_v54  ;;  %v3343_v46 = vpop.f32.mrb[76].mxu0  ;;  %v3268_v47 = vpop.f32.mrb[73].mxu1  ;;  %4984 = vmatprep.mubr.f32.mxu1 %v22042_v4  ;;  %v15732_v1 = vpack.c.bf16 %v8698_v49, %v8697_v5 }
 0x1ef   :  { %v3345_v48 = vpop.f32.mrb[77].mxu0  ;;  %15503 = vmatprep.subr.bf16.mxu0 %v15502_v27  ;;  %v18094_v12 = vadd.f32 %v3268_v47, %v17828_v2  ;;  %v18115_v47 = vadd.f32 %v3266_v34, %v17828_v2 }
 0x1f0   :  { %13993 = vmatmul.mubr.msk.f32.gmra.mrb[118].mxu0 %vm2269_vm2, %v17890_v39  ;;  %15507 = vmatprep.subr.bf16.mxu1 %v15506_v45 }
 0x1f1   :  { %13995 = vmatmul.mubr.msk.f32.gmra.mrb[118].mxu1 %vm2269_vm2, %v17890_v39  ;;  %15505 = vmatpush1.bf16.msra.mxu0 %v15504_v15  ;;  %v3272_v23 = vpop.f32.mrb[74].mxu1  ;;  %22139 = vst [vmem:[#allocation25_spill] sm:$0xff] %v18094_v12  ;;  %v18104_v15 = vadd.f32 %v3345_v48, %v17828_v2  ;;  %22145 = vst [vmem:[#allocation31_spill] sm:$0xff] %v18115_v47 }
 0x1f2   :  { %15509 = vmatpush1.bf16.msra.mxu1 %v15508_v53  ;;  %v3349_v8 = vpop.f32.mrb[78].mxu0  ;;  %v3274_v4 = vpop.f32.mrb[75].mxu1  ;;  %5055 = vmatprep.mubr.f32.mxu0 %v22138_v13  ;;  %v18097_v27 = vadd.f32 %v3272_v23, %v17830_v10 }
 0x1f3   :  { %v18100_v3 = vadd.f32 %v3274_v4, %v17830_v10  ;;  %v3351_v45 = vpop.f32.mrb[79].mxu0  ;;  %5132 = vmatprep.mubr.f32.mxu1 %v22138_v13  ;;  %22142 = vst [vmem:[#allocation28_spill] sm:$0xff] %v18104_v15  ;;  %v18107_v53 = vadd.f32 %v3349_v8, %v17830_v10  ;;  %v18123_v8 = vadd.f32 %v3343_v46, %v17828_v2 }
 0x1f4   :  { %22140 = vst [vmem:[#allocation26_spill] sm:$0xff] %v18097_v27  ;;  %v18110_v38 = vadd.f32 %v3351_v45, %v17830_v10  ;;  %13996 = vmatmul.mubr.msk.f32.vlgmr.msra.gmra.mrb[120].mxu0 %vm2269_vm2, %v17867_v30  ;;  %v15512_v34 = vpack.c.bf16 %v18097_v27, %v18115_v47 }
 0x1f5   :  { %22141 = vst [vmem:[#allocation27_spill] sm:$0xff] %v18100_v3  ;;  %22143 = vst [vmem:[#allocation29_spill] sm:$0xff] %v18107_v53  ;;  %v15510_v4 = vpack.c.bf16 %v18100_v3, %v18094_v12  ;;  %13998 = vmatmul.mubr.msk.f32.vlgmr.msra.gmra.mrb[120].mxu1 %vm2269_vm2, %v17867_v30  ;;  %v3420_v48 = vpop.f32.mrb[76].mxu1  ;;  %5061 = vmatprep.mubr.f32.mxu0 %v22138_v13  ;;  %v15516_v12 = vpack.c.bf16 %v18107_v53, %v18123_v8 }
 0x1f6   :  { %22144 = vst [vmem:[#allocation30_spill] sm:$0xff] %v18110_v38  ;;  %22146 = vst [vmem:[#allocation32_spill] sm:$0xff] %v18123_v8  ;;  %v15514_v23 = vpack.c.bf16 %v18110_v38, %v18104_v15  ;;  %v3497_v45 = vpop.f32.mrb[80].mxu0  ;;  %v3422_v50 = vpop.f32.mrb[77].mxu1  ;;  %5138 = vmatprep.mubr.f32.mxu1 %v22138_v13 }
 0x1f7   :  { %v3499_v3 = vpop.f32.mrb[81].mxu0  ;;  %15511 = vmatprep.subr.bf16.mxu0 %v15510_v4  ;;  %v18138_v27 = vadd.f32 %v3422_v50, %v17828_v2  ;;  %v18159_v50 = vadd.f32 %v3420_v48, %v17828_v2 }
 0x1f8   :  { %13997 = vmatmul.mubr.msk.f32.gmra.mrb[122].mxu0 %vm2269_vm2, %v17890_v39  ;;  %15515 = vmatprep.subr.bf16.mxu1 %v15514_v23 }
 0x1f9   :  { %13999 = vmatmul.mubr.msk.f32.gmra.mrb[122].mxu1 %vm2269_vm2, %v17890_v39  ;;  %15513 = vmatpush1.bf16.msra.mxu0 %v15512_v34  ;;  %v3426_v46 = vpop.f32.mrb[78].mxu1  ;;  %22147 = vst [vmem:[#allocation33_spill] sm:$0xff] %v18138_v27  ;;  %v18148_v34 = vadd.f32 %v3499_v3, %v17828_v2  ;;  %22153 = vst [vmem:[#allocation39_spill] sm:$0xff] %v18159_v50 }
 0x1fa   :  { %15517 = vmatpush1.bf16.msra.mxu1 %v15516_v12  ;;  %v3503_v38 = vpop.f32.mrb[82].mxu0  ;;  %v3428_v15 = vpop.f32.mrb[79].mxu1  ;;  %5209 = vmatprep.mubr.f32.mxu0 %v22138_v13  ;;  %v18141_v4 = vadd.f32 %v3426_v46, %v17830_v10 }
 0x1fb   :  { %v18144_v53 = vadd.f32 %v3428_v15, %v17830_v10  ;;  %v3505_v23 = vpop.f32.mrb[83].mxu0  ;;  %5286 = vmatprep.mubr.f32.mxu1 %v22138_v13  ;;  %22150 = vst [vmem:[#allocation36_spill] sm:$0xff] %v18148_v34  ;;  %v18151_v12 = vadd.f32 %v3503_v38, %v17830_v10  ;;  %v18167_v38 = vadd.f32 %v3497_v45, %v17828_v2 }
 0x1fc   :  { %22148 = vst [vmem:[#allocation34_spill] sm:$0xff] %v18141_v4  ;;  %v18154_v8 = vadd.f32 %v3505_v23, %v17830_v10  ;;  %14000 = vmatmul.mubr.msk.f32.vlgmr.msra.gmra.mrb[124].mxu0 %vm2269_vm2, %v17867_v30  ;;  %v15520_v48 = vpack.c.bf16 %v18141_v4, %v18159_v50 }
 0x1fd   :  { %22149 = vst [vmem:[#allocation35_spill] sm:$0xff] %v18144_v53  ;;  %22151 = vst [vmem:[#allocation37_spill] sm:$0xff] %v18151_v12  ;;  %v15518_v15 = vpack.c.bf16 %v18144_v53, %v18138_v27  ;;  %14002 = vmatmul.mubr.msk.f32.vlgmr.msra.gmra.mrb[124].mxu1 %vm2269_vm2, %v17867_v30  ;;  %v3574_v3 = vpop.f32.mrb[80].mxu1  ;;  %5215 = vmatprep.mubr.f32.mxu0 %v22138_v13  ;;  %v15524_v27 = vpack.c.bf16 %v18151_v12, %v18167_v38 }
 0x1fe   :  { %22152 = vst [vmem:[#allocation38_spill] sm:$0xff] %v18154_v8  ;;  %22154 = vst [vmem:[#allocation40_spill] sm:$0xff] %v18167_v38  ;;  %v15522_v46 = vpack.c.bf16 %v18154_v8, %v18148_v34  ;;  %v3651_v23 = vpop.f32.mrb[84].mxu0  ;;  %v3576_v47 = vpop.f32.mrb[81].mxu1  ;;  %5292 = vmatprep.mubr.f32.mxu1 %v22138_v13 }
 0x1ff   :  { %v3653_v53 = vpop.f32.mrb[85].mxu0  ;;  %15519 = vmatprep.subr.bf16.mxu0 %v15518_v15  ;;  %v18182_v4 = vadd.f32 %v3576_v47, %v17828_v2  ;;  %v18203_v47 = vadd.f32 %v3574_v3, %v17828_v2 }
 0x200   :  { %14001 = vmatmul.mubr.msk.f32.gmra.mrb[126].mxu0 %vm2269_vm2, %v17890_v39  ;;  %15523 = vmatprep.subr.bf16.mxu1 %v15522_v46 }
 0x201   :  { %14003 = vmatmul.mubr.msk.f32.gmra.mrb[126].mxu1 %vm2269_vm2, %v17890_v39  ;;  %15521 = vmatpush1.bf16.msra.mxu0 %v15520_v48  ;;  %v3580_v45 = vpop.f32.mrb[82].mxu1  ;;  %22155 = vst [vmem:[#allocation41_spill] sm:$0xff] %v18182_v4  ;;  %v18192_v48 = vadd.f32 %v3653_v53, %v17828_v2  ;;  %22161 = vst [vmem:[#allocation47_spill] sm:$0xff] %v18203_v47 }
 0x202   :  { %15525 = vmatpush1.bf16.msra.mxu1 %v15524_v27  ;;  %v3657_v8 = vpop.f32.mrb[86].mxu0  ;;  %v3582_v34 = vpop.f32.mrb[83].mxu1  ;;  %5363 = vmatprep.mubr.f32.mxu0 %v22138_v13  ;;  %v18185_v15 = vadd.f32 %v3580_v45, %v17830_v10 }
 0x203   :  { %v18188_v12 = vadd.f32 %v3582_v34, %v17830_v10  ;;  %v3659_v46 = vpop.f32.mrb[87].mxu0  ;;  %5440 = vmatprep.mubr.f32.mxu1 %v22138_v13  ;;  %22158 = vst [vmem:[#allocation44_spill] sm:$0xff] %v18192_v48  ;;  %v18195_v27 = vadd.f32 %v3657_v8, %v17830_v10  ;;  %v18211_v8 = vadd.f32 %v3651_v23, %v17828_v2 }
 0x204   :  { %22156 = vst [vmem:[#allocation42_spill] sm:$0xff] %v18185_v15  ;;  %v18198_v38 = vadd.f32 %v3659_v46, %v17830_v10  ;;  %14004 = vmatmul.mubr.msk.f32.vlgmr.msra.gmra.mrb[128].mxu0 %vm2269_vm2, %v17867_v30  ;;  %v15528_v3 = vpack.c.bf16 %v18185_v15, %v18203_v47 }
 0x205   :  { %22157 = vst [vmem:[#allocation43_spill] sm:$0xff] %v18188_v12  ;;  %22159 = vst [vmem:[#allocation45_spill] sm:$0xff] %v18195_v27  ;;  %v15526_v34 = vpack.c.bf16 %v18188_v12, %v18182_v4  ;;  %14006 = vmatmul.mubr.msk.f32.vlgmr.msra.gmra.mrb[128].mxu1 %vm2269_vm2, %v17867_v30  ;;  %v3728_v53 = vpop.f32.mrb[84].mxu1  ;;  %5369 = vmatprep.mubr.f32.mxu0 %v22138_v13  ;;  %v15532_v4 = vpack.c.bf16 %v18195_v27, %v18211_v8 }
 0x206   :  { %22160 = vst [vmem:[#allocation46_spill] sm:$0xff] %v18198_v38  ;;  %22162 = vst [vmem:[#allocation48_spill] sm:$0xff] %v18211_v8  ;;  %v15530_v45 = vpack.c.bf16 %v18198_v38, %v18192_v48  ;;  %v3805_v46 = vpop.f32.mrb[88].mxu0  ;;  %v3730_v50 = vpop.f32.mrb[85].mxu1  ;;  %5446 = vmatprep.mubr.f32.mxu1 %v22138_v13 }
 0x207   :  { %v3807_v12 = vpop.f32.mrb[89].mxu0  ;;  %15527 = vmatprep.subr.bf16.mxu0 %v15526_v34  ;;  %v18226_v15 = vadd.f32 %v3730_v50, %v17828_v2  ;;  %v18247_v50 = vadd.f32 %v3728_v53, %v17828_v2 }
 0x208   :  { %14005 = vmatmul.mubr.msk.f32.gmra.mrb[130].mxu0 %vm2269_vm2, %v17890_v39  ;;  %15531 = vmatprep.subr.bf16.mxu1 %v15530_v45 }
 0x209   :  { %14007 = vmatmul.mubr.msk.f32.gmra.mrb[130].mxu1 %vm2269_vm2, %v17890_v39  ;;  %15529 = vmatpush1.bf16.msra.mxu0 %v15528_v3  ;;  %v3734_v23 = vpop.f32.mrb[86].mxu1  ;;  %22163 = vst [vmem:[#allocation49_spill] sm:$0xff] %v18226_v15  ;;  %v18236_v3 = vadd.f32 %v3807_v12, %v17828_v2  ;;  %22169 = vst [vmem:[#allocation55_spill] sm:$0xff] %v18247_v50 }
 0x20a   :  { %15533 = vmatpush1.bf16.msra.mxu1 %v15532_v4  ;;  %v3811_v38 = vpop.f32.mrb[90].mxu0  ;;  %v3736_v48 = vpop.f32.mrb[87].mxu1  ;;  %5517 = vmatprep.mubr.f32.mxu0 %v22138_v13  ;;  %v18229_v34 = vadd.f32 %v3734_v23, %v17830_v10 }
 0x20b   :  { %v18232_v27 = vadd.f32 %v3736_v48, %v17830_v10  ;;  %v3813_v45 = vpop.f32.mrb[91].mxu0  ;;  %5594 = vmatprep.mubr.f32.mxu1 %v22138_v13  ;;  %22166 = vst [vmem:[#allocation52_spill] sm:$0xff] %v18236_v3  ;;  %v18239_v4 = vadd.f32 %v3811_v38, %v17830_v10  ;;  %v18255_v38 = vadd.f32 %v3805_v46, %v17828_v2 }
 0x20c   :  { %22164 = vst [vmem:[#allocation50_spill] sm:$0xff] %v18229_v34  ;;  %v18242_v8 = vadd.f32 %v3813_v45, %v17830_v10  ;;  %14008 = vmatmul.mubr.msk.f32.vlgmr.msra.gmra.mrb[132].mxu0 %vm2269_vm2, %v17867_v30  ;;  %v15536_v53 = vpack.c.bf16 %v18229_v34, %v18247_v50 }
 0x20d   :  { %22165 = vst [vmem:[#allocation51_spill] sm:$0xff] %v18232_v27  ;;  %22167 = vst [vmem:[#allocation53_spill] sm:$0xff] %v18239_v4  ;;  %v15534_v48 = vpack.c.bf16 %v18232_v27, %v18226_v15  ;;  %14010 = vmatmul.mubr.msk.f32.vlgmr.msra.gmra.mrb[132].mxu1 %vm2269_vm2, %v17867_v30  ;;  %v3882_v12 = vpop.f32.mrb[88].mxu1  ;;  %5523 = vmatprep.mubr.f32.mxu0 %v22138_v13  ;;  %v15540_v15 = vpack.c.bf16 %v18239_v4, %v18255_v38 }
 0x20e   :  { %22168 = vst [vmem:[#allocation54_spill] sm:$0xff] %v18242_v8  ;;  %22170 = vst [vmem:[#allocation56_spill] sm:$0xff] %v18255_v38  ;;  %v15538_v23 = vpack.c.bf16 %v18242_v8, %v18236_v3  ;;  %v3959_v45 = vpop.f32.mrb[92].mxu0  ;;  %v3884_v47 = vpop.f32.mrb[89].mxu1  ;;  %5600 = vmatprep.mubr.f32.mxu1 %v22138_v13 }
 0x20f   :  { %v3961_v27 = vpop.f32.mrb[93].mxu0  ;;  %15535 = vmatprep.subr.bf16.mxu0 %v15534_v48  ;;  %v18270_v34 = vadd.f32 %v3884_v47, %v17828_v2  ;;  %v18291_v47 = vadd.f32 %v3882_v12, %v17828_v2 }
 0x210   :  { %14009 = vmatmul.mubr.msk.f32.gmra.mrb[134].mxu0 %vm2269_vm2, %v17890_v39  ;;  %15539 = vmatprep.subr.bf16.mxu1 %v15538_v23 }
 0x211   :  { %14011 = vmatmul.mubr.msk.f32.gmra.mrb[134].mxu1 %vm2269_vm2, %v17890_v39  ;;  %15537 = vmatpush1.bf16.msra.mxu0 %v15536_v53  ;;  %v3888_v46 = vpop.f32.mrb[90].mxu1  ;;  %22171 = vst [vmem:[#allocation57_spill] sm:$0xff] %v18270_v34  ;;  %v18280_v53 = vadd.f32 %v3961_v27, %v17828_v2  ;;  %22177 = vst [vmem:[#allocation63_spill] sm:$0xff] %v18291_v47 }
 0x212   :  { %15541 = vmatpush1.bf16.msra.mxu1 %v15540_v15  ;;  %v3965_v8 = vpop.f32.mrb[94].mxu0  ;;  %v3890_v3 = vpop.f32.mrb[91].mxu1  ;;  %5671 = vmatprep.mubr.f32.mxu0 %v22138_v13  ;;  %v18273_v48 = vadd.f32 %v3888_v46, %v17830_v10 }
 0x213   :  { %v18276_v4 = vadd.f32 %v3890_v3, %v17830_v10  ;;  %v3967_v23 = vpop.f32.mrb[95].mxu0  ;;  %5748 = vmatprep.mubr.f32.mxu1 %v22138_v13  ;;  %22174 = vst [vmem:[#allocation60_spill] sm:$0xff] %v18280_v53  ;;  %v18283_v15 = vadd.f32 %v3965_v8, %v17830_v10  ;;  %v18299_v8 = vadd.f32 %v3959_v45, %v17828_v2 }
 0x214   :  { %22172 = vst [vmem:[#allocation58_spill] sm:$0xff] %v18273_v48  ;;  %v18286_v38 = vadd.f32 %v3967_v23, %v17830_v10  ;;  %14012 = vmatmul.mubr.msk.f32.vlgmr.msra.gmra.mrb[136].mxu0 %vm2269_vm2, %v17867_v30  ;;  %v15544_v12 = vpack.c.bf16 %v18273_v48, %v18291_v47 }
 0x215   :  { %22173 = vst [vmem:[#allocation59_spill] sm:$0xff] %v18276_v4  ;;  %22175 = vst [vmem:[#allocation61_spill] sm:$0xff] %v18283_v15  ;;  %v15542_v3 = vpack.c.bf16 %v18276_v4, %v18270_v34  ;;  %14014 = vmatmul.mubr.msk.f32.vlgmr.msra.gmra.mrb[136].mxu1 %vm2269_vm2, %v17867_v30  ;;  %v4036_v27 = vpop.f32.mrb[92].mxu1  ;;  %5677 = vmatprep.mubr.f32.mxu0 %v22138_v13  ;;  %v15548_v34 = vpack.c.bf16 %v18283_v15, %v18299_v8 }
 0x216   :  { %22176 = vst [vmem:[#allocation62_spill] sm:$0xff] %v18286_v38  ;;  %22178 = vst [vmem:[#allocation64_spill] sm:$0xff] %v18299_v8  ;;  %v15546_v46 = vpack.c.bf16 %v18286_v38, %v18280_v53  ;;  %v4113_v23 = vpop.f32.mrb[96].mxu0  ;;  %v4038_v50 = vpop.f32.mrb[93].mxu1  ;;  %5754 = vmatprep.mubr.f32.mxu1 %v22138_v13 }
 0x217   :  { %v4115_v4 = vpop.f32.mrb[97].mxu0  ;;  %15543 = vmatprep.subr.bf16.mxu0 %v15542_v3  ;;  %v18314_v48 = vadd.f32 %v4038_v50, %v17828_v2  ;;  %v18335_v50 = vadd.f32 %v4036_v27, %v17828_v2 }
 0x218   :  { %14013 = vmatmul.mubr.msk.f32.gmra.mrb[138].mxu0 %vm2269_vm2, %v17890_v39  ;;  %15547 = vmatprep.subr.bf16.mxu1 %v15546_v46 }
 0x219   :  { %14015 = vmatmul.mubr.msk.f32.gmra.mrb[138].mxu1 %vm2269_vm2, %v17890_v39  ;;  %15545 = vmatpush1.bf16.msra.mxu0 %v15544_v12  ;;  %v4042_v45 = vpop.f32.mrb[94].mxu1  ;;  %22179 = vst [vmem:[#allocation65_spill] sm:$0xff] %v18314_v48  ;;  %v18324_v12 = vadd.f32 %v4115_v4, %v17828_v2  ;;  %22185 = vst [vmem:[#allocation71_spill] sm:$0xff] %v18335_v50 }
 0x21a   :  { %15549 = vmatpush1.bf16.msra.mxu1 %v15548_v34  ;;  %v4119_v38 = vpop.f32.mrb[98].mxu0  ;;  %v4044_v53 = vpop.f32.mrb[95].mxu1  ;;  %5825 = vmatprep.mubr.f32.mxu0 %v22138_v13  ;;  %v18317_v3 = vadd.f32 %v4042_v45, %v17830_v10 }
 0x21b   :  { %v18320_v15 = vadd.f32 %v4044_v53, %v17830_v10  ;;  %v4121_v46 = vpop.f32.mrb[99].mxu0  ;;  %5902 = vmatprep.mubr.f32.mxu1 %v22138_v13  ;;  %22182 = vst [vmem:[#allocation68_spill] sm:$0xff] %v18324_v12  ;;  %v18327_v34 = vadd.f32 %v4119_v38, %v17830_v10  ;;  %v18343_v38 = vadd.f32 %v4113_v23, %v17828_v2 }
 0x21c   :  { %22180 = vst [vmem:[#allocation66_spill] sm:$0xff] %v18317_v3  ;;  %v18330_v8 = vadd.f32 %v4121_v46, %v17830_v10  ;;  %14016 = vmatmul.mubr.msk.f32.vlgmr.msra.gmra.mrb[140].mxu0 %vm2269_vm2, %v17867_v30  ;;  %v15552_v27 = vpack.c.bf16 %v18317_v3, %v18335_v50 }
 0x21d   :  { %22181 = vst [vmem:[#allocation67_spill] sm:$0xff] %v18320_v15  ;;  %22183 = vst [vmem:[#allocation69_spill] sm:$0xff] %v18327_v34  ;;  %v15550_v53 = vpack.c.bf16 %v18320_v15, %v18314_v48  ;;  %14018 = vmatmul.mubr.msk.f32.vlgmr.msra.gmra.mrb[140].mxu1 %vm2269_vm2, %v17867_v30  ;;  %v4190_v4 = vpop.f32.mrb[96].mxu1  ;;  %5831 = vmatprep.mubr.f32.mxu0 %v22138_v13  ;;  %v15556_v15 = vpack.c.bf16 %v18327_v34, %v18343_v38 }
 0x21e   :  { %22184 = vst [vmem:[#allocation70_spill] sm:$0xff] %v18330_v8  ;;  %22186 = vst [vmem:[#allocation72_spill] sm:$0xff] %v18343_v38  ;;  %v15554_v45 = vpack.c.bf16 %v18330_v8, %v18324_v12  ;;  %v4192_v46 = vpop.f32.mrb[97].mxu1  ;;  %5908 = vmatprep.mubr.f32.mxu1 %v22138_v13 }
 0x21f   :  { %15551 = vmatprep.subr.bf16.mxu0 %v15550_v53  ;;  %v18358_v12 = vadd.f32 %v4192_v46, %v17828_v2 }
 0x220   :  { %14017 = vmatmul.mubr.msk.f32.gmra.mrb[142].mxu0 %vm2269_vm2, %v17890_v39  ;;  %15555 = vmatprep.subr.bf16.mxu1 %v15554_v45  ;;  %v18370_v45 = vadd.f32 %v4190_v4, %v17828_v2  ;;  %v18392_v4 = vpop.permute.xlu0 %4207 }
 0x221   :  { %14019 = vmatmul.mubr.msk.f32.gmra.mrb[142].mxu1 %vm2269_vm2, %v17890_v39  ;;  %15553 = vmatpush1.bf16.msra.mxu0 %v15552_v27  ;;  %v4196_v23 = vpop.f32.mrb[98].mxu1  ;;  %22187 = vst [vmem:[#allocation73_spill] sm:$0xff] %v18358_v12 }
 0x222   :  { %15557 = vmatpush1.bf16.msra.mxu1 %v15556_v15  ;;  %v4198_v8 = vpop.f32.mrb[99].mxu1  ;;  %5979 = vmatprep.mubr.f32.mxu0 %v22138_v13  ;;  %v18361_v53 = vadd.f32 %v4196_v23, %v17830_v10  ;;  %22190 = vst [vmem:[#allocation76_spill] sm:$0xff] %v18370_v45 }
 0x223   :  { %v18364_v34 = vadd.f32 %v4198_v8, %v17830_v10  ;;  %6056 = vmatprep.mubr.f32.mxu1 %v22138_v13 }
 0x224   :  { %22188 = vst [vmem:[#allocation74_spill] sm:$0xff] %v18361_v53  ;;  %14020 = vmatmul.mubr.msk.f32.vlgmr.msra.gmra.mrb[144].mxu0 %vm2269_vm2, %v17867_v30  ;;  %v15560_v8 = vpack.c.bf16 %v18361_v53, %v18370_v45  ;;  %v18398_v53 = vpop.permute.xlu1 %4212 }
 0x225   :  { %22189 = vst [vmem:[#allocation75_spill] sm:$0xff] %v18364_v34  ;;  %v15558_v15 = vpack.c.bf16 %v18364_v34, %v18358_v12  ;;  %14022 = vmatmul.mubr.msk.f32.vlgmr.msra.gmra.mrb[144].mxu1 %vm2269_vm2, %v17867_v30  ;;  %5985 = vmatprep.mubr.f32.mxu0 %v22138_v13 }
 0x226   :  { %6062 = vmatprep.mubr.f32.mxu1 %v22138_v13 }
 0x227   :  { %15559 = vmatprep.subr.bf16.mxu0 %v15558_v15 }
 0x228   :  { %14021 = vmatmul.mubr.msk.f32.gmra.mrb[146].mxu0 %vm2269_vm2, %v17890_v39 }
 0x229   :  { %14023 = vmatmul.mubr.msk.f32.gmra.mrb[146].mxu1 %vm2269_vm2, %v17890_v39  ;;  %15561 = vmatpush1.bf16.msra.mxu0 %v15560_v8 }
 0x22a   :  { %6133 = vmatprep.mubr.f32.mxu0 %v22138_v13  ;;  %6320 = vmatprep.mubr.f32.mxu1 %v22138_v13 }
 0x22c   :  { %14024 = vmatmul.mubr.msk.f32.vlgmr.msra.gmra.mrb[148].mxu0 %vm2269_vm2, %v17867_v30 }
 0x22d   :  { %6139 = vmatprep.mubr.f32.mxu0 %v22138_v13 }
 0x230   :  { %14025 = vmatmul.mubr.msk.f32.gmra.mrb[150].mxu0 %vm2269_vm2, %v17890_v39 }
 0x231   :  { %6462 = vmatprep.mubr.f32.mxu0 %v22138_v13 }
 0x29d   :  { %v4287_v46 = vpop.f32.mrb[100].mxu0  ;;  %v4364_v27 = vpop.f32.mrb[100].mxu1 }
 0x29e   :  { %v4288_v23 = vadd.f32 %v4287_v46, %v18392_v4  ;;  %v4365_v15 = vadd.f32 %v4364_v27, %v18392_v4  ;;  %v4289_v8 = vpop.f32.mrb[101].mxu0  ;;  %v4366_v2 = vpop.f32.mrb[101].mxu1 }
 0x29f   :  { %v4290_v10 = vadd.f32 %v4289_v8, %v18392_v4  ;;  %v4367_v30 = vadd.f32 %v4366_v2, %v18392_v4 }
 0x2a0   :  { %16703 = vtanh.f32 %v4288_v23 }
 0x2a1   :  { %16705 = vtanh.f32 %v4365_v15  ;;  %v4293_v39 = vpop.f32.mrb[102].mxu0  ;;  %v4370_v34 = vpop.f32.mrb[102].mxu1 }
 0x2a2   :  { %16707 = vtanh.f32 %v4290_v10  ;;  %v4294_v45 = vadd.f32 %v4293_v39, %v18398_v53  ;;  %v4371_v38 = vadd.f32 %v4370_v34, %v18398_v53  ;;  %v4295_v46 = vpop.f32.mrb[103].mxu0  ;;  %v4372_v12 = vpop.f32.mrb[103].mxu1 }
 0x2a3   :  { %16709 = vtanh.f32 %v4367_v30  ;;  %v4296_v27 = vadd.f32 %v4295_v46, %v18398_v53  ;;  %v4373_v8 = vadd.f32 %v4372_v12, %v18398_v53 }
 0x2a4   :  { %16711 = vtanh.f32 %v4294_v45 }
 0x2a5   :  { %16713 = vtanh.f32 %v4371_v38 }
 0x2a6   :  { %16715 = vtanh.f32 %v4296_v27  ;;  %v4441_v2 = vpop.f32.mrb[104].mxu0 }
 0x2a7   :  { %16717 = vtanh.f32 %v4373_v8  ;;  %v4442_v23 = vadd.f32 %v4441_v2, %v18392_v4  ;;  %v4518_v15 = vpop.f32.mrb[104].mxu1  ;;  %v4443_v10 = vpop.f32.mrb[105].mxu0 }
 0x2a8   :  { %v4519_v39 = vadd.f32 %v4518_v15, %v18392_v4  ;;  %v4444_v34 = vadd.f32 %v4443_v10, %v18392_v4  ;;  %v4520_v3 = vpop.f32.mrb[105].mxu1 }
 0x2a9   :  { %16719 = vtanh.f32 %v4442_v23  ;;  %v4521_v30 = vadd.f32 %v4520_v3, %v18392_v4 }
 0x2aa   :  { %v16704_v46 = vpop.eup %16703  ;;  %16721 = vtanh.f32 %v4519_v39  ;;  %v4447_v12 = vpop.f32.mrb[106].mxu0 }
 0x2ab   :  { %v16706_v45 = vpop.eup %16705  ;;  %16723 = vtanh.f32 %v4444_v34  ;;  %v4448_v38 = vadd.f32 %v4447_v12, %v18398_v53  ;;  %v4524_v27 = vpop.f32.mrb[106].mxu1 }
 0x2ac   :  { %v4449_v8 = vpop.f32.mrb[107].mxu0  ;;  %v16708_v2 = vpop.eup %16707  ;;  %16725 = vtanh.f32 %v4521_v30  ;;  %v4525_v50 = vadd.f32 %v4524_v27, %v18398_v53 }
 0x2ad   :  { %v4450_v15 = vadd.f32 %v4449_v8, %v18398_v53  ;;  %v4526_v10 = vpop.f32.mrb[107].mxu1  ;;  %v16710_v48 = vpop.eup %16709  ;;  %16727 = vtanh.f32 %v4448_v38 }
 0x2ae   :  { %v4527_v3 = vadd.f32 %v4526_v10, %v18398_v53  ;;  %v16712_v23 = vpop.eup %16711  ;;  %16729 = vtanh.f32 %v4525_v50 }
 0x2af   :  { %v16714_v39 = vpop.eup %16713  ;;  %16731 = vtanh.f32 %v4450_v15  ;;  %v4595_v34 = vpop.f32.mrb[108].mxu0  ;;  %v15564_v12 = vpack.c.bf16 %v16712_v23, %v16704_v46 }
 0x2b0   :  { %v4672_v47 = vpop.f32.mrb[108].mxu1  ;;  %v16716_v51 = vpop.eup %16715  ;;  %16733 = vtanh.f32 %v4527_v3  ;;  %v4596_v30 = vadd.f32 %v4595_v34, %v18392_v4  ;;  %v15568_v54 = vpack.c.bf16 %v16714_v39, %v16706_v45 }
 0x2b1   :  { %v4673_v27 = vadd.f32 %v4672_v47, %v18392_v4  ;;  %v4597_v22 = vpop.f32.mrb[109].mxu0  ;;  %v4674_v8 = vpop.f32.mrb[109].mxu1  ;;  %v15562_v50 = vpack.c.bf16 %v16716_v51, %v16708_v2  ;;  %v18421_v51 = vld [vmem:[%s22039_s6 + $0x50] sm:$0x1] }
 0x2b2   :  { %v16718_v7 = vpop.eup %16717  ;;  %v4598_v38 = vadd.f32 %v4597_v22, %v18392_v4  ;;  %v4675_v10 = vadd.f32 %v4674_v8, %v18392_v4  ;;  %16735 = vtanh.f32 %v4596_v30 }
 0x2b3   :  { %v15566_v15 = vpack.c.bf16 %v16718_v7, %v16710_v48  ;;  %v16720_v9 = vpop.eup %16719  ;;  %16737 = vtanh.f32 %v4673_v27  ;;  %v4601_v46 = vpop.f32.mrb[110].mxu0  ;;  %15563 = vmatprep.subr.bf16.mxu1 %v15562_v50 }
 0x2b4   :  { %v4678_v23 = vpop.f32.mrb[110].mxu1  ;;  %v16722_v3 = vpop.eup %16721  ;;  %16739 = vtanh.f32 %v4598_v38  ;;  %v4602_v47 = vadd.f32 %v4601_v46, %v18398_v53  ;;  %15565 = vmatpush1.bf16.msra.mxu1 %v15564_v12 }
 0x2b5   :  { %v4679_v34 = vadd.f32 %v4678_v23, %v18398_v53  ;;  %v4603_v45 = vpop.f32.mrb[111].mxu0  ;;  %v4680_v39 = vpop.f32.mrb[111].mxu1  ;;  %16741 = vtanh.f32 %v4675_v10  ;;  %15567 = vmatprep.subr.bf16.mxu1 %v15566_v15 }
 0x2b6   :  { %v16724_v7 = vpop.eup %16723  ;;  %v4604_v22 = vadd.f32 %v4603_v45, %v18398_v53  ;;  %v4681_v48 = vadd.f32 %v4680_v39, %v18398_v53  ;;  %16743 = vtanh.f32 %v4602_v47 }
 0x2b7   :  { %v16726_v2 = vpop.eup %16725  ;;  %16745 = vtanh.f32 %v4679_v34  ;;  %v4749_v27 = vpop.f32.mrb[112].mxu0  ;;  %14026 = vmatmul.mubr.msk.f32.vlgmr.msra.gmra.mrb[148].mxu1 %vm2269_vm2, %v18421_v51 }
 0x2b8   :  { %v16728_v30 = vpop.eup %16727  ;;  %16747 = vtanh.f32 %v4604_v22  ;;  %v4750_v8 = vadd.f32 %v4749_v27, %v18392_v4  ;;  %v4826_v38 = vpop.f32.mrb[112].mxu1  ;;  %15569 = vmatpush1.bf16.msra.mxu1 %v15568_v54  ;;  %6391 = vmatprep.mubr.f32.mxu1 %v22138_v13 }
 0x2b9   :  { %v16730_v12 = vpop.eup %16729  ;;  %v4751_v50 = vpop.f32.mrb[113].mxu0  ;;  %v15572_v10 = vpack.c.bf16 %v16728_v30, %v16720_v9  ;;  %16749 = vtanh.f32 %v4681_v48  ;;  %v4827_v15 = vadd.f32 %v4826_v38, %v18392_v4 }
 0x2ba   :  { %v16732_v46 = vpop.eup %16731  ;;  %v4752_v23 = vadd.f32 %v4751_v50, %v18392_v4  ;;  %v4828_v47 = vpop.f32.mrb[113].mxu1  ;;  %v15576_v34 = vpack.c.bf16 %v16730_v12, %v16722_v3  ;;  %16751 = vtanh.f32 %v4750_v8 }
 0x2bb   :  { %v16734_v45 = vpop.eup %16733  ;;  %v4829_v39 = vadd.f32 %v4828_v47, %v18392_v4  ;;  %v15570_v22 = vpack.c.bf16 %v16732_v46, %v16724_v7  ;;  %16753 = vtanh.f32 %v4827_v15  ;;  %v4755_v27 = vpop.f32.mrb[114].mxu0  ;;  %14027 = vmatmul.mubr.msk.f32.vlgmr.msra.gmra.mrb[150].mxu1 %vm2269_vm2, %v18421_v51 }
 0x2bc   :  { %v15574_v54 = vpack.c.bf16 %v16734_v45, %v16726_v2  ;;  %v16736_v9 = vpop.eup %16735  ;;  %16755 = vtanh.f32 %v4752_v23  ;;  %v4756_v48 = vadd.f32 %v4755_v27, %v18398_v53  ;;  %v4832_v30 = vpop.f32.mrb[114].mxu1  ;;  %6533 = vmatprep.mubr.f32.mxu1 %v22138_v13 }
 0x2bd   :  { %v4757_v38 = vpop.f32.mrb[115].mxu0  ;;  %15571 = vmatprep.subr.bf16.mxu0 %v15570_v22  ;;  %v16738_v3 = vpop.eup %16737  ;;  %16757 = vtanh.f32 %v4829_v39  ;;  %v4833_v12 = vadd.f32 %v4832_v30, %v18398_v53 }
 0x2be   :  { %v4758_v7 = vadd.f32 %v4757_v38, %v18398_v53  ;;  %v4834_v8 = vpop.f32.mrb[115].mxu1  ;;  %15575 = vmatprep.subr.bf16.mxu1 %v15574_v54  ;;  %15573 = vmatpush1.bf16.msra.mxu0 %v15572_v10  ;;  %v16740_v50 = vpop.eup %16739  ;;  %16759 = vtanh.f32 %v4756_v48 }
 0x2bf   :  { %v4835_v2 = vadd.f32 %v4834_v8, %v18398_v53  ;;  %15577 = vmatpush1.bf16.msra.mxu1 %v15576_v34  ;;  %v16742_v46 = vpop.eup %16741  ;;  %16761 = vtanh.f32 %v4833_v12  ;;  %v4903_v15 = vpop.f32.mrb[116].mxu0 }
 0x2c0   :  { %v16744_v23 = vpop.eup %16743  ;;  %16763 = vtanh.f32 %v4758_v7  ;;  %v4904_v47 = vadd.f32 %v4903_v15, %v18392_v4  ;;  %v4980_v45 = vpop.f32.mrb[116].mxu1 }
 0x2c1   :  { %v4905_v39 = vpop.f32.mrb[117].mxu0  ;;  %14028 = vmatmul.mubr.msk.f32.vlgmr.msra.gmra.mrb[152].mxu0 %vm2269_vm2, %v18421_v51  ;;  %v16746_v22 = vpop.eup %16745  ;;  %16765 = vtanh.f32 %v4835_v2  ;;  %v4981_v10 = vadd.f32 %v4980_v45, %v18392_v4  ;;  %v15580_v34 = vpack.c.bf16 %v16744_v23, %v16736_v9 }
 0x2c2   :  { %v4906_v27 = vadd.f32 %v4905_v39, %v18392_v4  ;;  %v4982_v54 = vpop.f32.mrb[117].mxu1  ;;  %14029 = vmatmul.mubr.msk.f32.vlgmr.msra.gmra.mrb[152].mxu1 %vm2269_vm2, %v18421_v51  ;;  %6604 = vmatprep.mubr.f32.mxu0 %v22138_v13  ;;  %v16748_v48 = vpop.eup %16747  ;;  %16767 = vtanh.f32 %v4904_v47  ;;  %v15584_v38 = vpack.c.bf16 %v16746_v22, %v16738_v3 }
 0x2c3   :  { %v4983_v30 = vadd.f32 %v4982_v54, %v18392_v4  ;;  %6675 = vmatprep.mubr.f32.mxu1 %v22138_v13  ;;  %v16750_v12 = vpop.eup %16749  ;;  %16769 = vtanh.f32 %v4981_v10  ;;  %v4909_v7 = vpop.f32.mrb[118].mxu0  ;;  %v15578_v8 = vpack.c.bf16 %v16748_v48, %v16740_v50 }
 0x2c4   :  { %v16752_v2 = vpop.eup %16751  ;;  %16771 = vtanh.f32 %v4906_v27  ;;  %v4910_v15 = vadd.f32 %v4909_v7, %v18398_v53  ;;  %v4986_v45 = vpop.f32.mrb[118].mxu1  ;;  %v15582_v9 = vpack.c.bf16 %v16750_v12, %v16742_v46 }
 0x2c5   :  { %v4911_v39 = vpop.f32.mrb[119].mxu0  ;;  %v16754_v23 = vpop.eup %16753  ;;  %16773 = vtanh.f32 %v4983_v30  ;;  %v4987_v47 = vadd.f32 %v4986_v45, %v18398_v53  ;;  %15579 = vmatprep.subr.bf16.mxu0 %v15578_v8 }
 0x2c6   :  { %v4912_v54 = vadd.f32 %v4911_v39, %v18398_v53  ;;  %v4988_v3 = vpop.f32.mrb[119].mxu1  ;;  %v16756_v22 = vpop.eup %16755  ;;  %16775 = vtanh.f32 %v4910_v15  ;;  %15583 = vmatprep.subr.bf16.mxu1 %v15582_v9  ;;  %15581 = vmatpush1.bf16.msra.mxu0 %v15580_v34 }
 0x2c7   :  { %v4989_v10 = vadd.f32 %v4988_v3, %v18398_v53  ;;  %v16758_v50 = vpop.eup %16757  ;;  %16777 = vtanh.f32 %v4987_v47  ;;  %15585 = vmatpush1.bf16.msra.mxu1 %v15584_v38  ;;  %v5057_v27 = vpop.f32.mrb[120].mxu0 }
 0x2c8   :  { %v16760_v48 = vpop.eup %16759  ;;  %16779 = vtanh.f32 %v4912_v54  ;;  %v5058_v46 = vadd.f32 %v5057_v27, %v18392_v4  ;;  %v5134_v30 = vpop.f32.mrb[120].mxu1 }
 0x2c9   :  { %v5059_v12 = vpop.f32.mrb[121].mxu0  ;;  %v16762_v7 = vpop.eup %16761  ;;  %16781 = vtanh.f32 %v4989_v10  ;;  %v5135_v8 = vadd.f32 %v5134_v30, %v18392_v4  ;;  %14030 = vmatmul.mubr.msk.f32.vlgmr.msra.gmra.mrb[154].mxu0 %vm2269_vm2, %v18421_v51  ;;  %v15588_v34 = vpack.c.bf16 %v16760_v48, %v16752_v2 }
 0x2ca   :  { %v5060_v15 = vadd.f32 %v5059_v12, %v18392_v4  ;;  %v5136_v45 = vpop.f32.mrb[121].mxu1  ;;  %v16764_v39 = vpop.eup %16763  ;;  %16783 = vtanh.f32 %v5058_v46  ;;  %14031 = vmatmul.mubr.msk.f32.vlgmr.msra.gmra.mrb[154].mxu1 %vm2269_vm2, %v18421_v51  ;;  %v15592_v9 = vpack.c.bf16 %v16762_v7, %v16754_v23  ;;  %6746 = vmatprep.mubr.f32.mxu0 %v22138_v13 }
 0x2cb   :  { %v5137_v38 = vadd.f32 %v5136_v45, %v18392_v4  ;;  %v16766_v47 = vpop.eup %16765  ;;  %16785 = vtanh.f32 %v5135_v8  ;;  %v5063_v54 = vpop.f32.mrb[122].mxu0  ;;  %v15586_v3 = vpack.c.bf16 %v16764_v39, %v16756_v22  ;;  %6817 = vmatprep.mubr.f32.mxu1 %v22138_v13 }
 0x2cc   :  { %v16768_v10 = vpop.eup %16767  ;;  %16787 = vtanh.f32 %v5060_v15  ;;  %v5064_v2 = vadd.f32 %v5063_v54, %v18398_v53  ;;  %v5140_v27 = vpop.f32.mrb[122].mxu1  ;;  %v15590_v46 = vpack.c.bf16 %v16766_v47, %v16758_v50 }
 0x2cd   :  { %v5065_v48 = vpop.f32.mrb[123].mxu0  ;;  %v16770_v30 = vpop.eup %16769  ;;  %16789 = vtanh.f32 %v5137_v38  ;;  %v5141_v12 = vadd.f32 %v5140_v27, %v18398_v53  ;;  %15587 = vmatprep.subr.bf16.mxu0 %v15586_v3 }
 0x2ce   :  { %v5066_v23 = vadd.f32 %v5065_v48, %v18398_v53  ;;  %v5142_v7 = vpop.f32.mrb[123].mxu1  ;;  %v16772_v8 = vpop.eup %16771  ;;  %16791 = vtanh.f32 %v5064_v2  ;;  %15591 = vmatprep.subr.bf16.mxu1 %v15590_v46  ;;  %15589 = vmatpush1.bf16.msra.mxu0 %v15588_v34 }
 0x2cf   :  { %v5143_v22 = vadd.f32 %v5142_v7, %v18398_v53  ;;  %v16774_v15 = vpop.eup %16773  ;;  %16793 = vtanh.f32 %v5141_v12  ;;  %15593 = vmatpush1.bf16.msra.mxu1 %v15592_v9  ;;  %v5211_v45 = vpop.f32.mrb[124].mxu0 }
 0x2d0   :  { %v16776_v39 = vpop.eup %16775  ;;  %16795 = vtanh.f32 %v5066_v23  ;;  %v5212_v50 = vadd.f32 %v5211_v45, %v18392_v4  ;;  %v5288_v38 = vpop.f32.mrb[124].mxu1 }
 0x2d1   :  { %v5213_v47 = vpop.f32.mrb[125].mxu0  ;;  %v16778_v54 = vpop.eup %16777  ;;  %16797 = vtanh.f32 %v5143_v22  ;;  %v5289_v3 = vadd.f32 %v5288_v38, %v18392_v4  ;;  %14032 = vmatmul.mubr.msk.f32.vlgmr.msra.gmra.mrb[156].mxu0 %vm2269_vm2, %v18421_v51  ;;  %v15596_v34 = vpack.c.bf16 %v16776_v39, %v16768_v10 }
 0x2d2   :  { %v5214_v2 = vadd.f32 %v5213_v47, %v18392_v4  ;;  %v5290_v27 = vpop.f32.mrb[125].mxu1  ;;  %v16780_v48 = vpop.eup %16779  ;;  %16799 = vtanh.f32 %v5212_v50  ;;  %14033 = vmatmul.mubr.msk.f32.vlgmr.msra.gmra.mrb[156].mxu1 %vm2269_vm2, %v18421_v51  ;;  %v15600_v46 = vpack.c.bf16 %v16778_v54, %v16770_v30  ;;  %6888 = vmatprep.mubr.f32.mxu0 %v22138_v13 }
 0x2d3   :  { %v5291_v9 = vadd.f32 %v5290_v27, %v18392_v4  ;;  %v16782_v12 = vpop.eup %16781  ;;  %16801 = vtanh.f32 %v5289_v3  ;;  %v5217_v23 = vpop.f32.mrb[126].mxu0  ;;  %v15594_v7 = vpack.c.bf16 %v16780_v48, %v16772_v8  ;;  %6959 = vmatprep.mubr.f32.mxu1 %v22138_v13 }
 0x2d4   :  { %v16784_v22 = vpop.eup %16783  ;;  %16803 = vtanh.f32 %v5214_v2  ;;  %v5218_v10 = vadd.f32 %v5217_v23, %v18398_v53  ;;  %v5294_v45 = vpop.f32.mrb[126].mxu1  ;;  %v15598_v50 = vpack.c.bf16 %v16782_v12, %v16774_v15 }
 0x2d5   :  { %v5219_v39 = vpop.f32.mrb[127].mxu0  ;;  %v16786_v38 = vpop.eup %16785  ;;  %16805 = vtanh.f32 %v5291_v9  ;;  %v5295_v47 = vadd.f32 %v5294_v45, %v18398_v53  ;;  %15595 = vmatprep.subr.bf16.mxu0 %v15594_v7 }
 0x2d6   :  { %v5220_v30 = vadd.f32 %v5219_v39, %v18398_v53  ;;  %v5296_v54 = vpop.f32.mrb[127].mxu1  ;;  %v16788_v3 = vpop.eup %16787  ;;  %16807 = vtanh.f32 %v5218_v10  ;;  %15599 = vmatprep.subr.bf16.mxu1 %v15598_v50  ;;  %15597 = vmatpush1.bf16.msra.mxu0 %v15596_v34 }
 0x2d7   :  { %v5297_v8 = vadd.f32 %v5296_v54, %v18398_v53  ;;  %v16790_v2 = vpop.eup %16789  ;;  %16809 = vtanh.f32 %v5295_v47  ;;  %15601 = vmatpush1.bf16.msra.mxu1 %v15600_v46  ;;  %v5365_v27 = vpop.f32.mrb[128].mxu0 }
 0x2d8   :  { %v16792_v48 = vpop.eup %16791  ;;  %16811 = vtanh.f32 %v5220_v30  ;;  %v5366_v15 = vadd.f32 %v5365_v27, %v18392_v4  ;;  %v5442_v9 = vpop.f32.mrb[128].mxu1 }
 0x2d9   :  { %v5367_v12 = vpop.f32.mrb[129].mxu0  ;;  %v16794_v23 = vpop.eup %16793  ;;  %16813 = vtanh.f32 %v5297_v8  ;;  %v5443_v7 = vadd.f32 %v5442_v9, %v18392_v4  ;;  %14034 = vmatmul.mubr.msk.f32.vlgmr.msra.gmra.mrb[158].mxu0 %vm2269_vm2, %v18421_v51  ;;  %v15604_v34 = vpack.c.bf16 %v16792_v48, %v16784_v22 }
 0x2da   :  { %v5368_v10 = vadd.f32 %v5367_v12, %v18392_v4  ;;  %v5444_v45 = vpop.f32.mrb[129].mxu1  ;;  %v16796_v39 = vpop.eup %16795  ;;  %16815 = vtanh.f32 %v5366_v15  ;;  %14035 = vmatmul.mubr.msk.f32.vlgmr.msra.gmra.mrb[158].mxu1 %vm2269_vm2, %v18421_v51  ;;  %v15608_v50 = vpack.c.bf16 %v16794_v23, %v16786_v38  ;;  %7030 = vmatprep.mubr.f32.mxu0 %v22138_v13 }
 0x2db   :  { %v5445_v46 = vadd.f32 %v5444_v45, %v18392_v4  ;;  %v16798_v47 = vpop.eup %16797  ;;  %16817 = vtanh.f32 %v5443_v7  ;;  %v5371_v30 = vpop.f32.mrb[130].mxu0  ;;  %v15602_v54 = vpack.c.bf16 %v16796_v39, %v16788_v3  ;;  %7101 = vmatprep.mubr.f32.mxu1 %v22138_v13 }
 0x2dc   :  { %v16800_v8 = vpop.eup %16799  ;;  %16819 = vtanh.f32 %v5368_v10  ;;  %v5372_v22 = vadd.f32 %v5371_v30, %v18398_v53  ;;  %v5448_v27 = vpop.f32.mrb[130].mxu1  ;;  %v15606_v15 = vpack.c.bf16 %v16798_v47, %v16790_v2 }
 0x2dd   :  { %v5373_v48 = vpop.f32.mrb[131].mxu0  ;;  %v16802_v9 = vpop.eup %16801  ;;  %16821 = vtanh.f32 %v5445_v46  ;;  %v5449_v12 = vadd.f32 %v5448_v27, %v18398_v53  ;;  %15603 = vmatprep.subr.bf16.mxu0 %v15602_v54 }
 0x2de   :  { %v5374_v38 = vadd.f32 %v5373_v48, %v18398_v53  ;;  %v5450_v23 = vpop.f32.mrb[131].mxu1  ;;  %v16804_v7 = vpop.eup %16803  ;;  %16823 = vtanh.f32 %v5372_v22  ;;  %15607 = vmatprep.subr.bf16.mxu1 %v15606_v15  ;;  %15605 = vmatpush1.bf16.msra.mxu0 %v15604_v34 }
 0x2df   :  { %v5451_v3 = vadd.f32 %v5450_v23, %v18398_v53  ;;  %v16806_v10 = vpop.eup %16805  ;;  %16825 = vtanh.f32 %v5449_v12  ;;  %15609 = vmatpush1.bf16.msra.mxu1 %v15608_v50  ;;  %v5519_v45 = vpop.f32.mrb[132].mxu0 }
 0x2e0   :  { %v16808_v39 = vpop.eup %16807  ;;  %16827 = vtanh.f32 %v5374_v38  ;;  %v5520_v2 = vadd.f32 %v5519_v45, %v18392_v4  ;;  %v5596_v46 = vpop.f32.mrb[132].mxu1 }
 0x2e1   :  { %v5521_v47 = vpop.f32.mrb[133].mxu0  ;;  %v16810_v30 = vpop.eup %16809  ;;  %16829 = vtanh.f32 %v5451_v3  ;;  %v5597_v54 = vadd.f32 %v5596_v46, %v18392_v4  ;;  %14036 = vmatmul.mubr.msk.f32.vlgmr.msra.gmra.mrb[160].mxu0 %vm2269_vm2, %v18421_v51  ;;  %v15612_v34 = vpack.c.bf16 %v16808_v39, %v16800_v8 }
 0x2e2   :  { %v5522_v22 = vadd.f32 %v5521_v47, %v18392_v4  ;;  %v5598_v27 = vpop.f32.mrb[133].mxu1  ;;  %v16812_v48 = vpop.eup %16811  ;;  %16831 = vtanh.f32 %v5520_v2  ;;  %14037 = vmatmul.mubr.msk.f32.vlgmr.msra.gmra.mrb[160].mxu1 %vm2269_vm2, %v18421_v51  ;;  %v15616_v15 = vpack.c.bf16 %v16810_v30, %v16802_v9  ;;  %7172 = vmatprep.mubr.f32.mxu0 %v22138_v13 }
 0x2e3   :  { %v5599_v50 = vadd.f32 %v5598_v27, %v18392_v4  ;;  %v16814_v12 = vpop.eup %16813  ;;  %16833 = vtanh.f32 %v5597_v54  ;;  %v5525_v38 = vpop.f32.mrb[134].mxu0  ;;  %v15610_v23 = vpack.c.bf16 %v16812_v48, %v16804_v7  ;;  %7243 = vmatprep.mubr.f32.mxu1 %v22138_v13 }
 0x2e4   :  { %v16816_v3 = vpop.eup %16815  ;;  %16835 = vtanh.f32 %v5522_v22  ;;  %v5526_v8 = vadd.f32 %v5525_v38, %v18398_v53  ;;  %v5602_v45 = vpop.f32.mrb[134].mxu1  ;;  %v15614_v2 = vpack.c.bf16 %v16814_v12, %v16806_v10 }
 0x2e5   :  { %v5527_v39 = vpop.f32.mrb[135].mxu0  ;;  %v16818_v46 = vpop.eup %16817  ;;  %16837 = vtanh.f32 %v5599_v50  ;;  %v5603_v47 = vadd.f32 %v5602_v45, %v18398_v53  ;;  %15611 = vmatprep.subr.bf16.mxu0 %v15610_v23 }
 0x2e6   :  { %v5528_v9 = vadd.f32 %v5527_v39, %v18398_v53  ;;  %v5604_v30 = vpop.f32.mrb[135].mxu1  ;;  %v16820_v54 = vpop.eup %16819  ;;  %16839 = vtanh.f32 %v5526_v8  ;;  %15615 = vmatprep.subr.bf16.mxu1 %v15614_v2  ;;  %15613 = vmatpush1.bf16.msra.mxu0 %v15612_v34 }
 0x2e7   :  { %v5605_v7 = vadd.f32 %v5604_v30, %v18398_v53  ;;  %v16822_v22 = vpop.eup %16821  ;;  %16841 = vtanh.f32 %v5603_v47  ;;  %15617 = vmatpush1.bf16.msra.mxu1 %v15616_v15  ;;  %v5673_v27 = vpop.f32.mrb[136].mxu0 }
 0x2e8   :  { %v16824_v48 = vpop.eup %16823  ;;  %16843 = vtanh.f32 %v5528_v9  ;;  %v5674_v10 = vadd.f32 %v5673_v27, %v18392_v4  ;;  %v5750_v50 = vpop.f32.mrb[136].mxu1 }
 0x2e9   :  { %v5675_v12 = vpop.f32.mrb[137].mxu0  ;;  %v16826_v38 = vpop.eup %16825  ;;  %16845 = vtanh.f32 %v5605_v7  ;;  %v5751_v23 = vadd.f32 %v5750_v50, %v18392_v4  ;;  %14038 = vmatmul.mubr.msk.f32.vlgmr.msra.gmra.mrb[162].mxu0 %vm2269_vm2, %v18421_v51  ;;  %v15620_v34 = vpack.c.bf16 %v16824_v48, %v16816_v3 }
 0x2ea   :  { %v5676_v8 = vadd.f32 %v5675_v12, %v18392_v4  ;;  %v5752_v45 = vpop.f32.mrb[137].mxu1  ;;  %v16828_v39 = vpop.eup %16827  ;;  %16847 = vtanh.f32 %v5674_v10  ;;  %14039 = vmatmul.mubr.msk.f32.vlgmr.msra.gmra.mrb[162].mxu1 %vm2269_vm2, %v18421_v51  ;;  %v15624_v2 = vpack.c.bf16 %v16826_v38, %v16818_v46  ;;  %7314 = vmatprep.mubr.f32.mxu0 %v22138_v13 }
 0x2eb   :  { %v5753_v15 = vadd.f32 %v5752_v45, %v18392_v4  ;;  %v16830_v47 = vpop.eup %16829  ;;  %16849 = vtanh.f32 %v5751_v23  ;;  %v5679_v9 = vpop.f32.mrb[138].mxu0  ;;  %v15618_v30 = vpack.c.bf16 %v16828_v39, %v16820_v54  ;;  %7385 = vmatprep.mubr.f32.mxu1 %v22138_v13 }
 0x2ec   :  { %v16832_v7 = vpop.eup %16831  ;;  %16851 = vtanh.f32 %v5676_v8  ;;  %v5680_v3 = vadd.f32 %v5679_v9, %v18398_v53  ;;  %v5756_v27 = vpop.f32.mrb[138].mxu1  ;;  %v15622_v10 = vpack.c.bf16 %v16830_v47, %v16822_v22 }
 0x2ed   :  { %v5681_v48 = vpop.f32.mrb[139].mxu0  ;;  %v16834_v50 = vpop.eup %16833  ;;  %16853 = vtanh.f32 %v5753_v15  ;;  %v5757_v12 = vadd.f32 %v5756_v27, %v18398_v53  ;;  %15619 = vmatprep.subr.bf16.mxu0 %v15618_v30 }
 0x2ee   :  { %v5682_v46 = vadd.f32 %v5681_v48, %v18398_v53  ;;  %v5758_v38 = vpop.f32.mrb[139].mxu1  ;;  %v16836_v23 = vpop.eup %16835  ;;  %16855 = vtanh.f32 %v5680_v3  ;;  %15623 = vmatprep.subr.bf16.mxu1 %v15622_v10  ;;  %15621 = vmatpush1.bf16.msra.mxu0 %v15620_v34 }
 0x2ef   :  { %v5759_v54 = vadd.f32 %v5758_v38, %v18398_v53  ;;  %v16838_v8 = vpop.eup %16837  ;;  %16857 = vtanh.f32 %v5757_v12  ;;  %15625 = vmatpush1.bf16.msra.mxu1 %v15624_v2  ;;  %v5827_v45 = vpop.f32.mrb[140].mxu0 }
 0x2f0   :  { %v16840_v39 = vpop.eup %16839  ;;  %16859 = vtanh.f32 %v5682_v46  ;;  %v5828_v22 = vadd.f32 %v5827_v45, %v18392_v4  ;;  %v5904_v15 = vpop.f32.mrb[140].mxu1 }
 0x2f1   :  { %v5829_v47 = vpop.f32.mrb[141].mxu0  ;;  %v16842_v9 = vpop.eup %16841  ;;  %16861 = vtanh.f32 %v5759_v54  ;;  %v5905_v30 = vadd.f32 %v5904_v15, %v18392_v4  ;;  %14040 = vmatmul.mubr.msk.f32.vlgmr.msra.gmra.mrb[164].mxu0 %vm2269_vm2, %v18421_v51  ;;  %v15628_v34 = vpack.c.bf16 %v16840_v39, %v16832_v7 }
 0x2f2   :  { %v5830_v3 = vadd.f32 %v5829_v47, %v18392_v4  ;;  %v5906_v27 = vpop.f32.mrb[141].mxu1  ;;  %v16844_v48 = vpop.eup %16843  ;;  %16863 = vtanh.f32 %v5828_v22  ;;  %14041 = vmatmul.mubr.msk.f32.vlgmr.msra.gmra.mrb[164].mxu1 %vm2269_vm2, %v18421_v51  ;;  %v15632_v10 = vpack.c.bf16 %v16842_v9, %v16834_v50  ;;  %7456 = vmatprep.mubr.f32.mxu0 %v22138_v13 }
 0x2f3   :  { %v5907_v2 = vadd.f32 %v5906_v27, %v18392_v4  ;;  %v16846_v12 = vpop.eup %16845  ;;  %16865 = vtanh.f32 %v5905_v30  ;;  %v5833_v46 = vpop.f32.mrb[142].mxu0  ;;  %v15626_v38 = vpack.c.bf16 %v16844_v48, %v16836_v23  ;;  %7527 = vmatprep.mubr.f32.mxu1 %v22138_v13 }
 0x2f4   :  { %v16848_v54 = vpop.eup %16847  ;;  %16867 = vtanh.f32 %v5830_v3  ;;  %v5834_v7 = vadd.f32 %v5833_v46, %v18398_v53  ;;  %v5910_v45 = vpop.f32.mrb[142].mxu1  ;;  %v15630_v22 = vpack.c.bf16 %v16846_v12, %v16838_v8 }
 0x2f5   :  { %v5835_v39 = vpop.f32.mrb[143].mxu0  ;;  %v16850_v15 = vpop.eup %16849  ;;  %16869 = vtanh.f32 %v5907_v2  ;;  %v5911_v47 = vadd.f32 %v5910_v45, %v18398_v53  ;;  %15627 = vmatprep.subr.bf16.mxu0 %v15626_v38 }
 0x2f6   :  { %v5836_v50 = vadd.f32 %v5835_v39, %v18398_v53  ;;  %v5912_v9 = vpop.f32.mrb[143].mxu1  ;;  %v16852_v30 = vpop.eup %16851  ;;  %16871 = vtanh.f32 %v5834_v7  ;;  %15631 = vmatprep.subr.bf16.mxu1 %v15630_v22  ;;  %15629 = vmatpush1.bf16.msra.mxu0 %v15628_v34 }
 0x2f7   :  { %v5913_v23 = vadd.f32 %v5912_v9, %v18398_v53  ;;  %v16854_v3 = vpop.eup %16853  ;;  %16873 = vtanh.f32 %v5911_v47  ;;  %15633 = vmatpush1.bf16.msra.mxu1 %v15632_v10  ;;  %v5981_v27 = vpop.f32.mrb[144].mxu0 }
 0x2f8   :  { %v16856_v48 = vpop.eup %16855  ;;  %16875 = vtanh.f32 %v5836_v50  ;;  %v5982_v8 = vadd.f32 %v5981_v27, %v18392_v4  ;;  %v6058_v2 = vpop.f32.mrb[144].mxu1 }
 0x2f9   :  { %v5983_v12 = vpop.f32.mrb[145].mxu0  ;;  %v16858_v46 = vpop.eup %16857  ;;  %16877 = vtanh.f32 %v5913_v23  ;;  %v6059_v38 = vadd.f32 %v6058_v2, %v18392_v4  ;;  %14042 = vmatmul.mubr.msk.f32.vlgmr.msra.gmra.mrb[166].mxu0 %vm2269_vm2, %v18421_v51  ;;  %v15636_v34 = vpack.c.bf16 %v16856_v48, %v16848_v54 }
 0x2fa   :  { %v5984_v7 = vadd.f32 %v5983_v12, %v18392_v4  ;;  %v6060_v45 = vpop.f32.mrb[145].mxu1  ;;  %v16860_v39 = vpop.eup %16859  ;;  %16879 = vtanh.f32 %v5982_v8  ;;  %14043 = vmatmul.mubr.msk.f32.vlgmr.msra.gmra.mrb[166].mxu1 %vm2269_vm2, %v18421_v51  ;;  %v15640_v22 = vpack.c.bf16 %v16858_v46, %v16850_v15  ;;  %7598 = vmatprep.mubr.f32.mxu0 %v22138_v13 }
 0x2fb   :  { %v6061_v10 = vadd.f32 %v6060_v45, %v18392_v4  ;;  %v16862_v47 = vpop.eup %16861  ;;  %16881 = vtanh.f32 %v6059_v38  ;;  %v5987_v50 = vpop.f32.mrb[146].mxu0  ;;  %v15634_v9 = vpack.c.bf16 %v16860_v39, %v16852_v30  ;;  %7669 = vmatprep.mubr.f32.mxu1 %v22138_v13 }
 0x2fc   :  { %v16864_v23 = vpop.eup %16863  ;;  %16883 = vtanh.f32 %v5984_v7  ;;  %v5988_v54 = vadd.f32 %v5987_v50, %v18398_v53  ;;  %v6064_v27 = vpop.f32.mrb[146].mxu1  ;;  %v15638_v8 = vpack.c.bf16 %v16862_v47, %v16854_v3 }
 0x2fd   :  { %v5989_v48 = vpop.f32.mrb[147].mxu0  ;;  %v16866_v2 = vpop.eup %16865  ;;  %16885 = vtanh.f32 %v6061_v10  ;;  %v6065_v12 = vadd.f32 %v6064_v27, %v18398_v53  ;;  %15635 = vmatprep.subr.bf16.mxu0 %v15634_v9 }
 0x2fe   :  { %v5990_v15 = vadd.f32 %v5989_v48, %v18398_v53  ;;  %v6066_v46 = vpop.f32.mrb[147].mxu1  ;;  %v16868_v38 = vpop.eup %16867  ;;  %16887 = vtanh.f32 %v5988_v54  ;;  %15639 = vmatprep.subr.bf16.mxu1 %v15638_v8  ;;  %15637 = vmatpush1.bf16.msra.mxu0 %v15636_v34 }
 0x2ff   :  { %v6067_v30 = vadd.f32 %v6066_v46, %v18398_v53  ;;  %v16870_v7 = vpop.eup %16869  ;;  %16889 = vtanh.f32 %v6065_v12  ;;  %15641 = vmatpush1.bf16.msra.mxu1 %v15640_v22  ;;  %v6135_v45 = vpop.f32.mrb[148].mxu0 }
 0x300   :  { %v16872_v39 = vpop.eup %16871  ;;  %16891 = vtanh.f32 %v5990_v15  ;;  %v6136_v3 = vadd.f32 %v6135_v45, %v18392_v4  ;;  %v6137_v10 = vpop.f32.mrb[149].mxu0 }
 0x301   :  { %v16874_v47 = vpop.eup %16873  ;;  %16893 = vtanh.f32 %v6067_v30  ;;  %v6138_v50 = vadd.f32 %v6137_v10, %v18392_v4  ;;  %14044 = vmatmul.mubr.msk.f32.vlgmr.msra.gmra.mrb[168].mxu0 %vm2269_vm2, %v18421_v51  ;;  %v15644_v9 = vpack.c.bf16 %v16872_v39, %v16864_v23 }
 0x302   :  { %v16876_v54 = vpop.eup %16875  ;;  %14045 = vmatmul.mubr.msk.f32.vlgmr.msra.gmra.mrb[168].mxu1 %vm2269_vm2, %v18421_v51  ;;  %v15648_v34 = vpack.c.bf16 %v16874_v47, %v16866_v2  ;;  %7740 = vmatprep.mubr.f32.mxu0 %v22138_v13  ;;  %16895 = vtanh.f32 %v6136_v3 }
 0x303   :  { %v16878_v22 = vpop.eup %16877  ;;  %v6141_v27 = vpop.f32.mrb[150].mxu0  ;;  %v15642_v48 = vpack.c.bf16 %v16876_v54, %v16868_v38  ;;  %7811 = vmatprep.mubr.f32.mxu1 %v22138_v13  ;;  %16897 = vtanh.f32 %v6138_v50  ;;  %v8647_v50 = vld [vmem:[%s22036_s3 + $0x80] sm:$0xff] }
 0x304   :  { %v16880_v8 = vpop.eup %16879  ;;  %v6142_v4 = vadd.f32 %v6141_v27, %v18398_v53  ;;  %v6143_v12 = vpop.f32.mrb[151].mxu0  ;;  %v15646_v15 = vpack.c.bf16 %v16878_v22, %v16870_v7  ;;  %v8632_v22 = vld [vmem:[%s22036_s3 + $0x8] sm:$0xff] }
 0x305   :  { %v16882_v46 = vpop.eup %16881  ;;  %v6144_v23 = vadd.f32 %v6143_v12, %v18398_v53  ;;  %15643 = vmatprep.subr.bf16.mxu0 %v15642_v48  ;;  %v8649_v12 = vld [vmem:[%s22036_s3 + $0x90] sm:$0xff] }
 0x306   :  { %v16884_v30 = vpop.eup %16883  ;;  %16899 = vtanh.f32 %v6142_v4  ;;  %15647 = vmatprep.subr.bf16.mxu1 %v15646_v15  ;;  %15645 = vmatpush1.bf16.msra.mxu0 %v15644_v9  ;;  %v8648_v9 = vld [vmem:[%s22036_s3 + $0x88] sm:$0xff]  ;;  %v8650_v15 = vld [vmem:[%s22036_s3 + $0x98] sm:$0xff] }
 0x307   :  { %v16886_v2 = vpop.eup %16885  ;;  %16901 = vtanh.f32 %v6144_v23  ;;  %15649 = vmatpush1.bf16.msra.mxu1 %v15648_v34  ;;  %v15662_v54 = vpack.c.bf16 %v8648_v9, %v8647_v50  ;;  %v8631_v34 = vld [vmem:[%s22036_s3] sm:$0xff]  ;;  %v8652_v9 = vld [vmem:[%s22036_s3 + $0xa8] sm:$0xff] }
 0x308   :  { %v16888_v38 = vpop.eup %16887  ;;  %v8651_v50 = vld [vmem:[%s22036_s3 + $0xa0] sm:$0xff] }
 0x309   :  { %v16890_v45 = vpop.eup %16889  ;;  %14046 = vmatmul.mubr.msk.f32.vlgmr.msra.gmra.mrb[170].mxu0 %vm2269_vm2, %v18421_v51  ;;  %v15652_v39 = vpack.c.bf16 %v16888_v38, %v16880_v8  ;;  %v15664_v8 = vpack.c.bf16 %v8632_v22, %v8631_v34  ;;  %v8680_v38 = vld [vmem:[%s22036_s3 + $0x188] sm:$0xff]  ;;  %v15670_v22 = vpack.c.bf16 %v8652_v9, %v8651_v50  ;;  %v8655_v9 = vld [vmem:[%s22036_s3 + $0xc0] sm:$0xff] }
 0x30a   :  { %v16892_v3 = vpop.eup %16891  ;;  %14047 = vmatmul.mubr.msk.f32.vlgmr.msra.gmra.mrb[170].mxu1 %vm2269_vm2, %v18421_v51  ;;  %v15656_v7 = vpack.c.bf16 %v16890_v45, %v16882_v46  ;;  %7882 = vmatprep.mubr.f32.mxu0 %v22138_v13  ;;  %v8679_v46 = vld [vmem:[%s22036_s3 + $0x180] sm:$0xff]  ;;  %v8633_v45 = vld [vmem:[%s22036_s3 + $0x10] sm:$0xff] }
 0x30b   :  { %v16894_v53 = vpop.eup %16893  ;;  %v15650_v10 = vpack.c.bf16 %v16892_v3, %v16884_v30  ;;  %7953 = vmatprep.mubr.f32.mxu1 %v22138_v13 }
 0x30c   :  { %v15654_v47 = vpack.c.bf16 %v16894_v53, %v16886_v2  ;;  %v16896_v27 = vpop.eup %16895  ;;  %v15666_v2 = vpack.c.bf16 %v8650_v15, %v8649_v12  ;;  %v8663_v53 = vld [vmem:[%s22036_s3 + $0x100] sm:$0xff]  ;;  %v8665_v12 = vld [vmem:[%s22036_s3 + $0x110] sm:$0xff]  ;;  %v8666_v15 = vld [vmem:[%s22036_s3 + $0x118] sm:$0xff] }
 0x30d   :  { %15651 = vmatprep.subr.bf16.mxu0 %v15650_v10  ;;  %v16898_v48 = vpop.eup %16897  ;;  %v8664_v10 = vld [vmem:[%s22036_s3 + $0x108] sm:$0xff] }
 0x30e   :  { %15655 = vmatprep.subr.bf16.mxu1 %v15654_v47  ;;  %15653 = vmatpush1.bf16.msra.mxu0 %v15652_v39  ;;  %v8634_v39 = vld [vmem:[%s22036_s3 + $0x18] sm:$0xff]  ;;  %v15696_v34 = vpack.c.bf16 %v8664_v10, %v8663_v53  ;;  %v8667_v53 = vld [vmem:[%s22036_s3 + $0x120] sm:$0xff]  ;;  %v8668_v10 = vld [vmem:[%s22036_s3 + $0x128] sm:$0xff] }
 0x30f   :  { %15657 = vmatpush1.bf16.msra.mxu1 %v15656_v7  ;;  %v15694_v7 = vpack.c.bf16 %v8680_v38, %v8679_v46  ;;  %v15668_v47 = vpack.c.bf16 %v8634_v39, %v8633_v45  ;;  %v15700_v38 = vpack.c.bf16 %v8666_v15, %v8665_v12  ;;  %v8637_v39 = vld [vmem:[%s22036_s3 + $0x30] sm:$0xff]  ;;  %v15704_v50 = vpack.c.bf16 %v8668_v10, %v8667_v53  ;;  %v8671_v10 = vld [vmem:[%s22036_s3 + $0x140] sm:$0xff] }
 0x310   :  { %v16900_v4 = vpop.eup %16899  ;;  %15663 = vmatprep.subr.bf16.mxu1 %v15662_v54  ;;  %v8681_v54 = vld [vmem:[%s22036_s3 + $0x190] sm:$0xff] }
 0x311   :  { %v16902_v23 = vpop.eup %16901  ;;  %14048 = vmatmul.mubr.msk.f32.vlgmr.msra.gmra.mrb[172].mxu0 %vm2269_vm2, %v18421_v51  ;;  %v15660_v30 = vpack.c.bf16 %v16900_v4, %v16896_v27  ;;  %v8682_v27 = vld [vmem:[%s22036_s3 + $0x198] sm:$0xff]  ;;  %v8669_v15 = vld [vmem:[%s22036_s3 + $0x130] sm:$0xff] }
 0x312   :  { %14049 = vmatmul.mubr.msk.f32.vlgmr.msra.gmra.mrb[172].mxu1 %vm2269_vm2, %v18421_v51  ;;  %v15658_v3 = vpack.c.bf16 %v16902_v23, %v16898_v48  ;;  %8024 = vmatprep.mubr.f32.mxu0 %v22138_v13  ;;  %v8635_v48 = vld [vmem:[%s22036_s3 + $0x20] sm:$0xff]  ;;  %v15698_v4 = vpack.c.bf16 %v8682_v27, %v8681_v54  ;;  %v8653_v23 = vld [vmem:[%s22036_s3 + $0xb0] sm:$0xff]  ;;  %v8656_v54 = vld [vmem:[%s22036_s3 + $0xc8] sm:$0xff] }
 0x313   :  { %15665 = vmatpush3.bf16.msra.mxu1 %v15664_v8  ;;  %v8636_v8 = vld [vmem:[%s22036_s3 + $0x28] sm:$0xff]  ;;  %v8686_v27 = vld [vmem:[%s22036_s3 + $0x1b8] sm:$0xff] }
 0x314   :  { %15659 = vmatprep.subr.bf16.mxu0 %v15658_v3  ;;  %15667 = vmatprep.subr.bf16.mxu1 %v15666_v2  ;;  %v15672_v46 = vpack.c.bf16 %v8636_v8, %v8635_v48  ;;  %v8683_v2 = vld [vmem:[%s22036_s3 + $0x1a0] sm:$0xff]  ;;  %v8638_v3 = vld [vmem:[%s22036_s3 + $0x38] sm:$0xff]  ;;  %v8640_v8 = vld [vmem:[%s22036_s3 + $0x48] sm:$0xff] }
 0x315   :  { %15661 = vmatpush1.bf16.msra.mxu0 %v15660_v30  ;;  %v8654_v30 = vld [vmem:[%s22036_s3 + $0xb8] sm:$0xff]  ;;  %v8639_v48 = vld [vmem:[%s22036_s3 + $0x40] sm:$0xff] }
 0x316   :  { %15695 = vmatprep.subr.bf16.mxu0 %v15694_v7  ;;  %v15674_v45 = vpack.c.bf16 %v8654_v30, %v8653_v23  ;;  %v15680_v12 = vpack.c.bf16 %v8640_v8, %v8639_v48  ;;  %v8657_v30 = vld [vmem:[%s22036_s3 + $0xd0] sm:$0xff]  ;;  %v8643_v48 = vld [vmem:[%s22036_s3 + $0x60] sm:$0xff]  ;;  %v8644_v8 = vld [vmem:[%s22036_s3 + $0x68] sm:$0xff] }
 0x317   :  { %15669 = vmatpush3.bf16.msra.mxu1 %v15668_v47  ;;  %v15676_v47 = vpack.c.bf16 %v8638_v3, %v8637_v39  ;;  %v8641_v39 = vld [vmem:[%s22036_s3 + $0x50] sm:$0xff]  ;;  %v8642_v3 = vld [vmem:[%s22036_s3 + $0x58] sm:$0xff] }
 0x318   :  { %14050 = vmatmul.mubr.msk.f32.vlgmr.msra.gmra.mrb[174].mxu0 %vm2269_vm2, %v18421_v51  ;;  %15671 = vmatprep.subr.bf16.mxu1 %v15670_v22  ;;  %v8684_v51 = vld [vmem:[%s22036_s3 + $0x1a8] sm:$0xff]  ;;  %v15678_v22 = vpack.c.bf16 %v8656_v54, %v8655_v9  ;;  %v15684_v53 = vpack.c.bf16 %v8642_v3, %v8641_v39  ;;  %v8659_v9 = vld [vmem:[%s22036_s3 + $0xe0] sm:$0xff]  ;;  %v8645_v39 = vld [vmem:[%s22036_s3 + $0x70] sm:$0xff] }
 0x319   :  { %15697 = vmatpush3.bf16.msra.mxu0 %v15696_v34  ;;  %v15702_v7 = vpack.c.bf16 %v8684_v51, %v8683_v2  ;;  %v8685_v34 = vld [vmem:[%s22036_s3 + $0x1b0] sm:$0xff]  ;;  %v8658_v2 = vld [vmem:[%s22036_s3 + $0xd8] sm:$0xff]  ;;  %v8688_v51 = vld [vmem:[%s22036_s3 + $0x1c8] sm:$0xff] }
 0x31a   :  { %15699 = vmatprep.subr.bf16.mxu0 %v15698_v4  ;;  %v15706_v4 = vpack.c.bf16 %v8686_v27, %v8685_v34  ;;  %v8660_v54 = vld [vmem:[%s22036_s3 + $0xe8] sm:$0xff]  ;;  %v8689_v34 = vld [vmem:[%s22036_s3 + $0x1d0] sm:$0xff]  ;;  %v8690_v27 = vld [vmem:[%s22036_s3 + $0x1d8] sm:$0xff] }
 0x31b   :  { %15673 = vmatpush3.bf16.msra.mxu1 %v15672_v46  ;;  %v8670_v46 = vld [vmem:[%s22036_s3 + $0x138] sm:$0xff] }
 0x31c   :  { %15675 = vmatprep.subr.bf16.mxu1 %v15674_v45  ;;  %v15708_v23 = vpack.c.bf16 %v8670_v46, %v8669_v15  ;;  %v15682_v45 = vpack.c.bf16 %v8658_v2, %v8657_v30  ;;  %v8673_v15 = vld [vmem:[%s22036_s3 + $0x150] sm:$0xff]  ;;  %v8674_v46 = vld [vmem:[%s22036_s3 + $0x158] sm:$0xff] }
 0x31d   :  { %15701 = vmatpush3.bf16.msra.mxu0 %v15700_v38  ;;  %v8687_v38 = vld [vmem:[%s22036_s3 + $0x1c0] sm:$0xff]  ;;  %v8661_v30 = vld [vmem:[%s22036_s3 + $0xf0] sm:$0xff]  ;;  %v8662_v2 = vld [vmem:[%s22036_s3 + $0xf8] sm:$0xff] }
 0x31e   :  { %15703 = vmatprep.subr.bf16.mxu0 %v15702_v7  ;;  %v15710_v7 = vpack.c.bf16 %v8688_v51, %v8687_v38  ;;  %v8691_v38 = vld [vmem:[%s22036_s3 + $0x1e0] sm:$0xff]  ;;  %v8692_v51 = vld [vmem:[%s22036_s3 + $0x1e8] sm:$0xff]  ;;  %v8646_v3 = vld [vmem:[%s22036_s3 + $0x78] sm:$0xff] }
 0x31f   :  { %15677 = vmatpush3.bf16.msra.mxu1 %v15676_v47  ;;  %v8672_v47 = vld [vmem:[%s22036_s3 + $0x148] sm:$0xff] }
 0x320   :  { %15679 = vmatprep.subr.bf16.mxu1 %v15678_v22  ;;  %v15686_v22 = vpack.c.bf16 %v8660_v54, %v8659_v9  ;;  %v8693_v9 = vld [vmem:[%s22036_s3 + $0x1f0] sm:$0xff]  ;;  %v8694_v54 = vld [vmem:[%s22036_s3 + $0x1f8] sm:$0xff] }
 0x321   :  { %15705 = vmatpush3.bf16.msra.mxu0 %v15704_v50  ;;  %v15712_v50 = vpack.c.bf16 %v8672_v47, %v8671_v10  ;;  %v8675_v10 = vld [vmem:[%s22036_s3 + $0x160] sm:$0xff]  ;;  %v8676_v47 = vld [vmem:[%s22036_s3 + $0x168] sm:$0xff] }
 0x322   :  { %15707 = vmatprep.subr.bf16.mxu0 %v15706_v4  ;;  %v15714_v4 = vpack.c.bf16 %v8690_v27, %v8689_v34  ;;  %v8711_v34 = vld [vmem:[%s22036_s3 + $0x280] sm:$0xff]  ;;  %v8712_v27 = vld [vmem:[%s22036_s3 + $0x288] sm:$0xff] }
 0x323   :  { %15681 = vmatpush3.bf16.msra.mxu1 %v15680_v12  ;;  %v15688_v12 = vpack.c.bf16 %v8644_v8, %v8643_v48  ;;  %v8677_v48 = vld [vmem:[%s22036_s3 + $0x170] sm:$0xff]  ;;  %v8678_v8 = vld [vmem:[%s22036_s3 + $0x178] sm:$0xff] }
 0x324   :  { %15683 = vmatprep.subr.bf16.mxu1 %v15682_v45  ;;  %v15690_v45 = vpack.c.bf16 %v8662_v2, %v8661_v30  ;;  %v18778_v30 = vpop.permute.xlu0 %6250 }
 0x325   :  { %15709 = vmatpush3.bf16.msra.mxu0 %v15708_v23  ;;  %v15716_v23 = vpack.c.bf16 %v8674_v46, %v8673_v15  ;;  %v8743_v15 = vld [vmem:[%s22036_s3 + $0x380] sm:$0xff]  ;;  %v8744_v46 = vld [vmem:[%s22036_s3 + $0x388] sm:$0xff] }
 0x326   :  { %15711 = vmatprep.subr.bf16.mxu0 %v15710_v7  ;;  %v15718_v7 = vpack.c.bf16 %v8692_v51, %v8691_v38 }
 0x327   :  { %15685 = vmatpush3.bf16.msra.mxu1 %v15684_v53  ;;  %v15692_v53 = vpack.c.bf16 %v8646_v3, %v8645_v39 }
 0x328   :  { %15687 = vmatprep.subr.bf16.mxu1 %v15686_v22  ;;  %v15722_v22 = vpack.c.bf16 %v8694_v54, %v8693_v9 }
 0x329   :  { %15713 = vmatpush3.bf16.msra.mxu0 %v15712_v50  ;;  %v15720_v50 = vpack.c.bf16 %v8676_v47, %v8675_v10 }
 0x32a   :  { %15715 = vmatprep.subr.bf16.mxu0 %v15714_v4  ;;  %v15726_v4 = vpack.c.bf16 %v8712_v27, %v8711_v34 }
 0x32b   :  { %15689 = vmatpush3.bf16.msra.mxu1 %v15688_v12  ;;  %v15724_v12 = vpack.c.bf16 %v8678_v8, %v8677_v48 }
 0x32c   :  { %15691 = vmatprep.subr.bf16.mxu1 %v15690_v45 }
 0x32d   :  { %15717 = vmatpush3.bf16.msra.mxu0 %v15716_v23  ;;  %v15758_v23 = vpack.c.bf16 %v8744_v46, %v8743_v15 }
 0x32e   :  { %15719 = vmatprep.subr.bf16.mxu0 %v15718_v7 }
 0x32f   :  { %15693 = vmatpush3.bf16.msra.mxu1 %v15692_v53 }
 0x330   :  { %15727 = vmatprep.subr.bf16.mxu1 %v15726_v4 }
 0x331   :  { %15721 = vmatpush3.bf16.msra.mxu0 %v15720_v50 }
 0x332   :  { %15723 = vmatprep.subr.bf16.mxu0 %v15722_v22 }
 0x335   :  { %15725 = vmatpush3.bf16.msra.mxu0 %v15724_v12 }
 0x336   :  { %15759 = vmatprep.subr.bf16.mxu0 %v15758_v23 }
 0x38a   :  { %v6322_v2 = vpop.f32.mrb[148].mxu1 }
 0x38b   :  { %v6323_v38 = vadd.f32 %v6322_v2, %v18778_v30  ;;  %v6324_v45 = vpop.f32.mrb[149].mxu1 }
 0x38c   :  { %v6325_v51 = vadd.f32 %v6324_v45, %v18778_v30 }
 0x38d   :  { %v14051_v39 = vmul.f32 -1.442695, %v6323_v38  ;;  %v22108_v38 = vlaneseq }
 0x38e   :  { %v14052_v3 = vmul.f32 -1.442695, %v6325_v51  ;;  %v6393_v7 = vpop.f32.mrb[150].mxu1 }
 0x38f   :  { %16903 = vpow2.f32 %v14051_v39  ;;  %v6394_v53 = vadd.f32 %v6393_v7, %v18778_v30  ;;  %v6395_v10 = vpop.f32.mrb[151].mxu1 }
 0x390   :  { %16905 = vpow2.f32 %v14052_v3  ;;  %v6396_v47 = vadd.f32 %v6395_v10, %v18778_v30 }
 0x391   :  { %v14053_v50 = vmul.f32 -1.442695, %v6394_v53 }
 0x392   :  { %v14054_v9 = vmul.f32 -1.442695, %v6396_v47 }
 0x393   :  { %16907 = vpow2.f32 %v14053_v50  ;;  %v18791_v50 = vshrl.u32 %v22108_v38, 7 }
 0x394   :  { %v6464_v54 = vpop.f32.mrb[152].mxu0  ;;  %16909 = vpow2.f32 %v14054_v9 }
 0x395   :  { %v6535_v34 = vpop.f32.mrb[152].mxu1  ;;  %v6466_v22 = vpop.f32.mrb[153].mxu0  ;;  %22191 = vst [vmem:[#allocation77_spill] sm:$0xff] %v18791_v50  ;;  %v6465_v9 = vadd.f32 %v6464_v54, %v18778_v30  ;;  %v8695_v54 = vld [vmem:[%s22036_s3 + $0x200] sm:$0xff] }
 0x396   :  { %v6467_v27 = vadd.f32 %v6466_v22, %v18778_v30  ;;  %v6537_v48 = vpop.f32.mrb[153].mxu1  ;;  %v18795_v22 = vsub.s32 0, %v18791_v50 }
 0x397   :  { %v6538_v8 = vadd.f32 %v6537_v48, %v18778_v30 }
 0x398   :  { %v14056_v4 = vmul.f32 -1.442695, %v6467_v27 }
 0x399   :  { %v14058_v12 = vmul.f32 -1.442695, %v6538_v8  ;;  %v16904_v15 = vpop.eup %16903 }
 0x39a   :  { %v16906_v46 = vpop.eup %16905  ;;  %v8181_v23 = vadd.f32 1.0, %v16904_v15  ;;  %16911 = vpow2.f32 %v14056_v4  ;;  %v14055_v4 = vmul.f32 -1.442695, %v6465_v9 }
 0x39b   :  { %v8182_v2 = vadd.f32 1.0, %v16906_v46  ;;  %16913 = vpow2.f32 %v14058_v12 }
 0x39c   :  { %16915 = vrcp.f32 %v8181_v23  ;;  %v18786_v45 = vpop.f32.mrb[154].mxu0 }
 0x39d   :  { %v16908_v51 = vpop.eup %16907  ;;  %16917 = vrcp.f32 %v8182_v2  ;;  %v18788_v39 = vpop.f32.mrb[154].mxu1  ;;  %v6536_v2 = vadd.f32 %v6535_v34, %v18778_v30  ;;  %v8713_v34 = vld [vmem:[%s22036_s3 + $0x290] sm:$0xff] }
 0x39e   :  { %v6608_v3 = vpop.f32.mrb[155].mxu0  ;;  %v16910_v7 = vpop.eup %16909  ;;  %v8183_v53 = vadd.f32 1.0, %v16908_v51 }
 0x39f   :  { %v6679_v10 = vpop.f32.mrb[155].mxu1  ;;  %v8184_v47 = vadd.f32 1.0, %v16910_v7 }
 0x3a0   :  { %16919 = vrcp.f32 %v8183_v53 }
 0x3a1   :  { %16921 = vrcp.f32 %v8184_v47  ;;  %v6609_v47 = vadd.f32 %v6608_v3, %v18778_v30  ;;  %v14057_v3 = vmul.f32 -1.442695, %v6536_v2  ;;  %v6680_v2 = vadd.f32 %v6679_v10, %v18778_v30 }
 0x3a4   :  { %v16912_v27 = vpop.eup %16911  ;;  %v18797_v48 = vpop.f32.mrb[156].mxu0 }
 0x3a5   :  { %v16914_v8 = vpop.eup %16913  ;;  %v8186_v12 = vadd.f32 1.0, %v16912_v27  ;;  %v18799_v15 = vpop.f32.mrb[156].mxu1  ;;  %v8696_v27 = vld [vmem:[%s22036_s3 + $0x208] sm:$0xff] }
 0x3a6   :  { %v18801_v46 = vpop.f32.mrb[157].mxu0  ;;  %v16916_v23 = vpop.eup %16915  ;;  %v8188_v51 = vadd.f32 1.0, %v16914_v8  ;;  %v8714_v8 = vld [vmem:[%s22036_s3 + $0x298] sm:$0xff]  ;;  %v15728_v50 = vpack.c.bf16 %v8696_v27, %v8695_v54  ;;  %v8728_v27 = vld [vmem:[%s22036_s3 + $0x308] sm:$0xff] }
 0x3a7   :  { %v18804_v7 = vpop.f32.mrb[157].mxu1  ;;  %v16918_v53 = vpop.eup %16917  ;;  %16923 = vrcp.f32 %v8186_v12  ;;  %v8334_v9 = vrot.slane %v16916_v23, %v18795_v22  ;;  %v15730_v13 = vpack.c.bf16 %v8714_v8, %v8713_v34  ;;  %v8715_v34 = vld [vmem:[%s22036_s3 + $0x2a0] sm:$0xff]  ;;  %v8716_v8 = vld [vmem:[%s22036_s3 + $0x2a8] sm:$0xff] }
 0x3a8   :  { %16925 = vrcp.f32 %v8188_v51  ;;  %v8338_v38 = vrot.slane %v16918_v53, %v18795_v22  ;;  %v8727_v51 = vld [vmem:[%s22036_s3 + $0x300] sm:$0xff] }
 0x3a9   :  { %16927 = vpow2.f32 %v14055_v4  ;;  %v14060_v4 = vmul.f32 -1.442695, %v6609_v47  ;;  %v8581_v5 = vmul.f32 %v8334_v9, %v17833_v14  ;;  %v8717_v14 = vld [vmem:[%s22036_s3 + $0x2b0] sm:$0xff] }
 0x3aa   :  { %v16920_v12 = vpop.eup %16919  ;;  %v8532_v23 = vmul.f32 %v8338_v38, %v17839_v16  ;;  %v8531_v16 = vmul.f32 %v8334_v9, %v17851_v20  ;;  %v8582_v10 = vmul.f32 %v8338_v38, %v17845_v18  ;;  %16929 = vpow2.f32 %v14057_v3 }
 0x3ab   :  { %v16922_v53 = vpop.eup %16921  ;;  %v8342_v54 = vrot.slane %v16920_v12, %v18795_v22  ;;  %v15760_v38 = vpack.c.bf16 %v8728_v27, %v8727_v51  ;;  %16931 = vpow2.f32 %v14060_v4  ;;  %v15762_v3 = vpack.c.bf16 %v8746_v6, %v8745_v11  ;;  %v8718_v6 = vld [vmem:[%s22036_s3 + $0x2b8] sm:$0xff]  ;;  %v8747_v11 = vld [vmem:[%s22036_s3 + $0x3a0] sm:$0xff]  ;;  %v8748_v51 = vld [vmem:[%s22036_s3 + $0x3a8] sm:$0xff] }
 0x3ac   :  { %v18843_v60 = vpop.f32.mrb[158].mxu0  ;;  %9495 = vmatprep.mubr.f32.mxu1 %v8532_v23  ;;  %v8346_v20 = vrot.slane %v16922_v53, %v18795_v22  ;;  %v15734_v53 = vpack.c.bf16 %v8716_v8, %v8715_v34 }
 0x3ad   :  { %v18847_v47 = vpop.f32.mrb[158].mxu1  ;;  %v18849_v12 = vpop.f32.mrb[159].mxu0  ;;  %9496 = vmatmul.mubr.f32.vlgmr.msra.gmra.mrb[174].mxu1 %v8531_v16  ;;  %v14062_v16 = vmul.f32 -1.442695, %v6680_v2  ;;  %v8533_v49 = vmul.f32 %v8342_v54, %v17854_v21  ;;  %v8583_v34 = vmul.f32 %v8342_v54, %v17836_v52  ;;  %v15738_v54 = vpack.c.bf16 %v8718_v6, %v8717_v14 }
 0x3ae   :  { %v18857_v23 = vpop.f32.mrb[159].mxu1  ;;  %15729 = vmatpush3.bf16.msra.mxu1 %v15728_v50  ;;  %9500 = vmatprep.mubr.f32.mxu1 %v8582_v10  ;;  %v8534_v18 = vmul.f32 %v8346_v20, %v17842_v17  ;;  %v8700_v50 = vld [vmem:[%s22036_s3 + $0x228] sm:$0xff]  ;;  %v8729_v17 = vld [vmem:[%s22036_s3 + $0x310] sm:$0xff]  ;;  %v8584_v9 = vmul.f32 %v8346_v20, %v17848_v19 }
 0x3af   :  { %15731 = vmatprep.subr.bf16.mxu1 %v15730_v13  ;;  %v8730_v13 = vld [vmem:[%s22036_s3 + $0x318] sm:$0xff]  ;;  %v15736_v27 = vpack.c.bf16 %v8700_v50, %v8699_v29  ;;  %16933 = vpow2.f32 %v14062_v16  ;;  %v8701_v20 = vld [vmem:[%s22036_s3 + $0x230] sm:$0xff]  ;;  %v8731_v29 = vld [vmem:[%s22036_s3 + $0x320] sm:$0xff] }
 0x3b0   :  { %9570 = vmatprep.mubr.f32.mxu0 %v8534_v18  ;;  %v15764_v8 = vpack.c.bf16 %v8730_v13, %v8729_v17  ;;  %v8719_v16 = vld [vmem:[%s22036_s3 + $0x2c0] sm:$0xff]  ;;  %v8750_v17 = vld [vmem:[%s22036_s3 + $0x3b8] sm:$0xff] }
 0x3b1   :  { %v16924_v21 = vpop.eup %16923  ;;  %9501 = vmatmul.mubr.f32.gmra.mrb[176].mxu1 %v8581_v5  ;;  %9571 = vmatmul.mubr.f32.vlgmr.msra.gmra.mrb[176].mxu0 %v8533_v49  ;;  %v8720_v5 = vld [vmem:[%s22036_s3 + $0x2c8] sm:$0xff] }
 0x3b2   :  { %v16926_v4 = vpop.eup %16925  ;;  %15733 = vmatpush3.bf16.msra.mxu1 %v15732_v1  ;;  %15761 = vmatpush3.bf16.msra.mxu0 %v15760_v38  ;;  %v18888_v2 = vrot.slane %v16924_v21, %v18795_v22  ;;  %v8702_v1 = vld [vmem:[%s22036_s3 + $0x238] sm:$0xff]  ;;  %v15766_v38 = vpack.c.bf16 %v8748_v51, %v8747_v11  ;;  %v15742_v6 = vpack.c.bf16 %v8720_v5, %v8719_v16  ;;  %v8704_v11 = vld [vmem:[%s22036_s3 + $0x248] sm:$0xff]  ;;  %v8733_v51 = vld [vmem:[%s22036_s3 + $0x330] sm:$0xff] }
 0x3b3   :  { %v16928_v19 = vpop.eup %16927  ;;  %9575 = vmatprep.mubr.f32.mxu0 %v8584_v9  ;;  %15735 = vmatprep.subr.bf16.mxu1 %v15734_v53  ;;  %v18892_v10 = vrot.slane %v16926_v4, %v18795_v22  ;;  %v8732_v53 = vld [vmem:[%s22036_s3 + $0x328] sm:$0xff]  ;;  %v15740_v21 = vpack.c.bf16 %v8702_v1, %v8701_v20  ;;  %v8751_v1 = vld [vmem:[%s22036_s3 + $0x3c0] sm:$0xff]  ;;  %v8705_v16 = vld [vmem:[%s22036_s3 + $0x250] sm:$0xff] }
 0x3b4   :  { %v18903_v18 = vpop.f32.mrb[160].mxu0  ;;  %v8536_v52 = vmul.f32 %v18888_v2, %v17877_v35  ;;  %15763 = vmatprep.subr.bf16.mxu0 %v15762_v3  ;;  %v8749_v3 = vld [vmem:[%s22036_s3 + $0x3b0] sm:$0xff]  ;;  %v8185_v13 = vadd.f32 1.0, %v16928_v19  ;;  %v15768_v9 = vpack.c.bf16 %v8732_v53, %v8731_v29  ;;  %v16930_v4 = vpop.eup %16929  ;;  %v8734_v19 = vld [vmem:[%s22036_s3 + $0x338] sm:$0xff]  ;;  %v8752_v29 = vld [vmem:[%s22036_s3 + $0x3c8] sm:$0xff] }
 0x3b5   :  { %v18916_v49 = vpop.f32.mrb[160].mxu1  ;;  %v18918_v50 = vpop.f32.mrb[161].mxu0  ;;  %9576 = vmatmul.mubr.f32.gmra.mrb[178].mxu0 %v8583_v34  ;;  %v8538_v35 = vmul.f32 %v18892_v10, %v17896_v41  ;;  %v8703_v41 = vld [vmem:[%s22036_s3 + $0x240] sm:$0xff]  ;;  %v8721_v34 = vld [vmem:[%s22036_s3 + $0x2d0] sm:$0xff]  ;;  %v8706_v5 = vld [vmem:[%s22036_s3 + $0x258] sm:$0xff] }
 0x3b6   :  { %v18928_v14 = vpop.f32.mrb[161].mxu1  ;;  %9645 = vmatprep.mubr.f32.mxu1 %v8536_v52  ;;  %15737 = vmatpush3.bf16.msra.mxu1 %v15736_v27  ;;  %v15770_v27 = vpack.c.bf16 %v8750_v17, %v8749_v3  ;;  %v16932_v20 = vpop.eup %16931  ;;  %16935 = vrcp.f32 %v8185_v13  ;;  %v15744_v52 = vpack.c.bf16 %v8704_v11, %v8703_v41  ;;  %v15774_v13 = vpack.c.bf16 %v8752_v29, %v8751_v1  ;;  %v8707_v1 = vld [vmem:[%s22036_s3 + $0x260] sm:$0xff]  ;;  %v8708_v29 = vld [vmem:[%s22036_s3 + $0x268] sm:$0xff] }
 0x3b7   :  { %15765 = vmatpush3.bf16.msra.mxu0 %v15764_v8  ;;  %9720 = vmatprep.mubr.f32.mxu0 %v8538_v35  ;;  %v8722_v8 = vld [vmem:[%s22036_s3 + $0x2d8] sm:$0xff]  ;;  %v8735_v35 = vld [vmem:[%s22036_s3 + $0x340] sm:$0xff]  ;;  %v8190_v3 = vadd.f32 1.0, %v16932_v20 }
 0x3b8   :  { %15739 = vmatprep.subr.bf16.mxu1 %v15738_v54  ;;  %15767 = vmatprep.subr.bf16.mxu0 %v15766_v38  ;;  %v8187_v54 = vadd.f32 1.0, %v16930_v4  ;;  %v15772_v38 = vpack.c.bf16 %v8734_v19, %v8733_v51  ;;  %v15746_v53 = vpack.c.bf16 %v8722_v8, %v8721_v34  ;;  %v8753_v4 = vld [vmem:[%s22036_s3 + $0x3d0] sm:$0xff]  ;;  %v15748_v34 = vpack.c.bf16 %v8706_v5, %v8705_v16  ;;  %v8726_v16 = vld [vmem:[%s22036_s3 + $0x2f8] sm:$0xff] }
 0x3b9   :  { %v16934_v41 = vpop.eup %16933  ;;  %v6607_v5 = vadd.f32 %v18786_v45, %v18778_v30  ;;  %v8710_v45 = vld [vmem:[%s22036_s3 + $0x278] sm:$0xff] }
 0x3ba   :  { %15741 = vmatpush3.bf16.msra.mxu1 %v15740_v21  ;;  %v8736_v21 = vld [vmem:[%s22036_s3 + $0x348] sm:$0xff]  ;;  %16937 = vrcp.f32 %v8187_v54 }
 0x3bb   :  { %15769 = vmatpush3.bf16.msra.mxu0 %v15768_v9  ;;  %15743 = vmatprep.subr.bf16.mxu1 %v15742_v6  ;;  %v8723_v9 = vld [vmem:[%s22036_s3 + $0x2e0] sm:$0xff]  ;;  %v8724_v6 = vld [vmem:[%s22036_s3 + $0x2e8] sm:$0xff]  ;;  %v15776_v8 = vpack.c.bf16 %v8736_v21, %v8735_v35  ;;  %16939 = vrcp.f32 %v8190_v3  ;;  %v8709_v21 = vld [vmem:[%s22036_s3 + $0x270] sm:$0xff] }
 0x3bc   :  { %v18963_v17 = vpop.f32.mrb[162].mxu0  ;;  %15771 = vmatprep.subr.bf16.mxu0 %v15770_v27  ;;  %v8754_v27 = vld [vmem:[%s22036_s3 + $0x3d8] sm:$0xff]  ;;  %v15750_v20 = vpack.c.bf16 %v8724_v6, %v8723_v9  ;;  %v8755_v35 = vld [vmem:[%s22036_s3 + $0x3e0] sm:$0xff]  ;;  %v8756_v3 = vld [vmem:[%s22036_s3 + $0x3e8] sm:$0xff] }
 0x3bd   :  { %22192 = vst [vmem:[#allocation78_spill] sm:$0xff] %v18963_v17  ;;  %v18974_v11 = vpop.f32.mrb[162].mxu1  ;;  %v18976_v51 = vpop.f32.mrb[163].mxu0  ;;  %v15778_v54 = vpack.c.bf16 %v8754_v27, %v8753_v4  ;;  %v8740_v4 = vld [vmem:[%s22036_s3 + $0x368] sm:$0xff]  ;;  %v8762_v17 = vld [vmem:[%s22036_s3 + $0x418] sm:$0xff] }
 0x3be   :  { %22193 = vst [vmem:[#allocation79_spill] sm:$0xff] %v18974_v11  ;;  %v18984_v19 = vpop.f32.mrb[163].mxu1  ;;  %15745 = vmatpush3.bf16.msra.mxu1 %v15744_v52  ;;  %v8737_v11 = vld [vmem:[%s22036_s3 + $0x350] sm:$0xff]  ;;  %v8192_v52 = vadd.f32 1.0, %v16934_v41  ;;  %v8739_v41 = vld [vmem:[%s22036_s3 + $0x360] sm:$0xff] }
 0x3bf   :  { %15773 = vmatpush3.bf16.msra.mxu0 %v15772_v38  ;;  %15747 = vmatprep.subr.bf16.mxu1 %v15746_v53  ;;  %v8738_v38 = vld [vmem:[%s22036_s3 + $0x358] sm:$0xff]  ;;  %v8725_v53 = vld [vmem:[%s22036_s3 + $0x2f0] sm:$0xff] }
 0x3c0   :  { %15775 = vmatprep.subr.bf16.mxu0 %v15774_v13  ;;  %v15752_v13 = vpack.c.bf16 %v8708_v29, %v8707_v1  ;;  %v15780_v9 = vpack.c.bf16 %v8738_v38, %v8737_v11  ;;  %v15754_v6 = vpack.c.bf16 %v8726_v16, %v8725_v53  ;;  %v16936_v27 = vpop.eup %16935  ;;  %16941 = vrcp.f32 %v8192_v52  ;;  %v8775_v11 = vld [vmem:[%s22036_s3 + $0x480] sm:$0xff]  ;;  %v8757_v52 = vld [vmem:[%s22036_s3 + $0x3f0] sm:$0xff] }
 0x3c1   :  { %v14059_v1 = vmul.f32 -1.442695, %v6607_v5  ;;  %v6751_v53 = vadd.f32 %v18801_v46, %v18778_v30  ;;  %v15784_v5 = vpack.c.bf16 %v8740_v4, %v8739_v41  ;;  %v8759_v46 = vld [vmem:[%s22036_s3 + $0x400] sm:$0xff]  ;;  %v8808_v4 = vld [vmem:[%s22036_s3 + $0x588] sm:$0xff] }
 0x3c2   :  { %15749 = vmatpush3.bf16.msra.mxu1 %v15748_v34  ;;  %v8807_v41 = vld [vmem:[%s22036_s3 + $0x580] sm:$0xff] }
 0x3c3   :  { %15777 = vmatpush3.bf16.msra.mxu0 %v15776_v8  ;;  %15751 = vmatprep.subr.bf16.mxu1 %v15750_v20  ;;  %v15782_v8 = vpack.c.bf16 %v8756_v3, %v8755_v35  ;;  %v8776_v20 = vld [vmem:[%s22036_s3 + $0x488] sm:$0xff]  ;;  %v15756_v35 = vpack.c.bf16 %v8710_v45, %v8709_v21  ;;  %v6678_v3 = vadd.f32 %v18788_v39, %v18778_v30  ;;  %v8742_v39 = vld [vmem:[%s22036_s3 + $0x378] sm:$0xff]  ;;  %16943 = vpow2.f32 %v14059_v1  ;;  %v8761_v1 = vld [vmem:[%s22036_s3 + $0x410] sm:$0xff] }
 0x3c4   :  { %v19024_v34 = vpop.f32.mrb[164].mxu0  ;;  %15779 = vmatprep.subr.bf16.mxu0 %v15778_v54  ;;  %v8758_v54 = vld [vmem:[%s22036_s3 + $0x3f8] sm:$0xff]  ;;  %v16938_v45 = vpop.eup %16937 }
 0x3c5   :  { %22194 = vst [vmem:[#allocation80_spill] sm:$0xff] %v19024_v34  ;;  %v19032_v29 = vpop.f32.mrb[164].mxu1  ;;  %v19034_v38 = vpop.f32.mrb[165].mxu0  ;;  %v15790_v34 = vpack.c.bf16 %v8776_v20, %v8775_v11  ;;  %v15786_v21 = vpack.c.bf16 %v8758_v54, %v8757_v52  ;;  %v14061_v20 = vmul.f32 -1.442695, %v6678_v3 }
 0x3c6   :  { %22195 = vst [vmem:[#allocation81_spill] sm:$0xff] %v19032_v29  ;;  %22196 = vst [vmem:[#allocation82_spill] sm:$0xff] %v19034_v38  ;;  %v19044_v16 = vpop.f32.mrb[165].mxu1  ;;  %15753 = vmatpush3.bf16.msra.mxu1 %v15752_v13  ;;  %v8350_v29 = vrot.slane %v16936_v27, %v18795_v22  ;;  %v8741_v38 = vld [vmem:[%s22036_s3 + $0x370] sm:$0xff]  ;;  %v8760_v13 = vld [vmem:[%s22036_s3 + $0x408] sm:$0xff]  ;;  %v16940_v27 = vpop.eup %16939 }
 0x3c7   :  { %22197 = vst [vmem:[#allocation83_spill] sm:$0xff] %v19044_v16  ;;  %15781 = vmatpush3.bf16.msra.mxu0 %v15780_v9  ;;  %15755 = vmatprep.subr.bf16.mxu1 %v15754_v6  ;;  %v8777_v9 = vld [vmem:[%s22036_s3 + $0x490] sm:$0xff]  ;;  %v8778_v6 = vld [vmem:[%s22036_s3 + $0x498] sm:$0xff]  ;;  %v15792_v11 = vpack.c.bf16 %v8760_v13, %v8759_v46  ;;  %v15788_v54 = vpack.c.bf16 %v8742_v39, %v8741_v38  ;;  %v8792_v13 = vld [vmem:[%s22036_s3 + $0x508] sm:$0xff] }
 0x3c8   :  { %15783 = vmatprep.subr.bf16.mxu0 %v15782_v8  ;;  %v14064_v8 = vmul.f32 -1.442695, %v6751_v53  ;;  %v8535_v52 = vmul.f32 %v8350_v29, %v17893_v40  ;;  %v15794_v16 = vpack.c.bf16 %v8778_v6, %v8777_v9  ;;  %v6822_v53 = vadd.f32 %v18804_v7, %v18778_v30  ;;  %v8809_v6 = vld [vmem:[%s22036_s3 + $0x590] sm:$0xff] }
 0x3c9   :  { %v8586_v40 = vmul.f32 %v18888_v2, %v17883_v37  ;;  %v15822_v38 = vpack.c.bf16 %v8808_v4, %v8807_v41  ;;  %v19095_v7 = vrot.slane %v16940_v27, %v18795_v22  ;;  %v8779_v37 = vld [vmem:[%s22036_s3 + $0x4a0] sm:$0xff]  ;;  %v8780_v2 = vld [vmem:[%s22036_s3 + $0x4a8] sm:$0xff]  ;;  %v15796_v9 = vpack.c.bf16 %v8762_v17, %v8761_v1  ;;  %v8794_v1 = vld [vmem:[%s22036_s3 + $0x518] sm:$0xff] }
 0x3ca   :  { %15757 = vmatpush3.bf16.msra.mxu1 %v15756_v35  ;;  %16945 = vpow2.f32 %v14064_v8  ;;  %v8585_v41 = vmul.f32 %v8350_v29, %v17870_v32  ;;  %v8763_v4 = vld [vmem:[%s22036_s3 + $0x420] sm:$0xff]  ;;  %v8764_v17 = vld [vmem:[%s22036_s3 + $0x428] sm:$0xff]  ;;  %v14066_v27 = vmul.f32 -1.442695, %v6822_v53  ;;  %v8782_v32 = vld [vmem:[%s22036_s3 + $0x4b8] sm:$0xff]  ;;  %v8588_v29 = vmul.f32 %v18892_v10, %v17899_v42 }
 0x3cb   :  { %15785 = vmatpush3.bf16.msra.mxu0 %v15784_v5  ;;  %15791 = vmatprep.subr.bf16.mxu1 %v15790_v34  ;;  %v8358_v34 = vrot.slane %v16938_v45, %v18795_v22  ;;  %v8791_v5 = vld [vmem:[%s22036_s3 + $0x500] sm:$0xff]  ;;  %v8810_v45 = vld [vmem:[%s22036_s3 + $0x598] sm:$0xff]  ;;  %16947 = vpow2.f32 %v14061_v20  ;;  %v8781_v20 = vld [vmem:[%s22036_s3 + $0x4b0] sm:$0xff] }
 0x3cc   :  { %v19082_v35 = vpop.f32.mrb[166].mxu0  ;;  %15787 = vmatprep.subr.bf16.mxu0 %v15786_v21  ;;  %v16942_v21 = vpop.eup %16941  ;;  %v8811_v42 = vld [vmem:[%s22036_s3 + $0x5a0] sm:$0xff]  ;;  %16949 = vpow2.f32 %v14066_v27 }
 0x3cd   :  { %v19090_v3 = vpop.f32.mrb[166].mxu1  ;;  %v19092_v46 = vpop.f32.mrb[167].mxu0  ;;  %9646 = vmatmul.mubr.f32.vlgmr.msra.gmra.mrb[178].mxu1 %v8535_v52  ;;  %v8537_v8 = vmul.f32 %v8358_v34, %v17902_v43  ;;  %v15798_v52 = vpack.c.bf16 %v8780_v2, %v8779_v37  ;;  %v8793_v43 = vld [vmem:[%s22036_s3 + $0x510] sm:$0xff]  ;;  %v19139_v53 = vrot.slane %v16942_v21, %v18795_v22  ;;  %v8587_v2 = vmul.f32 %v8358_v34, %v17880_v36  ;;  %v8795_v36 = vld [vmem:[%s22036_s3 + $0x520] sm:$0xff]  ;;  %v8796_v34 = vld [vmem:[%s22036_s3 + $0x528] sm:$0xff] }
 0x3ce   :  { %v19106_v39 = vpop.f32.mrb[167].mxu1  ;;  %9650 = vmatprep.mubr.f32.mxu1 %v8586_v40  ;;  %15793 = vmatpush3.bf16.msra.mxu1 %v15792_v11  ;;  %v15824_v11 = vpack.c.bf16 %v8792_v13, %v8791_v5  ;;  %v15800_v40 = vpack.c.bf16 %v8764_v17, %v8763_v4  ;;  %v16944_v10 = vpop.eup %16943  ;;  %v8765_v5 = vld [vmem:[%s22036_s3 + $0x430] sm:$0xff]  ;;  %v8766_v13 = vld [vmem:[%s22036_s3 + $0x438] sm:$0xff]  ;;  %v15828_v21 = vpack.c.bf16 %v8794_v1, %v8793_v43 }
 0x3cf   :  { %15789 = vmatpush3.bf16.msra.mxu0 %v15788_v54  ;;  %15795 = vmatprep.subr.bf16.mxu1 %v15794_v16  ;;  %v8540_v16 = vmul.f32 %v19095_v7, %v17919_v56  ;;  %v15826_v54 = vpack.c.bf16 %v8810_v45, %v8809_v6  ;;  %v8812_v56 = vld [vmem:[%s22036_s3 + $0x5a8] sm:$0xff]  ;;  %v8542_v4 = vmul.f32 %v19139_v53, %v17933_v61  ;;  %v8189_v27 = vadd.f32 1.0, %v16944_v10  ;;  %v8814_v61 = vld [vmem:[%s22036_s3 + $0x5b8] sm:$0xff]  ;;  %v8785_v43 = vld [vmem:[%s22036_s3 + $0x4d0] sm:$0xff] }
 0x3d0   :  { %15823 = vmatprep.subr.bf16.mxu0 %v15822_v38  ;;  %v15802_v38 = vpack.c.bf16 %v8782_v32, %v8781_v20  ;;  %v8784_v6 = vld [vmem:[%s22036_s3 + $0x4c8] sm:$0xff]  ;;  %v15830_v17 = vpack.c.bf16 %v8812_v56, %v8811_v42  ;;  %v8767_v32 = vld [vmem:[%s22036_s3 + $0x440] sm:$0xff]  ;;  %v8786_v1 = vld [vmem:[%s22036_s3 + $0x4d8] sm:$0xff] }
 0x3d1   :  { %9651 = vmatmul.mubr.f32.gmra.mrb[180].mxu1 %v8585_v41  ;;  %v8797_v56 = vld [vmem:[%s22036_s3 + $0x530] sm:$0xff]  ;;  %v8798_v10 = vld [vmem:[%s22036_s3 + $0x538] sm:$0xff]  ;;  %16951 = vrcp.f32 %v8189_v27  ;;  %v8788_v27 = vld [vmem:[%s22036_s3 + $0x4e8] sm:$0xff] }
 0x3d2   :  { %9721 = vmatmul.mubr.f32.vlgmr.msra.gmra.mrb[180].mxu0 %v8537_v8  ;;  %15797 = vmatpush3.bf16.msra.mxu1 %v15796_v9  ;;  %v8783_v9 = vld [vmem:[%s22036_s3 + $0x4c0] sm:$0xff] }
 0x3d3   :  { %9725 = vmatprep.mubr.f32.mxu0 %v8588_v29  ;;  %9795 = vmatprep.mubr.f32.mxu1 %v8540_v16  ;;  %v15806_v20 = vpack.c.bf16 %v8784_v6, %v8783_v9  ;;  %v8768_v29 = vld [vmem:[%s22036_s3 + $0x448] sm:$0xff]  ;;  %v8769_v9 = vld [vmem:[%s22036_s3 + $0x450] sm:$0xff]  ;;  %v8770_v6 = vld [vmem:[%s22036_s3 + $0x458] sm:$0xff] }
 0x3d4   :  { %15825 = vmatpush3.bf16.msra.mxu0 %v15824_v11  ;;  %v19153_v37 = vpop.f32.mrb[168].mxu0  ;;  %15799 = vmatprep.subr.bf16.mxu1 %v15798_v52  ;;  %v15804_v11 = vpack.c.bf16 %v8766_v13, %v8765_v5  ;;  %v8813_v52 = vld [vmem:[%s22036_s3 + $0x5b0] sm:$0xff]  ;;  %v16946_v16 = vpop.eup %16945  ;;  %v8815_v5 = vld [vmem:[%s22036_s3 + $0x5c0] sm:$0xff]  ;;  %v8816_v13 = vld [vmem:[%s22036_s3 + $0x5c8] sm:$0xff] }
 0x3d5   :  { %v19162_v45 = vpop.f32.mrb[168].mxu1  ;;  %v19164_v41 = vpop.f32.mrb[169].mxu0  ;;  %15827 = vmatprep.subr.bf16.mxu0 %v15826_v54  ;;  %v15832_v54 = vpack.c.bf16 %v8796_v34, %v8795_v36  ;;  %v15834_v42 = vpack.c.bf16 %v8814_v61, %v8813_v52  ;;  %v15836_v36 = vpack.c.bf16 %v8798_v10, %v8797_v56  ;;  %v8787_v34 = vld [vmem:[%s22036_s3 + $0x4e0] sm:$0xff]  ;;  %v15838_v61 = vpack.c.bf16 %v8816_v13, %v8815_v5  ;;  %v8772_v56 = vld [vmem:[%s22036_s3 + $0x468] sm:$0xff]  ;;  %v8790_v5 = vld [vmem:[%s22036_s3 + $0x4f8] sm:$0xff] }
 0x3d6   :  { %v19174_v8 = vpop.f32.mrb[169].mxu1  ;;  %9726 = vmatmul.mubr.f32.gmra.mrb[182].mxu0 %v8587_v2  ;;  %15801 = vmatpush3.bf16.msra.mxu1 %v15800_v40  ;;  %v16948_v40 = vpop.eup %16947  ;;  %v8194_v2 = vadd.f32 1.0, %v16946_v16  ;;  %v6749_v13 = vadd.f32 %v18797_v48, %v18778_v30  ;;  %v8820_v48 = vld [vmem:[%s22036_s3 + $0x5e8] sm:$0xff] }
 0x3d7   :  { %9870 = vmatprep.mubr.f32.mxu0 %v8542_v4  ;;  %15803 = vmatprep.subr.bf16.mxu1 %v15802_v38  ;;  %v15808_v38 = vpack.c.bf16 %v8768_v29, %v8767_v32  ;;  %v8191_v4 = vadd.f32 1.0, %v16948_v40  ;;  %v8800_v32 = vld [vmem:[%s22036_s3 + $0x548] sm:$0xff]  ;;  %v16950_v29 = vpop.eup %16949  ;;  %v15814_v40 = vpack.c.bf16 %v8788_v27, %v8787_v34  ;;  %v8773_v27 = vld [vmem:[%s22036_s3 + $0x470] sm:$0xff] }
 0x3d8   :  { %15829 = vmatpush3.bf16.msra.mxu0 %v15828_v21  ;;  %v15810_v21 = vpack.c.bf16 %v8786_v1, %v8785_v43  ;;  %v8817_v43 = vld [vmem:[%s22036_s3 + $0x5d0] sm:$0xff]  ;;  %v8818_v1 = vld [vmem:[%s22036_s3 + $0x5d8] sm:$0xff]  ;;  %16953 = vrcp.f32 %v8194_v2  ;;  %v8196_v2 = vadd.f32 1.0, %v16950_v29 }
 0x3d9   :  { %15831 = vmatprep.subr.bf16.mxu0 %v15830_v17  ;;  %16955 = vrcp.f32 %v8191_v4 }
 0x3da   :  { %15805 = vmatpush3.bf16.msra.mxu1 %v15804_v11  ;;  %16957 = vrcp.f32 %v8196_v2  ;;  %v8821_v2 = vld [vmem:[%s22036_s3 + $0x5f0] sm:$0xff] }
 0x3db   :  { %15807 = vmatprep.subr.bf16.mxu1 %v15806_v20  ;;  %v8799_v20 = vld [vmem:[%s22036_s3 + $0x540] sm:$0xff] }
 0x3dc   :  { %15833 = vmatpush3.bf16.msra.mxu0 %v15832_v54  ;;  %v19212_v17 = vpop.f32.mrb[170].mxu0  ;;  %v15812_v54 = vpack.c.bf16 %v8770_v6, %v8769_v9  ;;  %v15840_v10 = vpack.c.bf16 %v8800_v32, %v8799_v20  ;;  %v8801_v9 = vld [vmem:[%s22036_s3 + $0x550] sm:$0xff]  ;;  %v8802_v6 = vld [vmem:[%s22036_s3 + $0x558] sm:$0xff]  ;;  %v16952_v20 = vpop.eup %16951 }
 0x3dd   :  { %v19220_v11 = vpop.f32.mrb[170].mxu1  ;;  %v19222_v52 = vpop.f32.mrb[171].mxu0  ;;  %15835 = vmatprep.subr.bf16.mxu0 %v15834_v42  ;;  %v8771_v42 = vld [vmem:[%s22036_s3 + $0x460] sm:$0xff]  ;;  %v15844_v29 = vpack.c.bf16 %v8802_v6, %v8801_v9  ;;  %v6820_v6 = vadd.f32 %v18799_v15, %v18778_v30  ;;  %v8842_v15 = vld [vmem:[%s22036_s3 + $0x698] sm:$0xff] }
 0x3de   :  { %v19230_v16 = vpop.f32.mrb[171].mxu1  ;;  %15809 = vmatpush3.bf16.msra.mxu1 %v15808_v38  ;;  %v8789_v38 = vld [vmem:[%s22036_s3 + $0x4f0] sm:$0xff]  ;;  %v15816_v4 = vpack.c.bf16 %v8772_v56, %v8771_v42 }
 0x3df   :  { %15811 = vmatprep.subr.bf16.mxu1 %v15810_v21  ;;  %v15842_v21 = vpack.c.bf16 %v8818_v1, %v8817_v43  ;;  %v15818_v34 = vpack.c.bf16 %v8790_v5, %v8789_v38  ;;  %v8840_v43 = vld [vmem:[%s22036_s3 + $0x688] sm:$0xff]  ;;  %v14063_v1 = vmul.f32 -1.442695, %v6749_v13  ;;  %v6893_v5 = vadd.f32 %v18849_v12, %v18778_v30  ;;  %v8823_v12 = vld [vmem:[%s22036_s3 + $0x600] sm:$0xff] }
 0x3e0   :  { %15837 = vmatpush3.bf16.msra.mxu0 %v15836_v36  ;;  %v8819_v36 = vld [vmem:[%s22036_s3 + $0x5e0] sm:$0xff]  ;;  %v8804_v38 = vld [vmem:[%s22036_s3 + $0x568] sm:$0xff] }
 0x3e1   :  { %15839 = vmatprep.subr.bf16.mxu0 %v15838_v61  ;;  %v8774_v61 = vld [vmem:[%s22036_s3 + $0x478] sm:$0xff]  ;;  %v15846_v56 = vpack.c.bf16 %v8820_v48, %v8819_v36  ;;  %v8366_v36 = vrot.slane %v16952_v20, %v18795_v22  ;;  %16959 = vpow2.f32 %v14063_v1  ;;  %v8872_v1 = vld [vmem:[%s22036_s3 + $0x788] sm:$0xff] }
 0x3e2   :  { %15813 = vmatpush3.bf16.msra.mxu1 %v15812_v54  ;;  %v8839_v54 = vld [vmem:[%s22036_s3 + $0x680] sm:$0xff]  ;;  %v15820_v13 = vpack.c.bf16 %v8774_v61, %v8773_v27  ;;  %v8841_v61 = vld [vmem:[%s22036_s3 + $0x690] sm:$0xff] }
 0x3e3   :  { %15815 = vmatprep.subr.bf16.mxu1 %v15814_v40  ;;  %v15854_v48 = vpack.c.bf16 %v8840_v43, %v8839_v54  ;;  %v8805_v54 = vld [vmem:[%s22036_s3 + $0x570] sm:$0xff] }
 0x3e4   :  { %15841 = vmatpush3.bf16.msra.mxu0 %v15840_v10  ;;  %v19270_v32 = vpop.f32.mrb[172].mxu0  ;;  %v8803_v10 = vld [vmem:[%s22036_s3 + $0x560] sm:$0xff] }
 0x3e5   :  { %22198 = vst [vmem:[#allocation84_spill] sm:$0xff] %v19270_v32  ;;  %v19278_v40 = vpop.f32.mrb[172].mxu1  ;;  %v19280_v42 = vpop.f32.mrb[173].mxu0  ;;  %15843 = vmatprep.subr.bf16.mxu0 %v15842_v21  ;;  %v8822_v21 = vld [vmem:[%s22036_s3 + $0x5f8] sm:$0xff]  ;;  %v15848_v27 = vpack.c.bf16 %v8804_v38, %v8803_v10  ;;  %v14068_v10 = vmul.f32 -1.442695, %v6893_v5  ;;  %v15858_v32 = vpack.c.bf16 %v8842_v15, %v8841_v61 }
 0x3e6   :  { %22199 = vst [vmem:[#allocation85_spill] sm:$0xff] %v19278_v40  ;;  %v19290_v9 = vpop.f32.mrb[173].mxu1  ;;  %15817 = vmatpush3.bf16.msra.mxu1 %v15816_v4  ;;  %v8824_v4 = vld [vmem:[%s22036_s3 + $0x608] sm:$0xff]  ;;  %v15850_v20 = vpack.c.bf16 %v8822_v21, %v8821_v2  ;;  %v8871_v40 = vld [vmem:[%s22036_s3 + $0x780] sm:$0xff]  ;;  %v8539_v21 = vmul.f32 %v8366_v36, %v17942_v63  ;;  %v8825_v5 = vld [vmem:[%s22036_s3 + $0x610] sm:$0xff] }
 0x3e7   :  { %15819 = vmatprep.subr.bf16.mxu1 %v15818_v34  ;;  %v16954_v34 = vpop.eup %16953  ;;  %v15856_v38 = vpack.c.bf16 %v8824_v4, %v8823_v12  ;;  %v6964_v12 = vadd.f32 %v18857_v23, %v18778_v30  ;;  %v8843_v61 = vld [vmem:[%s22036_s3 + $0x6a0] sm:$0xff]  ;;  %v8844_v15 = vld [vmem:[%s22036_s3 + $0x6a8] sm:$0xff]  ;;  %16961 = vpow2.f32 %v14068_v10 }
 0x3e8   :  { %15845 = vmatpush3.bf16.msra.mxu0 %v15844_v29  ;;  %v8806_v29 = vld [vmem:[%s22036_s3 + $0x578] sm:$0xff]  ;;  %v16956_v43 = vpop.eup %16955  ;;  %v8827_v10 = vld [vmem:[%s22036_s3 + $0x620] sm:$0xff] }
 0x3e9   :  { %15847 = vmatprep.subr.bf16.mxu0 %v15846_v56  ;;  %v14065_v56 = vmul.f32 -1.442695, %v6820_v6  ;;  %v8590_v6 = vmul.f32 %v19095_v7, %v17928_v59  ;;  %v15852_v63 = vpack.c.bf16 %v8806_v29, %v8805_v54  ;;  %v8374_v23 = vrot.slane %v16956_v43, %v18795_v22  ;;  %v8855_v59 = vld [vmem:[%s22036_s3 + $0x700] sm:$0xff]  ;;  %v8856_v7 = vld [vmem:[%s22036_s3 + $0x708] sm:$0xff]  ;;  %v8873_v54 = vld [vmem:[%s22036_s3 + $0x790] sm:$0xff] }
 0x3ea   :  { %15821 = vmatpush3.bf16.msra.mxu1 %v15820_v13  ;;  %v8826_v13 = vld [vmem:[%s22036_s3 + $0x618] sm:$0xff]  ;;  %v8589_v29 = vmul.f32 %v8366_v36, %v17922_v57  ;;  %v15862_v43 = vpack.c.bf16 %v8844_v15, %v8843_v61  ;;  %v8845_v57 = vld [vmem:[%s22036_s3 + $0x6b0] sm:$0xff]  ;;  %v8876_v61 = vld [vmem:[%s22036_s3 + $0x7a8] sm:$0xff] }
 0x3eb   :  { %v19325_v2 = vpop.f32.mrb[174].mxu0  ;;  %15855 = vmatprep.subr.bf16.mxu1 %v15854_v48  ;;  %v19341_v48 = vrot.slane %v16954_v34, %v18795_v22  ;;  %v15860_v34 = vpack.c.bf16 %v8826_v13, %v8825_v5  ;;  %16963 = vpow2.f32 %v14065_v56  ;;  %v15888_v5 = vpack.c.bf16 %v8856_v7, %v8855_v59  ;;  %v8857_v13 = vld [vmem:[%s22036_s3 + $0x710] sm:$0xff]  ;;  %v8847_v7 = vld [vmem:[%s22036_s3 + $0x6c0] sm:$0xff] }
 0x3ec   :  { %15849 = vmatpush3.bf16.msra.mxu0 %v15848_v27  ;;  %v19336_v4 = vpop.f32.mrb[175].mxu0  ;;  %v15886_v27 = vpack.c.bf16 %v8872_v1, %v8871_v40  ;;  %v8874_v40 = vld [vmem:[%s22036_s3 + $0x798] sm:$0xff]  ;;  %v14070_v1 = vmul.f32 -1.442695, %v6964_v12  ;;  %v8541_v36 = vmul.f32 %v8374_v23, %v17945_v0  ;;  %v8592_v12 = vmul.f32 %v19139_v53, %v17936_v62  ;;  %v8875_v0 = vld [vmem:[%s22036_s3 + $0x7a0] sm:$0xff]  ;;  %v8829_v62 = vld [vmem:[%s22036_s3 + $0x630] sm:$0xff] }
 0x3ed   :  { %9796 = vmatmul.mubr.f32.vlgmr.msra.gmra.mrb[182].mxu1 %v8539_v21  ;;  %15851 = vmatprep.subr.bf16.mxu0 %v15850_v20  ;;  %v16958_v20 = vpop.eup %16957  ;;  %v8544_v21 = vmul.f32 %v19341_v48, %v17963_v24  ;;  %v15890_v56 = vpack.c.bf16 %v8874_v40, %v8873_v54  ;;  %v8858_v24 = vld [vmem:[%s22036_s3 + $0x718] sm:$0xff]  ;;  %v8591_v54 = vmul.f32 %v8374_v23, %v17925_v58  ;;  %v8877_v58 = vld [vmem:[%s22036_s3 + $0x7b0] sm:$0xff] }
 0x3ee   :  { %9800 = vmatprep.mubr.f32.mxu1 %v8590_v6  ;;  %15857 = vmatpush3.bf16.msra.mxu1 %v15856_v38  ;;  %v8828_v38 = vld [vmem:[%s22036_s3 + $0x628] sm:$0xff]  ;;  %v16960_v15 = vpop.eup %16959  ;;  %v8830_v53 = vld [vmem:[%s22036_s3 + $0x638] sm:$0xff]  ;;  %16965 = vpow2.f32 %v14070_v1  ;;  %v15892_v59 = vpack.c.bf16 %v8858_v24, %v8857_v13  ;;  %v15894_v40 = vpack.c.bf16 %v8876_v61, %v8875_v0  ;;  %v8861_v24 = vld [vmem:[%s22036_s3 + $0x730] sm:$0xff] }
 0x3ef   :  { %15859 = vmatprep.subr.bf16.mxu1 %v15858_v32  ;;  %v8846_v32 = vld [vmem:[%s22036_s3 + $0x6b8] sm:$0xff]  ;;  %v15864_v6 = vpack.c.bf16 %v8828_v38, %v8827_v10  ;;  %v15868_v38 = vpack.c.bf16 %v8830_v53, %v8829_v62  ;;  %v8879_v0 = vld [vmem:[%s22036_s3 + $0x7c0] sm:$0xff]  ;;  %v8880_v61 = vld [vmem:[%s22036_s3 + $0x7c8] sm:$0xff] }
 0x3f0   :  { %15853 = vmatpush3.bf16.msra.mxu0 %v15852_v63  ;;  %v19387_v63 = vrot.slane %v16958_v20, %v18795_v22  ;;  %v8859_v20 = vld [vmem:[%s22036_s3 + $0x720] sm:$0xff]  ;;  %v8878_v23 = vld [vmem:[%s22036_s3 + $0x7b8] sm:$0xff]  ;;  %v8833_v62 = vld [vmem:[%s22036_s3 + $0x650] sm:$0xff] }
 0x3f1   :  { %9801 = vmatmul.mubr.f32.gmra.mrb[184].mxu1 %v8589_v29  ;;  %15887 = vmatprep.subr.bf16.mxu0 %v15886_v27  ;;  %v15866_v27 = vpack.c.bf16 %v8846_v32, %v8845_v57  ;;  %v8860_v29 = vld [vmem:[%s22036_s3 + $0x728] sm:$0xff]  ;;  %v8849_v32 = vld [vmem:[%s22036_s3 + $0x6d0] sm:$0xff]  ;;  %v15898_v13 = vpack.c.bf16 %v8878_v23, %v8877_v58  ;;  %v8834_v53 = vld [vmem:[%s22036_s3 + $0x658] sm:$0xff] }
 0x3f2   :  { %15861 = vmatpush3.bf16.msra.mxu1 %v15860_v34  ;;  %9945 = vmatprep.mubr.f32.mxu1 %v8544_v21  ;;  %v8848_v34 = vld [vmem:[%s22036_s3 + $0x6c8] sm:$0xff]  ;;  %v8546_v10 = vmul.f32 %v19387_v63, %v17972_v28  ;;  %v8831_v21 = vld [vmem:[%s22036_s3 + $0x640] sm:$0xff]  ;;  %v15896_v57 = vpack.c.bf16 %v8860_v29, %v8859_v20  ;;  %v8882_v58 = vld [vmem:[%s22036_s3 + $0x7d8] sm:$0xff] }
 0x3f3   :  { %9871 = vmatmul.mubr.f32.vlgmr.msra.gmra.mrb[184].mxu0 %v8541_v36  ;;  %15863 = vmatprep.subr.bf16.mxu1 %v15862_v43  ;;  %v8193_v43 = vadd.f32 1.0, %v16960_v15  ;;  %v15870_v1 = vpack.c.bf16 %v8848_v34, %v8847_v7  ;;  %v8832_v28 = vld [vmem:[%s22036_s3 + $0x648] sm:$0xff]  ;;  %v8850_v36 = vld [vmem:[%s22036_s3 + $0x6d8] sm:$0xff]  ;;  %v8851_v34 = vld [vmem:[%s22036_s3 + $0x6e0] sm:$0xff] }
 0x3f4   :  { %9875 = vmatprep.mubr.f32.mxu0 %v8592_v12  ;;  %15889 = vmatpush3.bf16.msra.mxu0 %v15888_v5  ;;  %v16962_v5 = vpop.eup %16961  ;;  %v8862_v12 = vld [vmem:[%s22036_s3 + $0x738] sm:$0xff]  ;;  %v8863_v20 = vld [vmem:[%s22036_s3 + $0x740] sm:$0xff]  ;;  %v8864_v29 = vld [vmem:[%s22036_s3 + $0x748] sm:$0xff] }
 0x3f5   :  { %15891 = vmatprep.subr.bf16.mxu0 %v15890_v56  ;;  %v16964_v56 = vpop.eup %16963  ;;  %16967 = vrcp.f32 %v8193_v43  ;;  %v8198_v15 = vadd.f32 1.0, %v16962_v5  ;;  %v15900_v7 = vpack.c.bf16 %v8862_v12, %v8861_v24  ;;  %v8853_v5 = vld [vmem:[%s22036_s3 + $0x6f0] sm:$0xff]  ;;  %v8866_v24 = vld [vmem:[%s22036_s3 + $0x758] sm:$0xff] }
 0x3f6   :  { %15865 = vmatpush3.bf16.msra.mxu1 %v15864_v6  ;;  %v15872_v6 = vpack.c.bf16 %v8832_v28, %v8831_v21  ;;  %v8836_v21 = vld [vmem:[%s22036_s3 + $0x668] sm:$0xff]  ;;  %v15904_v28 = vpack.c.bf16 %v8864_v29, %v8863_v20  ;;  %v7035_v20 = vadd.f32 %v18918_v50, %v18778_v30  ;;  %v8887_v50 = vld [vmem:[%s22036_s3 + $0x800] sm:$0xff] }
 0x3f7   :  { %9876 = vmatmul.mubr.f32.gmra.mrb[186].mxu0 %v8591_v54  ;;  %15867 = vmatprep.subr.bf16.mxu1 %v15866_v27  ;;  %v15874_v27 = vpack.c.bf16 %v8850_v36, %v8849_v32  ;;  %v8852_v54 = vld [vmem:[%s22036_s3 + $0x6e8] sm:$0xff]  ;;  %16969 = vrcp.f32 %v8198_v15  ;;  %v6891_v32 = vadd.f32 %v18843_v60, %v18778_v30  ;;  %v8838_v15 = vld [vmem:[%s22036_s3 + $0x678] sm:$0xff] }
 0x3f8   :  { %15893 = vmatpush3.bf16.msra.mxu0 %v15892_v59  ;;  %10020 = vmatprep.mubr.f32.mxu0 %v8546_v10  ;;  %v8195_v59 = vadd.f32 1.0, %v16964_v56  ;;  %v16966_v43 = vpop.eup %16965  ;;  %v15876_v10 = vpack.c.bf16 %v8834_v53, %v8833_v62  ;;  %v15878_v23 = vpack.c.bf16 %v8852_v54, %v8851_v34  ;;  %v8884_v60 = vld [vmem:[%s22036_s3 + $0x7e8] sm:$0xff]  ;;  %v8903_v53 = vld [vmem:[%s22036_s3 + $0x880] sm:$0xff] }
 0x3f9   :  { %15895 = vmatprep.subr.bf16.mxu0 %v15894_v40  ;;  %v15902_v40 = vpack.c.bf16 %v8880_v61, %v8879_v0  ;;  %v8200_v36 = vadd.f32 1.0, %v16966_v43  ;;  %v8837_v61 = vld [vmem:[%s22036_s3 + $0x670] sm:$0xff]  ;;  %v8867_v54 = vld [vmem:[%s22036_s3 + $0x760] sm:$0xff] }
 0x3fa   :  { %15869 = vmatpush3.bf16.msra.mxu1 %v15868_v38  ;;  %v8881_v38 = vld [vmem:[%s22036_s3 + $0x7d0] sm:$0xff]  ;;  %16971 = vrcp.f32 %v8195_v59  ;;  %v8904_v59 = vld [vmem:[%s22036_s3 + $0x888] sm:$0xff]  ;;  %v15884_v29 = vpack.c.bf16 %v8838_v15, %v8837_v61 }
 0x3fb   :  { %15871 = vmatprep.subr.bf16.mxu1 %v15870_v1  ;;  %v8835_v1 = vld [vmem:[%s22036_s3 + $0x660] sm:$0xff]  ;;  %v15906_v56 = vpack.c.bf16 %v8882_v58, %v8881_v38  ;;  %16973 = vrcp.f32 %v8200_v36  ;;  %v8885_v43 = vld [vmem:[%s22036_s3 + $0x7f0] sm:$0xff]  ;;  %v6962_v38 = vadd.f32 %v18847_v47, %v18778_v30  ;;  %v8906_v47 = vld [vmem:[%s22036_s3 + $0x898] sm:$0xff] }
 0x3fc   :  { %15897 = vmatpush3.bf16.msra.mxu0 %v15896_v57  ;;  %v8854_v57 = vld [vmem:[%s22036_s3 + $0x6f8] sm:$0xff]  ;;  %v15880_v12 = vpack.c.bf16 %v8836_v21, %v8835_v1  ;;  %v8888_v1 = vld [vmem:[%s22036_s3 + $0x808] sm:$0xff]  ;;  %v8889_v15 = vld [vmem:[%s22036_s3 + $0x810] sm:$0xff] }
 0x3fd   :  { %15899 = vmatprep.subr.bf16.mxu0 %v15898_v13  ;;  %v8865_v13 = vld [vmem:[%s22036_s3 + $0x750] sm:$0xff]  ;;  %v15882_v0 = vpack.c.bf16 %v8854_v57, %v8853_v5  ;;  %v8870_v36 = vld [vmem:[%s22036_s3 + $0x778] sm:$0xff] }
 0x3fe   :  { %15873 = vmatpush3.bf16.msra.mxu1 %v15872_v6  ;;  %v8883_v6 = vld [vmem:[%s22036_s3 + $0x7e0] sm:$0xff]  ;;  %v15908_v62 = vpack.c.bf16 %v8866_v24, %v8865_v13  ;;  %v14072_v13 = vmul.f32 -1.442695, %v7035_v20  ;;  %v15920_v24 = vpack.c.bf16 %v8888_v1, %v8887_v50  ;;  %v8937_v20 = vld [vmem:[%s22036_s3 + $0x990] sm:$0xff]  ;;  %v8892_v50 = vld [vmem:[%s22036_s3 + $0x828] sm:$0xff] }
 0x3ff   :  { %15875 = vmatprep.subr.bf16.mxu1 %v15874_v27  ;;  %v16968_v27 = vpop.eup %16967  ;;  %v15910_v34 = vpack.c.bf16 %v8884_v60, %v8883_v6  ;;  %v8936_v6 = vld [vmem:[%s22036_s3 + $0x988] sm:$0xff]  ;;  %v14069_v60 = vmul.f32 -1.442695, %v6962_v38 }
 0x400   :  { %15901 = vmatpush3.bf16.msra.mxu0 %v15900_v7  ;;  %v14067_v7 = vmul.f32 -1.442695, %v6891_v32  ;;  %v8382_v58 = vrot.slane %v16968_v27, %v18795_v22  ;;  %v8869_v32 = vld [vmem:[%s22036_s3 + $0x770] sm:$0xff]  ;;  %v8890_v27 = vld [vmem:[%s22036_s3 + $0x818] sm:$0xff] }
 0x401   :  { %15903 = vmatprep.subr.bf16.mxu0 %v15902_v40  ;;  %v8868_v40 = vld [vmem:[%s22036_s3 + $0x768] sm:$0xff]  ;;  %v16970_v5 = vpop.eup %16969 }
 0x402   :  { %15877 = vmatpush3.bf16.msra.mxu1 %v15876_v10  ;;  %v8886_v10 = vld [vmem:[%s22036_s3 + $0x7f8] sm:$0xff]  ;;  %v15912_v21 = vpack.c.bf16 %v8868_v40, %v8867_v54  ;;  %16975 = vpow2.f32 %v14067_v7  ;;  %v8907_v7 = vld [vmem:[%s22036_s3 + $0x8a0] sm:$0xff]  ;;  %v15924_v40 = vpack.c.bf16 %v8890_v27, %v8889_v15 }
 0x403   :  { %15879 = vmatprep.subr.bf16.mxu1 %v15878_v23  ;;  %v15918_v23 = vpack.c.bf16 %v8904_v59, %v8903_v53  ;;  %v15914_v57 = vpack.c.bf16 %v8886_v10, %v8885_v43  ;;  %v8594_v53 = vmul.f32 %v19341_v48, %v17969_v26  ;;  %v15916_v59 = vpack.c.bf16 %v8870_v36, %v8869_v32  ;;  %v8919_v26 = vld [vmem:[%s22036_s3 + $0x900] sm:$0xff]  ;;  %v8920_v48 = vld [vmem:[%s22036_s3 + $0x908] sm:$0xff] }
 0x404   :  { %15905 = vmatpush3.bf16.msra.mxu0 %v15904_v28  ;;  %v8905_v28 = vld [vmem:[%s22036_s3 + $0x890] sm:$0xff]  ;;  %16977 = vpow2.f32 %v14072_v13  ;;  %v8593_v10 = vmul.f32 %v8382_v58, %v17966_v25  ;;  %v8596_v32 = vmul.f32 %v19387_v63, %v17978_v31  ;;  %v8940_v13 = vld [vmem:[%s22036_s3 + $0x9a8] sm:$0xff]  ;;  %v8894_v63 = vld [vmem:[%s22036_s3 + $0x838] sm:$0xff] }
 0x405   :  { %15907 = vmatprep.subr.bf16.mxu0 %v15906_v56  ;;  %v16972_v56 = vpop.eup %16971  ;;  %v15922_v61 = vpack.c.bf16 %v8906_v47, %v8905_v28  ;;  %16979 = vpow2.f32 %v14069_v60  ;;  %v15952_v28 = vpack.c.bf16 %v8920_v48, %v8919_v26  ;;  %v8909_v25 = vld [vmem:[%s22036_s3 + $0x8b0] sm:$0xff]  ;;  %v8911_v60 = vld [vmem:[%s22036_s3 + $0x8c0] sm:$0xff]  ;;  %v8942_v26 = vld [vmem:[%s22036_s3 + $0x9b8] sm:$0xff] }
 0x406   :  { %15881 = vmatpush3.bf16.msra.mxu1 %v15880_v12  ;;  %v8935_v12 = vld [vmem:[%s22036_s3 + $0x980] sm:$0xff]  ;;  %v16974_v43 = vpop.eup %16973  ;;  %v8893_v31 = vld [vmem:[%s22036_s3 + $0x830] sm:$0xff] }
 0x407   :  { %15883 = vmatprep.subr.bf16.mxu1 %v15882_v0  ;;  %v8543_v0 = vmul.f32 %v8382_v58, %v17985_v33  ;;  %v19561_v33 = vrot.slane %v16970_v5, %v18795_v22  ;;  %v15950_v54 = vpack.c.bf16 %v8936_v6, %v8935_v12  ;;  %v8910_v58 = vld [vmem:[%s22036_s3 + $0x8b8] sm:$0xff] }
 0x408   :  { %15909 = vmatpush3.bf16.msra.mxu0 %v15908_v62  ;;  %v7106_v62 = vadd.f32 %v18928_v14, %v18778_v30  ;;  %v8390_v14 = vrot.slane %v16972_v56, %v18795_v22  ;;  %v19607_v56 = vrot.slane %v16974_v43, %v18795_v22  ;;  %v15930_v12 = vpack.c.bf16 %v8910_v58, %v8909_v25  ;;  %v8943_v25 = vld [vmem:[%s22036_s3 + $0x9c0] sm:$0xff]  ;;  %v8944_v58 = vld [vmem:[%s22036_s3 + $0x9c8] sm:$0xff] }
 0x409   :  { %15911 = vmatprep.subr.bf16.mxu0 %v15910_v34  ;;  %v8908_v34 = vld [vmem:[%s22036_s3 + $0x8a8] sm:$0xff] }
 0x40a   :  { %15885 = vmatpush3.bf16.msra.mxu1 %v15884_v29  ;;  %v8938_v29 = vld [vmem:[%s22036_s3 + $0x998] sm:$0xff]  ;;  %v15926_v38 = vpack.c.bf16 %v8908_v34, %v8907_v7  ;;  %v14074_v1 = vmul.f32 -1.442695, %v7106_v62  ;;  %v8545_v47 = vmul.f32 %v8390_v14, %v17992_v44  ;;  %v8939_v44 = vld [vmem:[%s22036_s3 + $0x9a0] sm:$0xff] }
 0x40b   :  { %15919 = vmatprep.subr.bf16.mxu1 %v15918_v23  ;;  %v8891_v23 = vld [vmem:[%s22036_s3 + $0x820] sm:$0xff]  ;;  %v15954_v5 = vpack.c.bf16 %v8938_v29, %v8937_v20  ;;  %v15958_v27 = vpack.c.bf16 %v8940_v13, %v8939_v44  ;;  %v8896_v20 = vld [vmem:[%s22036_s3 + $0x848] sm:$0xff] }
 0x40c   :  { %15913 = vmatpush3.bf16.msra.mxu0 %v15912_v21  ;;  %v8548_v21 = vmul.f32 %v19561_v33, %v18006_v55  ;;  %v8922_v55 = vld [vmem:[%s22036_s3 + $0x918] sm:$0xff]  ;;  %v15928_v36 = vpack.c.bf16 %v8892_v50, %v8891_v23  ;;  %16981 = vpow2.f32 %v14074_v1  ;;  %v8923_v62 = vld [vmem:[%s22036_s3 + $0x920] sm:$0xff]  ;;  %v8925_v1 = vld [vmem:[%s22036_s3 + $0x930] sm:$0xff] }
 0x40d   :  { %9946 = vmatmul.mubr.f32.vlgmr.msra.gmra.mrb[186].mxu1 %v8543_v0  ;;  %15915 = vmatprep.subr.bf16.mxu0 %v15914_v57  ;;  %v8921_v57 = vld [vmem:[%s22036_s3 + $0x910] sm:$0xff]  ;;  %v8912_v0 = vld [vmem:[%s22036_s3 + $0x8c8] sm:$0xff]  ;;  %v22201_v7 = vld [vmem:[#allocation12_spill] sm:$0xff] }
 0x40e   :  { %9950 = vmatprep.mubr.f32.mxu1 %v8594_v53  ;;  %15921 = vmatpush3.bf16.msra.mxu1 %v15920_v24  ;;  %v16976_v24 = vpop.eup %16975  ;;  %v15956_v6 = vpack.c.bf16 %v8922_v55, %v8921_v57  ;;  %v8924_v53 = vld [vmem:[%s22036_s3 + $0x928] sm:$0xff]  ;;  %v8550_v34 = vmul.f32 %v19607_v56, %v22201_v7  ;;  %v15934_v48 = vpack.c.bf16 %v8912_v0, %v8911_v60  ;;  %v8897_v57 = vld [vmem:[%s22036_s3 + $0x850] sm:$0xff]  ;;  %v8898_v55 = vld [vmem:[%s22036_s3 + $0x858] sm:$0xff] }
 0x40f   :  { %15923 = vmatprep.subr.bf16.mxu1 %v15922_v61  ;;  %v22200_v61 = vld [vmem:[#allocation9_spill] sm:$0xff]  ;;  %v16978_v29 = vpop.eup %16977  ;;  %v15960_v43 = vpack.c.bf16 %v8924_v53, %v8923_v62  ;;  %v8945_v60 = vld [vmem:[%s22036_s3 + $0x9d0] sm:$0xff]  ;;  %v8946_v0 = vld [vmem:[%s22036_s3 + $0x9d8] sm:$0xff]  ;;  %v7033_v7 = vadd.f32 %v18903_v18, %v18778_v30 }
 0x410   :  { %15917 = vmatpush3.bf16.msra.mxu0 %v15916_v59  ;;  %v8595_v15 = vmul.f32 %v8390_v14, %v22200_v61  ;;  %v8197_v59 = vadd.f32 1.0, %v16976_v24  ;;  %v8941_v14 = vld [vmem:[%s22036_s3 + $0x9b0] sm:$0xff]  ;;  %v16980_v23 = vpop.eup %16979  ;;  %v8915_v44 = vld [vmem:[%s22036_s3 + $0x8e0] sm:$0xff]  ;;  %v8916_v13 = vld [vmem:[%s22036_s3 + $0x8e8] sm:$0xff]  ;;  %v15966_v24 = vpack.c.bf16 %v8944_v58, %v8943_v25  ;;  %v7177_v58 = vadd.f32 %v18976_v51, %v18778_v30 }
 0x411   :  { %9951 = vmatmul.mubr.f32.gmra.mrb[188].mxu1 %v8593_v10  ;;  %15951 = vmatprep.subr.bf16.mxu0 %v15950_v54  ;;  %v15932_v54 = vpack.c.bf16 %v8894_v63, %v8893_v31  ;;  %v8913_v10 = vld [vmem:[%s22036_s3 + $0x8d0] sm:$0xff]  ;;  %v15962_v50 = vpack.c.bf16 %v8942_v26, %v8941_v14  ;;  %v8928_v31 = vld [vmem:[%s22036_s3 + $0x948] sm:$0xff]  ;;  %v15942_v61 = vpack.c.bf16 %v8916_v13, %v8915_v44  ;;  %v8930_v26 = vld [vmem:[%s22036_s3 + $0x958] sm:$0xff] }
 0x412   :  { %15925 = vmatpush3.bf16.msra.mxu1 %v15924_v40  ;;  %10095 = vmatprep.mubr.f32.mxu1 %v8548_v21  ;;  %v8895_v40 = vld [vmem:[%s22036_s3 + $0x840] sm:$0xff]  ;;  %v8926_v21 = vld [vmem:[%s22036_s3 + $0x938] sm:$0xff]  ;;  %16983 = vrcp.f32 %v8197_v59  ;;  %v8917_v53 = vld [vmem:[%s22036_s3 + $0x8f0] sm:$0xff] }
 0x413   :  { %10021 = vmatmul.mubr.f32.vlgmr.msra.gmra.mrb[188].mxu0 %v8545_v47  ;;  %15927 = vmatprep.subr.bf16.mxu1 %v15926_v38  ;;  %v8914_v38 = vld [vmem:[%s22036_s3 + $0x8d8] sm:$0xff]  ;;  %v8202_v47 = vadd.f32 1.0, %v16978_v29  ;;  %v8929_v14 = vld [vmem:[%s22036_s3 + $0x950] sm:$0xff]  ;;  %v8948_v18 = vld [vmem:[%s22036_s3 + $0x9e8] sm:$0xff] }
 0x414   :  { %10025 = vmatprep.mubr.f32.mxu0 %v8596_v32  ;;  %15953 = vmatpush3.bf16.msra.mxu0 %v15952_v28  ;;  %v15936_v28 = vpack.c.bf16 %v8896_v20, %v8895_v40  ;;  %v8199_v32 = vadd.f32 1.0, %v16980_v23  ;;  %v8918_v59 = vld [vmem:[%s22036_s3 + $0x8f8] sm:$0xff]  ;;  %v8947_v40 = vld [vmem:[%s22036_s3 + $0x9e0] sm:$0xff]  ;;  %v8901_v29 = vld [vmem:[%s22036_s3 + $0x870] sm:$0xff] }
 0x415   :  { %15955 = vmatprep.subr.bf16.mxu0 %v15954_v5  ;;  %v15938_v5 = vpack.c.bf16 %v8914_v38, %v8913_v10  ;;  %16985 = vrcp.f32 %v8202_v47  ;;  %v15946_v20 = vpack.c.bf16 %v8918_v59, %v8917_v53  ;;  %v15972_v38 = vpack.c.bf16 %v8930_v26, %v8929_v14  ;;  %v8967_v23 = vld [vmem:[%s22036_s3 + $0xa80] sm:$0xff]  ;;  %v8932_v25 = vld [vmem:[%s22036_s3 + $0x968] sm:$0xff]  ;;  %v22202_v53 = vld [vmem:[#allocation15_spill] sm:$0xff] }
 0x416   :  { %15929 = vmatpush3.bf16.msra.mxu1 %v15928_v36  ;;  %v15964_v36 = vpack.c.bf16 %v8926_v21, %v8925_v1  ;;  %v16982_v63 = vpop.eup %16981  ;;  %16987 = vrcp.f32 %v8199_v32  ;;  %v14071_v1 = vmul.f32 -1.442695, %v7033_v7  ;;  %v15974_v21 = vpack.c.bf16 %v8948_v18, %v8947_v40  ;;  %v8951_v51 = vld [vmem:[%s22036_s3 + $0xa00] sm:$0xff]  ;;  %v8952_v44 = vld [vmem:[%s22036_s3 + $0xa08] sm:$0xff]  ;;  %v22203_v26 = vld [vmem:[#allocation11_spill] sm:$0xff] }
 0x417   :  { %10026 = vmatmul.mubr.f32.gmra.mrb[190].mxu0 %v8595_v15  ;;  %15931 = vmatprep.subr.bf16.mxu1 %v15930_v12  ;;  %v8927_v12 = vld [vmem:[%s22036_s3 + $0x940] sm:$0xff]  ;;  %v7248_v14 = vadd.f32 %v18984_v19, %v18778_v30 }
 0x418   :  { %15957 = vmatpush3.bf16.msra.mxu0 %v15956_v6  ;;  %10170 = vmatprep.mubr.f32.mxu0 %v8550_v34  ;;  %v15940_v6 = vpack.c.bf16 %v8898_v55, %v8897_v57  ;;  %v8899_v15 = vld [vmem:[%s22036_s3 + $0x860] sm:$0xff]  ;;  %v15968_v62 = vpack.c.bf16 %v8928_v31, %v8927_v12  ;;  %v8204_v34 = vadd.f32 1.0, %v16982_v63  ;;  %v8950_v57 = vld [vmem:[%s22036_s3 + $0x9f8] sm:$0xff]  ;;  %v7104_v55 = vadd.f32 %v18916_v49, %v18778_v30  ;;  %v8933_v63 = vld [vmem:[%s22036_s3 + $0x970] sm:$0xff] }
 0x419   :  { %15959 = vmatprep.subr.bf16.mxu0 %v15958_v27  ;;  %v8900_v27 = vld [vmem:[%s22036_s3 + $0x868] sm:$0xff]  ;;  %v8970_v49 = vld [vmem:[%s22036_s3 + $0xa98] sm:$0xff] }
 0x41a   :  { %15933 = vmatpush3.bf16.msra.mxu1 %v15932_v54  ;;  %v15970_v54 = vpack.c.bf16 %v8946_v0, %v8945_v60  ;;  %16989 = vrcp.f32 %v8204_v34  ;;  %v14076_v0 = vmul.f32 -1.442695, %v7177_v58  ;;  %v8953_v34 = vld [vmem:[%s22036_s3 + $0xa10] sm:$0xff]  ;;  %v8955_v58 = vld [vmem:[%s22036_s3 + $0xa20] sm:$0xff] }
 0x41b   :  { %15935 = vmatprep.subr.bf16.mxu1 %v15934_v48  ;;  %v15944_v48 = vpack.c.bf16 %v8900_v27, %v8899_v15  ;;  %16991 = vpow2.f32 %v14071_v1  ;;  %v8999_v15 = vld [vmem:[%s22036_s3 + $0xb80] sm:$0xff]  ;;  %v9000_v27 = vld [vmem:[%s22036_s3 + $0xb88] sm:$0xff] }
 0x41c   :  { %15961 = vmatpush3.bf16.msra.mxu0 %v15960_v43  ;;  %v8902_v43 = vld [vmem:[%s22036_s3 + $0x878] sm:$0xff]  ;;  %v16984_v10 = vpop.eup %16983  ;;  %16993 = vpow2.f32 %v14076_v0  ;;  %v9003_v0 = vld [vmem:[%s22036_s3 + $0xba0] sm:$0xff] }
 0x41d   :  { %15963 = vmatprep.subr.bf16.mxu0 %v15962_v50  ;;  %v8968_v50 = vld [vmem:[%s22036_s3 + $0xa88] sm:$0xff]  ;;  %v15948_v47 = vpack.c.bf16 %v8902_v43, %v8901_v29  ;;  %v8398_v32 = vrot.slane %v16984_v10, %v18795_v22  ;;  %v16014_v43 = vpack.c.bf16 %v9000_v27, %v8999_v15 }
 0x41e   :  { %15937 = vmatpush3.bf16.msra.mxu1 %v15936_v28  ;;  %v8931_v28 = vld [vmem:[%s22036_s3 + $0x960] sm:$0xff]  ;;  %v8972_v29 = vld [vmem:[%s22036_s3 + $0xaa8] sm:$0xff] }
 0x41f   :  { %15939 = vmatprep.subr.bf16.mxu1 %v15938_v5  ;;  %v8949_v5 = vld [vmem:[%s22036_s3 + $0x9f0] sm:$0xff]  ;;  %v15976_v13 = vpack.c.bf16 %v8932_v25, %v8931_v28  ;;  %v16986_v12 = vpop.eup %16985  ;;  %v8547_v59 = vmul.f32 %v8398_v32, %v22202_v53  ;;  %v8984_v10 = vld [vmem:[%s22036_s3 + $0xb08] sm:$0xff] }
 0x420   :  { %15965 = vmatpush3.bf16.msra.mxu0 %v15964_v36  ;;  %v15982_v36 = vpack.c.bf16 %v8968_v50, %v8967_v23  ;;  %v15978_v31 = vpack.c.bf16 %v8950_v57, %v8949_v5  ;;  %v16988_v60 = vpop.eup %16987  ;;  %v19781_v18 = vrot.slane %v16986_v12, %v18795_v22  ;;  %v9001_v23 = vld [vmem:[%s22036_s3 + $0xb90] sm:$0xff]  ;;  %v9002_v50 = vld [vmem:[%s22036_s3 + $0xb98] sm:$0xff]  ;;  %v14078_v5 = vmul.f32 -1.442695, %v7248_v14  ;;  %v22205_v57 = vld [vmem:[#allocation17_spill] sm:$0xff] }
 0x421   :  { %15967 = vmatprep.subr.bf16.mxu0 %v15966_v24  ;;  %v8969_v24 = vld [vmem:[%s22036_s3 + $0xa90] sm:$0xff]  ;;  %v8406_v19 = vrot.slane %v16988_v60, %v18795_v22  ;;  %v8986_v12 = vld [vmem:[%s22036_s3 + $0xb18] sm:$0xff] }
 0x422   :  { %15941 = vmatpush3.bf16.msra.mxu1 %v15940_v6  ;;  %v8934_v6 = vld [vmem:[%s22036_s3 + $0x978] sm:$0xff]  ;;  %v15986_v7 = vpack.c.bf16 %v8970_v49, %v8969_v24  ;;  %v16018_v24 = vpack.c.bf16 %v9002_v50, %v9001_v23  ;;  %v8985_v49 = vld [vmem:[%s22036_s3 + $0xb10] sm:$0xff]  ;;  %v8960_v23 = vld [vmem:[%s22036_s3 + $0xa48] sm:$0xff] }
 0x423   :  { %15943 = vmatprep.subr.bf16.mxu1 %v15942_v61  ;;  %v15984_v61 = vpack.c.bf16 %v8952_v44, %v8951_v51  ;;  %v15980_v40 = vpack.c.bf16 %v8934_v6, %v8933_v63  ;;  %v8974_v51 = vld [vmem:[%s22036_s3 + $0xab8] sm:$0xff]  ;;  %v16020_v53 = vpack.c.bf16 %v8986_v12, %v8985_v49  ;;  %v8979_v12 = vld [vmem:[%s22036_s3 + $0xae0] sm:$0xff] }
 0x424   :  { %15969 = vmatpush3.bf16.msra.mxu0 %v15968_v62  ;;  %v14073_v62 = vmul.f32 -1.442695, %v7104_v55  ;;  %v16990_v1 = vpop.eup %16989  ;;  %v8552_v55 = vmul.f32 %v19781_v18, %v22205_v57  ;;  %v22206_v44 = vld [vmem:[#allocation16_spill] sm:$0xff] }
 0x425   :  { %15971 = vmatprep.subr.bf16.mxu0 %v15970_v54  ;;  %v8954_v54 = vld [vmem:[%s22036_s3 + $0xa18] sm:$0xff]  ;;  %v19827_v60 = vrot.slane %v16990_v1, %v18795_v22  ;;  %v16992_v15 = vpop.eup %16991 }
 0x426   :  { %15945 = vmatpush3.bf16.msra.mxu1 %v15944_v48  ;;  %v8598_v48 = vmul.f32 %v19561_v33, %v22203_v26  ;;  %v8983_v33 = vld [vmem:[%s22036_s3 + $0xb00] sm:$0xff]  ;;  %16995 = vpow2.f32 %v14073_v62  ;;  %v8958_v62 = vld [vmem:[%s22036_s3 + $0xa38] sm:$0xff]  ;;  %v16994_v50 = vpop.eup %16993 }
 0x427   :  { %15947 = vmatprep.subr.bf16.mxu1 %v15946_v20  ;;  %v8971_v20 = vld [vmem:[%s22036_s3 + $0xaa0] sm:$0xff]  ;;  %16997 = vpow2.f32 %v14078_v5  ;;  %v8990_v5 = vld [vmem:[%s22036_s3 + $0xb38] sm:$0xff] }
 0x428   :  { %15973 = vmatpush3.bf16.msra.mxu0 %v15972_v38  ;;  %v15988_v38 = vpack.c.bf16 %v8954_v54, %v8953_v34  ;;  %v15990_v25 = vpack.c.bf16 %v8972_v29, %v8971_v20  ;;  %v22208_v34 = vld [vmem:[#allocation13_spill] sm:$0xff]  ;;  %v22209_v20 = vld [vmem:[#allocation20_spill] sm:$0xff] }
 0x429   :  { %15975 = vmatprep.subr.bf16.mxu0 %v15974_v21  ;;  %v22204_v21 = vld [vmem:[#allocation10_spill] sm:$0xff]  ;;  %v8599_v54 = vmul.f32 %v8406_v19, %v22208_v34  ;;  %v8987_v26 = vld [vmem:[%s22036_s3 + $0xb20] sm:$0xff]  ;;  %v8554_v29 = vmul.f32 %v19827_v60, %v22209_v20 }
 0x42a   :  { %15949 = vmatpush3.bf16.msra.mxu1 %v15948_v47  ;;  %v8597_v28 = vmul.f32 %v8398_v32, %v22204_v21  ;;  %v8956_v47 = vld [vmem:[%s22036_s3 + $0xa28] sm:$0xff]  ;;  %v8973_v32 = vld [vmem:[%s22036_s3 + $0xab0] sm:$0xff] }
 0x42b   :  { %15983 = vmatprep.subr.bf16.mxu1 %v15982_v36  ;;  %v16016_v36 = vpack.c.bf16 %v8984_v10, %v8983_v33  ;;  %v15992_v6 = vpack.c.bf16 %v8956_v47, %v8955_v58  ;;  %v15994_v27 = vpack.c.bf16 %v8974_v51, %v8973_v32  ;;  %v9006_v33 = vld [vmem:[%s22036_s3 + $0xbb8] sm:$0xff]  ;;  %v8977_v21 = vld [vmem:[%s22036_s3 + $0xad0] sm:$0xff]  ;;  %v8206_v32 = vadd.f32 1.0, %v16994_v50 }
 0x42c   :  { %15977 = vmatpush3.bf16.msra.mxu0 %v15976_v13  ;;  %v8549_v13 = vmul.f32 %v8406_v19, %v22206_v44  ;;  %v9005_v19 = vld [vmem:[%s22036_s3 + $0xbb0] sm:$0xff] }
 0x42d   :  { %10096 = vmatmul.mubr.f32.vlgmr.msra.gmra.mrb[190].mxu1 %v8547_v59  ;;  %15979 = vmatprep.subr.bf16.mxu0 %v15978_v31  ;;  %v22207_v31 = vld [vmem:[#allocation14_spill] sm:$0xff]  ;;  %v8975_v59 = vld [vmem:[%s22036_s3 + $0xac0] sm:$0xff]  ;;  %v16026_v58 = vpack.c.bf16 %v9006_v33, %v9005_v19 }
 0x42e   :  { %10100 = vmatprep.mubr.f32.mxu1 %v8598_v48  ;;  %15985 = vmatpush3.bf16.msra.mxu1 %v15984_v61  ;;  %v8600_v63 = vmul.f32 %v19607_v56, %v22207_v31  ;;  %v9004_v61 = vld [vmem:[%s22036_s3 + $0xba8] sm:$0xff]  ;;  %v8957_v56 = vld [vmem:[%s22036_s3 + $0xa30] sm:$0xff]  ;;  %v9011_v19 = vld [vmem:[%s22036_s3 + $0xbe0] sm:$0xff] }
 0x42f   :  { %15987 = vmatprep.subr.bf16.mxu1 %v15986_v7  ;;  %v8976_v7 = vld [vmem:[%s22036_s3 + $0xac8] sm:$0xff]  ;;  %v16022_v14 = vpack.c.bf16 %v9004_v61, %v9003_v0  ;;  %v8989_v47 = vld [vmem:[%s22036_s3 + $0xb30] sm:$0xff] }
 0x430   :  { %15981 = vmatpush3.bf16.msra.mxu0 %v15980_v40  ;;  %v8988_v48 = vld [vmem:[%s22036_s3 + $0xb28] sm:$0xff]  ;;  %v8201_v40 = vadd.f32 1.0, %v16992_v15  ;;  %v15998_v10 = vpack.c.bf16 %v8976_v7, %v8975_v59  ;;  %v8961_v44 = vld [vmem:[%s22036_s3 + $0xa50] sm:$0xff]  ;;  %v16028_v49 = vpack.c.bf16 %v8990_v5, %v8989_v47  ;;  %v8995_v47 = vld [vmem:[%s22036_s3 + $0xb60] sm:$0xff] }
 0x431   :  { %10101 = vmatmul.mubr.f32.gmra.mrb[192].mxu1 %v8597_v28  ;;  %16015 = vmatprep.subr.bf16.mxu0 %v16014_v43  ;;  %v15996_v43 = vpack.c.bf16 %v8958_v62, %v8957_v56  ;;  %v16024_v1 = vpack.c.bf16 %v8988_v48, %v8987_v26  ;;  %v8978_v28 = vld [vmem:[%s22036_s3 + $0xad8] sm:$0xff]  ;;  %v8980_v31 = vld [vmem:[%s22036_s3 + $0xae8] sm:$0xff]  ;;  %v8981_v34 = vld [vmem:[%s22036_s3 + $0xaf0] sm:$0xff] }
 0x432   :  { %15989 = vmatpush3.bf16.msra.mxu1 %v15988_v38  ;;  %10245 = vmatprep.mubr.f32.mxu1 %v8552_v55  ;;  %v8959_v38 = vld [vmem:[%s22036_s3 + $0xa40] sm:$0xff]  ;;  %16999 = vrcp.f32 %v8201_v40  ;;  %v16002_v51 = vpack.c.bf16 %v8978_v28, %v8977_v21  ;;  %v8992_v0 = vld [vmem:[%s22036_s3 + $0xb48] sm:$0xff]  ;;  %v9010_v56 = vld [vmem:[%s22036_s3 + $0xbd8] sm:$0xff]  ;;  %v16006_v62 = vpack.c.bf16 %v8980_v31, %v8979_v12 }
 0x433   :  { %10171 = vmatmul.mubr.f32.vlgmr.msra.gmra.mrb[192].mxu0 %v8549_v13  ;;  %15991 = vmatprep.subr.bf16.mxu1 %v15990_v25  ;;  %v16996_v25 = vpop.eup %16995  ;;  %v16000_v57 = vpack.c.bf16 %v8960_v23, %v8959_v38  ;;  %v9007_v55 = vld [vmem:[%s22036_s3 + $0xbc0] sm:$0xff]  ;;  %v8962_v13 = vld [vmem:[%s22036_s3 + $0xa58] sm:$0xff]  ;;  %17001 = vrcp.f32 %v8206_v32  ;;  %v8964_v59 = vld [vmem:[%s22036_s3 + $0xa68] sm:$0xff] }
 0x434   :  { %10175 = vmatprep.mubr.f32.mxu0 %v8600_v63  ;;  %16017 = vmatpush3.bf16.msra.mxu0 %v16016_v36  ;;  %v9008_v36 = vld [vmem:[%s22036_s3 + $0xbc8] sm:$0xff]  ;;  %v16998_v61 = vpop.eup %16997  ;;  %v16004_v15 = vpack.c.bf16 %v8962_v13, %v8961_v44  ;;  %v8993_v20 = vld [vmem:[%s22036_s3 + $0xb50] sm:$0xff]  ;;  %v8966_v23 = vld [vmem:[%s22036_s3 + $0xa78] sm:$0xff] }
 0x435   :  { %16019 = vmatprep.subr.bf16.mxu0 %v16018_v24  ;;  %v8203_v24 = vadd.f32 1.0, %v16996_v25  ;;  %v16030_v63 = vpack.c.bf16 %v9008_v36, %v9007_v55  ;;  %v8208_v48 = vadd.f32 1.0, %v16998_v61  ;;  %v9012_v33 = vld [vmem:[%s22036_s3 + $0xbe8] sm:$0xff]  ;;  %v8965_v38 = vld [vmem:[%s22036_s3 + $0xa70] sm:$0xff]  ;;  %v9031_v21 = vld [vmem:[%s22036_s3 + $0xc80] sm:$0xff] }
 0x436   :  { %15993 = vmatpush3.bf16.msra.mxu1 %v15992_v6  ;;  %v8991_v6 = vld [vmem:[%s22036_s3 + $0xb40] sm:$0xff]  ;;  %v9032_v28 = vld [vmem:[%s22036_s3 + $0xc88] sm:$0xff]  ;;  %v16012_v36 = vpack.c.bf16 %v8966_v23, %v8965_v38  ;;  %v9013_v32 = vld [vmem:[%s22036_s3 + $0xbf0] sm:$0xff] }
 0x437   :  { %10176 = vmatmul.mubr.f32.gmra.mrb[194].mxu0 %v8599_v54  ;;  %15995 = vmatprep.subr.bf16.mxu1 %v15994_v27  ;;  %v9009_v27 = vld [vmem:[%s22036_s3 + $0xbd0] sm:$0xff]  ;;  %17003 = vrcp.f32 %v8203_v24  ;;  %v16032_v7 = vpack.c.bf16 %v8992_v0, %v8991_v6  ;;  %v8982_v54 = vld [vmem:[%s22036_s3 + $0xaf8] sm:$0xff]  ;;  %v8996_v5 = vld [vmem:[%s22036_s3 + $0xb68] sm:$0xff] }
 0x438   :  { %16021 = vmatpush3.bf16.msra.mxu0 %v16020_v53  ;;  %10320 = vmatprep.mubr.f32.mxu0 %v8554_v29  ;;  %v8963_v53 = vld [vmem:[%s22036_s3 + $0xa60] sm:$0xff]  ;;  %v16034_v40 = vpack.c.bf16 %v9010_v56, %v9009_v27  ;;  %v8994_v29 = vld [vmem:[%s22036_s3 + $0xb58] sm:$0xff]  ;;  %17005 = vrcp.f32 %v8208_v48  ;;  %v9016_v31 = vld [vmem:[%s22036_s3 + $0xc08] sm:$0xff] }
 0x439   :  { %16023 = vmatprep.subr.bf16.mxu0 %v16022_v14  ;;  %v22210_v14 = vld [vmem:[#allocation78_spill] sm:$0xff]  ;;  %v22212_v44 = vld [vmem:[#allocation79_spill] sm:$0xff]  ;;  %v9015_v12 = vld [vmem:[%s22036_s3 + $0xc00] sm:$0xff] }
 0x43a   :  { %15997 = vmatpush3.bf16.msra.mxu1 %v15996_v43  ;;  %v7175_v26 = vadd.f32 %v22210_v14, %v18778_v30  ;;  %v16008_v43 = vpack.c.bf16 %v8964_v59, %v8963_v53  ;;  %v7246_v13 = vadd.f32 %v22212_v44, %v18778_v30  ;;  %v9033_v6 = vld [vmem:[%s22036_s3 + $0xc90] sm:$0xff]  ;;  %v9034_v0 = vld [vmem:[%s22036_s3 + $0xc98] sm:$0xff]  ;;  %v16048_v59 = vpack.c.bf16 %v9016_v31, %v9015_v12  ;;  %v9035_v23 = vld [vmem:[%s22036_s3 + $0xca0] sm:$0xff] }
 0x43b   :  { %15999 = vmatprep.subr.bf16.mxu1 %v15998_v10  ;;  %v16010_v10 = vpack.c.bf16 %v8982_v54, %v8981_v34  ;;  %v8997_v27 = vld [vmem:[%s22036_s3 + $0xb70] sm:$0xff]  ;;  %v8998_v56 = vld [vmem:[%s22036_s3 + $0xb78] sm:$0xff]  ;;  %v9064_v34 = vld [vmem:[%s22036_s3 + $0xd88] sm:$0xff]  ;;  %v16050_v48 = vpack.c.bf16 %v9034_v0, %v9033_v6 }
 0x43c   :  { %16025 = vmatpush3.bf16.msra.mxu0 %v16024_v1  ;;  %v17000_v50 = vpop.eup %16999  ;;  %v16036_v1 = vpack.c.bf16 %v8994_v29, %v8993_v20  ;;  %v14075_v25 = vmul.f32 -1.442695, %v7175_v26  ;;  %v14077_v54 = vmul.f32 -1.442695, %v7246_v13  ;;  %v22213_v14 = vld [vmem:[#allocation23_spill] sm:$0xff]  ;;  %v22217_v13 = vld [vmem:[#allocation25_spill] sm:$0xff] }
 0x43d   :  { %16027 = vmatprep.subr.bf16.mxu0 %v16026_v58  ;;  %v16038_v58 = vpack.c.bf16 %v9012_v33, %v9011_v19  ;;  %v8414_v24 = vrot.slane %v17000_v50, %v18795_v22  ;;  %v17002_v61 = vpop.eup %17001  ;;  %v9018_v20 = vld [vmem:[%s22036_s3 + $0xc18] sm:$0xff]  ;;  %v9036_v50 = vld [vmem:[%s22036_s3 + $0xca8] sm:$0xff] }
 0x43e   :  { %16001 = vmatpush3.bf16.msra.mxu1 %v16000_v57  ;;  %v22211_v57 = vld [vmem:[#allocation82_spill] sm:$0xff]  ;;  %17007 = vpow2.f32 %v14075_v25  ;;  %v22214_v29 = vld [vmem:[#allocation83_spill] sm:$0xff]  ;;  %v20001_v38 = vrot.slane %v17002_v61, %v18795_v22 }
 0x43f   :  { %16003 = vmatprep.subr.bf16.mxu1 %v16002_v51  ;;  %v7319_v55 = vadd.f32 %v22211_v57, %v18778_v30  ;;  %v9014_v51 = vld [vmem:[%s22036_s3 + $0xbf8] sm:$0xff]  ;;  %v8551_v26 = vmul.f32 %v8414_v24, %v22213_v14  ;;  %v22216_v57 = vld [vmem:[#allocation18_spill] sm:$0xff] }
 0x440   :  { %16029 = vmatpush3.bf16.msra.mxu0 %v16028_v49  ;;  %v16046_v49 = vpack.c.bf16 %v9032_v28, %v9031_v21  ;;  %v22215_v19 = vld [vmem:[#allocation19_spill] sm:$0xff]  ;;  %v9048_v28 = vld [vmem:[%s22036_s3 + $0xd08] sm:$0xff] }
 0x441   :  { %16031 = vmatprep.subr.bf16.mxu0 %v16030_v63  ;;  %v16040_v63 = vpack.c.bf16 %v8996_v5, %v8995_v47  ;;  %v14080_v53 = vmul.f32 -1.442695, %v7319_v55  ;;  %v8602_v33 = vmul.f32 %v19781_v18, %v22215_v19  ;;  %v9047_v18 = vld [vmem:[%s22036_s3 + $0xd00] sm:$0xff]  ;;  %v9066_v47 = vld [vmem:[%s22036_s3 + $0xd98] sm:$0xff]  ;;  %v8601_v55 = vmul.f32 %v8414_v24, %v22216_v57  ;;  %v9037_v24 = vld [vmem:[%s22036_s3 + $0xcb0] sm:$0xff] }
 0x442   :  { %16005 = vmatpush3.bf16.msra.mxu1 %v16004_v15  ;;  %v16042_v15 = vpack.c.bf16 %v9014_v51, %v9013_v32  ;;  %v9019_v32 = vld [vmem:[%s22036_s3 + $0xc20] sm:$0xff]  ;;  %v9020_v51 = vld [vmem:[%s22036_s3 + $0xc28] sm:$0xff]  ;;  %v16080_v12 = vpack.c.bf16 %v9048_v28, %v9047_v18  ;;  %v9038_v31 = vld [vmem:[%s22036_s3 + $0xcb8] sm:$0xff] }
 0x443   :  { %16007 = vmatprep.subr.bf16.mxu1 %v16006_v62  ;;  %v17004_v62 = vpop.eup %17003  ;;  %17009 = vpow2.f32 %v14080_v53  ;;  %v9049_v61 = vld [vmem:[%s22036_s3 + $0xd10] sm:$0xff]  ;;  %v9022_v14 = vld [vmem:[%s22036_s3 + $0xc38] sm:$0xff]  ;;  %v9051_v19 = vld [vmem:[%s22036_s3 + $0xd20] sm:$0xff] }
 0x444   :  { %16033 = vmatpush3.bf16.msra.mxu0 %v16032_v7  ;;  %v9063_v7 = vld [vmem:[%s22036_s3 + $0xd80] sm:$0xff]  ;;  %v17006_v5 = vpop.eup %17005  ;;  %17011 = vpow2.f32 %v14077_v54  ;;  %v16058_v54 = vpack.c.bf16 %v9038_v31, %v9037_v24  ;;  %v9070_v18 = vld [vmem:[%s22036_s3 + $0xdb8] sm:$0xff]  ;;  %v9041_v57 = vld [vmem:[%s22036_s3 + $0xcd0] sm:$0xff] }
 0x445   :  { %16035 = vmatprep.subr.bf16.mxu0 %v16034_v40  ;;  %v9017_v40 = vld [vmem:[%s22036_s3 + $0xc10] sm:$0xff]  ;;  %v16078_v21 = vpack.c.bf16 %v9064_v34, %v9063_v7  ;;  %v20047_v53 = vrot.slane %v17006_v5, %v18795_v22  ;;  %v9068_v7 = vld [vmem:[%s22036_s3 + $0xda8] sm:$0xff] }
 0x446   :  { %16009 = vmatpush3.bf16.msra.mxu1 %v16008_v43  ;;  %v7390_v43 = vadd.f32 %v22214_v29, %v18778_v30  ;;  %v16052_v25 = vpack.c.bf16 %v9018_v20, %v9017_v40  ;;  %v9040_v40 = vld [vmem:[%s22036_s3 + $0xcc8] sm:$0xff] }
 0x447   :  { %16011 = vmatprep.subr.bf16.mxu1 %v16010_v10  ;;  %v16044_v10 = vpack.c.bf16 %v8998_v56, %v8997_v27  ;;  %v22219_v27 = vld [vmem:[#allocation22_spill] sm:$0xff]  ;;  %v22220_v20 = vld [vmem:[#allocation21_spill] sm:$0xff] }
 0x448   :  { %16037 = vmatpush3.bf16.msra.mxu0 %v16036_v1  ;;  %v8422_v1 = vrot.slane %v17004_v62, %v18795_v22  ;;  %v14082_v44 = vmul.f32 -1.442695, %v7390_v43  ;;  %v8604_v56 = vmul.f32 %v19827_v60, %v22219_v27  ;;  %v16056_v62 = vpack.c.bf16 %v9020_v51, %v9019_v32  ;;  %v17008_v34 = vpop.eup %17007  ;;  %v9021_v60 = vld [vmem:[%s22036_s3 + $0xc30] sm:$0xff]  ;;  %v9044_v27 = vld [vmem:[%s22036_s3 + $0xce8] sm:$0xff] }
 0x449   :  { %16039 = vmatprep.subr.bf16.mxu0 %v16038_v58  ;;  %v9065_v58 = vld [vmem:[%s22036_s3 + $0xd90] sm:$0xff] }
 0x44a   :  { %16013 = vmatpush3.bf16.msra.mxu1 %v16012_v36  ;;  %v16054_v36 = vpack.c.bf16 %v9036_v50, %v9035_v23  ;;  %v16082_v0 = vpack.c.bf16 %v9066_v47, %v9065_v58  ;;  %17013 = vpow2.f32 %v14082_v44  ;;  %v8603_v29 = vmul.f32 %v8422_v1, %v22220_v20  ;;  %v22221_v23 = vld [vmem:[#allocation28_spill] sm:$0xff]  ;;  %v9024_v58 = vld [vmem:[%s22036_s3 + $0xc48] sm:$0xff]  ;;  %v9053_v51 = vld [vmem:[%s22036_s3 + $0xd30] sm:$0xff] }
 0x44b   :  { %16047 = vmatprep.subr.bf16.mxu1 %v16046_v49  ;;  %v8556_v49 = vmul.f32 %v20001_v38, %v22217_v13  ;;  %v8558_v50 = vmul.f32 %v20047_v53, %v22221_v23  ;;  %v9054_v44 = vld [vmem:[%s22036_s3 + $0xd38] sm:$0xff]  ;;  %v9045_v20 = vld [vmem:[%s22036_s3 + $0xcf0] sm:$0xff] }
 0x44c   :  { %16041 = vmatpush3.bf16.msra.mxu0 %v16040_v63  ;;  %v22218_v63 = vld [vmem:[#allocation24_spill] sm:$0xff]  ;;  %v9057_v23 = vld [vmem:[%s22036_s3 + $0xd50] sm:$0xff] }
 0x44d   :  { %10246 = vmatmul.mubr.f32.vlgmr.msra.gmra.mrb[194].mxu1 %v8551_v26  ;;  %16043 = vmatprep.subr.bf16.mxu0 %v16042_v15  ;;  %v8553_v6 = vmul.f32 %v8422_v1, %v22218_v63  ;;  %v9050_v15 = vld [vmem:[%s22036_s3 + $0xd18] sm:$0xff]  ;;  %v9069_v1 = vld [vmem:[%s22036_s3 + $0xdb0] sm:$0xff]  ;;  %v17010_v47 = vpop.eup %17009 }
 0x44e   :  { %10250 = vmatprep.mubr.f32.mxu1 %v8602_v33  ;;  %16049 = vmatpush3.bf16.msra.mxu1 %v16048_v59  ;;  %v9067_v59 = vld [vmem:[%s22036_s3 + $0xda0] sm:$0xff]  ;;  %v16084_v26 = vpack.c.bf16 %v9050_v15, %v9049_v61  ;;  %v9052_v33 = vld [vmem:[%s22036_s3 + $0xd28] sm:$0xff]  ;;  %v16090_v32 = vpack.c.bf16 %v9070_v18, %v9069_v1  ;;  %v8210_v24 = vadd.f32 1.0, %v17010_v47  ;;  %v9025_v63 = vld [vmem:[%s22036_s3 + $0xc50] sm:$0xff]  ;;  %v16092_v61 = vpack.c.bf16 %v9054_v44, %v9053_v51 }
 0x44f   :  { %16051 = vmatprep.subr.bf16.mxu1 %v16050_v48  ;;  %v9039_v48 = vld [vmem:[%s22036_s3 + $0xcc0] sm:$0xff]  ;;  %v16086_v43 = vpack.c.bf16 %v9068_v7, %v9067_v59  ;;  %v16088_v5 = vpack.c.bf16 %v9052_v33, %v9051_v19  ;;  %v9056_v59 = vld [vmem:[%s22036_s3 + $0xd48] sm:$0xff] }
 0x450   :  { %16045 = vmatpush3.bf16.msra.mxu0 %v16044_v10  ;;  %v8205_v10 = vadd.f32 1.0, %v17008_v34  ;;  %v16062_v28 = vpack.c.bf16 %v9040_v40, %v9039_v48  ;;  %v9043_v15 = vld [vmem:[%s22036_s3 + $0xce0] sm:$0xff]  ;;  %v9028_v48 = vld [vmem:[%s22036_s3 + $0xc68] sm:$0xff] }
 0x451   :  { %10251 = vmatmul.mubr.f32.gmra.mrb[196].mxu1 %v8601_v55  ;;  %16079 = vmatprep.subr.bf16.mxu0 %v16078_v21  ;;  %v16060_v21 = vpack.c.bf16 %v9022_v14, %v9021_v60  ;;  %v9042_v55 = vld [vmem:[%s22036_s3 + $0xcd8] sm:$0xff]  ;;  %v16070_v14 = vpack.c.bf16 %v9044_v27, %v9043_v15  ;;  %v9075_v1 = vld [vmem:[%s22036_s3 + $0xde0] sm:$0xff]  ;;  %v9076_v18 = vld [vmem:[%s22036_s3 + $0xde8] sm:$0xff] }
 0x452   :  { %16053 = vmatpush3.bf16.msra.mxu1 %v16052_v25  ;;  %10395 = vmatprep.mubr.f32.mxu1 %v8556_v49  ;;  %v9023_v25 = vld [vmem:[%s22036_s3 + $0xc40] sm:$0xff]  ;;  %17015 = vrcp.f32 %v8205_v10  ;;  %v16066_v31 = vpack.c.bf16 %v9042_v55, %v9041_v57  ;;  %v9074_v60 = vld [vmem:[%s22036_s3 + $0xdd8] sm:$0xff]  ;;  %v9096_v55 = vld [vmem:[%s22036_s3 + $0xe88] sm:$0xff] }
 0x453   :  { %10321 = vmatmul.mubr.f32.vlgmr.msra.gmra.mrb[196].mxu0 %v8553_v6  ;;  %16055 = vmatprep.subr.bf16.mxu1 %v16054_v36  ;;  %v17012_v36 = vpop.eup %17011  ;;  %v16064_v13 = vpack.c.bf16 %v9024_v58, %v9023_v25  ;;  %v9071_v49 = vld [vmem:[%s22036_s3 + $0xdc0] sm:$0xff]  ;;  %v9026_v6 = vld [vmem:[%s22036_s3 + $0xc58] sm:$0xff]  ;;  %17017 = vrcp.f32 %v8210_v24  ;;  %v9029_v25 = vld [vmem:[%s22036_s3 + $0xc70] sm:$0xff] }
 0x454   :  { %10325 = vmatprep.mubr.f32.mxu0 %v8604_v56  ;;  %16081 = vmatpush3.bf16.msra.mxu0 %v16080_v12  ;;  %v9072_v12 = vld [vmem:[%s22036_s3 + $0xdc8] sm:$0xff]  ;;  %v17014_v7 = vpop.eup %17013  ;;  %v16068_v34 = vpack.c.bf16 %v9026_v6, %v9025_v63  ;;  %v9030_v58 = vld [vmem:[%s22036_s3 + $0xc78] sm:$0xff]  ;;  %v9095_v57 = vld [vmem:[%s22036_s3 + $0xe80] sm:$0xff] }
 0x455   :  { %16083 = vmatprep.subr.bf16.mxu0 %v16082_v0  ;;  %v8207_v0 = vadd.f32 1.0, %v17012_v36  ;;  %v16094_v56 = vpack.c.bf16 %v9072_v12, %v9071_v49  ;;  %v8212_v33 = vadd.f32 1.0, %v17014_v7  ;;  %v9059_v51 = vld [vmem:[%s22036_s3 + $0xd60] sm:$0xff]  ;;  %v9060_v44 = vld [vmem:[%s22036_s3 + $0xd68] sm:$0xff]  ;;  %v16076_v49 = vpack.c.bf16 %v9030_v58, %v9029_v25  ;;  %v9077_v12 = vld [vmem:[%s22036_s3 + $0xdf0] sm:$0xff] }
 0x456   :  { %16057 = vmatpush3.bf16.msra.mxu1 %v16056_v62  ;;  %v9055_v62 = vld [vmem:[%s22036_s3 + $0xd40] sm:$0xff]  ;;  %v9078_v24 = vld [vmem:[%s22036_s3 + $0xdf8] sm:$0xff]  ;;  %v16104_v15 = vpack.c.bf16 %v9060_v44, %v9059_v51  ;;  %v9097_v27 = vld [vmem:[%s22036_s3 + $0xe90] sm:$0xff] }
 0x457   :  { %10326 = vmatmul.mubr.f32.gmra.mrb[198].mxu0 %v8603_v29  ;;  %16059 = vmatprep.subr.bf16.mxu1 %v16058_v54  ;;  %v9073_v54 = vld [vmem:[%s22036_s3 + $0xdd0] sm:$0xff]  ;;  %17019 = vrcp.f32 %v8207_v0  ;;  %v16096_v40 = vpack.c.bf16 %v9056_v59, %v9055_v62  ;;  %v9046_v29 = vld [vmem:[%s22036_s3 + $0xcf8] sm:$0xff]  ;;  %v16110_v0 = vpack.c.bf16 %v9096_v55, %v9095_v57  ;;  %v16106_v59 = vpack.c.bf16 %v9078_v24, %v9077_v12  ;;  %v9112_v58 = vld [vmem:[%s22036_s3 + $0xf08] sm:$0xff] }
 0x458   :  { %16085 = vmatpush3.bf16.msra.mxu0 %v16084_v26  ;;  %10470 = vmatprep.mubr.f32.mxu0 %v8558_v50  ;;  %v9027_v26 = vld [vmem:[%s22036_s3 + $0xc60] sm:$0xff]  ;;  %v16098_v10 = vpack.c.bf16 %v9074_v60, %v9073_v54  ;;  %v9058_v50 = vld [vmem:[%s22036_s3 + $0xd58] sm:$0xff]  ;;  %17021 = vrcp.f32 %v8212_v33  ;;  %v9061_v7 = vld [vmem:[%s22036_s3 + $0xd70] sm:$0xff] }
 0x459   :  { %16087 = vmatprep.subr.bf16.mxu0 %v16086_v43  ;;  %v22222_v43 = vld [vmem:[#allocation80_spill] sm:$0xff]  ;;  %v22227_v12 = vld [vmem:[#allocation33_spill] sm:$0xff] }
 0x45a   :  { %16061 = vmatpush3.bf16.msra.mxu1 %v16060_v21  ;;  %v7317_v19 = vadd.f32 %v22222_v43, %v18778_v30  ;;  %v16072_v21 = vpack.c.bf16 %v9028_v48, %v9027_v26  ;;  %v9127_v26 = vld [vmem:[%s22036_s3 + $0xf80] sm:$0xff]  ;;  %v9128_v48 = vld [vmem:[%s22036_s3 + $0xf88] sm:$0xff]  ;;  %v9082_v33 = vld [vmem:[%s22036_s3 + $0xe18] sm:$0xff] }
 0x45b   :  { %16063 = vmatprep.subr.bf16.mxu1 %v16062_v28  ;;  %v16074_v28 = vpack.c.bf16 %v9046_v29, %v9045_v20  ;;  %v22224_v20 = vld [vmem:[#allocation31_spill] sm:$0xff]  ;;  %v16142_v25 = vpack.c.bf16 %v9128_v48, %v9127_v26  ;;  %v9083_v44 = vld [vmem:[%s22036_s3 + $0xe20] sm:$0xff] }
 0x45c   :  { %16089 = vmatpush3.bf16.msra.mxu0 %v16088_v5  ;;  %v17016_v47 = vpop.eup %17015  ;;  %v16100_v5 = vpack.c.bf16 %v9058_v50, %v9057_v23  ;;  %v14079_v36 = vmul.f32 -1.442695, %v7317_v19  ;;  %v9081_v19 = vld [vmem:[%s22036_s3 + $0xe10] sm:$0xff]  ;;  %v9130_v57 = vld [vmem:[%s22036_s3 + $0xf98] sm:$0xff] }
 0x45d   :  { %16091 = vmatprep.subr.bf16.mxu0 %v16090_v32  ;;  %v16102_v32 = vpack.c.bf16 %v9076_v18, %v9075_v1  ;;  %v8430_v6 = vrot.slane %v17016_v47, %v18795_v22  ;;  %v17018_v62 = vpop.eup %17017  ;;  %v22225_v23 = vld [vmem:[#allocation27_spill] sm:$0xff]  ;;  %v9099_v18 = vld [vmem:[%s22036_s3 + $0xea0] sm:$0xff]  ;;  %v16116_v47 = vpack.c.bf16 %v9082_v33, %v9081_v19 }
 0x45e   :  { %16065 = vmatpush3.bf16.msra.mxu1 %v16064_v13  ;;  %v7461_v13 = vadd.f32 %v19092_v46, %v18778_v30  ;;  %v9079_v46 = vld [vmem:[%s22036_s3 + $0xe00] sm:$0xff]  ;;  %17023 = vpow2.f32 %v14079_v36  ;;  %v8606_v50 = vmul.f32 %v20001_v38, %v22225_v23  ;;  %v20221_v1 = vrot.slane %v17018_v62, %v18795_v22  ;;  %v22226_v36 = vld [vmem:[#allocation26_spill] sm:$0xff]  ;;  %v9086_v26 = vld [vmem:[%s22036_s3 + $0xe38] sm:$0xff] }
 0x45f   :  { %16067 = vmatprep.subr.bf16.mxu1 %v16066_v31  ;;  %v22223_v31 = vld [vmem:[#allocation81_spill] sm:$0xff]  ;;  %v8555_v29 = vmul.f32 %v8430_v6, %v22224_v20 }
 0x460   :  { %16093 = vmatpush3.bf16.msra.mxu0 %v16092_v61  ;;  %v7388_v63 = vadd.f32 %v22223_v31, %v18778_v30  ;;  %v9080_v61 = vld [vmem:[%s22036_s3 + $0xe08] sm:$0xff]  ;;  %v14084_v60 = vmul.f32 -1.442695, %v7461_v13  ;;  %v9111_v38 = vld [vmem:[%s22036_s3 + $0xf00] sm:$0xff]  ;;  %v8560_v24 = vmul.f32 %v20221_v1, %v22227_v12 }
 0x461   :  { %16095 = vmatprep.subr.bf16.mxu0 %v16094_v56  ;;  %v9098_v56 = vld [vmem:[%s22036_s3 + $0xe98] sm:$0xff]  ;;  %v17020_v54 = vpop.eup %17019  ;;  %v9084_v13 = vld [vmem:[%s22036_s3 + $0xe28] sm:$0xff]  ;;  %v16144_v31 = vpack.c.bf16 %v9112_v58, %v9111_v38  ;;  %v9115_v33 = vld [vmem:[%s22036_s3 + $0xf20] sm:$0xff] }
 0x462   :  { %16069 = vmatpush3.bf16.msra.mxu1 %v16068_v34  ;;  %v9062_v34 = vld [vmem:[%s22036_s3 + $0xd78] sm:$0xff]  ;;  %v16114_v43 = vpack.c.bf16 %v9098_v56, %v9097_v27  ;;  %17025 = vpow2.f32 %v14084_v60  ;;  %v17022_v55 = vpop.eup %17021  ;;  %v22229_v56 = vld [vmem:[#allocation30_spill] sm:$0xff]  ;;  %v9087_v38 = vld [vmem:[%s22036_s3 + $0xe40] sm:$0xff] }
 0x463   :  { %16071 = vmatprep.subr.bf16.mxu1 %v16070_v14  ;;  %v16112_v14 = vpack.c.bf16 %v9080_v61, %v9079_v46  ;;  %v9114_v27 = vld [vmem:[%s22036_s3 + $0xf18] sm:$0xff]  ;;  %v8608_v62 = vmul.f32 %v20047_v53, %v22229_v56  ;;  %v9085_v53 = vld [vmem:[%s22036_s3 + $0xe30] sm:$0xff]  ;;  %v9104_v20 = vld [vmem:[%s22036_s3 + $0xec8] sm:$0xff] }
 0x464   :  { %16097 = vmatpush3.bf16.msra.mxu0 %v16096_v40  ;;  %v14081_v40 = vmul.f32 -1.442695, %v7388_v63  ;;  %v9101_v63 = vld [vmem:[%s22036_s3 + $0xeb0] sm:$0xff]  ;;  %v9088_v58 = vld [vmem:[%s22036_s3 + $0xe48] sm:$0xff]  ;;  %v9119_v56 = vld [vmem:[%s22036_s3 + $0xf40] sm:$0xff] }
 0x465   :  { %16099 = vmatprep.subr.bf16.mxu0 %v16098_v10  ;;  %v7532_v10 = vadd.f32 %v19106_v39, %v18778_v30  ;;  %v8438_v39 = vrot.slane %v17020_v54, %v18795_v22  ;;  %v9132_v54 = vld [vmem:[%s22036_s3 + $0xfa8] sm:$0xff] }
 0x466   :  { %16073 = vmatpush3.bf16.msra.mxu1 %v16072_v21  ;;  %v16108_v21 = vpack.c.bf16 %v9062_v34, %v9061_v7  ;;  %17027 = vpow2.f32 %v14081_v40  ;;  %v20267_v7 = vrot.slane %v17022_v55, %v18795_v22  ;;  %v9131_v34 = vld [vmem:[%s22036_s3 + $0xfa0] sm:$0xff]  ;;  %v9106_v55 = vld [vmem:[%s22036_s3 + $0xed8] sm:$0xff]  ;;  %v9136_v12 = vld [vmem:[%s22036_s3 + $0xfc8] sm:$0xff] }
 0x467   :  { %16075 = vmatprep.subr.bf16.mxu1 %v16074_v28  ;;  %v9100_v28 = vld [vmem:[%s22036_s3 + $0xea8] sm:$0xff]  ;;  %v9103_v40 = vld [vmem:[%s22036_s3 + $0xec0] sm:$0xff]  ;;  %v16150_v19 = vpack.c.bf16 %v9132_v54, %v9131_v34  ;;  %v9137_v54 = vld [vmem:[%s22036_s3 + $0xfd0] sm:$0xff] }
 0x468   :  { %16101 = vmatpush3.bf16.msra.mxu0 %v16100_v5  ;;  %v9129_v5 = vld [vmem:[%s22036_s3 + $0xf90] sm:$0xff]  ;;  %v16118_v51 = vpack.c.bf16 %v9100_v28, %v9099_v18  ;;  %v17024_v60 = vpop.eup %17023  ;;  %v16124_v18 = vpack.c.bf16 %v9086_v26, %v9085_v53  ;;  %v9091_v53 = vld [vmem:[%s22036_s3 + $0xe60] sm:$0xff]  ;;  %v9092_v26 = vld [vmem:[%s22036_s3 + $0xe68] sm:$0xff] }
 0x469   :  { %16103 = vmatprep.subr.bf16.mxu0 %v16102_v32  ;;  %v8605_v32 = vmul.f32 %v8430_v6, %v22226_v36  ;;  %v9102_v6 = vld [vmem:[%s22036_s3 + $0xeb8] sm:$0xff]  ;;  %v16146_v61 = vpack.c.bf16 %v9130_v57, %v9129_v5  ;;  %v8209_v23 = vadd.f32 1.0, %v17024_v60  ;;  %v9133_v28 = vld [vmem:[%s22036_s3 + $0xfb0] sm:$0xff] }
 0x46a   :  { %16077 = vmatpush3.bf16.msra.mxu1 %v16076_v49  ;;  %v14086_v49 = vmul.f32 -1.442695, %v7532_v10  ;;  %v9116_v10 = vld [vmem:[%s22036_s3 + $0xf28] sm:$0xff]  ;;  %v9105_v57 = vld [vmem:[%s22036_s3 + $0xed0] sm:$0xff]  ;;  %v9138_v60 = vld [vmem:[%s22036_s3 + $0xfd8] sm:$0xff] }
 0x46b   :  { %16111 = vmatprep.subr.bf16.mxu1 %v16110_v0  ;;  %v22228_v0 = vld [vmem:[#allocation32_spill] sm:$0xff]  ;;  %v16152_v5 = vpack.c.bf16 %v9116_v10, %v9115_v33  ;;  %v16162_v10 = vpack.c.bf16 %v9138_v60, %v9137_v54 }
 0x46c   :  { %16105 = vmatpush3.bf16.msra.mxu0 %v16104_v15  ;;  %v8557_v46 = vmul.f32 %v8438_v39, %v22228_v0  ;;  %v9113_v15 = vld [vmem:[%s22036_s3 + $0xf10] sm:$0xff]  ;;  %17029 = vpow2.f32 %v14086_v49  ;;  %v9135_v49 = vld [vmem:[%s22036_s3 + $0xfc0] sm:$0xff]  ;;  %v9162_v54 = vld [vmem:[%s22036_s3 + $0x1098] sm:$0xff] }
 0x46d   :  { %10396 = vmatmul.mubr.f32.vlgmr.msra.gmra.mrb[198].mxu1 %v8555_v29  ;;  %16107 = vmatprep.subr.bf16.mxu0 %v16106_v59  ;;  %v16120_v59 = vpack.c.bf16 %v9084_v13, %v9083_v44  ;;  %v16148_v48 = vpack.c.bf16 %v9114_v27, %v9113_v15  ;;  %v22230_v29 = vld [vmem:[#allocation29_spill] sm:$0xff]  ;;  %v9118_v44 = vld [vmem:[%s22036_s3 + $0xf38] sm:$0xff]  ;;  %17031 = vrcp.f32 %v8209_v23  ;;  %v16128_v13 = vpack.c.bf16 %v9088_v58, %v9087_v38  ;;  %v9121_v23 = vld [vmem:[%s22036_s3 + $0xf50] sm:$0xff] }
 0x46e   :  { %10400 = vmatprep.mubr.f32.mxu1 %v8606_v50  ;;  %16113 = vmatpush3.bf16.msra.mxu1 %v16112_v14  ;;  %v16122_v14 = vpack.c.bf16 %v9102_v6, %v9101_v63  ;;  %v22231_v50 = vld [vmem:[#allocation36_spill] sm:$0xff]  ;;  %v9089_v63 = vld [vmem:[%s22036_s3 + $0xe50] sm:$0xff]  ;;  %v9108_v15 = vld [vmem:[%s22036_s3 + $0xee8] sm:$0xff]  ;;  %v16158_v27 = vpack.c.bf16 %v9136_v12, %v9135_v49 }
 0x46f   :  { %16115 = vmatprep.subr.bf16.mxu1 %v16114_v43  ;;  %v8607_v43 = vmul.f32 %v8438_v39, %v22230_v29  ;;  %v9134_v39 = vld [vmem:[%s22036_s3 + $0xfb8] sm:$0xff]  ;;  %v9123_v49 = vld [vmem:[%s22036_s3 + $0xf60] sm:$0xff]  ;;  %v9124_v12 = vld [vmem:[%s22036_s3 + $0xf68] sm:$0xff] }
 0x470   :  { %16109 = vmatpush3.bf16.msra.mxu0 %v16108_v21  ;;  %v8562_v21 = vmul.f32 %v20267_v7, %v22231_v50  ;;  %v9090_v6 = vld [vmem:[%s22036_s3 + $0xe58] sm:$0xff] }
 0x471   :  { %10401 = vmatmul.mubr.f32.gmra.mrb[200].mxu1 %v8605_v32  ;;  %16143 = vmatprep.subr.bf16.mxu0 %v16142_v25  ;;  %v16126_v25 = vpack.c.bf16 %v9104_v20, %v9103_v40  ;;  %v16154_v32 = vpack.c.bf16 %v9134_v39, %v9133_v28  ;;  %v16132_v34 = vpack.c.bf16 %v9090_v6, %v9089_v63  ;;  %v9109_v20 = vld [vmem:[%s22036_s3 + $0xef0] sm:$0xff]  ;;  %v9110_v29 = vld [vmem:[%s22036_s3 + $0xef8] sm:$0xff]  ;;  %v9139_v28 = vld [vmem:[%s22036_s3 + $0xfe0] sm:$0xff] }
 0x472   :  { %16117 = vmatpush3.bf16.msra.mxu1 %v16116_v47  ;;  %10545 = vmatprep.mubr.f32.mxu1 %v8560_v24  ;;  %v17026_v47 = vpop.eup %17025  ;;  %v9122_v50 = vld [vmem:[%s22036_s3 + $0xf58] sm:$0xff]  ;;  %v16138_v39 = vpack.c.bf16 %v9110_v29, %v9109_v20 }
 0x473   :  { %10471 = vmatmul.mubr.f32.vlgmr.msra.gmra.mrb[200].mxu0 %v8557_v46  ;;  %16119 = vmatprep.subr.bf16.mxu1 %v16118_v51  ;;  %v17028_v36 = vpop.eup %17027  ;;  %v9117_v51 = vld [vmem:[%s22036_s3 + $0xf30] sm:$0xff]  ;;  %v8214_v24 = vadd.f32 1.0, %v17026_v47  ;;  %v9094_v38 = vld [vmem:[%s22036_s3 + $0xe78] sm:$0xff] }
 0x474   :  { %10475 = vmatprep.mubr.f32.mxu0 %v8608_v62  ;;  %16145 = vmatpush3.bf16.msra.mxu0 %v16144_v31  ;;  %v16130_v31 = vpack.c.bf16 %v9106_v55, %v9105_v57  ;;  %v8211_v0 = vadd.f32 1.0, %v17028_v36  ;;  %v16156_v46 = vpack.c.bf16 %v9118_v44, %v9117_v51  ;;  %v9120_v62 = vld [vmem:[%s22036_s3 + $0xf48] sm:$0xff]  ;;  %v16164_v57 = vpack.c.bf16 %v9122_v50, %v9121_v23  ;;  %v9159_v55 = vld [vmem:[%s22036_s3 + $0x1080] sm:$0xff]  ;;  %v22232_v50 = vld [vmem:[#allocation39_spill] sm:$0xff] }
 0x475   :  { %16147 = vmatprep.subr.bf16.mxu0 %v16146_v61  ;;  %v9107_v61 = vld [vmem:[%s22036_s3 + $0xee0] sm:$0xff]  ;;  %17033 = vrcp.f32 %v8214_v24  ;;  %v16160_v40 = vpack.c.bf16 %v9120_v62, %v9119_v56  ;;  %v9160_v36 = vld [vmem:[%s22036_s3 + $0x1088] sm:$0xff]  ;;  %v7603_v24 = vadd.f32 %v19164_v41, %v18778_v30  ;;  %v7674_v23 = vadd.f32 %v19174_v8, %v18778_v30 }
 0x476   :  { %16121 = vmatpush3.bf16.msra.mxu1 %v16120_v59  ;;  %v17030_v59 = vpop.eup %17029  ;;  %17035 = vrcp.f32 %v8211_v0  ;;  %v9141_v0 = vld [vmem:[%s22036_s3 + $0xff0] sm:$0xff]  ;;  %v9143_v41 = vld [vmem:[%s22036_s3 + $0x1000] sm:$0xff]  ;;  %v9144_v56 = vld [vmem:[%s22036_s3 + $0x1008] sm:$0xff] }
 0x477   :  { %10476 = vmatmul.mubr.f32.gmra.mrb[202].mxu0 %v8607_v43  ;;  %16123 = vmatprep.subr.bf16.mxu1 %v16122_v14  ;;  %v16134_v14 = vpack.c.bf16 %v9108_v15, %v9107_v61  ;;  %v7459_v43 = vadd.f32 %v19082_v35, %v18778_v30  ;;  %v9140_v35 = vld [vmem:[%s22036_s3 + $0xfe8] sm:$0xff]  ;;  %v17032_v58 = vpop.eup %17031  ;;  %v7530_v61 = vadd.f32 %v19090_v3, %v18778_v30  ;;  %v9161_v3 = vld [vmem:[%s22036_s3 + $0x1090] sm:$0xff]  ;;  %v14088_v20 = vmul.f32 -1.442695, %v7603_v24 }
 0x478   :  { %16149 = vmatpush3.bf16.msra.mxu0 %v16148_v48  ;;  %10620 = vmatprep.mubr.f32.mxu0 %v8562_v21  ;;  %v8446_v15 = vrot.slane %v17032_v58, %v18795_v22 }
 0x479   :  { %16151 = vmatprep.subr.bf16.mxu0 %v16150_v19  ;;  %v8216_v19 = vadd.f32 1.0, %v17030_v59 }
 0x47a   :  { %16125 = vmatpush3.bf16.msra.mxu1 %v16124_v18  ;;  %v16136_v18 = vpack.c.bf16 %v9092_v26, %v9091_v53  ;;  %v9125_v26 = vld [vmem:[%s22036_s3 + $0xf70] sm:$0xff] }
 0x47b   :  { %16127 = vmatprep.subr.bf16.mxu1 %v16126_v25  ;;  %v9093_v25 = vld [vmem:[%s22036_s3 + $0xe70] sm:$0xff]  ;;  %17037 = vrcp.f32 %v8216_v19  ;;  %v9191_v19 = vld [vmem:[%s22036_s3 + $0x1180] sm:$0xff] }
 0x47c   :  { %16153 = vmatpush3.bf16.msra.mxu0 %v16152_v5  ;;  %v16140_v6 = vpack.c.bf16 %v9094_v38, %v9093_v25  ;;  %v22233_v25 = vld [vmem:[#allocation35_spill] sm:$0xff] }
 0x47d   :  { %16155 = vmatprep.subr.bf16.mxu0 %v16154_v32  ;;  %v14083_v32 = vmul.f32 -1.442695, %v7459_v43  ;;  %v16176_v43 = vpack.c.bf16 %v9144_v56, %v9143_v41  ;;  %v8610_v38 = vmul.f32 %v20221_v1, %v22233_v25  ;;  %v9175_v1 = vld [vmem:[%s22036_s3 + $0x1100] sm:$0xff] }
 0x47e   :  { %16129 = vmatpush3.bf16.msra.mxu1 %v16128_v13  ;;  %v16166_v13 = vpack.c.bf16 %v9140_v35, %v9139_v28  ;;  %v9145_v28 = vld [vmem:[%s22036_s3 + $0x1010] sm:$0xff]  ;;  %v9146_v35 = vld [vmem:[%s22036_s3 + $0x1018] sm:$0xff] }
 0x47f   :  { %16131 = vmatprep.subr.bf16.mxu1 %v16130_v31  ;;  %v17034_v60 = vpop.eup %17033  ;;  %17039 = vpow2.f32 %v14083_v32  ;;  %v16180_v32 = vpack.c.bf16 %v9146_v35, %v9145_v28  ;;  %v22236_v41 = vld [vmem:[#allocation40_spill] sm:$0xff] }
 0x480   :  { %16157 = vmatpush3.bf16.msra.mxu0 %v16156_v46  ;;  %v14181_v48 = vpop.f32.mrb[174].mxu1  ;;  %v9142_v46 = vld [vmem:[%s22036_s3 + $0xff8] sm:$0xff]  ;;  %v20445_v8 = vrot.slane %v17034_v60, %v18795_v22  ;;  %17041 = vpow2.f32 %v14088_v20 }
 0x481   :  { %16159 = vmatprep.subr.bf16.mxu0 %v16158_v27  ;;  %v14182_v33 = vpop.f32.mrb[175].mxu1  ;;  %v16174_v27 = vpack.c.bf16 %v9160_v36, %v9159_v55  ;;  %v16170_v53 = vpack.c.bf16 %v9142_v46, %v9141_v0  ;;  %v9176_v36 = vld [vmem:[%s22036_s3 + $0x1108] sm:$0xff]  ;;  %v22239_v35 = vld [vmem:[#allocation44_spill] sm:$0xff] }
 0x482   :  { %v14183_v21 = vadd.f32 %v14182_v33, %v14181_v48  ;;  %16133 = vmatpush3.bf16.msra.mxu1 %v16132_v34  ;;  %v16168_v34 = vpack.c.bf16 %v9124_v12, %v9123_v49  ;;  %v9126_v48 = vld [vmem:[%s22036_s3 + $0xf78] sm:$0xff]  ;;  %v9192_v33 = vld [vmem:[%s22036_s3 + $0x1188] sm:$0xff] }
 0x483   :  { %16135 = vmatprep.subr.bf16.mxu1 %v16134_v14  ;;  %v16172_v58 = vpack.c.bf16 %v9126_v48, %v9125_v26  ;;  %v16206_v55 = vpack.c.bf16 %v9192_v33, %v9191_v19  ;;  %v22234_v49 = vld [vmem:[#allocation34_spill] sm:$0xff]  ;;  %v22235_v0 = vld [vmem:[#allocation41_spill] sm:$0xff] }
 0x484   :  { %16161 = vmatpush3.bf16.msra.mxu0 %v16160_v40  ;;  %v14184_v47 = vpop.f32.mrb[176].mxu1  ;;  %v14219_v5 = vpop.f32.mrb[176].mxu0  ;;  %v8609_v12 = vmul.f32 %v8446_v15, %v22234_v49  ;;  %v8564_v46 = vmul.f32 %v20445_v8, %v22235_v0  ;;  %v9195_v26 = vld [vmem:[%s22036_s3 + $0x11a0] sm:$0xff]  ;;  %v9196_v48 = vld [vmem:[%s22036_s3 + $0x11a8] sm:$0xff]  ;;  %v9181_v49 = vld [vmem:[%s22036_s3 + $0x1130] sm:$0xff] }
 0x485   :  { %16163 = vmatprep.subr.bf16.mxu0 %v16162_v10  ;;  %v14185_v51 = vpop.f32.mrb[177].mxu1  ;;  %v14220_v44 = vpop.f32.mrb[177].mxu0  ;;  %v14085_v10 = vmul.f32 -1.442695, %v7530_v61  ;;  %v16208_v61 = vpack.c.bf16 %v9176_v36, %v9175_v1  ;;  %v9167_v19 = vld [vmem:[%s22036_s3 + $0x10c0] sm:$0xff]  ;;  %v9168_v33 = vld [vmem:[%s22036_s3 + $0x10c8] sm:$0xff] }
 0x486   :  { %v14186_v31 = vadd.f32 %v14185_v51, %v14184_v47  ;;  %v14221_v63 = vadd.f32 %v14220_v44, %v14219_v5  ;;  %16137 = vmatpush3.bf16.msra.mxu1 %v16136_v18  ;;  %v17036_v40 = vpop.eup %17035  ;;  %v16178_v18 = vpack.c.bf16 %v9162_v54, %v9161_v3  ;;  %v9163_v47 = vld [vmem:[%s22036_s3 + $0x10a0] sm:$0xff]  ;;  %v9164_v5 = vld [vmem:[%s22036_s3 + $0x10a8] sm:$0xff]  ;;  %v9193_v51 = vld [vmem:[%s22036_s3 + $0x1190] sm:$0xff] }
 0x487   :  { %16139 = vmatprep.subr.bf16.mxu1 %v16138_v39  ;;  %v9194_v44 = vld [vmem:[%s22036_s3 + $0x1198] sm:$0xff]  ;;  %17043 = vpow2.f32 %v14085_v10  ;;  %v16182_v24 = vpack.c.bf16 %v9164_v5, %v9163_v47  ;;  %v22237_v54 = vld [vmem:[#allocation38_spill] sm:$0xff]  ;;  %v22238_v10 = vld [vmem:[#allocation37_spill] sm:$0xff]  ;;  %v16190_v5 = vpack.c.bf16 %v9168_v33, %v9167_v19  ;;  %v7601_v33 = vadd.f32 %v19153_v37, %v18778_v30 }
 0x488   :  { %v20411_v62 = vadd.f32 %v14221_v63, %v14183_v21  ;;  %16165 = vmatpush3.bf16.msra.mxu0 %v16164_v57  ;;  %v14222_v59 = vpop.f32.mrb[178].mxu0  ;;  %v8559_v21 = vmul.f32 %v8446_v15, %v22232_v50  ;;  %v8454_v57 = vrot.slane %v17036_v40, %v18795_v22  ;;  %v9148_v63 = vld [vmem:[%s22036_s3 + $0x1028] sm:$0xff]  ;;  %v9165_v15 = vld [vmem:[%s22036_s3 + $0x10b0] sm:$0xff]  ;;  %v9178_v3 = vld [vmem:[%s22036_s3 + $0x1118] sm:$0xff]  ;;  %v8612_v60 = vmul.f32 %v20267_v7, %v22237_v54 }
 0x489   :  { %16167 = vmatprep.subr.bf16.mxu0 %v16166_v13  ;;  %v14223_v14 = vpop.f32.mrb[179].mxu0  ;;  %v17038_v13 = vpop.eup %17037  ;;  %v9149_v7 = vld [vmem:[%s22036_s3 + $0x1030] sm:$0xff]  ;;  %v16214_v50 = vpack.c.bf16 %v9196_v48, %v9195_v26  ;;  %v9198_v47 = vld [vmem:[%s22036_s3 + $0x11b8] sm:$0xff]  ;;  %v9204_v37 = vld [vmem:[%s22036_s3 + $0x11e8] sm:$0xff] }
 0x48a   :  { %v14224_v29 = vadd.f32 %v14223_v14, %v14222_v59  ;;  %16141 = vmatpush3.bf16.msra.mxu1 %v16140_v6  ;;  %v14090_v6 = vmul.f32 -1.442695, %v7674_v23  ;;  %v8561_v56 = vmul.f32 %v8454_v57, %v22236_v41  ;;  %v16210_v59 = vpack.c.bf16 %v9194_v44, %v9193_v51  ;;  %v17040_v40 = vpop.eup %17039  ;;  %v9170_v51 = vld [vmem:[%s22036_s3 + $0x10d8] sm:$0xff]  ;;  %v9171_v41 = vld [vmem:[%s22036_s3 + $0x10e0] sm:$0xff] }
 0x48b   :  { %16175 = vmatprep.subr.bf16.mxu1 %v16174_v27  ;;  %v9166_v27 = vld [vmem:[%s22036_s3 + $0x10b8] sm:$0xff]  ;;  %v8611_v23 = vmul.f32 %v8454_v57, %v22238_v10  ;;  %v8213_v28 = vadd.f32 1.0, %v17040_v40  ;;  %v9151_v57 = vld [vmem:[%s22036_s3 + $0x1040] sm:$0xff]  ;;  %v17042_v1 = vpop.eup %17041 }
 0x48c   :  { %v20440_v39 = vadd.f32 %v14224_v29, %v14186_v31  ;;  %16169 = vmatpush3.bf16.msra.mxu0 %v16168_v34  ;;  %v9147_v31 = vld [vmem:[%s22036_s3 + $0x1020] sm:$0xff]  ;;  %v9177_v34 = vld [vmem:[%s22036_s3 + $0x1110] sm:$0xff]  ;;  %v16186_v20 = vpack.c.bf16 %v9166_v27, %v9165_v15  ;;  %v9150_v29 = vld [vmem:[%s22036_s3 + $0x1038] sm:$0xff]  ;;  %17045 = vpow2.f32 %v14090_v6  ;;  %v8218_v6 = vadd.f32 1.0, %v17042_v1 }
 0x48d   :  { %10546 = vmatmul.mubr.f32.vlgmr.msra.gmra.mrb[202].mxu1 %v8559_v21  ;;  %16171 = vmatprep.subr.bf16.mxu0 %v16170_v53  ;;  %v16184_v14 = vpack.c.bf16 %v9148_v63, %v9147_v31  ;;  %v20491_v53 = vrot.slane %v17038_v13, %v18795_v22  ;;  %v9179_v21 = vld [vmem:[%s22036_s3 + $0x1120] sm:$0xff]  ;;  %17047 = vrcp.f32 %v8213_v28  ;;  %v9200_v63 = vld [vmem:[%s22036_s3 + $0x11c8] sm:$0xff]  ;;  %v9202_v26 = vld [vmem:[%s22036_s3 + $0x11d8] sm:$0xff] }
 0x48e   :  { %10550 = vmatprep.mubr.f32.mxu1 %v8610_v38  ;;  %16177 = vmatpush3.bf16.msra.mxu1 %v16176_v43  ;;  %v16212_v43 = vpack.c.bf16 %v9178_v3, %v9177_v34  ;;  %v16188_v38 = vpack.c.bf16 %v9150_v29, %v9149_v7  ;;  %v9199_v31 = vld [vmem:[%s22036_s3 + $0x11c0] sm:$0xff]  ;;  %v9184_v3 = vld [vmem:[%s22036_s3 + $0x1148] sm:$0xff]  ;;  %17049 = vrcp.f32 %v8218_v6  ;;  %v9174_v19 = vld [vmem:[%s22036_s3 + $0x10f8] sm:$0xff] }
 0x48f   :  { %16179 = vmatprep.subr.bf16.mxu1 %v16178_v18  ;;  %v9180_v18 = vld [vmem:[%s22036_s3 + $0x1128] sm:$0xff]  ;;  %v8566_v25 = vmul.f32 %v20491_v53, %v22239_v35  ;;  %v9183_v34 = vld [vmem:[%s22036_s3 + $0x1140] sm:$0xff] }
 0x490   :  { %16173 = vmatpush3.bf16.msra.mxu0 %v16172_v58  ;;  %v9197_v58 = vld [vmem:[%s22036_s3 + $0x11b0] sm:$0xff]  ;;  %v16216_v36 = vpack.c.bf16 %v9180_v18, %v9179_v21  ;;  %v9155_v40 = vld [vmem:[%s22036_s3 + $0x1060] sm:$0xff]  ;;  %v16224_v29 = vpack.c.bf16 %v9184_v3, %v9183_v34  ;;  %v9186_v18 = vld [vmem:[%s22036_s3 + $0x1158] sm:$0xff] }
 0x491   :  { %10551 = vmatmul.mubr.f32.gmra.mrb[204].mxu1 %v8609_v12  ;;  %16207 = vmatprep.subr.bf16.mxu0 %v16206_v55  ;;  %v9152_v55 = vld [vmem:[%s22036_s3 + $0x1048] sm:$0xff]  ;;  %v17044_v44 = vpop.eup %17043  ;;  %v16218_v13 = vpack.c.bf16 %v9198_v47, %v9197_v58  ;;  %v9182_v12 = vld [vmem:[%s22036_s3 + $0x1138] sm:$0xff]  ;;  %v9185_v21 = vld [vmem:[%s22036_s3 + $0x1150] sm:$0xff] }
 0x492   :  { %16181 = vmatpush3.bf16.msra.mxu1 %v16180_v32  ;;  %10695 = vmatprep.mubr.f32.mxu1 %v8564_v46  ;;  %v9169_v32 = vld [vmem:[%s22036_s3 + $0x10d0] sm:$0xff]  ;;  %v8215_v15 = vadd.f32 1.0, %v17044_v44  ;;  %v16220_v27 = vpack.c.bf16 %v9182_v12, %v9181_v49  ;;  %v9158_v47 = vld [vmem:[%s22036_s3 + $0x1078] sm:$0xff]  ;;  %v16228_v1 = vpack.c.bf16 %v9186_v18, %v9185_v21  ;;  %v9188_v12 = vld [vmem:[%s22036_s3 + $0x1168] sm:$0xff] }
 0x493   :  { %10621 = vmatmul.mubr.f32.vlgmr.msra.gmra.mrb[204].mxu0 %v8561_v56  ;;  %16183 = vmatprep.subr.bf16.mxu1 %v16182_v24  ;;  %v16192_v24 = vpack.c.bf16 %v9152_v55, %v9151_v57  ;;  %v16194_v0 = vpack.c.bf16 %v9170_v51, %v9169_v32  ;;  %v9153_v46 = vld [vmem:[%s22036_s3 + $0x1050] sm:$0xff]  ;;  %v9172_v56 = vld [vmem:[%s22036_s3 + $0x10e8] sm:$0xff]  ;;  %v14087_v51 = vmul.f32 -1.442695, %v7601_v33  ;;  %v9226_v3 = vld [vmem:[%s22036_s3 + $0x1298] sm:$0xff] }
 0x494   :  { %10625 = vmatprep.mubr.f32.mxu0 %v8612_v60  ;;  %16209 = vmatpush3.bf16.msra.mxu0 %v16208_v61  ;;  %v9154_v61 = vld [vmem:[%s22036_s3 + $0x1058] sm:$0xff]  ;;  %v16198_v48 = vpack.c.bf16 %v9172_v56, %v9171_v41  ;;  %17051 = vrcp.f32 %v8215_v15  ;;  %v9157_v58 = vld [vmem:[%s22036_s3 + $0x1070] sm:$0xff]  ;;  %v9224_v32 = vld [vmem:[%s22036_s3 + $0x1288] sm:$0xff] }
 0x495   :  { %16211 = vmatprep.subr.bf16.mxu0 %v16210_v59  ;;  %v16222_v59 = vpack.c.bf16 %v9200_v63, %v9199_v31  ;;  %v16196_v60 = vpack.c.bf16 %v9154_v61, %v9153_v46  ;;  %v16204_v6 = vpack.c.bf16 %v9158_v47, %v9157_v58  ;;  %v9206_v46 = vld [vmem:[%s22036_s3 + $0x11f8] sm:$0xff]  ;;  %v7672_v61 = vadd.f32 %v19162_v45, %v18778_v30  ;;  %v9207_v41 = vld [vmem:[%s22036_s3 + $0x1200] sm:$0xff]  ;;  %v9208_v56 = vld [vmem:[%s22036_s3 + $0x1208] sm:$0xff] }
 0x496   :  { %16185 = vmatpush3.bf16.msra.mxu1 %v16184_v14  ;;  %v17046_v54 = vpop.eup %17045  ;;  %v9201_v14 = vld [vmem:[%s22036_s3 + $0x11d0] sm:$0xff]  ;;  %v9227_v47 = vld [vmem:[%s22036_s3 + $0x12a0] sm:$0xff] }
 0x497   :  { %10626 = vmatmul.mubr.f32.gmra.mrb[206].mxu0 %v8611_v23  ;;  %16187 = vmatprep.subr.bf16.mxu1 %v16186_v20  ;;  %v9156_v20 = vld [vmem:[%s22036_s3 + $0x1068] sm:$0xff]  ;;  %v8220_v10 = vadd.f32 1.0, %v17046_v54  ;;  %v9225_v45 = vld [vmem:[%s22036_s3 + $0x1290] sm:$0xff]  ;;  %v14089_v33 = vmul.f32 -1.442695, %v7672_v61  ;;  %v9230_v61 = vld [vmem:[%s22036_s3 + $0x12b8] sm:$0xff] }
 0x498   :  { %16213 = vmatpush3.bf16.msra.mxu0 %v16212_v43  ;;  %10770 = vmatprep.mubr.f32.mxu0 %v8566_v25  ;;  %v9173_v43 = vld [vmem:[%s22036_s3 + $0x10f0] sm:$0xff]  ;;  %v16200_v35 = vpack.c.bf16 %v9156_v20, %v9155_v40  ;;  %v9203_v25 = vld [vmem:[%s22036_s3 + $0x11e0] sm:$0xff]  ;;  %v16242_v21 = vpack.c.bf16 %v9226_v3, %v9225_v45 }
 0x499   :  { %16215 = vmatprep.subr.bf16.mxu0 %v16214_v50  ;;  %v16226_v50 = vpack.c.bf16 %v9202_v26, %v9201_v14  ;;  %17053 = vrcp.f32 %v8220_v10  ;;  %v16230_v49 = vpack.c.bf16 %v9204_v37, %v9203_v25  ;;  %v9209_v18 = vld [vmem:[%s22036_s3 + $0x1210] sm:$0xff] }
 0x49a   :  { %16189 = vmatpush3.bf16.msra.mxu1 %v16188_v38  ;;  %v16202_v38 = vpack.c.bf16 %v9174_v19, %v9173_v43  ;;  %17055 = vpow2.f32 %v14087_v51  ;;  %v9255_v43 = vld [vmem:[%s22036_s3 + $0x1380] sm:$0xff]  ;;  %v9256_v19 = vld [vmem:[%s22036_s3 + $0x1388] sm:$0xff]  ;;  %v22241_v25 = vld [vmem:[#allocation43_spill] sm:$0xff] }
 0x49b   :  { %16191 = vmatprep.subr.bf16.mxu1 %v16190_v5  ;;  %v17048_v5 = vpop.eup %17047  ;;  %v8614_v37 = vmul.f32 %v20445_v8, %v22241_v25  ;;  %v9239_v8 = vld [vmem:[%s22036_s3 + $0x1300] sm:$0xff]  ;;  %v9258_v51 = vld [vmem:[%s22036_s3 + $0x1398] sm:$0xff] }
 0x49c   :  { %16217 = vmatpush3.bf16.msra.mxu0 %v16216_v36  ;;  %v9223_v36 = vld [vmem:[%s22036_s3 + $0x1280] sm:$0xff]  ;;  %v17050_v54 = vpop.eup %17049 }
 0x49d   :  { %16219 = vmatprep.subr.bf16.mxu0 %v16218_v13  ;;  %v20669_v58 = vrot.slane %v17050_v54, %v18795_v22  ;;  %v9259_v54 = vld [vmem:[%s22036_s3 + $0x13a0] sm:$0xff] }
 0x49e   :  { %16193 = vmatpush3.bf16.msra.mxu1 %v16192_v24  ;;  %v7745_v24 = vadd.f32 %v19222_v52, %v18778_v30  ;;  %v16238_v52 = vpack.c.bf16 %v9224_v32, %v9223_v36  ;;  %v17052_v40 = vpop.eup %17051  ;;  %v9257_v32 = vld [vmem:[%s22036_s3 + $0x1390] sm:$0xff] }
 0x49f   :  { %16195 = vmatprep.subr.bf16.mxu1 %v16194_v0  ;;  %v9205_v0 = vld [vmem:[%s22036_s3 + $0x11f0] sm:$0xff] }
 0x4a0   :  { %16221 = vmatpush3.bf16.msra.mxu0 %v16220_v27  ;;  %v14257_v7 = vpop.f32.mrb[178].mxu1  ;;  %v8462_v27 = vrot.slane %v17048_v5, %v18795_v22  ;;  %v16234_v26 = vpack.c.bf16 %v9206_v46, %v9205_v0  ;;  %v14092_v20 = vmul.f32 -1.442695, %v7745_v24  ;;  %v9228_v5 = vld [vmem:[%s22036_s3 + $0x12a8] sm:$0xff]  ;;  %v9229_v46 = vld [vmem:[%s22036_s3 + $0x12b0] sm:$0xff] }
 0x4a1   :  { %v14258_v23 = vpop.f32.mrb[179].mxu1  ;;  %16223 = vmatprep.subr.bf16.mxu0 %v16222_v59  ;;  %v9212_v24 = vld [vmem:[%s22036_s3 + $0x1228] sm:$0xff] }
 0x4a2   :  { %v14259_v28 = vadd.f32 %v14258_v23, %v14257_v7  ;;  %16197 = vmatpush3.bf16.msra.mxu1 %v16196_v60  ;;  %v22240_v23 = vld [vmem:[#allocation47_spill] sm:$0xff]  ;;  %17057 = vpow2.f32 %v14092_v20  ;;  %v9231_v20 = vld [vmem:[%s22036_s3 + $0x12c0] sm:$0xff] }
 0x4a3   :  { %16199 = vmatprep.subr.bf16.mxu1 %v16198_v48  ;;  %v9190_v48 = vld [vmem:[%s22036_s3 + $0x1178] sm:$0xff]  ;;  %17059 = vpow2.f32 %v14089_v33  ;;  %v9243_v33 = vld [vmem:[%s22036_s3 + $0x1320] sm:$0xff] }
 0x4a4   :  { %v9648_v57 = vadd.f32 %v14259_v28, %v20411_v62  ;;  %16225 = vmatpush3.bf16.msra.mxu0 %v16224_v29  ;;  %v14260_v55 = vpop.f32.mrb[180].mxu1  ;;  %v9187_v62 = vld [vmem:[%s22036_s3 + $0x1160] sm:$0xff]  ;;  %v16240_v29 = vpack.c.bf16 %v9208_v56, %v9207_v41  ;;  %v9210_v28 = vld [vmem:[%s22036_s3 + $0x1218] sm:$0xff]  ;;  %v9241_v41 = vld [vmem:[%s22036_s3 + $0x1310] sm:$0xff] }
 0x4a5   :  { %v14295_v44 = vpop.f32.mrb[180].mxu0  ;;  %v14261_v13 = vpop.f32.mrb[181].mxu1  ;;  %16227 = vmatprep.subr.bf16.mxu0 %v16226_v50  ;;  %v16232_v34 = vpack.c.bf16 %v9188_v12, %v9187_v62  ;;  %v8563_v50 = vmul.f32 %v8462_v27, %v22240_v23  ;;  %v16244_v36 = vpack.c.bf16 %v9210_v28, %v9209_v18  ;;  %v16246_v62 = vpack.c.bf16 %v9228_v5, %v9227_v47  ;;  %v9211_v12 = vld [vmem:[%s22036_s3 + $0x1220] sm:$0xff]  ;;  %v9242_v56 = vld [vmem:[%s22036_s3 + $0x1318] sm:$0xff]  ;;  %v9261_v28 = vld [vmem:[%s22036_s3 + $0x13b0] sm:$0xff] }
 0x4a6   :  { %v14262_v31 = vadd.f32 %v14261_v13, %v14260_v55  ;;  %v14296_v63 = vpop.f32.mrb[181].mxu0  ;;  %16201 = vmatpush3.bf16.msra.mxu1 %v16200_v35  ;;  %v7816_v35 = vadd.f32 %v19230_v16, %v18778_v30  ;;  %v8470_v16 = vrot.slane %v17052_v40, %v18795_v22  ;;  %v16270_v55 = vpack.c.bf16 %v9256_v19, %v9255_v43  ;;  %v22242_v13 = vld [vmem:[#allocation42_spill] sm:$0xff] }
 0x4a7   :  { %v14297_v15 = vadd.f32 %v14296_v63, %v14295_v44  ;;  %16203 = vmatprep.subr.bf16.mxu1 %v16202_v38  ;;  %v17054_v44 = vpop.eup %17053  ;;  %v22243_v63 = vld [vmem:[#allocation49_spill] sm:$0xff]  ;;  %v16248_v45 = vpack.c.bf16 %v9212_v24, %v9211_v12  ;;  %v16276_v40 = vpack.c.bf16 %v9242_v56, %v9241_v41  ;;  %v9217_v12 = vld [vmem:[%s22036_s3 + $0x1250] sm:$0xff]  ;;  %v9218_v24 = vld [vmem:[%s22036_s3 + $0x1258] sm:$0xff] }
 0x4a8   :  { %v9653_v59 = vadd.f32 %v14262_v31, %v20440_v39  ;;  %16229 = vmatpush3.bf16.msra.mxu0 %v16228_v1  ;;  %v9189_v39 = vld [vmem:[%s22036_s3 + $0x1170] sm:$0xff]  ;;  %v9240_v1 = vld [vmem:[%s22036_s3 + $0x1308] sm:$0xff]  ;;  %v14094_v31 = vmul.f32 -1.442695, %v7816_v35  ;;  %v20717_v3 = vrot.slane %v17054_v44, %v18795_v22  ;;  %v9262_v35 = vld [vmem:[%s22036_s3 + $0x13b8] sm:$0xff] }
 0x4a9   :  { %v20643_v60 = vadd.f32 %v14297_v15, %v9648_v57  ;;  %v14298_v14 = vpop.f32.mrb[182].mxu0  ;;  %16231 = vmatprep.subr.bf16.mxu0 %v16230_v49  ;;  %v16236_v38 = vpack.c.bf16 %v9190_v48, %v9189_v39  ;;  %v8613_v49 = vmul.f32 %v8462_v27, %v22242_v13  ;;  %v16272_v0 = vpack.c.bf16 %v9240_v1, %v9239_v8  ;;  %v22244_v15 = vld [vmem:[#allocation48_spill] sm:$0xff]  ;;  %v9264_v13 = vld [vmem:[%s22036_s3 + $0x13c8] sm:$0xff]  ;;  %v9265_v41 = vld [vmem:[%s22036_s3 + $0x13d0] sm:$0xff] }
 0x4aa   :  { %v14299_v7 = vpop.f32.mrb[183].mxu0  ;;  %16205 = vmatpush3.bf16.msra.mxu1 %v16204_v6  ;;  %v8568_v6 = vmul.f32 %v20669_v58, %v22243_v63  ;;  %v8565_v27 = vmul.f32 %v8470_v16, %v22244_v15  ;;  %v16250_v39 = vpack.c.bf16 %v9230_v61, %v9229_v46  ;;  %v9214_v48 = vld [vmem:[%s22036_s3 + $0x1238] sm:$0xff]  ;;  %17061 = vpow2.f32 %v14094_v31  ;;  %v9263_v44 = vld [vmem:[%s22036_s3 + $0x13c0] sm:$0xff]  ;;  %v9248_v15 = vld [vmem:[%s22036_s3 + $0x1348] sm:$0xff] }
 0x4ab   :  { %v14300_v10 = vadd.f32 %v14299_v7, %v14298_v14  ;;  %16239 = vmatprep.subr.bf16.mxu1 %v16238_v52  ;;  %v16274_v52 = vpack.c.bf16 %v9258_v51, %v9257_v32  ;;  %v9260_v14 = vld [vmem:[%s22036_s3 + $0x13a8] sm:$0xff]  ;;  %v16282_v1 = vpack.c.bf16 %v9262_v35, %v9261_v28  ;;  %v9246_v32 = vld [vmem:[%s22036_s3 + $0x1338] sm:$0xff]  ;;  %v16286_v46 = vpack.c.bf16 %v9264_v13, %v9263_v44  ;;  %v9247_v61 = vld [vmem:[%s22036_s3 + $0x1340] sm:$0xff] }
 0x4ac   :  { %16233 = vmatpush3.bf16.msra.mxu0 %v16232_v34  ;;  %v9232_v7 = vld [vmem:[%s22036_s3 + $0x12c8] sm:$0xff]  ;;  %v16278_v19 = vpack.c.bf16 %v9260_v14, %v9259_v54  ;;  %v9266_v56 = vld [vmem:[%s22036_s3 + $0x13d8] sm:$0xff]  ;;  %v16288_v14 = vpack.c.bf16 %v9248_v15, %v9247_v61  ;;  %v7814_v44 = vadd.f32 %v19220_v11, %v18778_v30  ;;  %v9289_v11 = vld [vmem:[%s22036_s3 + $0x1490] sm:$0xff] }
 0x4ad   :  { %v20677_v57 = vadd.f32 %v14300_v10, %v9653_v59  ;;  %10696 = vmatmul.mubr.f32.vlgmr.msra.gmra.mrb[206].mxu1 %v8563_v50  ;;  %16235 = vmatprep.subr.bf16.mxu0 %v16234_v26  ;;  %v22245_v59 = vld [vmem:[#allocation46_spill] sm:$0xff]  ;;  %v17056_v26 = vpop.eup %17055  ;;  %v22247_v50 = vld [vmem:[#allocation52_spill] sm:$0xff]  ;;  %v16254_v25 = vpack.c.bf16 %v9232_v7, %v9231_v20  ;;  %v16290_v20 = vpack.c.bf16 %v9266_v56, %v9265_v41 }
 0x4ae   :  { %10700 = vmatprep.mubr.f32.mxu1 %v8614_v37  ;;  %16241 = vmatpush3.bf16.msra.mxu1 %v16240_v29  ;;  %v8616_v34 = vmul.f32 %v20491_v53, %v22245_v59  ;;  %v9213_v53 = vld [vmem:[%s22036_s3 + $0x1230] sm:$0xff]  ;;  %v22246_v29 = vld [vmem:[#allocation45_spill] sm:$0xff]  ;;  %v8217_v23 = vadd.f32 1.0, %v17056_v26  ;;  %v17058_v47 = vpop.eup %17057 }
 0x4af   :  { %16243 = vmatprep.subr.bf16.mxu1 %v16242_v21  ;;  %v8615_v43 = vmul.f32 %v8470_v16, %v22246_v29  ;;  %v9244_v10 = vld [vmem:[%s22036_s3 + $0x1328] sm:$0xff]  ;;  %v8570_v21 = vmul.f32 %v20717_v3, %v22247_v50  ;;  %v16252_v18 = vpack.c.bf16 %v9214_v48, %v9213_v53  ;;  %v9215_v37 = vld [vmem:[%s22036_s3 + $0x1240] sm:$0xff]  ;;  %v9233_v16 = vld [vmem:[%s22036_s3 + $0x12d0] sm:$0xff]  ;;  %v17060_v8 = vpop.eup %17059  ;;  %v7743_v53 = vadd.f32 %v19212_v17, %v18778_v30 }
 0x4b0   :  { %16237 = vmatpush3.bf16.msra.mxu0 %v16236_v38  ;;  %v9216_v38 = vld [vmem:[%s22036_s3 + $0x1248] sm:$0xff]  ;;  %v16280_v5 = vpack.c.bf16 %v9244_v10, %v9243_v33  ;;  %17063 = vrcp.f32 %v8217_v23  ;;  %v8219_v31 = vadd.f32 1.0, %v17060_v8  ;;  %v9237_v26 = vld [vmem:[%s22036_s3 + $0x12f0] sm:$0xff]  ;;  %v9250_v29 = vld [vmem:[%s22036_s3 + $0x1358] sm:$0xff] }
 0x4b1   :  { %10701 = vmatmul.mubr.f32.gmra.mrb[208].mxu1 %v8613_v49  ;;  %16271 = vmatprep.subr.bf16.mxu0 %v16270_v55  ;;  %v9234_v55 = vld [vmem:[%s22036_s3 + $0x12d8] sm:$0xff]  ;;  %v16256_v51 = vpack.c.bf16 %v9216_v38, %v9215_v37  ;;  %v8222_v49 = vadd.f32 1.0, %v17058_v47  ;;  %v9249_v7 = vld [vmem:[%s22036_s3 + $0x1350] sm:$0xff]  ;;  %v9267_v33 = vld [vmem:[%s22036_s3 + $0x13e0] sm:$0xff]  ;;  %v14091_v38 = vmul.f32 -1.442695, %v7743_v53 }
 0x4b2   :  { %16245 = vmatpush3.bf16.msra.mxu1 %v16244_v36  ;;  %10845 = vmatprep.mubr.f32.mxu1 %v8568_v6  ;;  %v9245_v36 = vld [vmem:[%s22036_s3 + $0x1330] sm:$0xff]  ;;  %v9235_v6 = vld [vmem:[%s22036_s3 + $0x12e0] sm:$0xff]  ;;  %v9268_v17 = vld [vmem:[%s22036_s3 + $0x13e8] sm:$0xff]  ;;  %v16292_v35 = vpack.c.bf16 %v9250_v29, %v9249_v7 }
 0x4b3   :  { %10771 = vmatmul.mubr.f32.vlgmr.msra.gmra.mrb[208].mxu0 %v8565_v27  ;;  %16247 = vmatprep.subr.bf16.mxu1 %v16246_v62  ;;  %v16258_v62 = vpack.c.bf16 %v9234_v55, %v9233_v16  ;;  %v16284_v63 = vpack.c.bf16 %v9246_v32, %v9245_v36  ;;  %17065 = vrcp.f32 %v8222_v49  ;;  %v9221_v23 = vld [vmem:[%s22036_s3 + $0x1270] sm:$0xff]  ;;  %v9222_v50 = vld [vmem:[%s22036_s3 + $0x1278] sm:$0xff]  ;;  %v9288_v37 = vld [vmem:[%s22036_s3 + $0x1488] sm:$0xff]  ;;  %v7887_v55 = vadd.f32 %v19280_v42, %v18778_v30 }
 0x4b4   :  { %10775 = vmatprep.mubr.f32.mxu0 %v8616_v34  ;;  %16273 = vmatpush3.bf16.msra.mxu0 %v16272_v0  ;;  %v9236_v0 = vld [vmem:[%s22036_s3 + $0x12e8] sm:$0xff]  ;;  %v17062_v27 = vpop.eup %17061  ;;  %v9219_v34 = vld [vmem:[%s22036_s3 + $0x1260] sm:$0xff]  ;;  %17067 = vrcp.f32 %v8219_v31  ;;  %v16268_v36 = vpack.c.bf16 %v9222_v50, %v9221_v23  ;;  %v9269_v32 = vld [vmem:[%s22036_s3 + $0x13f0] sm:$0xff] }
 0x4b5   :  { %16275 = vmatprep.subr.bf16.mxu0 %v16274_v52  ;;  %v16260_v52 = vpack.c.bf16 %v9218_v24, %v9217_v12  ;;  %v16262_v59 = vpack.c.bf16 %v9236_v0, %v9235_v6  ;;  %v8224_v48 = vadd.f32 1.0, %v17062_v27  ;;  %v9252_v16 = vld [vmem:[%s22036_s3 + $0x1368] sm:$0xff]  ;;  %v9290_v6 = vld [vmem:[%s22036_s3 + $0x1498] sm:$0xff]  ;;  %v9253_v61 = vld [vmem:[%s22036_s3 + $0x1370] sm:$0xff]  ;;  %v14096_v27 = vmul.f32 -1.442695, %v7887_v55 }
 0x4b6   :  { %16249 = vmatpush3.bf16.msra.mxu1 %v16248_v45  ;;  %v9220_v45 = vld [vmem:[%s22036_s3 + $0x1268] sm:$0xff]  ;;  %v16306_v53 = vpack.c.bf16 %v9290_v6, %v9289_v11  ;;  %v22249_v7 = vld [vmem:[#allocation51_spill] sm:$0xff] }
 0x4b7   :  { %10776 = vmatmul.mubr.f32.gmra.mrb[210].mxu0 %v8615_v43  ;;  %16251 = vmatprep.subr.bf16.mxu1 %v16250_v39  ;;  %v9238_v39 = vld [vmem:[%s22036_s3 + $0x12f8] sm:$0xff]  ;;  %17069 = vrcp.f32 %v8224_v48  ;;  %v9272_v12 = vld [vmem:[%s22036_s3 + $0x1408] sm:$0xff]  ;;  %v9273_v48 = vld [vmem:[%s22036_s3 + $0x1410] sm:$0xff]  ;;  %v8618_v29 = vmul.f32 %v20669_v58, %v22249_v7 }
 0x4b8   :  { %16277 = vmatpush3.bf16.msra.mxu0 %v16276_v40  ;;  %10920 = vmatprep.mubr.f32.mxu0 %v8570_v21  ;;  %v16266_v10 = vpack.c.bf16 %v9238_v39, %v9237_v26  ;;  %17071 = vpow2.f32 %v14091_v38  ;;  %v22248_v26 = vld [vmem:[#allocation55_spill] sm:$0xff]  ;;  %v9303_v58 = vld [vmem:[%s22036_s3 + $0x1500] sm:$0xff]  ;;  %v9304_v23 = vld [vmem:[%s22036_s3 + $0x1508] sm:$0xff] }
 0x4b9   :  { %16279 = vmatprep.subr.bf16.mxu0 %v16278_v19  ;;  %v16264_v19 = vpack.c.bf16 %v9220_v45, %v9219_v34  ;;  %v9320_v34 = vld [vmem:[%s22036_s3 + $0x1588] sm:$0xff]  ;;  %v14093_v45 = vmul.f32 -1.442695, %v7814_v44  ;;  %17073 = vpow2.f32 %v14096_v27 }
 0x4ba   :  { %16253 = vmatpush3.bf16.msra.mxu1 %v16252_v18  ;;  %v17064_v21 = vpop.eup %17063 }
 0x4bb   :  { %16255 = vmatprep.subr.bf16.mxu1 %v16254_v25  ;;  %v9287_v25 = vld [vmem:[%s22036_s3 + $0x1480] sm:$0xff]  ;;  %v8478_v49 = vrot.slane %v17064_v21, %v18795_v22  ;;  %17075 = vpow2.f32 %v14093_v45 }
 0x4bc   :  { %16281 = vmatpush3.bf16.msra.mxu0 %v16280_v5  ;;  %v16294_v5 = vpack.c.bf16 %v9268_v17, %v9267_v33  ;;  %v16302_v42 = vpack.c.bf16 %v9288_v37, %v9287_v25  ;;  %v9292_v33 = vld [vmem:[%s22036_s3 + $0x14a8] sm:$0xff]  ;;  %v22255_v45 = vld [vmem:[#allocation60_spill] sm:$0xff] }
 0x4bd   :  { %16283 = vmatprep.subr.bf16.mxu0 %v16282_v1  ;;  %v17066_v0 = vpop.eup %17065  ;;  %v8567_v39 = vmul.f32 %v8478_v49, %v22248_v26  ;;  %v22250_v25 = vld [vmem:[#allocation50_spill] sm:$0xff] }
 0x4be   :  { %16257 = vmatpush3.bf16.msra.mxu1 %v16256_v51  ;;  %v9270_v51 = vld [vmem:[%s22036_s3 + $0x13f8] sm:$0xff]  ;;  %v17068_v15 = vpop.eup %17067  ;;  %v8617_v37 = vmul.f32 %v8478_v49, %v22250_v25  ;;  %v9325_v26 = vld [vmem:[%s22036_s3 + $0x15b0] sm:$0xff] }
 0x4bf   :  { %16259 = vmatprep.subr.bf16.mxu1 %v16258_v62  ;;  %v9271_v62 = vld [vmem:[%s22036_s3 + $0x1400] sm:$0xff]  ;;  %v8486_v17 = vrot.slane %v17068_v15, %v18795_v22  ;;  %v9306_v49 = vld [vmem:[%s22036_s3 + $0x1518] sm:$0xff] }
 0x4c0   :  { %16285 = vmatpush3.bf16.msra.mxu0 %v16284_v63  ;;  %v14333_v54 = vpop.f32.mrb[182].mxu1  ;;  %v16304_v56 = vpack.c.bf16 %v9272_v12, %v9271_v62  ;;  %v22254_v15 = vld [vmem:[#allocation53_spill] sm:$0xff]  ;;  %v9282_v25 = vld [vmem:[%s22036_s3 + $0x1458] sm:$0xff] }
 0x4c1   :  { %v14334_v40 = vpop.f32.mrb[183].mxu1  ;;  %16287 = vmatprep.subr.bf16.mxu0 %v16286_v46  ;;  %v16298_v46 = vpack.c.bf16 %v9270_v51, %v9269_v32  ;;  %v22252_v32 = vld [vmem:[#allocation56_spill] sm:$0xff]  ;;  %v8619_v27 = vmul.f32 %v8486_v17, %v22254_v15 }
 0x4c2   :  { %v14335_v43 = vadd.f32 %v14334_v40, %v14333_v54  ;;  %16261 = vmatpush3.bf16.msra.mxu1 %v16260_v52  ;;  %v7958_v54 = vadd.f32 %v19290_v9, %v18778_v30  ;;  %v9274_v40 = vld [vmem:[%s22036_s3 + $0x1418] sm:$0xff]  ;;  %v20895_v9 = vrot.slane %v17066_v0, %v18795_v22  ;;  %v8569_v51 = vmul.f32 %v8486_v17, %v22252_v32  ;;  %v9309_v17 = vld [vmem:[%s22036_s3 + $0x1530] sm:$0xff]  ;;  %v9331_v15 = vld [vmem:[%s22036_s3 + $0x15e0] sm:$0xff] }
 0x4c3   :  { %16263 = vmatprep.subr.bf16.mxu1 %v16262_v59  ;;  %v9319_v59 = vld [vmem:[%s22036_s3 + $0x1580] sm:$0xff]  ;;  %v16308_v21 = vpack.c.bf16 %v9274_v40, %v9273_v48  ;;  %v9278_v0 = vld [vmem:[%s22036_s3 + $0x1438] sm:$0xff]  ;;  %v9280_v40 = vld [vmem:[%s22036_s3 + $0x1448] sm:$0xff] }
 0x4c4   :  { %v9798_v18 = vadd.f32 %v14335_v43, %v20643_v60  ;;  %16289 = vmatpush3.bf16.msra.mxu0 %v16288_v14  ;;  %v14336_v28 = vpop.f32.mrb[184].mxu1  ;;  %v9251_v60 = vld [vmem:[%s22036_s3 + $0x1360] sm:$0xff]  ;;  %v9330_v32 = vld [vmem:[%s22036_s3 + $0x15d8] sm:$0xff] }
 0x4c5   :  { %v14337_v47 = vpop.f32.mrb[185].mxu1  ;;  %16291 = vmatprep.subr.bf16.mxu0 %v16290_v20  ;;  %v16296_v63 = vpack.c.bf16 %v9252_v16, %v9251_v60  ;;  %v14098_v60 = vmul.f32 -1.442695, %v7958_v54  ;;  %v22251_v16 = vld [vmem:[#allocation57_spill] sm:$0xff] }
 0x4c6   :  { %v14371_v8 = vpop.f32.mrb[184].mxu0  ;;  %v14338_v1 = vadd.f32 %v14337_v47, %v14336_v28  ;;  %16265 = vmatpush3.bf16.msra.mxu1 %v16264_v19  ;;  %v9291_v19 = vld [vmem:[%s22036_s3 + $0x14a0] sm:$0xff]  ;;  %v9322_v28 = vld [vmem:[%s22036_s3 + $0x1598] sm:$0xff]  ;;  %v8572_v55 = vmul.f32 %v20895_v9, %v22251_v16 }
 0x4c7   :  { %v14372_v13 = vpop.f32.mrb[185].mxu0  ;;  %16267 = vmatprep.subr.bf16.mxu1 %v16266_v10  ;;  %v16334_v10 = vpack.c.bf16 %v9320_v34, %v9319_v59  ;;  %v16310_v38 = vpack.c.bf16 %v9292_v33, %v9291_v19  ;;  %v9275_v47 = vld [vmem:[%s22036_s3 + $0x1420] sm:$0xff]  ;;  %17077 = vpow2.f32 %v14098_v60  ;;  %v9308_v59 = vld [vmem:[%s22036_s3 + $0x1528] sm:$0xff] }
 0x4c8   :  { %v9803_v24 = vadd.f32 %v14338_v1, %v20677_v57  ;;  %v14373_v31 = vadd.f32 %v14372_v13, %v14371_v8  ;;  %16293 = vmatpush3.bf16.msra.mxu0 %v16292_v35  ;;  %v9254_v57 = vld [vmem:[%s22036_s3 + $0x1378] sm:$0xff]  ;;  %v17070_v35 = vpop.eup %17069  ;;  %v16336_v8 = vpack.c.bf16 %v9304_v23, %v9303_v58  ;;  %v9293_v1 = vld [vmem:[%s22036_s3 + $0x14b0] sm:$0xff]  ;;  %v9279_v48 = vld [vmem:[%s22036_s3 + $0x1440] sm:$0xff] }
 0x4c9   :  { %16295 = vmatprep.subr.bf16.mxu0 %v16294_v5  ;;  %v16300_v43 = vpack.c.bf16 %v9254_v57, %v9253_v61  ;;  %v9276_v5 = vld [vmem:[%s22036_s3 + $0x1428] sm:$0xff]  ;;  %v9305_v13 = vld [vmem:[%s22036_s3 + $0x1510] sm:$0xff]  ;;  %v17072_v11 = vpop.eup %17071  ;;  %v9295_v61 = vld [vmem:[%s22036_s3 + $0x14c0] sm:$0xff]  ;;  %v16320_v58 = vpack.c.bf16 %v9280_v40, %v9279_v48 }
 0x4ca   :  { %v20875_v52 = vadd.f32 %v14373_v31, %v9798_v18  ;;  %v14374_v41 = vpop.f32.mrb[186].mxu0  ;;  %16269 = vmatpush3.bf16.msra.mxu1 %v16268_v36  ;;  %v9321_v18 = vld [vmem:[%s22036_s3 + $0x1590] sm:$0xff]  ;;  %v9294_v36 = vld [vmem:[%s22036_s3 + $0x14b8] sm:$0xff]  ;;  %v16312_v12 = vpack.c.bf16 %v9276_v5, %v9275_v47  ;;  %v9323_v31 = vld [vmem:[%s22036_s3 + $0x15a0] sm:$0xff]  ;;  %v8221_v34 = vadd.f32 1.0, %v17072_v11 }
 0x4cb   :  { %v14375_v14 = vpop.f32.mrb[187].mxu0  ;;  %16303 = vmatprep.subr.bf16.mxu1 %v16302_v42  ;;  %v16338_v44 = vpack.c.bf16 %v9322_v28, %v9321_v18  ;;  %v22253_v42 = vld [vmem:[#allocation54_spill] sm:$0xff]  ;;  %v16314_v6 = vpack.c.bf16 %v9294_v36, %v9293_v1  ;;  %v9327_v23 = vld [vmem:[%s22036_s3 + $0x15c0] sm:$0xff] }
 0x4cc   :  { %v14376_v20 = vadd.f32 %v14375_v14, %v14374_v41  ;;  %16297 = vmatpush3.bf16.msra.mxu0 %v16296_v63  ;;  %v8620_v62 = vmul.f32 %v20717_v3, %v22253_v42  ;;  %v9324_v63 = vld [vmem:[%s22036_s3 + $0x15a8] sm:$0xff]  ;;  %v9277_v3 = vld [vmem:[%s22036_s3 + $0x1430] sm:$0xff]  ;;  %17079 = vrcp.f32 %v8221_v34  ;;  %v9299_v47 = vld [vmem:[%s22036_s3 + $0x14e0] sm:$0xff] }
 0x4cd   :  { %10846 = vmatmul.mubr.f32.vlgmr.msra.gmra.mrb[210].mxu1 %v8567_v39  ;;  %16299 = vmatprep.subr.bf16.mxu0 %v16298_v46  ;;  %v16340_v46 = vpack.c.bf16 %v9306_v49, %v9305_v13  ;;  %v9296_v57 = vld [vmem:[%s22036_s3 + $0x14c8] sm:$0xff]  ;;  %v16342_v41 = vpack.c.bf16 %v9324_v63, %v9323_v31  ;;  %v16316_v14 = vpack.c.bf16 %v9278_v0, %v9277_v3  ;;  %v9326_v39 = vld [vmem:[%s22036_s3 + $0x15b8] sm:$0xff]  ;;  %v9311_v16 = vld [vmem:[%s22036_s3 + $0x1540] sm:$0xff] }
 0x4ce   :  { %v20910_v50 = vadd.f32 %v14376_v20, %v9803_v24  ;;  %10850 = vmatprep.mubr.f32.mxu1 %v8618_v29  ;;  %16305 = vmatpush3.bf16.msra.mxu1 %v16304_v56  ;;  %v20943_v24 = vrot.slane %v17070_v35, %v18795_v22  ;;  %v9307_v56 = vld [vmem:[%s22036_s3 + $0x1520] sm:$0xff]  ;;  %v17074_v20 = vpop.eup %17073  ;;  %v9297_v29 = vld [vmem:[%s22036_s3 + $0x14d0] sm:$0xff]  ;;  %v16346_v33 = vpack.c.bf16 %v9326_v39, %v9325_v26  ;;  %v9300_v5 = vld [vmem:[%s22036_s3 + $0x14e8] sm:$0xff] }
 0x4cf   :  { %16307 = vmatprep.subr.bf16.mxu1 %v16306_v53  ;;  %v16318_v53 = vpack.c.bf16 %v9296_v57, %v9295_v61  ;;  %v16344_v7 = vpack.c.bf16 %v9308_v59, %v9307_v56  ;;  %v17076_v19 = vpop.eup %17075  ;;  %v8226_v18 = vadd.f32 1.0, %v17074_v20  ;;  %v9281_v35 = vld [vmem:[%s22036_s3 + $0x1450] sm:$0xff]  ;;  %v9284_v13 = vld [vmem:[%s22036_s3 + $0x1468] sm:$0xff]  ;;  %v22256_v31 = vld [vmem:[#allocation84_spill] sm:$0xff] }
 0x4d0   :  { %16301 = vmatpush3.bf16.msra.mxu0 %v16300_v43  ;;  %v8574_v54 = vmul.f32 %v20943_v24, %v22255_v45  ;;  %v9298_v43 = vld [vmem:[%s22036_s3 + $0x14d8] sm:$0xff]  ;;  %v16324_v1 = vpack.c.bf16 %v9282_v25, %v9281_v35  ;;  %v9329_v36 = vld [vmem:[%s22036_s3 + $0x15d0] sm:$0xff]  ;;  %v7885_v63 = vadd.f32 %v22256_v31, %v18778_v30  ;;  %v9351_v26 = vld [vmem:[%s22036_s3 + $0x1680] sm:$0xff] }
 0x4d1   :  { %10851 = vmatmul.mubr.f32.gmra.mrb[212].mxu1 %v8617_v37  ;;  %16335 = vmatprep.subr.bf16.mxu0 %v16334_v10  ;;  %v9310_v10 = vld [vmem:[%s22036_s3 + $0x1538] sm:$0xff]  ;;  %v16322_v28 = vpack.c.bf16 %v9298_v43, %v9297_v29  ;;  %v8223_v37 = vadd.f32 1.0, %v17076_v19  ;;  %17081 = vrcp.f32 %v8226_v18  ;;  %v16354_v3 = vpack.c.bf16 %v9330_v32, %v9329_v36  ;;  %v9313_v0 = vld [vmem:[%s22036_s3 + $0x1550] sm:$0xff]  ;;  %v9352_v39 = vld [vmem:[%s22036_s3 + $0x1688] sm:$0xff] }
 0x4d2   :  { %16309 = vmatpush3.bf16.msra.mxu1 %v16308_v21  ;;  %10995 = vmatprep.mubr.f32.mxu1 %v8572_v55  ;;  %v9328_v21 = vld [vmem:[%s22036_s3 + $0x15c8] sm:$0xff]  ;;  %v9285_v56 = vld [vmem:[%s22036_s3 + $0x1470] sm:$0xff]  ;;  %v9286_v59 = vld [vmem:[%s22036_s3 + $0x1478] sm:$0xff] }
 0x4d3   :  { %10921 = vmatmul.mubr.f32.vlgmr.msra.gmra.mrb[212].mxu0 %v8569_v51  ;;  %16311 = vmatprep.subr.bf16.mxu1 %v16310_v38  ;;  %v16348_v38 = vpack.c.bf16 %v9310_v10, %v9309_v17  ;;  %v16350_v60 = vpack.c.bf16 %v9328_v21, %v9327_v23  ;;  %v9312_v55 = vld [vmem:[%s22036_s3 + $0x1548] sm:$0xff]  ;;  %v16326_v51 = vpack.c.bf16 %v9300_v5, %v9299_v47  ;;  %17083 = vrcp.f32 %v8223_v37  ;;  %v9334_v17 = vld [vmem:[%s22036_s3 + $0x15f8] sm:$0xff]  ;;  %v9335_v18 = vld [vmem:[%s22036_s3 + $0x1600] sm:$0xff] }
 0x4d4   :  { %10925 = vmatprep.mubr.f32.mxu0 %v8620_v62  ;;  %16337 = vmatpush3.bf16.msra.mxu0 %v16336_v8  ;;  %v17078_v8 = vpop.eup %17077  ;;  %v16352_v42 = vpack.c.bf16 %v9312_v55, %v9311_v16  ;;  %v9301_v62 = vld [vmem:[%s22036_s3 + $0x14f0] sm:$0xff]  ;;  %v9316_v20 = vld [vmem:[%s22036_s3 + $0x1568] sm:$0xff]  ;;  %v16332_v19 = vpack.c.bf16 %v9286_v59, %v9285_v56  ;;  %v9354_v47 = vld [vmem:[%s22036_s3 + $0x1698] sm:$0xff] }
 0x4d5   :  { %16339 = vmatprep.subr.bf16.mxu0 %v16338_v44  ;;  %v9283_v44 = vld [vmem:[%s22036_s3 + $0x1460] sm:$0xff]  ;;  %v8228_v11 = vadd.f32 1.0, %v17078_v8  ;;  %v9317_v16 = vld [vmem:[%s22036_s3 + $0x1570] sm:$0xff] }
 0x4d6   :  { %16313 = vmatpush3.bf16.msra.mxu1 %v16312_v12  ;;  %v9302_v12 = vld [vmem:[%s22036_s3 + $0x14f8] sm:$0xff]  ;;  %v16328_v57 = vpack.c.bf16 %v9284_v13, %v9283_v44  ;;  %v17080_v34 = vpop.eup %17079  ;;  %v22257_v10 = vld [vmem:[#allocation85_spill] sm:$0xff]  ;;  %v9337_v31 = vld [vmem:[%s22036_s3 + $0x1610] sm:$0xff] }
 0x4d7   :  { %10926 = vmatmul.mubr.f32.gmra.mrb[214].mxu0 %v8619_v27  ;;  %16315 = vmatprep.subr.bf16.mxu1 %v16314_v6  ;;  %v9332_v27 = vld [vmem:[%s22036_s3 + $0x15e8] sm:$0xff]  ;;  %17085 = vrcp.f32 %v8228_v11  ;;  %v8494_v21 = vrot.slane %v17080_v34, %v18795_v22  ;;  %v9385_v34 = vld [vmem:[%s22036_s3 + $0x1790] sm:$0xff] }
 0x4d8   :  { %16341 = vmatpush3.bf16.msra.mxu0 %v16340_v46  ;;  %11070 = vmatprep.mubr.f32.mxu0 %v8574_v54  ;;  %v9314_v46 = vld [vmem:[%s22036_s3 + $0x1558] sm:$0xff]  ;;  %v16358_v40 = vpack.c.bf16 %v9332_v27, %v9331_v15  ;;  %v9384_v44 = vld [vmem:[%s22036_s3 + $0x1788] sm:$0xff] }
 0x4d9   :  { %16343 = vmatprep.subr.bf16.mxu0 %v16342_v41  ;;  %v16330_v41 = vpack.c.bf16 %v9302_v12, %v9301_v62 }
 0x4da   :  { %16317 = vmatpush3.bf16.msra.mxu1 %v16316_v14  ;;  %v16356_v14 = vpack.c.bf16 %v9314_v46, %v9313_v0 }
 0x4db   :  { %16319 = vmatprep.subr.bf16.mxu1 %v16318_v53  ;;  %v14095_v53 = vmul.f32 -1.442695, %v7885_v63  ;;  %v17082_v5 = vpop.eup %17081  ;;  %v9338_v63 = vld [vmem:[%s22036_s3 + $0x1618] sm:$0xff] }
 0x4dc   :  { %16345 = vmatpush3.bf16.msra.mxu0 %v16344_v7  ;;  %v8029_v7 = vadd.f32 %v19336_v4, %v18778_v30  ;;  %v16366_v4 = vpack.c.bf16 %v9352_v39, %v9351_v26  ;;  %v21119_v46 = vrot.slane %v17082_v5, %v18795_v22  ;;  %v16372_v59 = vpack.c.bf16 %v9338_v63, %v9337_v31  ;;  %v9360_v5 = vld [vmem:[%s22036_s3 + $0x16c8] sm:$0xff] }
 0x4dd   :  { %16347 = vmatprep.subr.bf16.mxu0 %v16346_v33  ;;  %v9333_v33 = vld [vmem:[%s22036_s3 + $0x15f0] sm:$0xff]  ;;  %17087 = vpow2.f32 %v14095_v53  ;;  %v17084_v55 = vpop.eup %17083  ;;  %v9339_v53 = vld [vmem:[%s22036_s3 + $0x1620] sm:$0xff] }
 0x4de   :  { %16321 = vmatpush3.bf16.msra.mxu1 %v16320_v58  ;;  %v7956_v58 = vadd.f32 %v22257_v10, %v18778_v30  ;;  %v14100_v8 = vmul.f32 -1.442695, %v8029_v7  ;;  %v8502_v15 = vrot.slane %v17084_v55, %v18795_v22  ;;  %v9357_v7 = vld [vmem:[%s22036_s3 + $0x16b0] sm:$0xff]  ;;  %v9370_v10 = vld [vmem:[%s22036_s3 + $0x1718] sm:$0xff]  ;;  %v9371_v55 = vld [vmem:[%s22036_s3 + $0x1720] sm:$0xff] }
 0x4df   :  { %16323 = vmatprep.subr.bf16.mxu1 %v16322_v28  ;;  %v9336_v28 = vld [vmem:[%s22036_s3 + $0x1608] sm:$0xff] }
 0x4e0   :  { %16349 = vmatpush3.bf16.msra.mxu0 %v16348_v38  ;;  %v14409_v49 = vpop.f32.mrb[186].mxu1  ;;  %v9353_v38 = vld [vmem:[%s22036_s3 + $0x1690] sm:$0xff]  ;;  %v16368_v32 = vpack.c.bf16 %v9336_v28, %v9335_v18  ;;  %v14097_v13 = vmul.f32 -1.442695, %v7956_v58  ;;  %17089 = vpow2.f32 %v14100_v8  ;;  %v9387_v18 = vld [vmem:[%s22036_s3 + $0x17a0] sm:$0xff]  ;;  %v9388_v28 = vld [vmem:[%s22036_s3 + $0x17a8] sm:$0xff] }
 0x4e1   :  { %v14410_v6 = vpop.f32.mrb[187].mxu1  ;;  %16351 = vmatprep.subr.bf16.mxu0 %v16350_v60  ;;  %v16362_v60 = vpack.c.bf16 %v9334_v17, %v9333_v33  ;;  %v16370_v12 = vpack.c.bf16 %v9354_v47, %v9353_v38  ;;  %v9369_v17 = vld [vmem:[%s22036_s3 + $0x1710] sm:$0xff]  ;;  %v9359_v47 = vld [vmem:[%s22036_s3 + $0x16c0] sm:$0xff]  ;;  %v9372_v8 = vld [vmem:[%s22036_s3 + $0x1728] sm:$0xff] }
 0x4e2   :  { %v14411_v61 = vadd.f32 %v14410_v6, %v14409_v49  ;;  %16325 = vmatpush3.bf16.msra.mxu1 %v16324_v1  ;;  %v22259_v6 = vld [vmem:[#allocation59_spill] sm:$0xff]  ;;  %17091 = vpow2.f32 %v14097_v13  ;;  %v22263_v58 = vld [vmem:[#allocation62_spill] sm:$0xff]  ;;  %v16404_v38 = vpack.c.bf16 %v9370_v10, %v9369_v17  ;;  %v16408_v63 = vpack.c.bf16 %v9372_v8, %v9371_v55  ;;  %v9415_v55 = vld [vmem:[%s22036_s3 + $0x1880] sm:$0xff] }
 0x4e3   :  { %16327 = vmatprep.subr.bf16.mxu1 %v16326_v51  ;;  %v9383_v51 = vld [vmem:[%s22036_s3 + $0x1780] sm:$0xff]  ;;  %v9389_v13 = vld [vmem:[%s22036_s3 + $0x17b0] sm:$0xff]  ;;  %v9416_v8 = vld [vmem:[%s22036_s3 + $0x1888] sm:$0xff] }
 0x4e4   :  { %v9948_v45 = vadd.f32 %v14411_v61, %v20875_v52  ;;  %16353 = vmatpush3.bf16.msra.mxu0 %v16352_v42  ;;  %v14412_v54 = vpop.f32.mrb[188].mxu1  ;;  %v9315_v52 = vld [vmem:[%s22036_s3 + $0x1560] sm:$0xff]  ;;  %v22258_v42 = vld [vmem:[#allocation63_spill] sm:$0xff]  ;;  %v16398_v27 = vpack.c.bf16 %v9384_v44, %v9383_v51 }
 0x4e5   :  { %v14413_v48 = vpop.f32.mrb[189].mxu1  ;;  %16355 = vmatprep.subr.bf16.mxu0 %v16354_v3  ;;  %v16360_v37 = vpack.c.bf16 %v9316_v20, %v9315_v52  ;;  %v8571_v62 = vmul.f32 %v8494_v21, %v22258_v42  ;;  %v8622_v3 = vmul.f32 %v20895_v9, %v22259_v6  ;;  %v9355_v61 = vld [vmem:[%s22036_s3 + $0x16a0] sm:$0xff]  ;;  %v16382_v42 = vpack.c.bf16 %v9360_v5, %v9359_v47  ;;  %v9362_v6 = vld [vmem:[%s22036_s3 + $0x16d8] sm:$0xff]  ;;  %v9365_v10 = vld [vmem:[%s22036_s3 + $0x16f0] sm:$0xff] }
 0x4e6   :  { %v14447_v29 = vpop.f32.mrb[188].mxu0  ;;  %v14414_v43 = vadd.f32 %v14413_v48, %v14412_v54  ;;  %16329 = vmatpush3.bf16.msra.mxu1 %v16328_v57  ;;  %v9356_v57 = vld [vmem:[%s22036_s3 + $0x16a8] sm:$0xff]  ;;  %v9367_v9 = vld [vmem:[%s22036_s3 + $0x1700] sm:$0xff]  ;;  %v17086_v54 = vpop.eup %17085  ;;  %v9350_v47 = vld [vmem:[%s22036_s3 + $0x1678] sm:$0xff] }
 0x4e7   :  { %v14448_v23 = vpop.f32.mrb[189].mxu0  ;;  %16331 = vmatprep.subr.bf16.mxu1 %v16330_v41  ;;  %v9368_v41 = vld [vmem:[%s22036_s3 + $0x1708] sm:$0xff]  ;;  %v16374_v39 = vpack.c.bf16 %v9356_v57, %v9355_v61  ;;  %v9373_v61 = vld [vmem:[%s22036_s3 + $0x1730] sm:$0xff]  ;;  %v9374_v57 = vld [vmem:[%s22036_s3 + $0x1738] sm:$0xff] }
 0x4e8   :  { %v9953_v35 = vadd.f32 %v14414_v43, %v20910_v50  ;;  %v14449_v25 = vadd.f32 %v14448_v23, %v14447_v29  ;;  %16357 = vmatpush3.bf16.msra.mxu0 %v16356_v14  ;;  %v9318_v50 = vld [vmem:[%s22036_s3 + $0x1578] sm:$0xff]  ;;  %v22260_v14 = vld [vmem:[#allocation58_spill] sm:$0xff]  ;;  %v16400_v20 = vpack.c.bf16 %v9368_v41, %v9367_v9  ;;  %v8624_v23 = vmul.f32 %v20943_v24, %v22263_v58 }
 0x4e9   :  { %16359 = vmatprep.subr.bf16.mxu0 %v16358_v40  ;;  %v16364_v0 = vpack.c.bf16 %v9318_v50, %v9317_v16  ;;  %v8621_v26 = vmul.f32 %v8494_v21, %v22260_v14  ;;  %v9340_v48 = vld [vmem:[%s22036_s3 + $0x1628] sm:$0xff]  ;;  %v9358_v29 = vld [vmem:[%s22036_s3 + $0x16b8] sm:$0xff]  ;;  %v9341_v24 = vld [vmem:[%s22036_s3 + $0x1630] sm:$0xff]  ;;  %v16406_v50 = vpack.c.bf16 %v9388_v28, %v9387_v18  ;;  %v16412_v14 = vpack.c.bf16 %v9374_v57, %v9373_v61 }
 0x4ea   :  { %v21101_v1 = vadd.f32 %v14449_v25, %v9948_v45  ;;  %v14450_v36 = vpop.f32.mrb[190].mxu0  ;;  %16333 = vmatpush3.bf16.msra.mxu1 %v16332_v19  ;;  %v9386_v45 = vld [vmem:[%s22036_s3 + $0x1798] sm:$0xff]  ;;  %v22261_v40 = vld [vmem:[#allocation65_spill] sm:$0xff]  ;;  %v16376_v21 = vpack.c.bf16 %v9340_v48, %v9339_v53  ;;  %v16378_v25 = vpack.c.bf16 %v9358_v29, %v9357_v7  ;;  %v9377_v28 = vld [vmem:[%s22036_s3 + $0x1750] sm:$0xff] }
 0x4eb   :  { %v14451_v49 = vpop.f32.mrb[191].mxu0  ;;  %16367 = vmatprep.subr.bf16.mxu1 %v16366_v4  ;;  %v8576_v52 = vmul.f32 %v21119_v46, %v22261_v40  ;;  %v22262_v43 = vld [vmem:[#allocation64_spill] sm:$0xff]  ;;  %v16402_v33 = vpack.c.bf16 %v9386_v45, %v9385_v34  ;;  %v21167_v4 = vrot.slane %v17086_v54, %v18795_v22  ;;  %v9392_v9 = vld [vmem:[%s22036_s3 + $0x17c8] sm:$0xff]  ;;  %v9345_v34 = vld [vmem:[%s22036_s3 + $0x1650] sm:$0xff] }
 0x4ec   :  { %v14452_v11 = vadd.f32 %v14451_v49, %v14450_v36  ;;  %16361 = vmatpush3.bf16.msra.mxu0 %v16360_v37  ;;  %v8573_v19 = vmul.f32 %v8502_v15, %v22262_v43  ;;  %v9342_v37 = vld [vmem:[%s22036_s3 + $0x1638] sm:$0xff]  ;;  %v9375_v48 = vld [vmem:[%s22036_s3 + $0x1740] sm:$0xff]  ;;  %v9376_v40 = vld [vmem:[%s22036_s3 + $0x1748] sm:$0xff] }
 0x4ed   :  { %10996 = vmatmul.mubr.f32.vlgmr.msra.gmra.mrb[214].mxu1 %v8571_v62  ;;  %16363 = vmatprep.subr.bf16.mxu0 %v16362_v60  ;;  %v22264_v60 = vld [vmem:[#allocation61_spill] sm:$0xff]  ;;  %v16380_v44 = vpack.c.bf16 %v9342_v37, %v9341_v24  ;;  %v9390_v49 = vld [vmem:[%s22036_s3 + $0x17b8] sm:$0xff]  ;;  %v16416_v17 = vpack.c.bf16 %v9376_v40, %v9375_v48  ;;  %v9401_v40 = vld [vmem:[%s22036_s3 + $0x1810] sm:$0xff] }
 0x4ee   :  { %v21134_v56 = vadd.f32 %v14452_v11, %v9953_v35  ;;  %11000 = vmatprep.mubr.f32.mxu1 %v8622_v3  ;;  %16369 = vmatpush3.bf16.msra.mxu1 %v16368_v32  ;;  %v17088_v35 = vpop.eup %17087  ;;  %v8623_v16 = vmul.f32 %v8502_v15, %v22264_v60  ;;  %v22265_v32 = vld [vmem:[#allocation68_spill] sm:$0xff]  ;;  %v9361_v11 = vld [vmem:[%s22036_s3 + $0x16d0] sm:$0xff] }
 0x4ef   :  { %16371 = vmatprep.subr.bf16.mxu1 %v16370_v12  ;;  %v8225_v36 = vadd.f32 1.0, %v17088_v35  ;;  %v8578_v51 = vmul.f32 %v21167_v4, %v22265_v32  ;;  %v9343_v62 = vld [vmem:[%s22036_s3 + $0x1640] sm:$0xff]  ;;  %v9344_v12 = vld [vmem:[%s22036_s3 + $0x1648] sm:$0xff]  ;;  %v17090_v31 = vpop.eup %17089  ;;  %v9346_v45 = vld [vmem:[%s22036_s3 + $0x1658] sm:$0xff] }
 0x4f0   :  { %16365 = vmatpush3.bf16.msra.mxu0 %v16364_v0  ;;  %v17092_v3 = vpop.eup %17091  ;;  %v16410_v0 = vpack.c.bf16 %v9390_v49, %v9389_v13  ;;  %v16384_v15 = vpack.c.bf16 %v9344_v12, %v9343_v62  ;;  %v8230_v41 = vadd.f32 1.0, %v17090_v31  ;;  %v9394_v7 = vld [vmem:[%s22036_s3 + $0x17d8] sm:$0xff]  ;;  %v9347_v43 = vld [vmem:[%s22036_s3 + $0x1660] sm:$0xff]  ;;  %v9397_v62 = vld [vmem:[%s22036_s3 + $0x17f0] sm:$0xff] }
 0x4f1   :  { %11001 = vmatmul.mubr.f32.gmra.mrb[216].mxu1 %v8621_v26  ;;  %16399 = vmatprep.subr.bf16.mxu0 %v16398_v27  ;;  %17093 = vrcp.f32 %v8225_v36  ;;  %v9391_v27 = vld [vmem:[%s22036_s3 + $0x17c0] sm:$0xff]  ;;  %v8227_v54 = vadd.f32 1.0, %v17092_v3  ;;  %v9366_v58 = vld [vmem:[%s22036_s3 + $0x16f8] sm:$0xff]  ;;  %v9400_v3 = vld [vmem:[%s22036_s3 + $0x1808] sm:$0xff] }
 0x4f2   :  { %16373 = vmatpush3.bf16.msra.mxu1 %v16372_v59  ;;  %11145 = vmatprep.mubr.f32.mxu1 %v8576_v52  ;;  %v16386_v59 = vpack.c.bf16 %v9362_v6, %v9361_v11  ;;  %v9363_v26 = vld [vmem:[%s22036_s3 + $0x16e0] sm:$0xff]  ;;  %v16414_v53 = vpack.c.bf16 %v9392_v9, %v9391_v27  ;;  %v16388_v52 = vpack.c.bf16 %v9346_v45, %v9345_v34  ;;  %17095 = vrcp.f32 %v8230_v41  ;;  %v9378_v35 = vld [vmem:[%s22036_s3 + $0x1758] sm:$0xff] }
 0x4f3   :  { %11071 = vmatmul.mubr.f32.vlgmr.msra.gmra.mrb[216].mxu0 %v8573_v19  ;;  %16375 = vmatprep.subr.bf16.mxu1 %v16374_v39  ;;  %v9364_v39 = vld [vmem:[%s22036_s3 + $0x16e8] sm:$0xff]  ;;  %17097 = vrcp.f32 %v8227_v54  ;;  %v9395_v37 = vld [vmem:[%s22036_s3 + $0x17e0] sm:$0xff]  ;;  %v9398_v12 = vld [vmem:[%s22036_s3 + $0x17f8] sm:$0xff]  ;;  %v16430_v11 = vpack.c.bf16 %v9416_v8, %v9415_v55 }
 0x4f4   :  { %11075 = vmatprep.mubr.f32.mxu0 %v8624_v23  ;;  %16401 = vmatpush3.bf16.msra.mxu0 %v16400_v20  ;;  %v9393_v20 = vld [vmem:[%s22036_s3 + $0x17d0] sm:$0xff]  ;;  %v16390_v29 = vpack.c.bf16 %v9364_v39, %v9363_v26  ;;  %v9348_v19 = vld [vmem:[%s22036_s3 + $0x1668] sm:$0xff]  ;;  %v8027_v23 = vadd.f32 %v19325_v2, %v18778_v30  ;;  %v16394_v2 = vpack.c.bf16 %v9366_v58, %v9365_v10  ;;  %v9399_v6 = vld [vmem:[%s22036_s3 + $0x1800] sm:$0xff] }
 0x4f5   :  { %16403 = vmatprep.subr.bf16.mxu0 %v16402_v33  ;;  %v16418_v18 = vpack.c.bf16 %v9394_v7, %v9393_v20  ;;  %v16392_v24 = vpack.c.bf16 %v9348_v19, %v9347_v43  ;;  %v9396_v30 = vld [vmem:[%s22036_s3 + $0x17e8] sm:$0xff]  ;;  %v9418_v27 = vld [vmem:[%s22036_s3 + $0x1898] sm:$0xff]  ;;  %v16426_v41 = vpack.c.bf16 %v9398_v12, %v9397_v62  ;;  %v9405_v8 = vld [vmem:[%s22036_s3 + $0x1830] sm:$0xff] }
 0x4f6   :  { %16377 = vmatpush3.bf16.msra.mxu1 %v16376_v21  ;;  %v14099_v36 = vmul.f32 -1.442695, %v8027_v23  ;;  %v22266_v39 = vld [vmem:[#allocation71_spill] sm:$0xff]  ;;  %v57_v23 = vld [vmem:[%s22035_s2] sm:$0x7]  ;;  %v9408_v62 = vld [vmem:[%s22036_s3 + $0x1848] sm:$0xff] }
 0x4f7   :  { %11076 = vmatmul.mubr.f32.gmra.mrb[218].mxu0 %v8623_v16  ;;  %16379 = vmatprep.subr.bf16.mxu1 %v16378_v25  ;;  %v22267_v7 = vld [vmem:[#allocation67_spill] sm:$0xff]  ;;  %v17143_v12 = vld [vmem:[%s22039_s6] sm:$0xff] }
 0x4f8   :  { %16405 = vmatpush3.bf16.msra.mxu0 %v16404_v38  ;;  %11220 = vmatprep.mubr.f32.mxu0 %v8578_v51  ;;  %v9349_v38 = vld [vmem:[%s22036_s3 + $0x1670] sm:$0xff]  ;;  %v16422_v51 = vpack.c.bf16 %v9396_v30, %v9395_v37  ;;  %17099 = vpow2.f32 %v14099_v36  ;;  %v9406_v36 = vld [vmem:[%s22036_s3 + $0x1838] sm:$0xff] }
 0x4f9   :  { %16407 = vmatprep.subr.bf16.mxu0 %v16406_v50  ;;  %v16420_v50 = vpack.c.bf16 %v9378_v35, %v9377_v28  ;;  %v9403_v35 = vld [vmem:[%s22036_s3 + $0x1820] sm:$0xff]  ;;  %v9421_v30 = vld [vmem:[%s22036_s3 + $0x18b0] sm:$0xff] }
 0x4fa   :  { %16381 = vmatpush3.bf16.msra.mxu1 %v16380_v44  ;;  %v9379_v44 = vld [vmem:[%s22036_s3 + $0x1760] sm:$0xff] }
 0x4fb   :  { %16383 = vmatprep.subr.bf16.mxu1 %v16382_v42  ;;  %v17094_v5 = vpop.eup %17093  ;;  %v16396_v42 = vpack.c.bf16 %v9350_v47, %v9349_v38  ;;  %v22270_v38 = vld [vmem:[#allocation72_spill] sm:$0xff] }
 0x4fc   :  { %16409 = vmatpush3.bf16.msra.mxu0 %v16408_v63  ;;  %v8510_v63 = vrot.slane %v17094_v5, %v18795_v22  ;;  %v17096_v9 = vpop.eup %17095  ;;  %v22271_v5 = vld [vmem:[#allocation70_spill] sm:$0xff] }
 0x4fd   :  { %16411 = vmatprep.subr.bf16.mxu0 %v16410_v0  ;;  %v17098_v34 = vpop.eup %17097  ;;  %v21333_v19 = vrot.slane %v17096_v9, %v18795_v22 }
 0x4fe   :  { %16385 = vmatpush3.bf16.msra.mxu1 %v16384_v15  ;;  %v9417_v15 = vld [vmem:[%s22036_s3 + $0x1890] sm:$0xff]  ;;  %v8518_v10 = vrot.slane %v17098_v34, %v18795_v22 }
 0x4ff   :  { %16387 = vmatprep.subr.bf16.mxu1 %v16386_v59  ;;  %v9381_v59 = vld [vmem:[%s22036_s3 + $0x1770] sm:$0xff]  ;;  %v16434_v48 = vpack.c.bf16 %v9418_v27, %v9417_v15  ;;  %v9428_v15 = vld [vmem:[%s22036_s3 + $0x18e8] sm:$0xff] }
 0x500   :  { %16413 = vmatpush3.bf16.msra.mxu0 %v16412_v14  ;;  %v14485_v33 = vpop.f32.mrb[190].mxu1  ;;  %v16432_v14 = vpack.c.bf16 %v9400_v3, %v9399_v6  ;;  %v8577_v47 = vmul.f32 %v8518_v10, %v22270_v38  ;;  %v17144_v6 = vld [vmem:[%s22039_s6 + $0x8] sm:$0xff]  ;;  %v17145_v27 = vld [vmem:[%s22039_s6 + $0x10] sm:$0xff] }
 0x501   :  { %v14486_v21 = vpop.f32.mrb[191].mxu1  ;;  %16415 = vmatprep.subr.bf16.mxu0 %v16414_v53  ;;  %v8575_v53 = vmul.f32 %v8510_v63, %v22266_v39 }
 0x502   :  { %v14487_v25 = vadd.f32 %v14486_v21, %v14485_v33  ;;  %16389 = vmatpush3.bf16.msra.mxu1 %v16388_v52  ;;  %v9402_v52 = vld [vmem:[%s22036_s3 + $0x1818] sm:$0xff]  ;;  %v9419_v33 = vld [vmem:[%s22036_s3 + $0x18a0] sm:$0xff]  ;;  %v22268_v21 = vld [vmem:[#allocation66_spill] sm:$0xff] }
 0x503   :  { %16391 = vmatprep.subr.bf16.mxu1 %v16390_v29  ;;  %v8626_v29 = vmul.f32 %v21119_v46, %v22267_v7  ;;  %v16436_v46 = vpack.c.bf16 %v9402_v52, %v9401_v40  ;;  %v9413_v40 = vld [vmem:[%s22036_s3 + $0x1870] sm:$0xff]  ;;  %v9414_v52 = vld [vmem:[%s22036_s3 + $0x1878] sm:$0xff] }
 0x504   :  { %v10098_v60 = vadd.f32 %v14487_v25, %v21101_v1  ;;  %16417 = vmatpush3.bf16.msra.mxu0 %v16416_v17  ;;  %v14488_v16 = vpop.f32.mrb[192].mxu1  ;;  %v9380_v1 = vld [vmem:[%s22036_s3 + $0x1768] sm:$0xff] }
 0x505   :  { %v14489_v32 = vpop.f32.mrb[193].mxu1  ;;  %16419 = vmatprep.subr.bf16.mxu0 %v16418_v18  ;;  %v16424_v57 = vpack.c.bf16 %v9380_v1, %v9379_v44  ;;  %v9420_v17 = vld [vmem:[%s22036_s3 + $0x18a8] sm:$0xff]  ;;  %v8625_v18 = vmul.f32 %v8510_v63, %v22268_v21  ;;  %v9426_v63 = vld [vmem:[%s22036_s3 + $0x18d8] sm:$0xff] }
 0x506   :  { %v14523_v13 = vpop.f32.mrb[192].mxu0  ;;  %v14490_v49 = vadd.f32 %v14489_v32, %v14488_v16  ;;  %16393 = vmatpush3.bf16.msra.mxu1 %v16392_v24  ;;  %v16438_v28 = vpack.c.bf16 %v9420_v17, %v9419_v33  ;;  %v9404_v25 = vld [vmem:[%s22036_s3 + $0x1828] sm:$0xff] }
 0x507   :  { %v14524_v31 = vpop.f32.mrb[193].mxu0  ;;  %16395 = vmatprep.subr.bf16.mxu1 %v16394_v2  ;;  %v22269_v24 = vld [vmem:[#allocation73_spill] sm:$0xff]  ;;  %v9422_v2 = vld [vmem:[%s22036_s3 + $0x18b8] sm:$0xff]  ;;  %v16440_v16 = vpack.c.bf16 %v9404_v25, %v9403_v35 }
 0x508   :  { %v10103_v0 = vadd.f32 %v14490_v49, %v21134_v56  ;;  %v14525_v61 = vadd.f32 %v14524_v31, %v14523_v13  ;;  %16421 = vmatpush3.bf16.msra.mxu0 %v16420_v50  ;;  %v9382_v56 = vld [vmem:[%s22036_s3 + $0x1778] sm:$0xff]  ;;  %v8580_v37 = vmul.f32 %v21333_v19, %v22269_v24  ;;  %v17100_v50 = vpop.eup %17099  ;;  %v16442_v55 = vpack.c.bf16 %v9422_v2, %v9421_v30  ;;  %v9424_v32 = vld [vmem:[%s22036_s3 + $0x18c8] sm:$0xff]  ;;  %v9425_v31 = vld [vmem:[%s22036_s3 + $0x18d0] sm:$0xff] }
 0x509   :  { %16423 = vmatprep.subr.bf16.mxu0 %v16422_v51  ;;  %v16428_v43 = vpack.c.bf16 %v9382_v56, %v9381_v59  ;;  %v22272_v51 = vld [vmem:[#allocation69_spill] sm:$0xff]  ;;  %v8229_v1 = vadd.f32 1.0, %v17100_v50  ;;  %v16444_v13 = vpack.c.bf16 %v9406_v36, %v9405_v8  ;;  %v16450_v3 = vpack.c.bf16 %v9426_v63, %v9425_v31  ;;  %v22273_v24 = vld [vmem:[#allocation76_spill] sm:$0xff]  ;;  %v22274_v30 = vld [vmem:[#allocation75_spill] sm:$0xff] }
 0x50a   :  { %v21321_v45 = vadd.f32 %v14525_v61, %v10098_v60  ;;  %v14526_v54 = vpop.f32.mrb[194].mxu0  ;;  %16397 = vmatpush3.bf16.msra.mxu1 %v16396_v42  ;;  %v8628_v60 = vmul.f32 %v21167_v4, %v22271_v5  ;;  %v9423_v4 = vld [vmem:[%s22036_s3 + $0x18c0] sm:$0xff]  ;;  %v8627_v44 = vmul.f32 %v8518_v10, %v22272_v51  ;;  %v9410_v61 = vld [vmem:[%s22036_s3 + $0x1858] sm:$0xff]  ;;  %v9412_v56 = vld [vmem:[%s22036_s3 + $0x1868] sm:$0xff]  ;;  %v16460_v10 = vpack.c.bf16 %v9414_v52, %v9413_v40 }
 0x50b   :  { %v14527_v26 = vpop.f32.mrb[195].mxu0  ;;  %16431 = vmatprep.subr.bf16.mxu1 %v16430_v11  ;;  %v16446_v49 = vpack.c.bf16 %v9424_v32, %v9423_v4  ;;  %v9407_v42 = vld [vmem:[%s22036_s3 + $0x1840] sm:$0xff]  ;;  %17101 = vrcp.f32 %v8229_v1  ;;  %v8630_v2 = vmul.f32 %v21333_v19, %v22274_v30 }
 0x50c   :  { %v14528_v20 = vadd.f32 %v14527_v26, %v14526_v54  ;;  %16425 = vmatpush3.bf16.msra.mxu0 %v16424_v57  ;;  %v16448_v11 = vpack.c.bf16 %v9408_v62, %v9407_v42  ;;  %v9427_v57 = vld [vmem:[%s22036_s3 + $0x18e0] sm:$0xff]  ;;  %v9429_v54 = vld [vmem:[%s22036_s3 + $0x18f0] sm:$0xff] }
 0x50d   :  { %11146 = vmatmul.mubr.f32.vlgmr.msra.gmra.mrb[218].mxu1 %v8575_v53  ;;  %16427 = vmatprep.subr.bf16.mxu0 %v16426_v41  ;;  %v16454_v41 = vpack.c.bf16 %v9428_v15, %v9427_v57  ;;  %v9411_v59 = vld [vmem:[%s22036_s3 + $0x1860] sm:$0xff] }
 0x50e   :  { %v21342_v58 = vadd.f32 %v14528_v20, %v10103_v0  ;;  %11150 = vmatprep.mubr.f32.mxu1 %v8626_v29  ;;  %16433 = vmatpush3.bf16.msra.mxu1 %v16432_v14  ;;  %v9409_v0 = vld [vmem:[%s22036_s3 + $0x1850] sm:$0xff]  ;;  %v9430_v14 = vld [vmem:[%s22036_s3 + $0x18f8] sm:$0xff]  ;;  %v16456_v53 = vpack.c.bf16 %v9412_v56, %v9411_v59 }
 0x50f   :  { %16435 = vmatprep.subr.bf16.mxu1 %v16434_v48  ;;  %v16452_v9 = vpack.c.bf16 %v9410_v61, %v9409_v0  ;;  %v16458_v48 = vpack.c.bf16 %v9430_v14, %v9429_v54 }
 0x510   :  { %16429 = vmatpush3.bf16.msra.mxu0 %v16428_v43 }
 0x511   :  { %11151 = vmatmul.mubr.f32.gmra.mrb[220].mxu1 %v8625_v18  ;;  %15237 = vmatprep.subr.msk.mxu0 %vm129_vm0, %v57_v23 }
 0x512   :  { %16437 = vmatpush3.bf16.msra.mxu1 %v16436_v46  ;;  %11295 = vmatprep.mubr.f32.mxu1 %v8580_v37 }
 0x513   :  { %11221 = vmatmul.mubr.f32.vlgmr.msra.gmra.mrb[220].mxu0 %v8577_v47  ;;  %16439 = vmatprep.subr.bf16.mxu1 %v16438_v28  ;;  %v22275_v47 = vld [vmem:[#allocation74_spill] sm:$0xff] }
 0x514   :  { %11225 = vmatprep.mubr.f32.mxu0 %v8628_v60  ;;  %15238 = vmatpush3.msk.msra.mxu0 %vm129_vm0, %v57_v23  ;;  %v22276_v60 = vmov 0.0  }
 0x515   :  { %v17102_v20 = vpop.eup %17101 }
 0x516   :  { %16441 = vmatpush3.bf16.msra.mxu1 %v16440_v16  ;;  %v8526_v23 = vrot.slane %v17102_v20, %v18795_v22 }
 0x517   :  { %11226 = vmatmul.mubr.f32.gmra.mrb[222].mxu0 %v8627_v44  ;;  %16443 = vmatprep.subr.bf16.mxu1 %v16442_v55 }
 0x518   :  { %15239 = vmatprep.mubr.msk.f32.mxu0 %vm122_vm1, %v17143_v12  ;;  %v8579_v37 = vmul.f32 %v8526_v23, %v22273_v24  ;;  %v8629_v5 = vmul.f32 %v8526_v23, %v22275_v47 }
 0x51a   :  { %16445 = vmatpush3.bf16.msra.mxu1 %v16444_v13 }
 0x51b   :  { %15240 = vmatmul.mubr.msk.f32.vlgmr.msra.gmra.mrb[224].mxu0 %vm122_vm1, %v17144_v6  ;;  %16447 = vmatprep.subr.bf16.mxu1 %v16446_v49 }
 0x51c   :  { %15246 = vmatprep.mubr.msk.f32.mxu0 %vm2269_vm2, %v17145_v27 }
 0x51e   :  { %16449 = vmatpush3.bf16.msra.mxu1 %v16448_v11 }
 0x51f   :  { %16451 = vmatprep.subr.bf16.mxu1 %v16450_v3 }
 0x520   :  { %v14561_v34 = vpop.f32.mrb[194].mxu1 }
 0x521   :  { %v14562_v26 = vpop.f32.mrb[195].mxu1 }
 0x522   :  { %v14563_v39 = vadd.f32 %v14562_v26, %v14561_v34  ;;  %16453 = vmatpush3.bf16.msra.mxu1 %v16452_v9 }
 0x523   :  { %16455 = vmatprep.subr.bf16.mxu1 %v16454_v41 }
 0x524   :  { %v10248_v7 = vadd.f32 %v14563_v39, %v21321_v45  ;;  %v14564_v29 = vpop.f32.mrb[196].mxu1 }
 0x525   :  { %v14565_v43 = vpop.f32.mrb[197].mxu1 }
 0x526   :  { %v14599_v33 = vpop.f32.mrb[196].mxu0  ;;  %v14566_v17 = vadd.f32 %v14565_v43, %v14564_v29  ;;  %16457 = vmatpush3.bf16.msra.mxu1 %v16456_v53 }
 0x527   :  { %v14600_v46 = vpop.f32.mrb[197].mxu0  ;;  %16459 = vmatprep.subr.bf16.mxu1 %v16458_v48 }
 0x528   :  { %v10253_v21 = vadd.f32 %v14566_v17, %v21342_v58  ;;  %v14601_v18 = vadd.f32 %v14600_v46, %v14599_v33 }
 0x52a   :  { %v10323_v28 = vadd.f32 %v14601_v18, %v10248_v7  ;;  %v14602_v35 = vpop.f32.mrb[198].mxu0  ;;  %16461 = vmatpush3.bf16.msra.mxu1 %v16460_v10 }
 0x52b   :  { %v14603_v25 = vpop.f32.mrb[199].mxu0 }
 0x52c   :  { %v14604_v45 = vadd.f32 %v14603_v25, %v14602_v35 }
 0x52d   :  { %11296 = vmatmul.mubr.f32.vlgmr.msra.gmra.mrb[222].mxu1 %v8579_v37 }
 0x52e   :  { %v10328_v38 = vadd.f32 %v14604_v45, %v10253_v21  ;;  %11300 = vmatprep.mubr.f32.mxu1 %v8630_v2 }
 0x531   :  { %11301 = vmatmul.mubr.f32.gmra.mrb[224].mxu1 %v8629_v5 }
 0x532   :  { %11898 = vmatprep.mubr.f32.mxu1 %v22276_v60 }
 0x540   :  { %v14637_v58 = vpop.f32.mrb[198].mxu1 }
 0x541   :  { %v14638_v16 = vpop.f32.mrb[199].mxu1 }
 0x542   :  { %v14639_v50 = vadd.f32 %v14638_v16, %v14637_v58 }
 0x544   :  { %v10398_v55 = vadd.f32 %v14639_v50, %v10323_v28  ;;  %v14640_v8 = vpop.f32.mrb[200].mxu1 }
 0x545   :  { %v14641_v36 = vpop.f32.mrb[201].mxu1 }
 0x546   :  { %v14675_v4 = vpop.f32.mrb[200].mxu0  ;;  %v14642_v32 = vadd.f32 %v14641_v36, %v14640_v8 }
 0x547   :  { %v14676_v51 = vpop.f32.mrb[201].mxu0 }
 0x548   :  { %v10403_v44 = vadd.f32 %v14642_v32, %v10328_v38  ;;  %v14677_v1 = vadd.f32 %v14676_v51, %v14675_v4 }
 0x54a   :  { %v10473_v19 = vadd.f32 %v14677_v1, %v10398_v55  ;;  %v14678_v13 = vpop.f32.mrb[202].mxu0 }
 0x54b   :  { %v14679_v49 = vpop.f32.mrb[203].mxu0 }
 0x54c   :  { %v14680_v42 = vadd.f32 %v14679_v49, %v14678_v13 }
 0x54e   :  { %v10478_v62 = vadd.f32 %v14680_v42, %v10403_v44 }
 0x560   :  { %v14713_v12 = vpop.f32.mrb[202].mxu1 }
 0x561   :  { %v14714_v31 = vpop.f32.mrb[203].mxu1 }
 0x562   :  { %v14715_v63 = vadd.f32 %v14714_v31, %v14713_v12 }
 0x564   :  { %v10548_v11 = vadd.f32 %v14715_v63, %v10473_v19  ;;  %v14716_v6 = vpop.f32.mrb[204].mxu1 }
 0x565   :  { %v14717_v3 = vpop.f32.mrb[205].mxu1 }
 0x566   :  { %v14751_v0 = vpop.f32.mrb[204].mxu0  ;;  %v14718_v61 = vadd.f32 %v14717_v3, %v14716_v6 }
 0x567   :  { %v14752_v57 = vpop.f32.mrb[205].mxu0 }
 0x568   :  { %v10553_v15 = vadd.f32 %v14718_v61, %v10478_v62  ;;  %v14753_v27 = vadd.f32 %v14752_v57, %v14751_v0 }
 0x56a   :  { %v10623_v9 = vadd.f32 %v14753_v27, %v10548_v11  ;;  %v14754_v41 = vpop.f32.mrb[206].mxu0 }
 0x56b   :  { %v14755_v59 = vpop.f32.mrb[207].mxu0 }
 0x56c   :  { %v14756_v56 = vadd.f32 %v14755_v59, %v14754_v41 }
 0x56e   :  { %v10628_v34 = vadd.f32 %v14756_v56, %v10553_v15 }
 0x580   :  { %v14789_v54 = vpop.f32.mrb[206].mxu1 }
 0x581   :  { %v14790_v14 = vpop.f32.mrb[207].mxu1 }
 0x582   :  { %v14791_v26 = vadd.f32 %v14790_v14, %v14789_v54 }
 0x584   :  { %v10698_v39 = vadd.f32 %v14791_v26, %v10623_v9  ;;  %v14792_v53 = vpop.f32.mrb[208].mxu1 }
 0x585   :  { %v14793_v48 = vpop.f32.mrb[209].mxu1 }
 0x586   :  { %v14827_v40 = vpop.f32.mrb[208].mxu0  ;;  %v14794_v52 = vadd.f32 %v14793_v48, %v14792_v53 }
 0x587   :  { %v14828_v20 = vpop.f32.mrb[209].mxu0 }
 0x588   :  { %v10703_v7 = vadd.f32 %v14794_v52, %v10628_v34  ;;  %v14829_v29 = vadd.f32 %v14828_v20, %v14827_v40  ;;  %v22278_v40 = vld [vmem:[#allocation5_spill] sm:$0xff] }
 0x58a   :  { %v10773_v43 = vadd.f32 %v14829_v29, %v10698_v39  ;;  %v14830_v33 = vpop.f32.mrb[210].mxu0  ;;  %v22277_v39 = vld [vmem:[#allocation6_spill] sm:$0xff] }
 0x58b   :  { %v14831_v17 = vpop.f32.mrb[211].mxu0 }
 0x58c   :  { %v14832_v10 = vadd.f32 %v14831_v17, %v14830_v33  ;;  %v52_v33 = vld [vmem:[%s22033_s0] sm:$0x3f]  ;;  %v55_v17 = vld [vmem:[%s22033_s0 + $0x18] sm:$0x3f] }
 0x58e   :  { %v10778_v46 = vadd.f32 %v14832_v10, %v10703_v7  ;;  %v17146_v10 = vld [vmem:[%s22039_s6 + $0x18] sm:$0xff] }
 0x5a0   :  { %v14865_v23 = vpop.f32.mrb[210].mxu1 }
 0x5a1   :  { %v14866_v21 = vpop.f32.mrb[211].mxu1 }
 0x5a2   :  { %v14867_v18 = vadd.f32 %v14866_v21, %v14865_v23  ;;  %v54_v23 = vld [vmem:[%s22033_s0 + $0x10] sm:$0x3f]  ;;  %v56_v21 = vld [vmem:[%s22033_s0 + $0x20] sm:$0x3f] }
 0x5a4   :  { %v10848_v28 = vadd.f32 %v14867_v18, %v10773_v43  ;;  %v14868_v35 = vpop.f32.mrb[212].mxu1  ;;  %v53_v43 = vld [vmem:[%s22033_s0 + $0x8] sm:$0x3f] }
 0x5a5   :  { %v14869_v25 = vpop.f32.mrb[213].mxu1  ;;  %v11462_v18 = vld [vmem:[%s22039_s6 + $0x28] sm:$0xff] }
 0x5a6   :  { %v14903_v24 = vpop.f32.mrb[212].mxu0  ;;  %v14870_v37 = vadd.f32 %v14869_v25, %v14868_v35 }
 0x5a7   :  { %v14904_v45 = vpop.f32.mrb[213].mxu0 }
 0x5a8   :  { %v10853_v30 = vadd.f32 %v14870_v37, %v10778_v46  ;;  %v14905_v2 = vadd.f32 %v14904_v45, %v14903_v24  ;;  %v11461_v46 = vld [vmem:[%s22039_s6 + $0x20] sm:$0xff] }
 0x5aa   :  { %v10923_v38 = vadd.f32 %v14905_v2, %v10848_v28  ;;  %v14906_v47 = vpop.f32.mrb[214].mxu0 }
 0x5ab   :  { %v14907_v5 = vpop.f32.mrb[215].mxu0 }
 0x5ac   :  { %v14908_v58 = vadd.f32 %v14907_v5, %v14906_v47  ;;  %v22279_v5 = vld [vmem:[#allocation8_spill] sm:$0xff] }
 0x5ae   :  { %v10928_v16 = vadd.f32 %v14908_v58, %v10853_v30 }
 0x5c0   :  { %v14941_v50 = vpop.f32.mrb[214].mxu1 }
 0x5c1   :  { %v14942_v55 = vpop.f32.mrb[215].mxu1 }
 0x5c2   :  { %v14943_v8 = vadd.f32 %v14942_v55, %v14941_v50  ;;  %v22280_v50 = vld [vmem:[#allocation7_spill] sm:$0xff] }
 0x5c4   :  { %v10998_v36 = vadd.f32 %v14943_v8, %v10923_v38  ;;  %v14944_v4 = vpop.f32.mrb[216].mxu1 }
 0x5c5   :  { %v14945_v32 = vpop.f32.mrb[217].mxu1 }
 0x5c6   :  { %v14979_v51 = vpop.f32.mrb[216].mxu0  ;;  %v14946_v44 = vadd.f32 %v14945_v32, %v14944_v4  ;;  %v11468_v32 = vpop.permute.xlu1 %11467 }
 0x5c7   :  { %v14980_v1 = vpop.f32.mrb[217].mxu0 }
 0x5c8   :  { %v11003_v19 = vadd.f32 %v14946_v44, %v10928_v16  ;;  %v14981_v13 = vadd.f32 %v14980_v1, %v14979_v51  ;;  %v11473_v44 = vpop.permute.xlu0 %11472 }
 0x5ca   :  { %v11073_v49 = vadd.f32 %v14981_v13, %v10998_v36  ;;  %v14982_v42 = vpop.f32.mrb[218].mxu0 }
 0x5cb   :  { %v14983_v62 = vpop.f32.mrb[219].mxu0 }
 0x5cc   :  { %v14984_v12 = vadd.f32 %v14983_v62, %v14982_v42 }
 0x5ce   :  { %v11078_v31 = vadd.f32 %v14984_v12, %v11003_v19 }
 0x5e0   :  { %v15017_v63 = vpop.f32.mrb[218].mxu1 }
 0x5e1   :  { %v15018_v11 = vpop.f32.mrb[219].mxu1 }
 0x5e2   :  { %v15019_v6 = vadd.f32 %v15018_v11, %v15017_v63 }
 0x5e4   :  { %v11148_v3 = vadd.f32 %v15019_v6, %v11073_v49  ;;  %v15020_v0 = vpop.f32.mrb[220].mxu1 }
 0x5e5   :  { %v15021_v61 = vpop.f32.mrb[221].mxu1 }
 0x5e6   :  { %v15055_v57 = vpop.f32.mrb[220].mxu0  ;;  %v15022_v15 = vadd.f32 %v15021_v61, %v15020_v0 }
 0x5e7   :  { %v15056_v27 = vpop.f32.mrb[221].mxu0 }
 0x5e8   :  { %v11153_v9 = vadd.f32 %v15022_v15, %v11078_v31  ;;  %v15057_v41 = vadd.f32 %v15056_v27, %v15055_v57 }
 0x5ea   :  { %v11223_v59 = vadd.f32 %v15057_v41, %v11148_v3  ;;  %v15058_v56 = vpop.f32.mrb[222].mxu0  ;;  %v11737_v41 = vld [vmem:[%s22039_s6 + $0x30] sm:$0xff] }
 0x5eb   :  { %v15059_v34 = vpop.f32.mrb[223].mxu0 }
 0x5ec   :  { %v15060_v54 = vadd.f32 %v15059_v34, %v15058_v56 }
 0x5ee   :  { %v11228_v14 = vadd.f32 %v15060_v54, %v11153_v9  ;;  %v15241_v26 = vpop.f32.mrb[224].mxu0 }
 0x5ef   :  { %v11381_v53 = vadd.f32 %v15241_v26, %v22277_v39  ;;  %v11375_v48 = vpop.f32.mrb[225].mxu0 }
 0x5f0   :  { %v11376_v52 = vadd.f32 %v11375_v48, %v22278_v40  ;;  %v11738_v40 = vld [vmem:[%s22039_s6 + $0x38] sm:$0xff] }
 0x5f1   :  { %v11385_v20 = vmax.f32 %v11381_v53, 0.0 }
 0x5f2   :  { %v11384_v7 = vmax.f32 %v11376_v52, 0.0 }
 0x5f4   :  { %v16462_v29 = vpack.c.bf16 %v11385_v20, %v11384_v7 }
 0x5f6   :  { %16463 = vmatprep.subr.bf16.mxu0 %v16462_v29 }
 0x5f7   :  { %16465 = vmatpush3.bf16.msra.mxu0 %v16462_v29 }
 0x5f8   :  { %14106 = vmatprep.subr.msk.mxu0 %vm11482_vm3, %v53_v43 }
 0x5fa   :  { %15247 = vmatmul.mubr.msk.f32.vlgmr.msra.gmra.mrb[226].mxu0 %vm2269_vm2, %v17146_v10  ;;  %v11749_v10 = vpop.permute.xlu0 %11748 }
 0x5fb   :  { %14107 = vmatpush1.msk.msra.mxu0 %vm11482_vm3, %v52_v33  ;;  %11562 = vmatprep.mubr.f32.mxu0 %v22276_v60 }
 0x5fc   :  { %14110 = vmatprep.subr.msk.mxu0 %vm11482_vm3, %v55_v17 }
 0x5fe   :  { %14108 = vmatmul.mubr.msk.f32.vlgmr.msra.gmra.mrb[228].mxu0 %vm11475_vm4, %v11461_v46 }
 0x5ff   :  { %11568 = vmatprep.mubr.f32.mxu0 %v22276_v60  ;;  %14111 = vmatpush1.msk.msra.mxu0 %vm11482_vm3, %v54_v23  ;;  %v11744_v23 = vpop.permute.xlu1 %11743 }
 0x600   :  { %v15093_v28 = vpop.f32.mrb[222].mxu1  ;;  %15249 = vmatprep.subr.msk.mxu0 %vm11482_vm3, %v56_v21 }
 0x601   :  { %v15094_v35 = vpop.f32.mrb[223].mxu1 }
 0x602   :  { %14109 = vmatmul.mubr.msk.f32.gmra.mrb[230].mxu0 %vm11475_vm4, %v11462_v18  ;;  %v15095_v25 = vadd.f32 %v15094_v35, %v15093_v28 }
 0x603   :  { %11639 = vmatprep.mubr.f32.mxu0 %v22276_v60 }
 0x604   :  { %v21479_v24 = vadd.f32 %v15095_v25, %v11223_v59  ;;  %v15096_v37 = vpop.f32.mrb[224].mxu1 }
 0x605   :  { %v15097_v45 = vpop.f32.mrb[225].mxu1 }
 0x606   :  { %14112 = vmatmul.mubr.msk.f32.vlgmr.msra.gmra.mrb[232].mxu0 %vm11475_vm4, %v11461_v46  ;;  %v15098_v30 = vadd.f32 %v15097_v45, %v15096_v37 }
 0x607   :  { %11645 = vmatprep.mubr.f32.mxu0 %v22276_v60  ;;  %15250 = vmatpush3.msk.msra.mxu0 %vm11482_vm3, %v56_v21 }
 0x608   :  { %v21484_v2 = vadd.f32 %v15098_v30, %v11228_v14 }
 0x60a   :  { %v16601_v38 = vpack.c.bf16 %v21484_v2, %v21479_v24  ;;  %14113 = vmatmul.mubr.msk.f32.gmra.mrb[234].mxu0 %vm11475_vm4, %v11462_v18  ;;  %v13075_v24 = vld [vmem:[%s22038_s5 + $0x58] sm:$0xff]  ;;  %v13080_v2 = vld [vmem:[%s22038_s5 + $0x80] sm:$0xff] }
 0x60b   :  { %15251 = vmatprep.mubr.msk.f32.mxu0 %vm11475_vm4, %v11461_v46 }
 0x60e   :  { %15252 = vmatmul.mubr.msk.f32.vlgmr.msra.gmra.mrb[236].mxu0 %vm11475_vm4, %v11462_v18 }
 0x60f   :  { %11821 = vmatprep.mubr.f32.mxu0 %v22276_v60 }
 0x6cd   :  { %v15248_v47 = vpop.f32.mrb[226].mxu0 }
 0x6ce   :  { %v21493_v58 = vadd.f32 %v15248_v47, %v22279_v5  ;;  %v11452_v16 = vpop.f32.mrb[227].mxu0  ;;  %v11986_v5 = vld [vmem:[%s22039_s6 + $0x58] sm:$0xff] }
 0x6cf   :  { %v21496_v55 = vadd.f32 %v11452_v16, %v22280_v50 }
 0x6d1   :  { %v16604_v8 = vpack.c.bf16 %v21493_v58, %v21496_v55  ;;  %v11564_v36 = vpop.f32.mrb[228].mxu0  ;;  %v13079_v58 = vld [vmem:[%s22038_s5 + $0x78] sm:$0xff] }
 0x6d2   :  { %v11566_v4 = vpop.f32.mrb[229].mxu0  ;;  %v11565_v51 = vadd.f32 %v11564_v36, %v11468_v32 }
 0x6d3   :  { %v11567_v1 = vadd.f32 %v11566_v4, %v11468_v32 }
 0x6d4   :  { %v11727_v62 = vmax.f32 %v11565_v51, 0.0 }
 0x6d5   :  { %v11570_v19 = vpop.f32.mrb[230].mxu0  ;;  %v11728_v31 = vmax.f32 %v11567_v1, 0.0 }
 0x6d6   :  { %v11571_v13 = vadd.f32 %v11570_v19, %v11473_v44  ;;  %v11572_v49 = vpop.f32.mrb[231].mxu0 }
 0x6d7   :  { %v11573_v42 = vadd.f32 %v11572_v49, %v11473_v44  ;;  %v11987_v49 = vld [vmem:[%s22039_s6 + $0x60] sm:$0xff] }
 0x6d8   :  { %v11732_v12 = vmax.f32 %v11571_v13, 0.0 }
 0x6d9   :  { %v11733_v63 = vmax.f32 %v11573_v42, 0.0  ;;  %v11641_v11 = vpop.f32.mrb[232].mxu0 }
 0x6da   :  { %v16468_v6 = vpack.c.bf16 %v11732_v12, %v11727_v62  ;;  %v11643_v3 = vpop.f32.mrb[233].mxu0  ;;  %v11642_v61 = vadd.f32 %v11641_v11, %v11468_v32 }
 0x6db   :  { %v16466_v0 = vpack.c.bf16 %v11733_v63, %v11728_v31  ;;  %v11644_v57 = vadd.f32 %v11643_v3, %v11468_v32  ;;  %v11993_v31 = vpop.permute.xlu1 %11992 }
 0x6dc   :  { %v11729_v56 = vmax.f32 %v11642_v61, 0.0 }
 0x6dd   :  { %v11647_v15 = vpop.f32.mrb[234].mxu0  ;;  %16467 = vmatprep.subr.bf16.mxu0 %v16466_v0  ;;  %v11730_v54 = vmax.f32 %v11644_v57, 0.0  ;;  %v11998_v0 = vpop.permute.xlu0 %11997 }
 0x6de   :  { %v11648_v27 = vadd.f32 %v11647_v15, %v11473_v44  ;;  %v11649_v9 = vpop.f32.mrb[235].mxu0  ;;  %16469 = vmatpush1.bf16.msra.mxu0 %v16468_v6 }
 0x6df   :  { %v11650_v59 = vadd.f32 %v11649_v9, %v11473_v44 }
 0x6e0   :  { %v11734_v34 = vmax.f32 %v11648_v27, 0.0 }
 0x6e1   :  { %v11735_v14 = vmax.f32 %v11650_v59, 0.0  ;;  %v15253_v26 = vpop.f32.mrb[236].mxu0  ;;  %14117 = vmatmul.mubr.msk.f32.vlgmr.msra.gmra.mrb[238].mxu0 %vm2269_vm2, %v11737_v41 }
 0x6e2   :  { %v16472_v39 = vpack.c.bf16 %v11734_v34, %v11729_v56  ;;  %v11724_v53 = vadd.f32 %v15253_v26, %v11473_v44  ;;  %v11718_v48 = vpop.f32.mrb[237].mxu0  ;;  %11827 = vmatprep.mubr.f32.mxu0 %v22276_v60 }
 0x6e3   :  { %v16470_v52 = vpack.c.bf16 %v11735_v14, %v11730_v54  ;;  %v11719_v20 = vadd.f32 %v11718_v48, %v11468_v32 }
 0x6e4   :  { %v11736_v7 = vmax.f32 %v11724_v53, 0.0 }
 0x6e5   :  { %v11731_v29 = vmax.f32 %v11719_v20, 0.0  ;;  %14118 = vmatmul.mubr.msk.f32.gmra.mrb[240].mxu0 %vm2269_vm2, %v11738_v40  ;;  %16471 = vmatprep.subr.bf16.mxu1 %v16470_v52 }
 0x6e6   :  { %16473 = vmatpush1.bf16.msra.mxu1 %v16472_v39  ;;  %15258 = vmatprep.mubr.msk.f32.mxu0 %vm2269_vm2, %v11737_v41 }
 0x6e7   :  { %v16474_v43 = vpack.c.bf16 %v11736_v7, %v11731_v29 }
 0x6e9   :  { %14119 = vmatmul.mubr.msk.f32.vlgmr.msra.gmra.mrb[226].mxu1 %vm2269_vm2, %v11737_v41  ;;  %16475 = vmatprep.subr.bf16.mxu0 %v16474_v43 }
 0x6ea   :  { %16477 = vmatpush3.bf16.msra.mxu0 %v16474_v43  ;;  %11904 = vmatprep.mubr.f32.mxu1 %v22276_v60 }
 0x6ed   :  { %14120 = vmatmul.mubr.msk.f32.gmra.mrb[228].mxu1 %vm2269_vm2, %v11738_v40  ;;  %15259 = vmatmul.mubr.msk.f32.vlgmr.msra.gmra.mrb[242].mxu0 %vm2269_vm2, %v11738_v40 }
 0x6ee   :  { %12070 = vmatprep.mubr.f32.mxu1 %v22276_v60  ;;  %12147 = vmatprep.mubr.f32.mxu0 %v22276_v60 }
 0x7b4   :  { %v11823_v33 = vpop.f32.mrb[238].mxu0 }
 0x7b5   :  { %v11825_v17 = vpop.f32.mrb[239].mxu0  ;;  %v21522_v25 = vadd.f32 %v11823_v33, %v11744_v23 }
 0x7b6   :  { %v21518_v28 = vadd.f32 %v11825_v17, %v11744_v23 }
 0x7b8   :  { %v11829_v46 = vpop.f32.mrb[240].mxu0 }
 0x7b9   :  { %v21516_v21 = vadd.f32 %v11829_v46, %v11749_v10  ;;  %v11831_v18 = vpop.f32.mrb[241].mxu0  ;;  %v12245_v46 = vld [vmem:[%s22039_s6 + $0x68] sm:$0x1] }
 0x7ba   :  { %v21520_v35 = vadd.f32 %v11831_v18, %v11749_v10  ;;  %v17177_v18 = vmov 0.0|0.0  }
 0x7bb   :  { %v21530_v30 = vpack.c.bf16 %v21516_v21, %v21522_v25 }
 0x7bc   :  { %v21526_v37 = vpack.c.bf16 %v21520_v35, %v21518_v28  ;;  %v11900_v45 = vpop.f32.mrb[226].mxu1 }
 0x7bd   :  { %v11902_v47 = vpop.f32.mrb[227].mxu1  ;;  %v21548_v13 = vadd.f32 %v11900_v45, %v11744_v23 }
 0x7be   :  { %16479 = vmatprep.subr.bf16.mxu1 %v21526_v37  ;;  %v21541_v44 = vadd.f32 %v11902_v47, %v11744_v23 }
 0x7bf   :  { %16481 = vmatpush1.bf16.msra.mxu1 %v21530_v30 }
 0x7c0   :  { %v11906_v16 = vpop.f32.mrb[228].mxu1  ;;  %v15260_v50 = vpop.f32.mrb[242].mxu0 }
 0x7c1   :  { %v21537_v36 = vadd.f32 %v11906_v16, %v11749_v10  ;;  %v21539_v4 = vadd.f32 %v15260_v50, %v11749_v10  ;;  %v11908_v32 = vpop.f32.mrb[229].mxu1  ;;  %v11977_v51 = vpop.f32.mrb[243].mxu0 }
 0x7c2   :  { %v21543_v1 = vadd.f32 %v11908_v32, %v11749_v10  ;;  %v21545_v19 = vadd.f32 %v11977_v51, %v11744_v23  ;;  %14123 = vmatmul.mubr.msk.f32.vlgmr.msra.gmra.mrb[230].mxu1 %vm2269_vm2, %v11986_v5  ;;  %v12543_v51 = vld [vmem:[%s22037_s4 + $0x80] sm:$0xff] }
 0x7c3   :  { %12076 = vmatprep.mubr.f32.mxu1 %v22276_v60  ;;  %v21564_v12 = vpack.c.bf16 %v21537_v36, %v21548_v13 }
 0x7c4   :  { %v21556_v42 = vpack.c.bf16 %v21543_v1, %v21541_v44  ;;  %v21560_v62 = vpack.c.bf16 %v21539_v4, %v21545_v19 }
 0x7c6   :  { %14124 = vmatmul.mubr.msk.f32.gmra.mrb[232].mxu1 %vm2269_vm2, %v11987_v49  ;;  %16483 = vmatprep.subr.bf16.mxu0 %v21556_v42 }
 0x7c7   :  { %16487 = vmatprep.subr.bf16.mxu1 %v21560_v62  ;;  %16485 = vmatpush1.bf16.msra.mxu0 %v21564_v12 }
 0x7c8   :  { %16489 = vmatpush3.bf16.msra.mxu1 %v21560_v62  ;;  %15265 = vmatprep.mubr.msk.f32.mxu1 %vm2269_vm2, %v11986_v5 }
 0x7ca   :  { %14125 = vmatmul.mubr.msk.f32.vlgmr.msra.gmra.mrb[244].mxu0 %vm2269_vm2, %v11986_v5 }
 0x7cb   :  { %15266 = vmatmul.mubr.msk.f32.vlgmr.msra.gmra.mrb[234].mxu1 %vm2269_vm2, %v11987_v49  ;;  %12153 = vmatprep.mubr.f32.mxu0 %v22276_v60 }
 0x7cc   :  { %12390 = vmatprep.mubr.f32.mxu1 %v22276_v60 }
 0x7ce   :  { %14126 = vmatmul.mubr.msk.f32.gmra.mrb[246].mxu0 %vm2269_vm2, %v11987_v49  ;;  %v12544_v49 = vld [vmem:[%s22037_s4 + $0x88] sm:$0xff] }
 0x7cf   :  { %12319 = vmatprep.mubr.f32.mxu0 %v22276_v60 }
 0x895   :  { %v12072_v63 = vpop.f32.mrb[230].mxu1 }
 0x896   :  { %v12073_v11 = vadd.f32 %v12072_v63, %v11993_v31  ;;  %v12074_v6 = vpop.f32.mrb[231].mxu1  ;;  %v16501_v63 = vpack.c.bf16 %v12544_v49, %v12543_v51  ;;  %v12536_v51 = vld [vmem:[%s22037_s4 + $0x48] sm:$0xff]  ;;  %v12579_v49 = vld [vmem:[%s22037_s4 + $0x1a0] sm:$0xff] }
 0x897   :  { %v12075_v3 = vadd.f32 %v12074_v6, %v11993_v31 }
 0x898   :  { %17103 = vtanh.f32 %v12073_v11  ;;  %v12528_v11 = vld [vmem:[%s22037_s4 + $0x8] sm:$0xff] }
 0x899   :  { %v12078_v61 = vpop.f32.mrb[232].mxu1  ;;  %17105 = vtanh.f32 %v12075_v3  ;;  %v12545_v3 = vld [vmem:[%s22037_s4 + $0x90] sm:$0xff] }
 0x89a   :  { %v12079_v57 = vadd.f32 %v12078_v61, %v11998_v0  ;;  %v12080_v15 = vpop.f32.mrb[233].mxu1  ;;  %v12529_v61 = vld [vmem:[%s22037_s4 + $0x10] sm:$0xff] }
 0x89b   :  { %v12081_v27 = vadd.f32 %v12080_v15, %v11998_v0  ;;  %v12530_v15 = vld [vmem:[%s22037_s4 + $0x18] sm:$0xff] }
 0x89c   :  { %17107 = vtanh.f32 %v12079_v57 }
 0x89d   :  { %17109 = vtanh.f32 %v12081_v27  ;;  %v12149_v9 = vpop.f32.mrb[244].mxu0  ;;  %v16507_v27 = vpack.c.bf16 %v12530_v15, %v12529_v61  ;;  %v12554_v61 = vld [vmem:[%s22037_s4 + $0xd8] sm:$0xff] }
 0x89e   :  { %v12150_v41 = vadd.f32 %v12149_v9, %v11993_v31  ;;  %v15267_v59 = vpop.f32.mrb[234].mxu1  ;;  %v12151_v56 = vpop.f32.mrb[245].mxu0  ;;  %v12547_v9 = vld [vmem:[%s22037_s4 + $0xa0] sm:$0xff] }
 0x89f   :  { %v12232_v34 = vadd.f32 %v15267_v59, %v11998_v0  ;;  %v12152_v54 = vadd.f32 %v12151_v56, %v11993_v31  ;;  %v12226_v14 = vpop.f32.mrb[235].mxu1  ;;  %v12531_v59 = vld [vmem:[%s22037_s4 + $0x20] sm:$0xff] }
 0x8a0   :  { %17111 = vtanh.f32 %v12150_v41  ;;  %v12227_v26 = vadd.f32 %v12226_v14, %v11993_v31  ;;  %v12527_v31 = vld [vmem:[%s22037_s4] sm:$0xff]  ;;  %v12548_v41 = vld [vmem:[%s22037_s4 + $0xa8] sm:$0xff] }
 0x8a1   :  { %17113 = vtanh.f32 %v12232_v34  ;;  %v12155_v39 = vpop.f32.mrb[246].mxu0  ;;  %v16503_v6 = vpack.c.bf16 %v12528_v11, %v12527_v31  ;;  %v16509_v56 = vpack.c.bf16 %v12548_v41, %v12547_v9  ;;  %v12532_v34 = vld [vmem:[%s22037_s4 + $0x28] sm:$0xff]  ;;  %v12538_v9 = vld [vmem:[%s22037_s4 + $0x58] sm:$0xff]  ;;  %v12581_v41 = vld [vmem:[%s22037_s4 + $0x1b0] sm:$0xff] }
 0x8a2   :  { %17115 = vtanh.f32 %v12152_v54  ;;  %v12156_v53 = vadd.f32 %v12155_v39, %v11998_v0  ;;  %v12157_v48 = vpop.f32.mrb[247].mxu0  ;;  %v17104_v52 = vpop.eup %17103  ;;  %v12575_v54 = vld [vmem:[%s22037_s4 + $0x180] sm:$0xff]  ;;  %v12576_v14 = vld [vmem:[%s22037_s4 + $0x188] sm:$0xff] }
 0x8a3   :  { %17117 = vtanh.f32 %v12227_v26  ;;  %v12158_v40 = vadd.f32 %v12157_v48, %v11998_v0  ;;  %v17106_v20 = vpop.eup %17105  ;;  %v12546_v0 = vld [vmem:[%s22037_s4 + $0x98] sm:$0xff]  ;;  %v16511_v26 = vpack.c.bf16 %v12532_v34, %v12531_v59  ;;  %v16533_v39 = vpack.c.bf16 %v12576_v14, %v12575_v54  ;;  %v12560_v48 = vld [vmem:[%s22037_s4 + $0x108] sm:$0xff]  ;;  %v12565_v34 = vld [vmem:[%s22037_s4 + $0x130] sm:$0xff] }
 0x8a4   :  { %17119 = vtanh.f32 %v12156_v53  ;;  %v16505_v57 = vpack.c.bf16 %v12546_v0, %v12545_v3  ;;  %v12559_v53 = vld [vmem:[%s22037_s4 + $0x100] sm:$0xff]  ;;  %v12580_v31 = vld [vmem:[%s22037_s4 + $0x1a8] sm:$0xff]  ;;  %v12553_v0 = vld [vmem:[%s22037_s4 + $0xd0] sm:$0xff] }
 0x8a5   :  { %17121 = vtanh.f32 %v12158_v40  ;;  %v12549_v40 = vld [vmem:[%s22037_s4 + $0xb0] sm:$0xff]  ;;  %v12564_v11 = vld [vmem:[%s22037_s4 + $0x128] sm:$0xff]  ;;  %v16541_v3 = vpack.c.bf16 %v12580_v31, %v12579_v49  ;;  %v12582_v59 = vld [vmem:[%s22037_s4 + $0x1b8] sm:$0xff] }
 0x8a6   :  { %v17108_v7 = vpop.eup %17107  ;;  %v12566_v54 = vld [vmem:[%s22037_s4 + $0x138] sm:$0xff]  ;;  %v12555_v14 = vld [vmem:[%s22037_s4 + $0xe0] sm:$0xff] }
 0x8a7   :  { %v17110_v29 = vpop.eup %17109  ;;  %v16492_v43 = vpack.c.bf16 %v17108_v7, %v17104_v52  ;;  %v16535_v52 = vpack.c.bf16 %v12560_v48, %v12559_v53  ;;  %v12533_v7 = vld [vmem:[%s22037_s4 + $0x30] sm:$0xff]  ;;  %v12583_v53 = vld [vmem:[%s22037_s4 + $0x1c0] sm:$0xff]  ;;  %v12584_v48 = vld [vmem:[%s22037_s4 + $0x1c8] sm:$0xff] }
 0x8a8   :  { %v16490_v33 = vpack.c.bf16 %v17110_v29, %v17106_v20  ;;  %v12550_v20 = vld [vmem:[%s22037_s4 + $0xb8] sm:$0xff]  ;;  %v12591_v31 = vld [vmem:[%s22037_s4 + $0x200] sm:$0xff] }
 0x8a9   :  { %v12534_v29 = vld [vmem:[%s22037_s4 + $0x38] sm:$0xff] }
 0x8aa   :  { %v17112_v17 = vpop.eup %17111  ;;  %16491 = vmatprep.subr.bf16.mxu0 %v16490_v33  ;;  %v16515_v33 = vpack.c.bf16 %v12534_v29, %v12533_v7  ;;  %v12540_v7 = vld [vmem:[%s22037_s4 + $0x68] sm:$0xff]  ;;  %v12567_v29 = vld [vmem:[%s22037_s4 + $0x140] sm:$0xff]  ;;  %v12570_v49 = vld [vmem:[%s22037_s4 + $0x158] sm:$0xff] }
 0x8ab   :  { %v17114_v10 = vpop.eup %17113  ;;  %16493 = vmatpush1.bf16.msra.mxu0 %v16492_v43  ;;  %v16513_v43 = vpack.c.bf16 %v12550_v20, %v12549_v40  ;;  %v16547_v40 = vpack.c.bf16 %v12566_v54, %v12565_v34  ;;  %v12539_v20 = vld [vmem:[%s22037_s4 + $0x60] sm:$0xff]  ;;  %v12573_v34 = vld [vmem:[%s22037_s4 + $0x170] sm:$0xff]  ;;  %v12574_v54 = vld [vmem:[%s22037_s4 + $0x178] sm:$0xff] }
 0x8ac   :  { %v17116_v23 = vpop.eup %17115  ;;  %16498 = vmatprep.subr.bf16.mxu0 %v17177_v18 }
 0x8ad   :  { %v17118_v45 = vpop.eup %17117 }
 0x8ae   :  { %v17120_v47 = vpop.eup %17119  ;;  %14129 = vmatmul.mubr.msk.f32.vlgmr.msra.gmra.mrb[248].mxu0 %vm2269_vm2, %v12245_v46  ;;  %v16499_v5 = vpack.c.bf16 %v17114_v10, %v17118_v45  ;;  %v12578_v10 = vld [vmem:[%s22037_s4 + $0x198] sm:$0xff] }
 0x8af   :  { %v17122_v16 = vpop.eup %17121  ;;  %15272 = vmatprep.mubr.msk.f32.mxu0 %vm17178_vm5, %v22276_v60  ;;  %v16496_v50 = vpack.c.bf16 %v17120_v47, %v17112_v17  ;;  %v12577_v17 = vld [vmem:[%s22037_s4 + $0x190] sm:$0xff]  ;;  %v12562_v45 = vld [vmem:[%s22037_s4 + $0x118] sm:$0xff]  ;;  %v12551_v47 = vld [vmem:[%s22037_s4 + $0xc0] sm:$0xff] }
 0x8b0   :  { %16500 = vmatpush3.bf16.msra.mxu0 %v16499_v5  ;;  %v16494_v32 = vpack.c.bf16 %v17122_v16, %v17116_v23  ;;  %v16537_v23 = vpack.c.bf16 %v12578_v10, %v12577_v17  ;;  %v12552_v5 = vld [vmem:[%s22037_s4 + $0xc8] sm:$0xff]  ;;  %v12557_v17 = vld [vmem:[%s22037_s4 + $0xf0] sm:$0xff]  ;;  %v12558_v10 = vld [vmem:[%s22037_s4 + $0xf8] sm:$0xff] }
 0x8b1   :  { %16534 = vmatprep.subr.bf16.mxu0 %v16533_v39 }
 0x8b2   :  { %16495 = vmatprep.subr.bf16.mxu1 %v16494_v32  ;;  %v12535_v32 = vld [vmem:[%s22037_s4 + $0x40] sm:$0xff] }
 0x8b3   :  { %15273 = vmatmul.mubr.msk.f32.vlgmr.msra.gmra.mrb[250].mxu0 %vm2269_vm2, %v12245_v46  ;;  %16497 = vmatpush1.bf16.msra.mxu1 %v16496_v50  ;;  %v16517_v50 = vpack.c.bf16 %v12552_v5, %v12551_v47  ;;  %v16529_v5 = vpack.c.bf16 %v12558_v10, %v12557_v17 }
 0x8b4   :  { %16502 = vmatprep.subr.bf16.mxu1 %v16501_v63  ;;  %16536 = vmatpush3.bf16.msra.mxu0 %v16535_v52  ;;  %v12563_v63 = vld [vmem:[%s22037_s4 + $0x120] sm:$0xff] }
 0x8b5   :  { %16538 = vmatprep.subr.bf16.mxu0 %v16537_v23  ;;  %v16543_v15 = vpack.c.bf16 %v12564_v11, %v12563_v63  ;;  %v12586_v23 = vld [vmem:[%s22037_s4 + $0x1d8] sm:$0xff]  ;;  %v12592_v63 = vld [vmem:[%s22037_s4 + $0x208] sm:$0xff]  ;;  %v12587_v11 = vld [vmem:[%s22037_s4 + $0x1e0] sm:$0xff] }
 0x8b6   :  { %14130 = vmatmul.mubr.msk.f32.vlgmr.msra.gmra.mrb[236].mxu1 %vm2269_vm2, %v12245_v46  ;;  %v12561_v46 = vld [vmem:[%s22037_s4 + $0x110] sm:$0xff] }
 0x8b7   :  { %16504 = vmatpush3.bf16.msra.mxu1 %v16503_v6  ;;  %v16539_v16 = vpack.c.bf16 %v12562_v45, %v12561_v46  ;;  %v16519_v6 = vpack.c.bf16 %v12536_v51, %v12535_v32  ;;  %v12585_v46 = vld [vmem:[%s22037_s4 + $0x1d0] sm:$0xff]  ;;  %v16527_v45 = vpack.c.bf16 %v12540_v7, %v12539_v20 }
 0x8b8   :  { %16506 = vmatprep.subr.bf16.mxu1 %v16505_v57  ;;  %v12537_v57 = vld [vmem:[%s22037_s4 + $0x50] sm:$0xff]  ;;  %v16553_v51 = vpack.c.bf16 %v12586_v23, %v12585_v46 }
 0x8b9   :  { %16540 = vmatpush3.bf16.msra.mxu0 %v16539_v16  ;;  %v16523_v39 = vpack.c.bf16 %v12538_v9, %v12537_v57  ;;  %v12541_v16 = vld [vmem:[%s22037_s4 + $0x70] sm:$0xff] }
 0x8ba   :  { %16542 = vmatprep.subr.bf16.mxu0 %v16541_v3  ;;  %v12569_v32 = vld [vmem:[%s22037_s4 + $0x150] sm:$0xff] }
 0x8bb   :  { %16508 = vmatpush3.bf16.msra.mxu1 %v16507_v27  ;;  %v16521_v27 = vpack.c.bf16 %v12554_v61, %v12553_v0  ;;  %v16555_v0 = vpack.c.bf16 %v12570_v49, %v12569_v32  ;;  %v21767_v61 = vpack.c.bf16 %v12592_v63, %v12591_v31  ;;  %v12589_v9 = vld [vmem:[%s22037_s4 + $0x1f0] sm:$0xff] }
 0x8bc   :  { %16510 = vmatprep.subr.bf16.mxu1 %v16509_v56  ;;  %v16545_v56 = vpack.c.bf16 %v12582_v59, %v12581_v41  ;;  %v12590_v41 = vld [vmem:[%s22037_s4 + $0x1f8] sm:$0xff] }
 0x8bd   :  { %16544 = vmatpush3.bf16.msra.mxu0 %v16543_v15  ;;  %v12571_v15 = vld [vmem:[%s22037_s4 + $0x160] sm:$0xff] }
 0x8be   :  { %16546 = vmatprep.subr.bf16.mxu0 %v16545_v56  ;;  %v16561_v56 = vpack.c.bf16 %v12590_v41, %v12589_v9  ;;  %v12594_v9 = vld [vmem:[%s22037_s4 + $0x218] sm:$0xff] }
 0x8bf   :  { %16512 = vmatpush3.bf16.msra.mxu1 %v16511_v26  ;;  %v12556_v26 = vld [vmem:[%s22037_s4 + $0xe8] sm:$0xff] }
 0x8c0   :  { %16514 = vmatprep.subr.bf16.mxu1 %v16513_v43  ;;  %v16525_v52 = vpack.c.bf16 %v12556_v26, %v12555_v14  ;;  %v16549_v43 = vpack.c.bf16 %v12584_v48, %v12583_v53  ;;  %v16563_v14 = vpack.c.bf16 %v12574_v54, %v12573_v34  ;;  %v12250_v26 = vpop.permute.xlu1 %12249 }
 0x8c1   :  { %16548 = vmatpush3.bf16.msra.mxu0 %v16547_v40 }
 0x8c2   :  { %16550 = vmatprep.subr.bf16.mxu0 %v16549_v43 }
 0x8c3   :  { %16516 = vmatpush3.bf16.msra.mxu1 %v16515_v33  ;;  %v12568_v33 = vld [vmem:[%s22037_s4 + $0x148] sm:$0xff] }
 0x8c4   :  { %16518 = vmatprep.subr.bf16.mxu1 %v16517_v50  ;;  %v16551_v47 = vpack.c.bf16 %v12568_v33, %v12567_v29  ;;  %v12542_v50 = vld [vmem:[%s22037_s4 + $0x78] sm:$0xff] }
 0x8c5   :  { %v16531_v3 = vpack.c.bf16 %v12542_v50, %v12541_v16 }
 0x8c6   :  { %16552 = vmatpush3.bf16.msra.mxu0 %v16551_v47 }
 0x8c7   :  { %16520 = vmatpush3.bf16.msra.mxu1 %v16519_v6  ;;  %v12588_v6 = vld [vmem:[%s22037_s4 + $0x1e8] sm:$0xff]  ;;  %16554 = vmatprep.subr.bf16.mxu0 %v16553_v51 }
 0x8c8   :  { %16522 = vmatprep.subr.bf16.mxu1 %v16521_v27  ;;  %v16557_v57 = vpack.c.bf16 %v12588_v6, %v12587_v11  ;;  %v12572_v27 = vld [vmem:[%s22037_s4 + $0x168] sm:$0xff] }
 0x8c9   :  { %v16559_v59 = vpack.c.bf16 %v12572_v27, %v12571_v15  ;;  %v12593_v27 = vld [vmem:[%s22037_s4 + $0x210] sm:$0xff] }
 0x8ca   :  { %16556 = vmatpush3.bf16.msra.mxu0 %v16555_v0  ;;  %v16569_v34 = vpack.c.bf16 %v12594_v9, %v12593_v27  ;;  %v13086_v9 = vld [vmem:[%s22038_s5 + $0xb0] sm:$0xff] }
 0x8cb   :  { %16524 = vmatpush3.bf16.msra.mxu1 %v16523_v39  ;;  %16558 = vmatprep.subr.bf16.mxu0 %v16557_v57 }
 0x8cc   :  { %16526 = vmatprep.subr.bf16.mxu1 %v16525_v52 }
 0x8ce   :  { %16560 = vmatpush3.bf16.msra.mxu0 %v16559_v59 }
 0x8cf   :  { %16528 = vmatpush3.bf16.msra.mxu1 %v16527_v45  ;;  %16562 = vmatprep.subr.bf16.mxu0 %v16561_v56 }
 0x8d0   :  { %16530 = vmatprep.subr.bf16.mxu1 %v16529_v5 }
 0x8d2   :  { %16564 = vmatpush3.bf16.msra.mxu0 %v16563_v14 }
 0x8d3   :  { %16532 = vmatpush3.bf16.msra.mxu1 %v16531_v3  ;;  %16597 = vmatprep.subr.bf16.mxu0 %v17177_v18 }
 0x8d4   :  { %16566 = vmatprep.subr.bf16.mxu1 %v21767_v61 }
 0x981   :  { %v12321_v39 = vpop.f32.mrb[248].mxu0 }
 0x982   :  { %v12322_v53 = vadd.f32 %v12321_v39, %v12250_v26  ;;  %v12323_v48 = vpop.f32.mrb[249].mxu0  ;;  %v12596_v39 = vld [vmem:[%s22037_s4 + $0x228] sm:$0xff] }
 0x983   :  { %v12324_v40 = vadd.f32 %v12323_v48, %v12250_v26 }
 0x984   :  { %v14132_v52 = vmul.f32 -1.442695, %v12322_v53 }
 0x985   :  { %v14133_v20 = vmul.f32 -1.442695, %v12324_v40 }
 0x986   :  { %17123 = vpow2.f32 %v14132_v52  ;;  %v12463_v7 = vpop.f32.mrb[250].mxu0 }
 0x987   :  { %17125 = vpow2.f32 %v14133_v20  ;;  %v12464_v29 = vadd.f32 %v12463_v7, %v12250_v26  ;;  %v15274_v43 = vpop.f32.mrb[251].mxu0  ;;  %v12597_v20 = vld [vmem:[%s22037_s4 + $0x230] sm:$0xff] }
 0x988   :  { %v12600_v43 = vld [vmem:[%s22037_s4 + $0x248] sm:$0xff] }
 0x989   :  { %v14136_v33 = vmul.f32 -1.442695, %v12464_v29  ;;  %v12392_v17 = vpop.f32.mrb[236].mxu1 }
 0x98a   :  { %v12393_v10 = vadd.f32 %v12392_v17, %v12250_v26  ;;  %v12394_v46 = vpop.f32.mrb[237].mxu1 }
 0x98b   :  { %17127 = vpow2.f32 %v14136_v33  ;;  %v12395_v23 = vadd.f32 %v12394_v46, %v12250_v26  ;;  %v12595_v26 = vld [vmem:[%s22037_s4 + $0x220] sm:$0xff] }
 0x98c   :  { %v14134_v45 = vmul.f32 -1.442695, %v12393_v10  ;;  %v12604_v10 = vld [vmem:[%s22037_s4 + $0x268] sm:$0xff] }
 0x98d   :  { %v14135_v47 = vmul.f32 -1.442695, %v12395_v23  ;;  %v12605_v23 = vld [vmem:[%s22037_s4 + $0x270] sm:$0xff] }
 0x98e   :  { %17129 = vpow2.f32 %v14134_v45  ;;  %v12606_v45 = vld [vmem:[%s22037_s4 + $0x278] sm:$0xff] }
 0x98f   :  { %17131 = vpow2.f32 %v14135_v47  ;;  %v16593_v47 = vpack.c.bf16 %v12606_v45, %v12605_v23  ;;  %v13069_v23 = vld [vmem:[%s22038_s5 + $0x28] sm:$0xff]  ;;  %v12909_v45 = vpop.permute.xlu1 %12908 }
 0x990   :  { %v17124_v5 = vpop.eup %17123 }
 0x991   :  { %v17126_v16 = vpop.eup %17125  ;;  %v12482_v50 = vadd.f32 1.0, %v17124_v5  ;;  %v13067_v5 = vld [vmem:[%s22038_s5 + $0x18] sm:$0xff] }
 0x992   :  { %v12483_v32 = vadd.f32 1.0, %v17126_v16  ;;  %v13072_v16 = vld [vmem:[%s22038_s5 + $0x40] sm:$0xff] }
 0x993   :  { %17133 = vrcp.f32 %v12482_v50  ;;  %v16622_v50 = vpack.c.bf16 %v13072_v16, %v13067_v5  ;;  %v13074_v16 = vld [vmem:[%s22038_s5 + $0x50] sm:$0xff] }
 0x994   :  { %17135 = vrcp.f32 %v12483_v32  ;;  %v13066_v32 = vld [vmem:[%s22038_s5 + $0x10] sm:$0xff]  ;;  %v16612_v55 = vpack.c.bf16 %v13079_v58, %v13074_v16  ;;  %v22281_v58 = vld [vmem:[#allocation77_spill] sm:$0xff] }
 0x995   :  { %v17128_v51 = vpop.eup %17127 }
 0x996   :  { %v12486_v49 = vadd.f32 1.0, %v17128_v51  ;;  %v13071_v51 = vld [vmem:[%s22038_s5 + $0x38] sm:$0xff] }
 0x998   :  { %v17130_v31 = vpop.eup %17129  ;;  %17137 = vrcp.f32 %v12486_v49  ;;  %v13077_v49 = vld [vmem:[%s22038_s5 + $0x68] sm:$0xff] }
 0x999   :  { %v17132_v63 = vpop.eup %17131  ;;  %v12484_v11 = vadd.f32 1.0, %v17130_v31  ;;  %v13082_v31 = vld [vmem:[%s22038_s5 + $0x90] sm:$0xff] }
 0x99a   :  { %v12485_v6 = vadd.f32 1.0, %v17132_v63  ;;  %v16624_v63 = vpack.c.bf16 %v13071_v51, %v13066_v32  ;;  %v13084_v32 = vld [vmem:[%s22038_s5 + $0xa0] sm:$0xff] }
 0x99b   :  { %17139 = vrcp.f32 %v12484_v11 }
 0x99c   :  { %17141 = vrcp.f32 %v12485_v6  ;;  %v16626_v6 = vpack.c.bf16 %v13082_v31, %v13077_v49  ;;  %v13089_v49 = vld [vmem:[%s22038_s5 + $0xc8] sm:$0xff] }
 0x99d   :  { %v17134_v3 = vpop.eup %17133  ;;  %v16616_v31 = vpack.c.bf16 %v13089_v49, %v13084_v32 }
 0x99e   :  { %v17136_v0 = vpop.eup %17135  ;;  %v12500_v57 = vrot.slane %v17134_v3, %v18795_v22  ;;  %v13076_v3 = vld [vmem:[%s22038_s5 + $0x60] sm:$0xff] }
 0x99f   :  { %v12504_v15 = vrot.slane %v17136_v0, %v18795_v22  ;;  %v13081_v0 = vld [vmem:[%s22038_s5 + $0x88] sm:$0xff] }
 0x9a0   :  { %v12517_v56 = vmul.f32 %v12500_v57, %v21522_v25  ;;  %v12522_v25 = vmul.f32 %v12500_v57, %v21516_v21  ;;  %v13087_v57 = vld [vmem:[%s22038_s5 + $0xb8] sm:$0xff] }
 0x9a1   :  { %v12518_v41 = vmul.f32 %v12504_v15, %v21518_v28  ;;  %v12523_v54 = vmul.f32 %v12504_v15, %v21520_v35  ;;  %v16573_v35 = vpack.c.bf16 %v12596_v39, %v12595_v26  ;;  %v13092_v15 = vld [vmem:[%s22038_s5 + $0xe0] sm:$0xff]  ;;  %v13101_v26 = vld [vmem:[%s22038_s5 + $0x128] sm:$0xff] }
 0x9a2   :  { %v17138_v59 = vpop.eup %17137  ;;  %v16630_v27 = vpack.c.bf16 %v13092_v15, %v13087_v57 }
 0x9a3   :  { %12671 = vmatprep.mubr.f32.mxu1 %v12518_v41  ;;  %v12516_v14 = vrot.slane %v17138_v59, %v18795_v22  ;;  %v13091_v41 = vld [vmem:[%s22038_s5 + $0xd8] sm:$0xff]  ;;  %v13097_v59 = vld [vmem:[%s22038_s5 + $0x108] sm:$0xff] }
 0x9a4   :  { %12672 = vmatmul.mubr.f32.vlgmr.msra.gmra.mrb[238].mxu1 %v12517_v56  ;;  %v13102_v56 = vld [vmem:[%s22038_s5 + $0x130] sm:$0xff] }
 0x9a5   :  { %v17140_v53 = vpop.eup %17139  ;;  %16568 = vmatpush3.bf16.msra.mxu1 %v21767_v61  ;;  %12676 = vmatprep.mubr.f32.mxu1 %v12523_v54  ;;  %v12521_v40 = vmul.f32 %v12516_v14, %v21545_v19  ;;  %v12598_v61 = vld [vmem:[%s22037_s4 + $0x238] sm:$0xff]  ;;  %v12599_v19 = vld [vmem:[%s22037_s4 + $0x240] sm:$0xff]  ;;  %v12526_v11 = vmul.f32 %v12516_v14, %v21539_v4  ;;  %v16628_v4 = vpack.c.bf16 %v13081_v0, %v13076_v3 }
 0x9a6   :  { %v17142_v28 = vpop.eup %17141  ;;  %16570 = vmatprep.subr.bf16.mxu1 %v16569_v34  ;;  %v12508_v48 = vrot.slane %v17140_v53, %v18795_v22  ;;  %v16577_v29 = vpack.c.bf16 %v12598_v61, %v12597_v20  ;;  %v16581_v33 = vpack.c.bf16 %v12600_v43, %v12599_v19  ;;  %v16634_v54 = vpack.c.bf16 %v13102_v56, %v13097_v59  ;;  %v13096_v14 = vld [vmem:[%s22038_s5 + $0x100] sm:$0xff]  ;;  %v13099_v0 = vld [vmem:[%s22038_s5 + $0x118] sm:$0xff]  ;;  %v13073_v56 = vld [vmem:[%s22038_s5 + $0x48] sm:$0xff] }
 0x9a7   :  { %v12512_v52 = vrot.slane %v17142_v28, %v18795_v22  ;;  %v16636_v39 = vpack.c.bf16 %v13101_v26, %v13096_v14  ;;  %v13068_v59 = vld [vmem:[%s22038_s5 + $0x20] sm:$0xff]  ;;  %v13061_v26 = vpop.permute.xlu1 %13060 }
 0x9a8   :  { %12677 = vmatmul.mubr.f32.gmra.mrb[240].mxu1 %v12522_v25  ;;  %v12519_v7 = vmul.f32 %v12508_v48, %v21548_v13  ;;  %v12601_v13 = vld [vmem:[%s22037_s4 + $0x250] sm:$0xff] }
 0x9a9   :  { %16572 = vmatpush3.bf16.msra.mxu1 %v16569_v34  ;;  %15307 = vmatprep.mubr.f32.mxu1 %v12521_v40  ;;  %v12520_v21 = vmul.f32 %v12512_v52, %v21541_v44  ;;  %v12525_v22 = vmul.f32 %v12512_v52, %v21543_v1  ;;  %v12524_v44 = vmul.f32 %v12508_v48, %v21537_v36  ;;  %v12602_v1 = vld [vmem:[%s22037_s4 + $0x258] sm:$0xff]  ;;  %v12603_v36 = vld [vmem:[%s22037_s4 + $0x260] sm:$0xff] }
 0x9aa   :  { %16574 = vmatprep.subr.bf16.mxu1 %v16573_v35  ;;  %v16585_v17 = vpack.c.bf16 %v12602_v1, %v12601_v13  ;;  %v16589_v46 = vpack.c.bf16 %v12604_v10, %v12603_v36  ;;  %v16632_v34 = vpack.c.bf16 %v13091_v41, %v13086_v9  ;;  %v13070_v36 = vld [vmem:[%s22038_s5 + $0x30] sm:$0xff] }
 0x9ab   :  { %12746 = vmatprep.mubr.f32.mxu0 %v12520_v21 }
 0x9ac   :  { %12747 = vmatmul.mubr.f32.vlgmr.msra.gmra.mrb[252].mxu0 %v12519_v7 }
 0x9ad   :  { %16576 = vmatpush3.bf16.msra.mxu1 %v16573_v35  ;;  %12751 = vmatprep.mubr.f32.mxu0 %v12525_v22 }
 0x9ae   :  { %16578 = vmatprep.subr.bf16.mxu1 %v16577_v29 }
 0x9b0   :  { %12752 = vmatmul.mubr.f32.gmra.mrb[254].mxu0 %v12524_v44 }
 0x9b1   :  { %16580 = vmatpush3.bf16.msra.mxu1 %v16577_v29  ;;  %15314 = vmatprep.mubr.msk.f32.mxu0 %vm17178_vm5, %v22276_v60 }
 0x9b2   :  { %16582 = vmatprep.subr.bf16.mxu1 %v16581_v33 }
 0x9b5   :  { %16584 = vmatpush3.bf16.msra.mxu1 %v16581_v33 }
 0x9b6   :  { %16586 = vmatprep.subr.bf16.mxu1 %v16585_v17 }
 0x9b9   :  { %16588 = vmatpush3.bf16.msra.mxu1 %v16585_v17  ;;  %v13065_v17 = vld [vmem:[%s22038_s5 + $0x8] sm:$0xff] }
 0x9ba   :  { %16590 = vmatprep.subr.bf16.mxu1 %v16589_v46  ;;  %v16606_v10 = vpack.c.bf16 %v13070_v36, %v13065_v17 }
 0x9bd   :  { %16592 = vmatpush3.bf16.msra.mxu1 %v16589_v46  ;;  %v13064_v46 = vld [vmem:[%s22038_s5] sm:$0xff] }
 0x9be   :  { %16594 = vmatprep.subr.bf16.mxu1 %v16593_v47 }
 0x9c1   :  { %16596 = vmatpush3.bf16.msra.mxu1 %v16593_v47  ;;  %v16610_v47 = vpack.c.bf16 %v13080_v2, %v13075_v24 }
 0x9c2   :  { %16623 = vmatprep.subr.bf16.mxu1 %v16622_v50  ;;  %v13090_v50 = vld [vmem:[%s22038_s5 + $0xd0] sm:$0xff] }
 0x9c4   :  { %15308 = vmatmul.mubr.f32.vlgmr.msra.gmra.mrb[242].mxu1 %v12526_v11  ;;  %v13100_v11 = vld [vmem:[%s22038_s5 + $0x120] sm:$0xff] }
 0x9c5   :  { %16625 = vmatpush1.bf16.msra.mxu1 %v16624_v63  ;;  %13243 = vmatprep.mubr.f32.mxu1 %v22276_v60  ;;  %v13095_v63 = vld [vmem:[%s22038_s5 + $0xf8] sm:$0xff] }
 0x9c6   :  { %16627 = vmatprep.subr.bf16.mxu1 %v16626_v6  ;;  %v13094_v6 = vld [vmem:[%s22038_s5 + $0xf0] sm:$0xff]  ;;  %v16618_v3 = vpack.c.bf16 %v13100_v11, %v13095_v63 }
 0x9c7   :  { %v16620_v57 = vpack.c.bf16 %v13099_v0, %v13094_v6  ;;  %v22282_v6 = vlaneseq }
 0x9c9   :  { %16629 = vmatpush1.bf16.msra.mxu1 %v16628_v4  ;;  %vm13809_vm8 = vcmp.lt.s32.totalorder %v22282_v6, 640 }
 0x9ca   :  { %16631 = vmatprep.subr.bf16.mxu1 %v16630_v27 }
 0x9cd   :  { %16633 = vmatpush1.bf16.msra.mxu1 %v16632_v34 }
 0x9ce   :  { %16635 = vmatprep.subr.bf16.mxu1 %v16634_v54 }
 0x9d1   :  { %16637 = vmatpush1.bf16.msra.mxu1 %v16636_v39  ;;  %v16639_v39 = vpack.c.bf16 %v13073_v56, %v13068_v59 }
 0x9d2   :  { %16655 = vmatprep.subr.bf16.mxu1 %v21556_v42  ;;  %v12835_v42 = vpop.permute.xlu0 %12834 }
 0x9d6   :  { %v12983_v5 = vpop.permute.xlu0 %12982 }
 0x9da   :  { %v13544_v17 = vpop.permute.xlu0 %13543 }
 0xa77   :  { %v15152_v53 = vpop.f32.mrb[238].mxu1 }
 0xa78   :  { %v15153_v28 = vpop.f32.mrb[239].mxu1 }
 0xa79   :  { %v15154_v25 = vadd.f32 %v15153_v28, %v15152_v53  ;;  %v13078_v28 = vld [vmem:[%s22038_s5 + $0x70] sm:$0xff] }
 0xa7b   :  { %v15155_v35 = vpop.f32.mrb[240].mxu1 }
 0xa7c   :  { %v15156_v48 = vpop.f32.mrb[241].mxu1 }
 0xa7d   :  { %v15157_v40 = vadd.f32 %v15156_v48, %v15155_v35  ;;  %v13088_v48 = vld [vmem:[%s22038_s5 + $0xc0] sm:$0xff] }
 0xa7f   :  { %v15190_v52 = vpop.f32.mrb[252].mxu0 }
 0xa80   :  { %v15191_v20 = vpop.f32.mrb[253].mxu0 }
 0xa81   :  { %v15192_v61 = vadd.f32 %v15191_v20, %v15190_v52  ;;  %v13103_v20 = vld [vmem:[%s22038_s5 + $0x138] sm:$0xff] }
 0xa83   :  { %v15193_v21 = vpop.f32.mrb[254].mxu0  ;;  %v12749_v7 = vadd.f32 %v15192_v61, %v15154_v25  ;;  %v13083_v25 = vld [vmem:[%s22038_s5 + $0x98] sm:$0xff]  ;;  %v17147_v61 = vld [vmem:[%s22039_s6 + $0x70] sm:$0xff] }
 0xa84   :  { %v15194_v29 = vpop.f32.mrb[255].mxu0  ;;  %v16642_v35 = vpack.c.bf16 %v13083_v25, %v13078_v28 }
 0xa85   :  { %v15195_v22 = vadd.f32 %v15194_v29, %v15193_v21 }
 0xa87   :  { %v12754_v19 = vadd.f32 %v15195_v22, %v15157_v40  ;;  %v13093_v40 = vld [vmem:[%s22038_s5 + $0xe8] sm:$0xff] }
 0xa88   :  { %v16645_v52 = vpack.c.bf16 %v13093_v40, %v13088_v48 }
 0xa97   :  { %v15309_v43 = vpop.f32.mrb[242].mxu1 }
 0xa98   :  { %v12829_v44 = vadd.f32 %v15309_v43, %v12754_v19  ;;  %v12823_v33 = vpop.f32.mrb[243].mxu1 }
 0xa99   :  { %v12824_v13 = vadd.f32 %v12823_v33, %v12749_v7 }
 0xa9b   :  { %v16598_v1 = vpack.c.bf16 %v12829_v44, %v12824_v13 }
 0xa9d   :  { %16599 = vmatpush3.bf16.msra.mxu0 %v16598_v1  ;;  %v17179_v1 = vmov 1966171168  }
 0xa9e   :  { %16600 = vmatprep.subr.bf16.mxu0 %v17177_v18 }
 0xaa0   :  { %15315 = vmatmul.mubr.msk.f32.vlgmr.msra.gmra.mrb[0].mxu0 %vm2269_vm2, %v12835_v42  ;;  %v13770_v42 = vunpack.c.l.s4 %v17179_v1 }
 0xaa1   :  { %16602 = vmatpush3.bf16.msra.mxu0 %v16601_v38  ;;  %15321 = vmatprep.mubr.msk.f32.mxu0 %vm17178_vm5, %v22276_v60  ;;  %v16608_v38 = vpack.c.bf16 %v13069_v23, %v13064_v46 }
 0xaa2   :  { %16603 = vmatprep.subr.bf16.mxu0 %v17177_v18 }
 0xaa4   :  { %15322 = vmatmul.mubr.msk.f32.vlgmr.msra.gmra.mrb[2].mxu0 %vm2269_vm2, %v12909_v45  ;;  %v13771_v45 = vunpack.c.0.s8 %v13770_v42 }
 0xaa5   :  { %16605 = vmatpush3.bf16.msra.mxu0 %v16604_v8  ;;  %15328 = vmatprep.mubr.msk.f32.mxu0 %vm17178_vm5, %v22276_v60  ;;  %v13085_v8 = vld [vmem:[%s22038_s5 + $0xa8] sm:$0xff] }
 0xaa6   :  { %16607 = vmatprep.subr.bf16.mxu0 %v16606_v10  ;;  %v16614_v51 = vpack.c.bf16 %v13090_v50, %v13085_v8 }
 0xaa8   :  { %15329 = vmatmul.mubr.msk.f32.vlgmr.msra.gmra.mrb[4].mxu0 %vm2269_vm2, %v12983_v5 }
 0xaa9   :  { %16609 = vmatpush1.bf16.msra.mxu0 %v16608_v38  ;;  %13172 = vmatprep.mubr.f32.mxu0 %v22276_v60 }
 0xaaa   :  { %16611 = vmatprep.subr.bf16.mxu0 %v16610_v47 }
 0xaad   :  { %16613 = vmatpush1.bf16.msra.mxu0 %v16612_v55  ;;  %v13774_v55 = vsub.s32 %v13771_v45, %v22281_v58 }
 0xaae   :  { %16615 = vmatprep.subr.bf16.mxu0 %v16614_v51 }
 0xab1   :  { %16617 = vmatpush1.bf16.msra.mxu0 %v16616_v31 }
 0xab2   :  { %16619 = vmatprep.subr.bf16.mxu0 %v16618_v3 }
 0xab5   :  { %16621 = vmatpush1.bf16.msra.mxu0 %v16620_v57 }
 0xab6   :  { %16638 = vmatprep.subr.bf16.mxu0 %v17177_v18 }
 0xb73   :  { %v12904_v15 = vpop.f32.mrb[0].mxu0 }
 0xb74   :  { %v15316_v4 = vpop.f32.mrb[1].mxu0 }
 0xb77   :  { %v12978_v27 = vpop.f32.mrb[2].mxu0 }
 0xb78   :  { %v12979_v9 = vadd.f32 %v12978_v27, %v12904_v15  ;;  %v15323_v41 = vpop.f32.mrb[3].mxu0 }
 0xb7b   :  { %v13052_v34 = vpop.f32.mrb[4].mxu0 }
 0xb7c   :  { %v13056_v54 = vadd.f32 %v13052_v34, %v12979_v9  ;;  %v15330_v14 = vpop.f32.mrb[5].mxu0 }
 0xb7e   :  { %v13063_v53 = vadd.f32 %v13061_v26, %v13056_v54 }
 0xb80   :  { %14140 = vmatmul.mubr.msk.f32.vlgmr.msra.gmra.mrb[6].mxu0 %vm13104_vm6, %v13063_v53  ;;  %14141 = vmatmul.mubr.msk.f32.vlgmr.msra.gmra.mrb[244].mxu1 %vm13104_vm6, %v13063_v53 }
 0xb81   :  { %16640 = vmatpush3.bf16.msra.mxu0 %v16639_v39  ;;  %16657 = vmatpush1.bf16.msra.mxu1 %v21564_v12  ;;  %v13098_v12 = vld [vmem:[%s22038_s5 + $0x110] sm:$0xff] }
 0xb82   :  { %16641 = vmatprep.subr.bf16.mxu0 %v17177_v18  ;;  %13457 = vmatprep.mubr.f32.mxu1 %v22276_v60  ;;  %v16648_v21 = vpack.c.bf16 %v13103_v20, %v13098_v12 }
 0xb83   :  { %15347 = vmatprep.mubr.msk.f32.mxu0 %vm17178_vm5, %v22276_v60 }
 0xb85   :  { %16643 = vmatpush3.bf16.msra.mxu0 %v16642_v35 }
 0xb86   :  { %16644 = vmatprep.subr.bf16.mxu0 %v17177_v18 }
 0xb88   :  { %14144 = vmatmul.mubr.msk.f32.vlgmr.msra.gmra.mrb[244].mxu1 %vm2269_vm2, %v17147_v61 }
 0xb89   :  { %16646 = vmatpush3.bf16.msra.mxu0 %v16645_v52  ;;  %13614 = vmatprep.mubr.f32.mxu1 %v22276_v60 }
 0xb8a   :  { %16647 = vmatprep.subr.bf16.mxu0 %v17177_v18 }
 0xb8d   :  { %16649 = vmatpush3.bf16.msra.mxu0 %v16648_v21 }
 0xb8e   :  { %16651 = vmatprep.subr.bf16.mxu0 %v21526_v37 }
 0xb90   :  { %15348 = vmatmul.mubr.msk.f32.vlgmr.msra.gmra.mrb[8].mxu0 %vm13104_vm6, %v13063_v53 }
 0xb91   :  { %16653 = vmatpush1.bf16.msra.mxu0 %v21530_v30  ;;  %13386 = vmatprep.mubr.f32.mxu0 %v22276_v60 }
 0xb92   :  { %16658 = vmatprep.subr.bf16.mxu0 %v17177_v18 }
 0xb94   :  { %14143 = vmatmul.mubr.msk.f32.vlgmr.msra.gmra.mrb[6].mxu0 %vm2269_vm2, %v17147_v61 }
 0xb95   :  { %16660 = vmatpush3.bf16.msra.mxu0 %v21560_v62  ;;  %15354 = vmatprep.mubr.msk.f32.mxu0 %vm17178_vm5, %v22276_v60  ;;  %v13539_v62 = vld [vmem:[%s22039_s6 + $0x78] sm:$0x1]  ;;  %s17180_s6 = smov [#allocation2]  }
 0xb96   :  { %15357 = vmatprep.subr.mxu0 %v22276_v60  ;;  %s13818_s26 = sshll.u32 %s17180_s6, 4  ;;  %s13819_s26 = int_to_ptr.vmem [resolvable:$true] %s13818_s26 }
 0xb97   :  { %s17148_s27 = scalar_lea.vmem %s13819_s26, 80  ;;  %s17152_s28 = scalar_lea.vmem %s13819_s26, 96 }
 0xb98   :  { %15355 = vmatmul.mubr.msk.f32.vlgmr.msra.gmra.mrb[8].mxu0 %vm2269_vm2, %v17147_v61  ;;  %p17149_p0 = scmp.ne.s32.totalorder %s13819_s26, %s17148_s27  ;;  %p17153_p1 = scmp.lt.s32.totalorder %s13819_s26, %s13819_s26 }
 0xb99   :  { %15359 = vmatprep.mubr.msk.f32.mxu0 %vm17178_vm5, %v22276_v60  ;;  %p17154_p2 = scmp.lt.s32.totalorder %s17152_s28, %s17148_s27 }
 0xb9b   :  { %p17155_p3 = por %p17154_p2, %p17153_p1 }
 0xb9d   :  { %p17156_p4 = pnand %p17155_p3, %p17149_p0 }
 0xc5b   :  { %v13459_v37 = vpop.f32.mrb[244].mxu1 }
 0xc5c   :  { %v13461_v30 = vpop.f32.mrb[245].mxu1  ;;  %v13536_v44 = vmax.f32 %v13459_v37, 0.0 }
 0xc5d   :  { %v13537_v19 = vmax.f32 %v13461_v30, 0.0 }
 0xc67   :  { %v13388_v7 = vpop.f32.mrb[6].mxu0 }
 0xc68   :  { %v13390_v29 = vpop.f32.mrb[7].mxu0  ;;  %v13534_v18 = vmax.f32 %v13388_v7, 0.0 }
 0xc69   :  { %v13535_v22 = vmax.f32 %v13390_v29, 0.0 }
 0xc6b   :  { %v13530_v43 = vpop.f32.mrb[8].mxu0  ;;  %13550 = vmatprep.subr.mxu1 %v13535_v22 }
 0xc6c   :  { %v13538_v33 = vmax.f32 %v13530_v43, 0.0  ;;  %v15356_v13 = vpop.f32.mrb[9].mxu0  ;;  %13551 = vmatpush1.msra.mxu1 %v13534_v18 }
 0xc6d   :  { %14146 = vmatmul.mubr.msk.f32.vlgmr.msra.gmra.mrb[246].mxu1 %vm13546_vm7, %v13539_v62  ;;  %13621 = vmatprep.subr.mxu1 %v13537_v19 }
 0xc6e   :  { %13622 = vmatpush1.msra.mxu1 %v13536_v44  ;;  %15358 = vmatpush3.msra.mxu0 %v13538_v33 }
 0xc6f   :  { %15360 = vmatmul.mubr.msk.f32.vlgmr.msra.gmra.mrb[10].mxu0 %vm13546_vm7, %v13539_v62  ;;  %13685 = vmatprep.mubr.f32.mxu1 %v22276_v60 }
 0xc71   :  { %14147 = vmatmul.mubr.msk.f32.vlgmr.msra.gmra.mrb[248].mxu1 %vm13546_vm7, %v13539_v62 }
 0xd40   :  { %v13616_v36 = vpop.f32.mrb[246].mxu1 }
 0xd41   :  { %v13617_v10 = vadd.f32 %v13616_v36, %v13544_v17  ;;  %v13618_v46 = vpop.f32.mrb[247].mxu1 }
 0xd42   :  { %v13619_v23 = vadd.f32 %v13618_v46, %v13544_v17  ;;  %v13758_v24 = vpop.f32.mrb[10].mxu0 }
 0xd43   :  { %v15361_v2 = vpop.f32.mrb[11].mxu0  ;;  %v13759_v8 = vadd.f32 %v13758_v24, %v13544_v17 }
 0xd44   :  { %v13767_v38 = vcombine.low %v13617_v10, %v13619_v23  ;;  %v13687_v47 = vpop.f32.mrb[248].mxu1 }
 0xd45   :  { %v13688_v5 = vadd.f32 %v13687_v47, %v13544_v17  ;;  %v13689_v16 = vpop.f32.mrb[249].mxu1  ;;  %v13789_v51 = vrot.slane %v13759_v8, %v13774_v55 }
 0xd46   :  { %v13690_v50 = vadd.f32 %v13689_v16, %v13544_v17  ;;  %v13775_v32 = vrot.slane %v13767_v38, %v13774_v55 }
 0xd47   :  { %v13804_v63 = vrot.slane %v13789_v51, %v13774_v55 }
 0xd48   :  { %v13768_v60 = vcombine.low %v13688_v5, %v13690_v50 }
 0xd4a   :  { %v13782_v49 = vrot.slane %v13768_v60, %v13774_v55 }
 0xd4c   :  { %v13790_v31 = vcombine.low %v13775_v32, %v13782_v49 }
 0xd4e   :  { %v13797_v11 = vrot.slane %v13790_v31, %v13774_v55 }
 0xd50   :  { %v13805_v3 = vcombine.low %v13797_v11, %v13804_v63 }
 0xd52   :  { %13811 = vst.msk [vmem:[#allocation2] sm:$0x1f] %vm13809_vm8, %v13805_v3 }
 0xd53   :  { %17159 = shalt.err (!%p17156_p4)
}
 0xd54   :  { %s17160_s29 = scalar_lea.hbm %s22040_s7, 80 }
 0xd55   :  { %p17161_p5 = scmp.ne.s32.totalorder %s22040_s7, %s17160_s29  ;;  %p17164_p6 = scmp.lt.u32.totalorder %s17160_s29, %s22040_s7 }
 0xd57   :  { %p17166_p7 = pnand %p17164_p6, %p17161_p5 }
 0xd59   :  { %17169 = shalt.err (!%p17166_p7)
}
 0xd5a   :  { %13821 = dma.vmem_to_hbm [thread:$0]  %s13819_s26, 80, %s22040_s7, [#allocation3]  }
 0xd5b   :  { %17170 = dma.done.wait [#allocation3], 80  }
 0xd5c   :  { %17171 = vsyncadd [#allocation3], 4294967216 }
 0xd5d   :  { %13825 = vsyncpa [#allocation3], 1 }

</bundles_post_ra>
